<compile_context>
chip_gen: v7x
topology: tpu7x:2x2x1
jax: 0.10.0
libtpu: 0.0.40
codegen_flags: <defaults>
</compile_context>

<pallas_src>
import functools

import jax
import jax.numpy as jnp
from jax.experimental import pallas as pl
from jax.experimental.pallas import tpu as pltpu


def add_layernorm_kernel(x_ref, y_ref, gamma_ref, beta_ref, o_ref, *, eps):
    # Residual add followed by LayerNorm over the last (hidden) axis.
    x = x_ref[...]
    y = y_ref[...]
    if x.dtype != jnp.float32:
        x = x.astype(jnp.float32)
    if y.dtype != jnp.float32:
        y = y.astype(jnp.float32)
    s = x + y                                              # (tile, H), f32

    h = s.shape[-1]
    inv_h = jnp.float32(1.0 / h)

    # Two-pass moments: mean, then E[(s - mean)^2].  The extra VPU pass is
    # free (kernel is HBM-bound) and avoids negative-variance cancellation.
    mean = jnp.sum(s, axis=-1, keepdims=True) * inv_h      # (tile, 1)
    d = s - mean
    var = jnp.sum(d * d, axis=-1, keepdims=True) * inv_h   # (tile, 1), >= 0
    inv = jax.lax.rsqrt(var + eps)                         # EUP slot -> ~free

    gamma = gamma_ref[...]                                 # (1, H), resident
    beta = beta_ref[...]                                   # (1, H), resident
    if gamma.dtype != jnp.float32:
        gamma = gamma.astype(jnp.float32)
    if beta.dtype != jnp.float32:
        beta = beta.astype(jnp.float32)

    out = d * inv * gamma + beta
    o_ref[...] = out.astype(o_ref.dtype)


def _num_tensorcores():
    """Best-effort TensorCore count per chip (2 on v7x, else 1)."""
    try:
        info = pltpu.get_tpu_info()
        for attr in ("num_cores", "tensorcores_per_chip", "num_tensorcores",
                     "core_count"):
            n = getattr(info, attr, None)
            if isinstance(n, int) and n > 0:
                return n
    except Exception:
        pass
    try:
        kind = jax.devices()[0].device_kind.lower()
        if "v7" in kind or "7x" in kind:
            return 2
    except Exception:
        pass
    return 1


def _pick_tile_rows(n_rows, n_cores):
    """Choose a row-tile size for the (rows, H) problem.

    - Small row counts on a 1-TC chip: single full-extent block (no per-step
      overhead).  With >=2 cores: even n_cores-way split (each core gets one
      full step via the 'parallel' axis) when it divides cleanly.
    - Large row counts: ~1024-row tiles (near HBM roofline, still well under
      the scoped-VMEM default), preferring a tile that divides n_rows with a
      step count that is a multiple of n_cores (empty tail, balanced cores).
    """
    if n_rows <= 1024:
        if n_cores >= 2 and n_rows % (8 * n_cores) == 0:
            return n_rows // n_cores
        return n_rows                    # full extent is always a legal block
    target = 1024
    for tile in range(target, 0, -8):    # multiples of 8 (sublane-aligned)
        if n_rows % tile == 0 and (n_rows // tile) % n_cores == 0:
            return tile
    return target                        # cdiv grid masks the ragged tail


def add_layernorm(x, y, gamma, beta, *, eps=1e-12, tile_rows=None):
    # x, y: (B, S, H); gamma, beta: (H,)
    B, S, H = x.shape
    R = B * S
    x2 = x.reshape(R, H)
    y2 = y.reshape(R, H)
    gamma2 = gamma.reshape(1, H)
    beta2 = beta.reshape(1, H)

    if tile_rows is None:
        tile_rows = _pick_tile_rows(R, _num_tensorcores())
    tile_rows = min(tile_rows, R)

    grid = (pl.cdiv(R, tile_rows),)      # partial tail block masked by Pallas

    kernel = functools.partial(add_layernorm_kernel, eps=eps)

    itemsize = jnp.dtype(x.dtype).itemsize
    cost = pl.CostEstimate(
        flops=10 * R * H,
        transcendentals=R,                              # one rsqrt per row
        bytes_accessed=3 * R * H * itemsize             # x, y, out
        + 2 * H * jnp.dtype(gamma.dtype).itemsize,      # gamma, beta
    )

    out = pl.pallas_call(
        kernel,
        out_shape=jax.ShapeDtypeStruct((R, H), x.dtype),
        grid_spec=pltpu.PrefetchScalarGridSpec(
            num_scalar_prefetch=0,
            grid=grid,
            in_specs=[
                pl.BlockSpec((tile_rows, H), lambda i: (i, 0)),
                pl.BlockSpec((tile_rows, H), lambda i: (i, 0)),
                pl.BlockSpec((1, H), lambda i: (0, 0)),   # gamma: resident
                pl.BlockSpec((1, H), lambda i: (0, 0)),   # beta: resident
            ],
            out_specs=pl.BlockSpec((tile_rows, H), lambda i: (i, 0)),
        ),
        compiler_params=pltpu.CompilerParams(
            dimension_semantics=("parallel",),
        ),
        cost_estimate=cost,
    )(x2, y2, gamma2, beta2)

    return out.reshape(B, S, H)


if __name__ == "__main__":
    B, S, H = 1, 384, 768
    key = jax.random.PRNGKey(0)
    k1, k2, k3, k4 = jax.random.split(key, 4)
    x325 = jax.random.normal(k1, (B, S, H), dtype=jnp.float32)
    x355 = jax.random.normal(k2, (B, S, H), dtype=jnp.float32)

    # PyTorch default init is weight=1 / bias=0; random affine params here so
    # the gamma/beta path is actually exercised by the check.
    gamma = 1.0 + 0.1 * jax.random.normal(k3, (H,), dtype=jnp.float32)
    beta = 0.1 * jax.random.normal(k4, (H,), dtype=jnp.float32)

    out = add_layernorm(x325, x355, gamma, beta, eps=1e-12)
    jax.block_until_ready(out)

    # Pure-JAX reference (matches torch.nn.LayerNorm semantics).
    s = x325 + x355
    mean = jnp.mean(s, axis=-1, keepdims=True)
    var = jnp.mean((s - mean) ** 2, axis=-1, keepdims=True)
    ref = (s - mean) / jnp.sqrt(var + 1e-12) * gamma + beta
    assert jnp.allclose(out, ref, atol=1e-4, rtol=1e-4)

    # Extra check: large-mean rows (the cancellation case the one-pass
    # variance form could NaN on) — two-pass form must stay finite & correct.
    xb = 1000.0 + 0.01 * jax.random.normal(k3, (B, S, H), dtype=jnp.float32)
    yb = 1000.0 + 0.01 * jax.random.normal(k4, (B, S, H), dtype=jnp.float32)
    out_b = add_layernorm(xb, yb, gamma, beta, eps=1e-12)
    jax.block_until_ready(out_b)
    sb = xb + yb
    mb = jnp.mean(sb, axis=-1, keepdims=True)
    vb = jnp.mean((sb - mb) ** 2, axis=-1, keepdims=True)
    ref_b = (sb - mb) / jnp.sqrt(vb + 1e-12) * gamma + beta
    assert jnp.all(jnp.isfinite(out_b))
    assert jnp.allclose(out_b, ref_b, atol=2e-3, rtol=2e-3)

    print("KERNEL_OK")
</pallas_src>

<mosaic_0001>
module attributes {stable_mosaic.version = 11 : i64} {
  func.func @add_layernorm_kernel(%arg0: i32, %arg1: memref<384x768xf32, #tpu.memory_space<vmem>>, %arg2: memref<384x768xf32, #tpu.memory_space<vmem>>, %arg3: memref<1x768xf32, #tpu.memory_space<vmem>>, %arg4: memref<1x768xf32, #tpu.memory_space<vmem>>, %arg5: memref<384x768xf32, #tpu.memory_space<vmem>>) attributes {dimension_semantics = [#tpu.dimension_semantics<parallel>], iteration_bounds = array<i64: 1>, scalar_prefetch = 0 : i64, scratch_operands = 0 : i64, tpu.core_type = #tpu.core_type<tc>, window_params = [{transform_indices = @transform_0, window_bounds = array<i64: 384, 768>}, {transform_indices = @transform_1, window_bounds = array<i64: 384, 768>}, {pipeline_mode = #tpu.pipeline_mode<synchronous>, transform_indices = @transform_2, window_bounds = array<i64: 1, 768>}, {pipeline_mode = #tpu.pipeline_mode<synchronous>, transform_indices = @transform_3, window_bounds = array<i64: 1, 768>}, {transform_indices = @transform_4, window_bounds = array<i64: 384, 768>}]} {
    %c0 = arith.constant 0 : index
    %c0_0 = arith.constant 0 : index
    %0 = vector.load %arg1[%c0, %c0_0] : memref<384x768xf32, #tpu.memory_space<vmem>>, vector<384x768xf32>
    %c0_1 = arith.constant 0 : index
    %c0_2 = arith.constant 0 : index
    %1 = vector.load %arg2[%c0_1, %c0_2] : memref<384x768xf32, #tpu.memory_space<vmem>>, vector<384x768xf32>
    %2 = arith.addf %0, %1 : vector<384x768xf32>
    %cst = arith.constant dense<0.000000e+00> : vector<384xf32>
    %3 = vector.multi_reduction <add>, %2, %cst [1] : vector<384x768xf32> to vector<384xf32>
    %4 = vector.shape_cast %3 : vector<384xf32> to vector<384x1xf32>
    %cst_3 = arith.constant 0.00130208337 : f32
    %5 = vector.broadcast %cst_3 : f32 to vector<384x1xf32>
    %6 = arith.mulf %4, %5 : vector<384x1xf32>
    %7 = vector.broadcast %6 : vector<384x1xf32> to vector<384x768xf32>
    %8 = arith.subf %2, %7 : vector<384x768xf32>
    %9 = arith.mulf %8, %8 : vector<384x768xf32>
    %cst_4 = arith.constant dense<0.000000e+00> : vector<384xf32>
    %10 = vector.multi_reduction <add>, %9, %cst_4 [1] : vector<384x768xf32> to vector<384xf32>
    %11 = vector.shape_cast %10 : vector<384xf32> to vector<384x1xf32>
    %cst_5 = arith.constant 0.00130208337 : f32
    %12 = vector.broadcast %cst_5 : f32 to vector<384x1xf32>
    %13 = arith.mulf %11, %12 : vector<384x1xf32>
    %cst_6 = arith.constant 9.99999996E-13 : f32
    %14 = vector.broadcast %cst_6 : f32 to vector<384x1xf32>
    %15 = arith.addf %13, %14 : vector<384x1xf32>
    %16 = math.rsqrt %15 : vector<384x1xf32>
    %c0_7 = arith.constant 0 : index
    %c0_8 = arith.constant 0 : index
    %17 = vector.load %arg3[%c0_7, %c0_8] : memref<1x768xf32, #tpu.memory_space<vmem>>, vector<1x768xf32>
    %c0_9 = arith.constant 0 : index
    %c0_10 = arith.constant 0 : index
    %18 = vector.load %arg4[%c0_9, %c0_10] : memref<1x768xf32, #tpu.memory_space<vmem>>, vector<1x768xf32>
    %19 = vector.broadcast %16 : vector<384x1xf32> to vector<384x768xf32>
    %20 = arith.mulf %8, %19 : vector<384x768xf32>
    %21 = vector.broadcast %17 : vector<1x768xf32> to vector<384x768xf32>
    %22 = arith.mulf %20, %21 : vector<384x768xf32>
    %23 = vector.broadcast %18 : vector<1x768xf32> to vector<384x768xf32>
    %24 = arith.addf %22, %23 : vector<384x768xf32>
    %c0_11 = arith.constant 0 : index
    %c0_12 = arith.constant 0 : index
    %25 = vector.load %arg5[%c0_11, %c0_12] : memref<384x768xf32, #tpu.memory_space<vmem>>, vector<384x768xf32>
    tpu.vector_store %arg5[%c0_11, %c0_12], %24 {strides = array<i32>} : memref<384x768xf32, #tpu.memory_space<vmem>>, vector<384x768xf32>,
    return
  }
  func.func @transform_0(%arg0: i32) -> (i32, i32) {
    %c0_i32 = arith.constant 0 : i32
    %c0_i32_0 = arith.constant 0 : i32
    return %arg0, %c0_i32 : i32, i32
  }
  func.func @transform_1(%arg0: i32) -> (i32, i32) {
    %c0_i32 = arith.constant 0 : i32
    %c0_i32_0 = arith.constant 0 : i32
    return %arg0, %c0_i32 : i32, i32
  }
  func.func @transform_2(%arg0: i32) -> (i32, i32) {
    %c0_i32 = arith.constant 0 : i32
    %c0_i32_0 = arith.constant 0 : i32
    %c0_i32_1 = arith.constant 0 : i32
    return %c0_i32, %c0_i32_0 : i32, i32
  }
  func.func @transform_3(%arg0: i32) -> (i32, i32) {
    %c0_i32 = arith.constant 0 : i32
    %c0_i32_0 = arith.constant 0 : i32
    %c0_i32_1 = arith.constant 0 : i32
    return %c0_i32, %c0_i32_0 : i32, i32
  }
  func.func @transform_4(%arg0: i32) -> (i32, i32) {
    %c0_i32 = arith.constant 0 : i32
    %c0_i32_0 = arith.constant 0 : i32
    return %arg0, %c0_i32 : i32, i32
  }
}

</mosaic_0001>

<bundles_post_ra>
// kernel: tpu_custom_call.1
= control target key start
LH: loop header
LB: loop body
LE: loop exit
PB: predicated region body
PF: predicated region fallthrough
CT: control target
= control target key end

     0   :  { %9 = vsyncpa [#allocation3], 0  ;;  %s7948_s0 = inlined_call_operand.hbm [shape: f32[384,768], index: 0, kind: input, shape index: {}]   ;;  %s7949_s1 = inlined_call_operand.hbm [shape: f32[384,768], index: 1, kind: input, shape index: {}]   ;;  %s7950_s2 = inlined_call_operand.hbm [shape: f32[1,768], index: 2, kind: input, shape index: {}]   ;;  %s7951_s3 = inlined_call_operand.hbm [shape: f32[1,768], index: 3, kind: input, shape index: {}]   ;;  %s7952_s4 = inlined_call_operand.hbm [shape: f32[384,768], index: 4, kind: output, shape index: {}]  }
   0x1   :  { %10 = vsyncpa [#allocation6], 0 }
   0x2   :  { %11 = vsyncpa [#allocation9], 0 }
   0x3   :  { %12 = vsyncpa [#allocation4], 0  ;;  %s3829_s15 = smov [#allocation5]   ;;  %s3830_s17 = smov [#allocation2]  }
   0x4   :  { %s30_s16 = sshll.u32 %s3829_s15, 4  ;;  %s18_s18 = sshll.u32 %s3830_s17, 4  ;;  %s31_s16 = int_to_ptr.vmem [resolvable:$true] %s30_s16  ;;  %s3861_s18 = int_to_ptr.vmem [resolvable:$true] %s18_s18 }
   0x5   :  { %s3711_s21 = scalar_lea.hbm %s7949_s1, 36864 }
   0x6   :  { %p3712_p0 = scmp.ne.s32.totalorder %s7949_s1, %s3711_s21  ;;  %p3715_p1 = scmp.lt.u32.totalorder %s3711_s21, %s7949_s1 }
   0x8   :  { %p3717_p2 = pnand %p3715_p1, %p3712_p0 }
   0xa   :  { %3720 = shalt.err (!%p3717_p2)
}
   0xb   :  { %s3721_s26 = scalar_lea.vmem %s31_s16, 36864  ;;  %p3726_p4 = scmp.lt.s32.totalorder %s31_s16, %s31_s16 }
   0xc   :  { %p3722_p3 = scmp.ne.s32.totalorder %s31_s16, %s3721_s26  ;;  %p3727_p5 = scmp.lt.s32.totalorder %s3721_s26, %s3721_s26 }
   0xe   :  { %p3728_p6 = por %p3727_p5, %p3726_p4 }
  0x10   :  { %p3729_p7 = pnand %p3728_p6, %p3722_p3 }
  0x12   :  { %3732 = shalt.err (!%p3729_p7)
}
  0x13   :  { %s3831_s27 = smov 768   ;;  %s3832_s28 = smov 48  }
  0x14   :  { %36 = dma.hbm_to_vmem [thread:$0]  %s7949_s1, 36864, %s31_s16, [#allocation6], %s3831_s27, %s3831_s27, %s3832_s28  }
  0x15   :  { %s3733_s7 = scalar_lea.hbm %s7948_s0, 36864 }
  0x16   :  { %p3734_p8 = scmp.ne.s32.totalorder %s7948_s0, %s3733_s7  ;;  %p3737_p9 = scmp.lt.u32.totalorder %s3733_s7, %s7948_s0 }
  0x18   :  { %p3739_p10 = pnand %p3737_p9, %p3734_p8 }
  0x1a   :  { %3742 = shalt.err (!%p3739_p10)
}
  0x1b   :  { %s3743_s12 = scalar_lea.vmem %s3861_s18, 36864  ;;  %p3748_p12 = scmp.lt.s32.totalorder %s3861_s18, %s3861_s18 }
  0x1c   :  { %p3744_p11 = scmp.ne.s32.totalorder %s3861_s18, %s3743_s12  ;;  %p3749_p13 = scmp.lt.s32.totalorder %s3743_s12, %s3743_s12 }
  0x1e   :  { %p3750_p0 = por %p3749_p13, %p3748_p12 }
  0x20   :  { %p3751_p1 = pnand %p3750_p0, %p3744_p11 }
  0x22   :  { %3754 = shalt.err (!%p3751_p1)
}
  0x23   :  { %24 = dma.hbm_to_vmem [thread:$0]  %s7948_s0, 36864, %s3861_s18, [#allocation3], %s3831_s27, %s3831_s27, %s3832_s28  }
  0x24   :  { %s3833_s14 = smov [#allocation7]   ;;  %s3834_s16 = smov [#allocation8]  }
  0x25   :  { %s43_s15 = sshll.u32 %s3833_s14, 4  ;;  %s53_s17 = sshll.u32 %s3834_s16, 4  ;;  %s44_s15 = int_to_ptr.vmem [resolvable:$true] %s43_s15  ;;  %s54_s17 = int_to_ptr.vmem [resolvable:$true] %s53_s17 }
  0x26   :  { %s3755_s21 = scalar_lea.hbm %s7950_s2, 96 }
  0x27   :  { %p3756_p2 = scmp.ne.s32.totalorder %s7950_s2, %s3755_s21  ;;  %p3759_p3 = scmp.lt.u32.totalorder %s3755_s21, %s7950_s2 }
  0x29   :  { %p3761_p4 = pnand %p3759_p3, %p3756_p2 }
  0x2b   :  { %3764 = shalt.err (!%p3761_p4)
}
  0x2c   :  { %s3765_s0 = scalar_lea.vmem %s44_s15, 96  ;;  %p3770_p6 = scmp.lt.s32.totalorder %s44_s15, %s44_s15 }
  0x2d   :  { %p3766_p5 = scmp.ne.s32.totalorder %s44_s15, %s3765_s0  ;;  %p3771_p7 = scmp.lt.s32.totalorder %s3765_s0, %s3765_s0 }
  0x2f   :  { %p3772_p8 = por %p3771_p7, %p3770_p6 }
  0x31   :  { %p3773_p9 = pnand %p3772_p8, %p3766_p5 }
  0x33   :  { %3776 = shalt.err (!%p3773_p9)
}
  0x34   :  { %46 = dma.hbm_to_vmem [thread:$0]  %s7950_s2, 96, %s44_s15, [#allocation6]  }
  0x35   :  { %s3777_s5 = scalar_lea.hbm %s7951_s3, 96 }
  0x36   :  { %p3778_p10 = scmp.ne.s32.totalorder %s7951_s3, %s3777_s5  ;;  %p3781_p11 = scmp.lt.u32.totalorder %s3777_s5, %s7951_s3 }
  0x38   :  { %p3783_p12 = pnand %p3781_p11, %p3778_p10 }
  0x3a   :  { %3786 = shalt.err (!%p3783_p12)
}
  0x3b   :  { %s3787_s10 = scalar_lea.vmem %s54_s17, 96  ;;  %p3792_p0 = scmp.lt.s32.totalorder %s54_s17, %s54_s17 }
  0x3c   :  { %p3788_p13 = scmp.ne.s32.totalorder %s54_s17, %s3787_s10  ;;  %p3793_p1 = scmp.lt.s32.totalorder %s3787_s10, %s3787_s10 }
  0x3e   :  { %p3794_p2 = por %p3793_p1, %p3792_p0 }
  0x40   :  { %p3795_p3 = pnand %p3794_p2, %p3788_p13 }
  0x42   :  { %3798 = shalt.err (!%p3795_p3)
}
  0x43   :  { %56 = dma.hbm_to_vmem [thread:$0]  %s7951_s3, 96, %s54_s17, [#allocation9]  }
  0x44   :  { %3821 = dma.done.wait [#allocation3], 36864  }
  0x45   :  { %3822 = vsyncadd [#allocation3], 4294930432 }
  0x46   :  { %3823 = dma.done.wait [#allocation6], 36960  }
  0x47   :  { %3824 = vsyncadd [#allocation6], 4294930336 }
  0x48   :  { %3825 = dma.done.wait [#allocation9], 96  }
  0x49   :  { %3826 = vsyncadd [#allocation9], 4294967200  ;;  %v81_v0 = vld [vmem:[#allocation2 + $0x60] sm:$0xff]  ;;  %v82_v1 = vld [vmem:[#allocation2 + $0x68] sm:$0xff]  ;;  %s3835_s3 = smov [#allocation10]  }
  0x4a   :  { %v83_v2 = vld [vmem:[#allocation2 + $0x70] sm:$0xff]  ;;  %v84_v3 = vld [vmem:[#allocation2 + $0x78] sm:$0xff]  ;;  %v369_v4 = vld [vmem:[#allocation5 + $0x60] sm:$0xff]  ;;  %s3594_s12 = sshll.u32 %s3835_s3, 4  ;;  %s3595_s12 = int_to_ptr.vmem [resolvable:$true] %s3594_s12 }
  0x4b   :  { %v370_v5 = vld [vmem:[#allocation5 + $0x68] sm:$0xff]  ;;  %v371_v6 = vld [vmem:[#allocation5 + $0x70] sm:$0xff]  ;;  %v85_v7 = vld [vmem:[#allocation2 + $0x80] sm:$0xff]  ;;  %v3922_v10 = vadd.f32 %v369_v4, %v81_v0  ;;  %s3799_s1 = scalar_lea.vmem %s3595_s12, 36864  ;;  %p3804_p5 = scmp.lt.s32.totalorder %s3595_s12, %s3595_s12 }
  0x4c   :  { %v372_v8 = vld [vmem:[#allocation5 + $0x78] sm:$0xff]  ;;  %v373_v9 = vld [vmem:[#allocation5 + $0x80] sm:$0xff]  ;;  %v3924_v11 = vadd.f32 %v370_v5, %v82_v1  ;;  %v3926_v12 = vadd.f32 %v371_v6, %v83_v2  ;;  %v86_v13 = vld [vmem:[#allocation2 + $0x88] sm:$0xff]  ;;  %p3800_p4 = scmp.ne.s32.totalorder %s3595_s12, %s3799_s1  ;;  %p3805_p6 = scmp.lt.s32.totalorder %s3799_s1, %s3799_s1 }
  0x4d   :  { %v69_v14 = vld [vmem:[#allocation2] sm:$0xff]  ;;  %v70_v15 = vld [vmem:[#allocation2 + $0x8] sm:$0xff]  ;;  %v71_v16 = vld [vmem:[#allocation2 + $0x10] sm:$0xff]  ;;  %v3928_v18 = vadd.f32 %v372_v8, %v84_v3  ;;  %v3932_v22 = vadd.f32 %v373_v9, %v85_v7 }
  0x4e   :  { %v374_v17 = vld [vmem:[#allocation5 + $0x88] sm:$0xff]  ;;  %v947_v19 = vadd.f32 %v3924_v11, %v3922_v10  ;;  %v72_v20 = vld [vmem:[#allocation2 + $0x18] sm:$0xff]  ;;  %v73_v21 = vld [vmem:[#allocation2 + $0x20] sm:$0xff]  ;;  %p3806_p7 = por %p3805_p6, %p3804_p5 }
  0x4f   :  { %v357_v23 = vld [vmem:[#allocation5] sm:$0xff]  ;;  %v358_v24 = vld [vmem:[#allocation5 + $0x8] sm:$0xff]  ;;  %v359_v25 = vld [vmem:[#allocation5 + $0x10] sm:$0xff]  ;;  %v3941_v36 = vadd.f32 %v374_v17, %v86_v13 }
  0x50   :  { %v948_v26 = vadd.f32 %v947_v19, %v3926_v12  ;;  %v74_v27 = vld [vmem:[#allocation2 + $0x28] sm:$0xff]  ;;  %v360_v28 = vld [vmem:[#allocation5 + $0x18] sm:$0xff]  ;;  %v361_v29 = vld [vmem:[#allocation5 + $0x20] sm:$0xff]  ;;  %v3935_v30 = vadd.f32 %v357_v23, %v69_v14  ;;  %v3937_v31 = vadd.f32 %v358_v24, %v70_v15  ;;  %v3939_v32 = vadd.f32 %v359_v25, %v71_v16  ;;  %p3807_p8 = pnand %p3806_p7, %p3800_p4 }
  0x51   :  { %v362_v33 = vld [vmem:[#allocation5 + $0x28] sm:$0xff]  ;;  %v87_v34 = vld [vmem:[#allocation2 + $0x90] sm:$0xff]  ;;  %v88_v35 = vld [vmem:[#allocation2 + $0x98] sm:$0xff]  ;;  %v3944_v38 = vadd.f32 %v360_v28, %v72_v20  ;;  %v3948_v43 = vadd.f32 %v361_v29, %v73_v21 }
  0x52   :  { %v949_v37 = vadd.f32 %v948_v26, %v3928_v18  ;;  %v933_v39 = vadd.f32 %v3937_v31, %v3935_v30  ;;  %v89_v40 = vld [vmem:[#allocation2 + $0xa0] sm:$0xff]  ;;  %v90_v41 = vld [vmem:[#allocation2 + $0xa8] sm:$0xff]  ;;  %v91_v42 = vld [vmem:[#allocation2 + $0xb0] sm:$0xff]  ;;  %v3956_v54 = vadd.f32 %v362_v33, %v74_v27 }
  0x53   :  { %v375_v44 = vld [vmem:[#allocation5 + $0x90] sm:$0xff]  ;;  %v376_v45 = vld [vmem:[#allocation5 + $0x98] sm:$0xff]  ;;  %v377_v46 = vld [vmem:[#allocation5 + $0xa0] sm:$0xff] }
  0x54   :  { %v950_v47 = vadd.f32 %v949_v37, %v3932_v22  ;;  %v934_v48 = vadd.f32 %v933_v39, %v3939_v32  ;;  %v92_v49 = vld [vmem:[#allocation2 + $0xb8] sm:$0xff]  ;;  %v378_v50 = vld [vmem:[#allocation5 + $0xa8] sm:$0xff]  ;;  %v379_v51 = vld [vmem:[#allocation5 + $0xb0] sm:$0xff]  ;;  %v3952_v52 = vadd.f32 %v375_v44, %v87_v34  ;;  %v3954_v53 = vadd.f32 %v376_v45, %v88_v35 }
  0x55   :  { %v380_v55 = vld [vmem:[#allocation5 + $0xb8] sm:$0xff]  ;;  %v3958_v56 = vadd.f32 %v377_v46, %v89_v40  ;;  %v75_v57 = vld [vmem:[#allocation2 + $0x30] sm:$0xff]  ;;  %v3962_v61 = vadd.f32 %v378_v50, %v90_v41  ;;  %v77_v63 = vld [vmem:[#allocation2 + $0x40] sm:$0xff]  ;;  %v3966_v2 = vadd.f32 %v379_v51, %v91_v42 }
  0x56   :  { %v76_v58 = vld [vmem:[#allocation2 + $0x38] sm:$0xff]  ;;  %v951_v59 = vadd.f32 %v950_v47, %v3941_v36  ;;  %v935_v60 = vadd.f32 %v934_v48, %v3944_v38  ;;  %v954_v62 = vadd.f32 %v3954_v53, %v3952_v52  ;;  %v78_v0 = vld [vmem:[#allocation2 + $0x48] sm:$0xff]  ;;  %v79_v1 = vld [vmem:[#allocation2 + $0x50] sm:$0xff]  ;;  %v3974_v16 = vadd.f32 %v380_v55, %v92_v49 }
  0x57   :  { %v363_v3 = vld [vmem:[#allocation5 + $0x30] sm:$0xff]  ;;  %v364_v4 = vld [vmem:[#allocation5 + $0x38] sm:$0xff]  ;;  %v365_v5 = vld [vmem:[#allocation5 + $0x40] sm:$0xff] }
  0x58   :  { %952 = vadd.xlane.f32.xlu1 %v951_v59  ;;  %v936_v6 = vadd.f32 %v935_v60, %v3948_v43  ;;  %v955_v7 = vadd.f32 %v954_v62, %v3958_v56  ;;  %v80_v8 = vld [vmem:[#allocation2 + $0x58] sm:$0xff]  ;;  %v366_v9 = vld [vmem:[#allocation5 + $0x48] sm:$0xff]  ;;  %v367_v13 = vld [vmem:[#allocation5 + $0x50] sm:$0xff]  ;;  %v3970_v14 = vadd.f32 %v363_v3, %v75_v57  ;;  %v3972_v15 = vadd.f32 %v364_v4, %v76_v58 }
  0x59   :  { %v368_v17 = vld [vmem:[#allocation5 + $0x58] sm:$0xff]  ;;  %v3976_v19 = vadd.f32 %v365_v5, %v77_v63  ;;  %v99_v20 = vld [vmem:[#allocation2 + $0xf0] sm:$0xff]  ;;  %v3980_v25 = vadd.f32 %v366_v9, %v78_v0  ;;  %v101_v27 = vld [vmem:[#allocation2 + $0x100] sm:$0xff]  ;;  %v3984_v33 = vadd.f32 %v367_v13, %v79_v1 }
  0x5a   :  { %v100_v21 = vld [vmem:[#allocation2 + $0xf8] sm:$0xff]  ;;  %v937_v23 = vadd.f32 %v936_v6, %v3956_v54  ;;  %v956_v24 = vadd.f32 %v955_v7, %v3962_v61  ;;  %v940_v26 = vadd.f32 %v3972_v15, %v3970_v14  ;;  %v102_v28 = vld [vmem:[#allocation2 + $0x108] sm:$0xff]  ;;  %v103_v29 = vld [vmem:[#allocation2 + $0x110] sm:$0xff]  ;;  %v3992_v47 = vadd.f32 %v368_v17, %v80_v8 }
  0x5b   :  { %v387_v34 = vld [vmem:[#allocation5 + $0xf0] sm:$0xff]  ;;  %v388_v35 = vld [vmem:[#allocation5 + $0xf8] sm:$0xff]  ;;  %v389_v37 = vld [vmem:[#allocation5 + $0x100] sm:$0xff] }
  0x5c   :  { %938 = vadd.xlane.f32.xlu0 %v937_v23  ;;  %v957_v39 = vadd.f32 %v956_v24, %v3966_v2  ;;  %v941_v40 = vadd.f32 %v940_v26, %v3976_v19  ;;  %v104_v41 = vld [vmem:[#allocation2 + $0x118] sm:$0xff]  ;;  %v390_v42 = vld [vmem:[#allocation5 + $0x108] sm:$0xff]  ;;  %v391_v44 = vld [vmem:[#allocation5 + $0x110] sm:$0xff]  ;;  %v3988_v45 = vadd.f32 %v387_v34, %v99_v20  ;;  %v3990_v46 = vadd.f32 %v388_v35, %v100_v21 }
  0x5d   :  { %v392_v48 = vld [vmem:[#allocation5 + $0x118] sm:$0xff]  ;;  %v3994_v49 = vadd.f32 %v389_v37, %v101_v27  ;;  %v93_v50 = vld [vmem:[#allocation2 + $0xc0] sm:$0xff]  ;;  %v94_v51 = vld [vmem:[#allocation2 + $0xc8] sm:$0xff]  ;;  %v3998_v58 = vadd.f32 %v390_v42, %v102_v28  ;;  %v4002_v0 = vadd.f32 %v391_v44, %v103_v29 }
  0x5e   :  { %8462 = vst [vmem:[#allocation15_spill] sm:$0xff] %v3988_v45  ;;  %8463 = vst [vmem:[#allocation16_spill] sm:$0xff] %v3990_v46  ;;  %v958_v55 = vadd.f32 %v957_v39, %v3974_v16  ;;  %v942_v57 = vadd.f32 %v941_v40, %v3980_v25  ;;  %v968_v59 = vadd.f32 %v3990_v46, %v3988_v45  ;;  %v95_v60 = vld [vmem:[#allocation2 + $0xd0] sm:$0xff]  ;;  %v96_v62 = vld [vmem:[#allocation2 + $0xd8] sm:$0xff] }
  0x5f   :  { %8464 = vst [vmem:[#allocation17_spill] sm:$0xff] %v3994_v49  ;;  %8465 = vst [vmem:[#allocation18_spill] sm:$0xff] %v3998_v58  ;;  %v97_v63 = vld [vmem:[#allocation2 + $0xe0] sm:$0xff]  ;;  %v382_v3 = vld [vmem:[#allocation5 + $0xc8] sm:$0xff]  ;;  %v4010_v20 = vadd.f32 %v392_v48, %v104_v41 }
  0x60   :  { %8466 = vst [vmem:[#allocation19_spill] sm:$0xff] %v4002_v0  ;;  %v381_v1 = vld [vmem:[#allocation5 + $0xc0] sm:$0xff]  ;;  %v383_v4 = vld [vmem:[#allocation5 + $0xd0] sm:$0xff]  ;;  %959 = vadd.xlane.f32.xlu1 %v958_v55  ;;  %v943_v5 = vadd.f32 %v942_v57, %v3984_v33  ;;  %v969_v6 = vadd.f32 %v968_v59, %v3994_v49  ;;  %v98_v7 = vld [vmem:[#allocation2 + $0xe8] sm:$0xff]  ;;  %v4008_v17 = vadd.f32 %v382_v3, %v94_v51 }
  0x61   :  { %v384_v8 = vld [vmem:[#allocation5 + $0xd8] sm:$0xff]  ;;  %v385_v9 = vld [vmem:[#allocation5 + $0xe0] sm:$0xff]  ;;  %v4006_v13 = vadd.f32 %v381_v1, %v93_v50  ;;  %8467 = vst [vmem:[#allocation20_spill] sm:$0xff] %v4010_v20  ;;  %v386_v21 = vld [vmem:[#allocation5 + $0xe8] sm:$0xff]  ;;  %v4012_v23 = vadd.f32 %v383_v4, %v95_v60 }
  0x62   :  { %v111_v24 = vld [vmem:[#allocation2 + $0x150] sm:$0xff]  ;;  %v112_v26 = vld [vmem:[#allocation2 + $0x158] sm:$0xff]  ;;  %v944_v27 = vadd.f32 %v943_v5, %v3992_v47  ;;  %v970_v28 = vadd.f32 %v969_v6, %v3998_v58  ;;  %v4016_v29 = vadd.f32 %v384_v8, %v96_v62  ;;  %v113_v35 = vld [vmem:[#allocation2 + $0x160] sm:$0xff]  ;;  %v4020_v40 = vadd.f32 %v385_v9, %v97_v63 }
  0x63   :  { %v961_v34 = vadd.f32 %v4008_v17, %v4006_v13  ;;  %v114_v37 = vld [vmem:[#allocation2 + $0x168] sm:$0xff]  ;;  %v115_v39 = vld [vmem:[#allocation2 + $0x170] sm:$0xff]  ;;  %v400_v42 = vld [vmem:[#allocation5 + $0x158] sm:$0xff]  ;;  %v4028_v62 = vadd.f32 %v386_v21, %v98_v7 }
  0x64   :  { %v399_v41 = vld [vmem:[#allocation5 + $0x150] sm:$0xff]  ;;  %v401_v44 = vld [vmem:[#allocation5 + $0x160] sm:$0xff]  ;;  %945 = vadd.xlane.f32.xlu0 %v944_v27  ;;  %v971_v48 = vadd.f32 %v970_v28, %v4002_v0  ;;  %v116_v51 = vld [vmem:[#allocation2 + $0x178] sm:$0xff]  ;;  %v4026_v60 = vadd.f32 %v400_v42, %v112_v26 }
  0x65   :  { %v962_v50 = vadd.f32 %v961_v34, %v4012_v23  ;;  %v402_v55 = vld [vmem:[#allocation5 + $0x168] sm:$0xff]  ;;  %v403_v57 = vld [vmem:[#allocation5 + $0x170] sm:$0xff]  ;;  %v4024_v59 = vadd.f32 %v399_v41, %v111_v24  ;;  %8470 = vst [vmem:[#allocation23_spill] sm:$0xff] %v4028_v62  ;;  %v404_v1 = vld [vmem:[#allocation5 + $0x178] sm:$0xff]  ;;  %v4030_v63 = vadd.f32 %v401_v44, %v113_v35 }
  0x66   :  { %8469 = vst [vmem:[#allocation22_spill] sm:$0xff] %v4026_v60  ;;  %v105_v3 = vld [vmem:[#allocation2 + $0x120] sm:$0xff]  ;;  %v106_v4 = vld [vmem:[#allocation2 + $0x128] sm:$0xff]  ;;  %v972_v5 = vadd.f32 %v971_v48, %v4010_v20  ;;  %v4034_v8 = vadd.f32 %v402_v55, %v114_v37  ;;  %v107_v24 = vld [vmem:[#allocation2 + $0x130] sm:$0xff]  ;;  %v4038_v28 = vadd.f32 %v403_v57, %v115_v39  ;;  %v4046_v55 = vadd.f32 %v404_v1, %v116_v51 }
  0x67   :  { %8468 = vst [vmem:[#allocation21_spill] sm:$0xff] %v4024_v59  ;;  %8471 = vst [vmem:[#allocation24_spill] sm:$0xff] %v4030_v63  ;;  %v963_v6 = vadd.f32 %v962_v50, %v4016_v29  ;;  %v982_v9 = vadd.f32 %v4026_v60, %v4024_v59  ;;  %v108_v27 = vld [vmem:[#allocation2 + $0x138] sm:$0xff]  ;;  %v109_v26 = vld [vmem:[#allocation2 + $0x140] sm:$0xff] }
  0x68   :  { %8472 = vst [vmem:[#allocation25_spill] sm:$0xff] %v4034_v8  ;;  %8473 = vst [vmem:[#allocation26_spill] sm:$0xff] %v4038_v28  ;;  %v393_v7 = vld [vmem:[#allocation5 + $0x120] sm:$0xff]  ;;  %v394_v21 = vld [vmem:[#allocation5 + $0x128] sm:$0xff]  ;;  %973 = vadd.xlane.f32.xlu1 %v972_v5 }
  0x69   :  { %v395_v34 = vld [vmem:[#allocation5 + $0x130] sm:$0xff]  ;;  %v964_v35 = vadd.f32 %v963_v6, %v4020_v40  ;;  %v983_v41 = vadd.f32 %v982_v9, %v4030_v63  ;;  %v110_v42 = vld [vmem:[#allocation2 + $0x148] sm:$0xff]  ;;  %v396_v44 = vld [vmem:[#allocation5 + $0x138] sm:$0xff]  ;;  %v4042_v48 = vadd.f32 %v393_v7, %v105_v3  ;;  %v4044_v50 = vadd.f32 %v394_v21, %v106_v4  ;;  %8476 = vst [vmem:[#allocation29_spill] sm:$0xff] %v4046_v55 }
  0x6a   :  { %v397_v37 = vld [vmem:[#allocation5 + $0x140] sm:$0xff]  ;;  %v398_v60 = vld [vmem:[#allocation5 + $0x148] sm:$0xff]  ;;  %v4048_v39 = vadd.f32 %v395_v34, %v107_v24  ;;  %v123_v57 = vld [vmem:[#allocation2 + $0x1b0] sm:$0xff]  ;;  %v4052_v20 = vadd.f32 %v396_v44, %v108_v27 }
  0x6b   :  { %8474 = vst [vmem:[#allocation27_spill] sm:$0xff] %v4042_v48  ;;  %8475 = vst [vmem:[#allocation28_spill] sm:$0xff] %v4044_v50  ;;  %v124_v59 = vld [vmem:[#allocation2 + $0x1b8] sm:$0xff]  ;;  %v965_v5 = vadd.f32 %v964_v35, %v4028_v62  ;;  %v984_v6 = vadd.f32 %v983_v41, %v4034_v8  ;;  %v975_v9 = vadd.f32 %v4044_v50, %v4042_v48  ;;  %v125_v3 = vld [vmem:[#allocation2 + $0x1c0] sm:$0xff] }
  0x6c   :  { %8477 = vst [vmem:[#allocation30_spill] sm:$0xff] %v4048_v39  ;;  %8478 = vst [vmem:[#allocation31_spill] sm:$0xff] %v4052_v20  ;;  %v126_v7 = vld [vmem:[#allocation2 + $0x1c8] sm:$0xff]  ;;  %v127_v4 = vld [vmem:[#allocation2 + $0x1d0] sm:$0xff]  ;;  %v4056_v21 = vadd.f32 %v397_v37, %v109_v26  ;;  %v4064_v50 = vadd.f32 %v398_v60, %v110_v42 }
  0x6d   :  { %v411_v51 = vld [vmem:[#allocation5 + $0x1b0] sm:$0xff]  ;;  %v412_v1 = vld [vmem:[#allocation5 + $0x1b8] sm:$0xff]  ;;  %v413_v24 = vld [vmem:[#allocation5 + $0x1c0] sm:$0xff]  ;;  %966 = vadd.xlane.f32.xlu0 %v965_v5  ;;  %v985_v34 = vadd.f32 %v984_v6, %v4038_v28  ;;  %v976_v35 = vadd.f32 %v975_v9, %v4048_v39 }
  0x6e   :  { %8479 = vst [vmem:[#allocation32_spill] sm:$0xff] %v4056_v21  ;;  %v128_v63 = vld [vmem:[#allocation2 + $0x1d8] sm:$0xff]  ;;  %v414_v41 = vld [vmem:[#allocation5 + $0x1c8] sm:$0xff]  ;;  %v415_v27 = vld [vmem:[#allocation5 + $0x1d0] sm:$0xff]  ;;  %v4060_v44 = vadd.f32 %v411_v51, %v123_v57  ;;  %v4062_v8 = vadd.f32 %v412_v1, %v124_v59  ;;  %v4066_v26 = vadd.f32 %v413_v24, %v125_v3 }
  0x6f   :  { %8482 = vst [vmem:[#allocation35_spill] sm:$0xff] %v4064_v50  ;;  %v416_v48 = vld [vmem:[#allocation5 + $0x1d8] sm:$0xff]  ;;  %v117_v37 = vld [vmem:[#allocation2 + $0x180] sm:$0xff]  ;;  %v118_v0 = vld [vmem:[#allocation2 + $0x188] sm:$0xff]  ;;  %v986_v5 = vadd.f32 %v985_v34, %v4046_v55  ;;  %v977_v6 = vadd.f32 %v976_v35, %v4052_v20  ;;  %v4070_v28 = vadd.f32 %v414_v41, %v126_v7  ;;  %v4074_v1 = vadd.f32 %v415_v27, %v127_v4 }
  0x70   :  { %8480 = vst [vmem:[#allocation33_spill] sm:$0xff] %v4060_v44  ;;  %8481 = vst [vmem:[#allocation34_spill] sm:$0xff] %v4062_v8  ;;  %v996_v9 = vadd.f32 %v4062_v8, %v4060_v44  ;;  %v119_v57 = vld [vmem:[#allocation2 + $0x190] sm:$0xff]  ;;  %v120_v51 = vld [vmem:[#allocation2 + $0x198] sm:$0xff]  ;;  %v4082_v8 = vadd.f32 %v416_v48, %v128_v63 }
  0x71   :  { %8483 = vst [vmem:[#allocation36_spill] sm:$0xff] %v4066_v26  ;;  %8484 = vst [vmem:[#allocation37_spill] sm:$0xff] %v4070_v28  ;;  %v121_v59 = vld [vmem:[#allocation2 + $0x1a0] sm:$0xff]  ;;  %v406_v42 = vld [vmem:[#allocation5 + $0x188] sm:$0xff]  ;;  %987 = vadd.xlane.f32.xlu1 %v986_v5  ;;  %v978_v24 = vadd.f32 %v977_v6, %v4056_v21 }
  0x72   :  { %8485 = vst [vmem:[#allocation38_spill] sm:$0xff] %v4074_v1  ;;  %v405_v60 = vld [vmem:[#allocation5 + $0x180] sm:$0xff]  ;;  %v407_v3 = vld [vmem:[#allocation5 + $0x190] sm:$0xff]  ;;  %v997_v34 = vadd.f32 %v996_v9, %v4066_v26  ;;  %v122_v55 = vld [vmem:[#allocation2 + $0x1a8] sm:$0xff]  ;;  %v4080_v20 = vadd.f32 %v406_v42, %v118_v0 }
  0x73   :  { %v408_v35 = vld [vmem:[#allocation5 + $0x198] sm:$0xff]  ;;  %v409_v7 = vld [vmem:[#allocation5 + $0x1a0] sm:$0xff]  ;;  %v4078_v41 = vadd.f32 %v405_v60, %v117_v37  ;;  %8488 = vst [vmem:[#allocation41_spill] sm:$0xff] %v4082_v8  ;;  %v410_v44 = vld [vmem:[#allocation5 + $0x1a8] sm:$0xff]  ;;  %v4084_v4 = vadd.f32 %v407_v3, %v119_v57  ;;  %v979_v5 = vadd.f32 %v978_v24, %v4064_v50 }
  0x74   :  { %8487 = vst [vmem:[#allocation40_spill] sm:$0xff] %v4080_v20  ;;  %v135_v27 = vld [vmem:[#allocation2 + $0x210] sm:$0xff]  ;;  %v136_v39 = vld [vmem:[#allocation2 + $0x218] sm:$0xff]  ;;  %v998_v6 = vadd.f32 %v997_v34, %v4070_v28  ;;  %v4088_v21 = vadd.f32 %v408_v35, %v120_v51  ;;  %v137_v37 = vld [vmem:[#allocation2 + $0x220] sm:$0xff]  ;;  %v4092_v42 = vadd.f32 %v409_v7, %v121_v59 }
  0x75   :  { %8486 = vst [vmem:[#allocation39_spill] sm:$0xff] %v4078_v41  ;;  %8489 = vst [vmem:[#allocation42_spill] sm:$0xff] %v4084_v4  ;;  %v989_v9 = vadd.f32 %v4080_v20, %v4078_v41  ;;  %v138_v60 = vld [vmem:[#allocation2 + $0x228] sm:$0xff]  ;;  %v139_v0 = vld [vmem:[#allocation2 + $0x230] sm:$0xff]  ;;  %980 = vadd.xlane.f32.xlu0 %v979_v5  ;;  %v4100_v20 = vadd.f32 %v410_v44, %v122_v55 }
  0x76   :  { %8490 = vst [vmem:[#allocation43_spill] sm:$0xff] %v4088_v21  ;;  %8491 = vst [vmem:[#allocation44_spill] sm:$0xff] %v4092_v42  ;;  %v423_v63 = vld [vmem:[#allocation5 + $0x210] sm:$0xff]  ;;  %v424_v48 = vld [vmem:[#allocation5 + $0x218] sm:$0xff]  ;;  %v999_v3 = vadd.f32 %v998_v6, %v4074_v1 }
  0x77   :  { %v425_v57 = vld [vmem:[#allocation5 + $0x220] sm:$0xff]  ;;  %v990_v24 = vadd.f32 %v989_v9, %v4084_v4  ;;  %v140_v26 = vld [vmem:[#allocation2 + $0x238] sm:$0xff]  ;;  %v426_v34 = vld [vmem:[#allocation5 + $0x228] sm:$0xff]  ;;  %v4096_v35 = vadd.f32 %v423_v63, %v135_v27  ;;  %v4098_v28 = vadd.f32 %v424_v48, %v136_v39  ;;  %8494 = vst [vmem:[#allocation47_spill] sm:$0xff] %v4100_v20 }
  0x78   :  { %v427_v51 = vld [vmem:[#allocation5 + $0x230] sm:$0xff]  ;;  %v428_v41 = vld [vmem:[#allocation5 + $0x238] sm:$0xff]  ;;  %v4102_v59 = vadd.f32 %v425_v57, %v137_v37  ;;  %v129_v7 = vld [vmem:[#allocation2 + $0x1e0] sm:$0xff]  ;;  %v1000_v5 = vadd.f32 %v999_v3, %v4082_v8  ;;  %v4106_v1 = vadd.f32 %v426_v34, %v138_v60 }
  0x79   :  { %8492 = vst [vmem:[#allocation45_spill] sm:$0xff] %v4096_v35  ;;  %8493 = vst [vmem:[#allocation46_spill] sm:$0xff] %v4098_v28  ;;  %v130_v50 = vld [vmem:[#allocation2 + $0x1e8] sm:$0xff]  ;;  %v991_v6 = vadd.f32 %v990_v24, %v4088_v21  ;;  %v1010_v9 = vadd.f32 %v4098_v28, %v4096_v35  ;;  %v131_v27 = vld [vmem:[#allocation2 + $0x1f0] sm:$0xff]  ;;  %v4110_v48 = vadd.f32 %v427_v51, %v139_v0 }
  0x7a   :  { %8495 = vst [vmem:[#allocation48_spill] sm:$0xff] %v4102_v59  ;;  %8496 = vst [vmem:[#allocation49_spill] sm:$0xff] %v4106_v1  ;;  %v132_v63 = vld [vmem:[#allocation2 + $0x1f8] sm:$0xff]  ;;  %v133_v39 = vld [vmem:[#allocation2 + $0x200] sm:$0xff]  ;;  %1001 = vadd.xlane.f32.xlu1 %v1000_v5  ;;  %v4118_v28 = vadd.f32 %v428_v41, %v140_v26 }
  0x7b   :  { %8497 = vst [vmem:[#allocation50_spill] sm:$0xff] %v4110_v48  ;;  %v417_v55 = vld [vmem:[#allocation5 + $0x1e0] sm:$0xff]  ;;  %v418_v44 = vld [vmem:[#allocation5 + $0x1e8] sm:$0xff]  ;;  %v419_v37 = vld [vmem:[#allocation5 + $0x1f0] sm:$0xff]  ;;  %v992_v57 = vadd.f32 %v991_v6, %v4092_v42  ;;  %v1011_v3 = vadd.f32 %v1010_v9, %v4102_v59 }
  0x7c   :  { %v134_v8 = vld [vmem:[#allocation2 + $0x208] sm:$0xff]  ;;  %v420_v24 = vld [vmem:[#allocation5 + $0x1f8] sm:$0xff]  ;;  %v421_v60 = vld [vmem:[#allocation5 + $0x200] sm:$0xff]  ;;  %v4114_v34 = vadd.f32 %v417_v55, %v129_v7  ;;  %v4116_v21 = vadd.f32 %v418_v44, %v130_v50  ;;  %8500 = vst [vmem:[#allocation53_spill] sm:$0xff] %v4118_v28  ;;  %v4120_v0 = vadd.f32 %v419_v37, %v131_v27 }
  0x7d   :  { %v422_v35 = vld [vmem:[#allocation5 + $0x208] sm:$0xff]  ;;  %v147_v51 = vld [vmem:[#allocation2 + $0x270] sm:$0xff]  ;;  %v148_v4 = vld [vmem:[#allocation2 + $0x278] sm:$0xff]  ;;  %v993_v5 = vadd.f32 %v992_v57, %v4100_v20  ;;  %v1012_v6 = vadd.f32 %v1011_v3, %v4106_v1  ;;  %v4124_v42 = vadd.f32 %v420_v24, %v132_v63  ;;  %v4128_v44 = vadd.f32 %v421_v60, %v133_v39 }
  0x7e   :  { %8498 = vst [vmem:[#allocation51_spill] sm:$0xff] %v4114_v34  ;;  %8499 = vst [vmem:[#allocation52_spill] sm:$0xff] %v4116_v21  ;;  %v1003_v9 = vadd.f32 %v4116_v21, %v4114_v34  ;;  %v149_v7 = vld [vmem:[#allocation2 + $0x280] sm:$0xff]  ;;  %v150_v55 = vld [vmem:[#allocation2 + $0x288] sm:$0xff]  ;;  %v4136_v21 = vadd.f32 %v422_v35, %v134_v8 }
  0x7f   :  { %8501 = vst [vmem:[#allocation54_spill] sm:$0xff] %v4120_v0  ;;  %8502 = vst [vmem:[#allocation55_spill] sm:$0xff] %v4124_v42  ;;  %v151_v50 = vld [vmem:[#allocation2 + $0x290] sm:$0xff]  ;;  %v436_v41 = vld [vmem:[#allocation5 + $0x278] sm:$0xff]  ;;  %994 = vadd.xlane.f32.xlu0 %v993_v5  ;;  %v1013_v37 = vadd.f32 %v1012_v6, %v4110_v48 }
  0x80   :  { %8503 = vst [vmem:[#allocation56_spill] sm:$0xff] %v4128_v44  ;;  %v435_v26 = vld [vmem:[#allocation5 + $0x270] sm:$0xff]  ;;  %v437_v27 = vld [vmem:[#allocation5 + $0x280] sm:$0xff]  ;;  %v1004_v57 = vadd.f32 %v1003_v9, %v4120_v0  ;;  %v152_v59 = vld [vmem:[#allocation2 + $0x298] sm:$0xff]  ;;  %v4134_v1 = vadd.f32 %v436_v41, %v148_v4 }
  0x81   :  { %v438_v3 = vld [vmem:[#allocation5 + $0x288] sm:$0xff]  ;;  %v439_v63 = vld [vmem:[#allocation5 + $0x290] sm:$0xff]  ;;  %v4132_v24 = vadd.f32 %v435_v26, %v147_v51  ;;  %8506 = vst [vmem:[#allocation59_spill] sm:$0xff] %v4136_v21  ;;  %v440_v34 = vld [vmem:[#allocation5 + $0x298] sm:$0xff]  ;;  %v4138_v39 = vadd.f32 %v437_v27, %v149_v7  ;;  %v1014_v5 = vadd.f32 %v1013_v37, %v4118_v28 }
  0x82   :  { %8505 = vst [vmem:[#allocation58_spill] sm:$0xff] %v4134_v1  ;;  %v141_v60 = vld [vmem:[#allocation2 + $0x240] sm:$0xff]  ;;  %v142_v20 = vld [vmem:[#allocation2 + $0x248] sm:$0xff]  ;;  %v1005_v6 = vadd.f32 %v1004_v57, %v4124_v42  ;;  %v4142_v48 = vadd.f32 %v438_v3, %v150_v55  ;;  %v143_v51 = vld [vmem:[#allocation2 + $0x250] sm:$0xff]  ;;  %v4146_v41 = vadd.f32 %v439_v63, %v151_v50 }
  0x83   :  { %8504 = vst [vmem:[#allocation57_spill] sm:$0xff] %v4132_v24  ;;  %8507 = vst [vmem:[#allocation60_spill] sm:$0xff] %v4138_v39  ;;  %v1024_v9 = vadd.f32 %v4134_v1, %v4132_v24  ;;  %v144_v26 = vld [vmem:[#allocation2 + $0x258] sm:$0xff]  ;;  %v145_v4 = vld [vmem:[#allocation2 + $0x260] sm:$0xff]  ;;  %1015 = vadd.xlane.f32.xlu1 %v1014_v5  ;;  %v4154_v1 = vadd.f32 %v440_v34, %v152_v59 }
  0x84   :  { %8508 = vst [vmem:[#allocation61_spill] sm:$0xff] %v4142_v48  ;;  %8509 = vst [vmem:[#allocation62_spill] sm:$0xff] %v4146_v41  ;;  %v429_v8 = vld [vmem:[#allocation5 + $0x240] sm:$0xff]  ;;  %v430_v35 = vld [vmem:[#allocation5 + $0x248] sm:$0xff]  ;;  %v1006_v27 = vadd.f32 %v1005_v6, %v4128_v44 }
  0x85   :  { %v431_v7 = vld [vmem:[#allocation5 + $0x250] sm:$0xff]  ;;  %v1025_v37 = vadd.f32 %v1024_v9, %v4138_v39  ;;  %v146_v28 = vld [vmem:[#allocation2 + $0x268] sm:$0xff]  ;;  %v432_v57 = vld [vmem:[#allocation5 + $0x258] sm:$0xff]  ;;  %v4150_v3 = vadd.f32 %v429_v8, %v141_v60  ;;  %v4152_v42 = vadd.f32 %v430_v35, %v142_v20  ;;  %8512 = vst [vmem:[#allocation65_spill] sm:$0xff] %v4154_v1 }
  0x86   :  { %v433_v55 = vld [vmem:[#allocation5 + $0x260] sm:$0xff]  ;;  %v434_v24 = vld [vmem:[#allocation5 + $0x268] sm:$0xff]  ;;  %v4156_v50 = vadd.f32 %v431_v7, %v143_v51  ;;  %v159_v63 = vld [vmem:[#allocation2 + $0x2d0] sm:$0xff]  ;;  %v1007_v5 = vadd.f32 %v1006_v27, %v4136_v21  ;;  %v4160_v44 = vadd.f32 %v432_v57, %v144_v26 }
  0x87   :  { %8510 = vst [vmem:[#allocation63_spill] sm:$0xff] %v4150_v3  ;;  %8511 = vst [vmem:[#allocation64_spill] sm:$0xff] %v4152_v42  ;;  %v160_v0 = vld [vmem:[#allocation2 + $0x2d8] sm:$0xff]  ;;  %v1026_v6 = vadd.f32 %v1025_v37, %v4142_v48  ;;  %v1017_v9 = vadd.f32 %v4152_v42, %v4150_v3  ;;  %v161_v60 = vld [vmem:[#allocation2 + $0x2e0] sm:$0xff]  ;;  %v4164_v35 = vadd.f32 %v433_v55, %v145_v4 }
  0x88   :  { %8513 = vst [vmem:[#allocation66_spill] sm:$0xff] %v4156_v50  ;;  %8514 = vst [vmem:[#allocation67_spill] sm:$0xff] %v4160_v44  ;;  %v162_v8 = vld [vmem:[#allocation2 + $0x2e8] sm:$0xff]  ;;  %v163_v20 = vld [vmem:[#allocation2 + $0x2f0] sm:$0xff]  ;;  %1008 = vadd.xlane.f32.xlu0 %v1007_v5  ;;  %v4172_v42 = vadd.f32 %v434_v24, %v146_v28 }
  0x89   :  { %8515 = vst [vmem:[#allocation68_spill] sm:$0xff] %v4164_v35  ;;  %v447_v59 = vld [vmem:[#allocation5 + $0x2d0] sm:$0xff]  ;;  %v448_v34 = vld [vmem:[#allocation5 + $0x2d8] sm:$0xff]  ;;  %v449_v51 = vld [vmem:[#allocation5 + $0x2e0] sm:$0xff]  ;;  %v1027_v7 = vadd.f32 %v1026_v6, %v4146_v41  ;;  %v1018_v27 = vadd.f32 %v1017_v9, %v4156_v50 }
  0x8a   :  { %v164_v39 = vld [vmem:[#allocation2 + $0x2f8] sm:$0xff]  ;;  %v450_v37 = vld [vmem:[#allocation5 + $0x2e8] sm:$0xff]  ;;  %v451_v26 = vld [vmem:[#allocation5 + $0x2f0] sm:$0xff]  ;;  %v4168_v57 = vadd.f32 %v447_v59, %v159_v63  ;;  %v4170_v48 = vadd.f32 %v448_v34, %v160_v0  ;;  %8518 = vst [vmem:[#allocation71_spill] sm:$0xff] %v4172_v42  ;;  %v4174_v4 = vadd.f32 %v449_v51, %v161_v60 }
  0x8b   :  { %v452_v3 = vld [vmem:[#allocation5 + $0x2f8] sm:$0xff]  ;;  %v153_v55 = vld [vmem:[#allocation2 + $0x2a0] sm:$0xff]  ;;  %v154_v21 = vld [vmem:[#allocation2 + $0x2a8] sm:$0xff]  ;;  %v1028_v5 = vadd.f32 %v1027_v7, %v4154_v1  ;;  %v1019_v6 = vadd.f32 %v1018_v27, %v4160_v44  ;;  %v4178_v41 = vadd.f32 %v450_v37, %v162_v8  ;;  %v4182_v34 = vadd.f32 %v451_v26, %v163_v20 }
  0x8c   :  { %8516 = vst [vmem:[#allocation69_spill] sm:$0xff] %v4168_v57  ;;  %8517 = vst [vmem:[#allocation70_spill] sm:$0xff] %v4170_v48  ;;  %v1038_v9 = vadd.f32 %v4170_v48, %v4168_v57  ;;  %v155_v63 = vld [vmem:[#allocation2 + $0x2b0] sm:$0xff]  ;;  %v156_v59 = vld [vmem:[#allocation2 + $0x2b8] sm:$0xff]  ;;  %v4190_v48 = vadd.f32 %v452_v3, %v164_v39 }
  0x8d   :  { %8519 = vst [vmem:[#allocation72_spill] sm:$0xff] %v4174_v4  ;;  %8520 = vst [vmem:[#allocation73_spill] sm:$0xff] %v4178_v41  ;;  %v157_v0 = vld [vmem:[#allocation2 + $0x2c0] sm:$0xff]  ;;  %v442_v24 = vld [vmem:[#allocation5 + $0x2a8] sm:$0xff]  ;;  %1029 = vadd.xlane.f32.xlu1 %v1028_v5  ;;  %v1020_v51 = vadd.f32 %v1019_v6, %v4164_v35 }
  0x8e   :  { %8521 = vst [vmem:[#allocation74_spill] sm:$0xff] %v4182_v34  ;;  %v441_v28 = vld [vmem:[#allocation5 + $0x2a0] sm:$0xff]  ;;  %v443_v60 = vld [vmem:[#allocation5 + $0x2b0] sm:$0xff]  ;;  %v1039_v7 = vadd.f32 %v1038_v9, %v4174_v4  ;;  %v158_v1 = vld [vmem:[#allocation2 + $0x2c8] sm:$0xff]  ;;  %v4188_v44 = vadd.f32 %v442_v24, %v154_v21 }
  0x8f   :  { %v444_v27 = vld [vmem:[#allocation5 + $0x2b8] sm:$0xff]  ;;  %v445_v8 = vld [vmem:[#allocation5 + $0x2c0] sm:$0xff]  ;;  %v4186_v37 = vadd.f32 %v441_v28, %v153_v55  ;;  %8524 = vst [vmem:[#allocation77_spill] sm:$0xff] %v4190_v48  ;;  %v446_v57 = vld [vmem:[#allocation5 + $0x2c8] sm:$0xff]  ;;  %v4192_v20 = vadd.f32 %v443_v60, %v155_v63  ;;  %v1021_v5 = vadd.f32 %v1020_v51, %v4172_v42 }
  0x90   :  { %8523 = vst [vmem:[#allocation76_spill] sm:$0xff] %v4188_v44  ;;  %v171_v26 = vld [vmem:[#allocation2 + $0x330] sm:$0xff]  ;;  %v172_v50 = vld [vmem:[#allocation2 + $0x338] sm:$0xff]  ;;  %v1040_v6 = vadd.f32 %v1039_v7, %v4178_v41  ;;  %v4196_v35 = vadd.f32 %v444_v27, %v156_v59  ;;  %v173_v55 = vld [vmem:[#allocation2 + $0x340] sm:$0xff]  ;;  %v4200_v24 = vadd.f32 %v445_v8, %v157_v0 }
  0x91   :  { %8522 = vst [vmem:[#allocation75_spill] sm:$0xff] %v4186_v37  ;;  %8525 = vst [vmem:[#allocation78_spill] sm:$0xff] %v4192_v20  ;;  %v1031_v9 = vadd.f32 %v4188_v44, %v4186_v37  ;;  %v174_v28 = vld [vmem:[#allocation2 + $0x348] sm:$0xff]  ;;  %v175_v21 = vld [vmem:[#allocation2 + $0x350] sm:$0xff]  ;;  %1022 = vadd.xlane.f32.xlu0 %v1021_v5  ;;  %v4208_v44 = vadd.f32 %v446_v57, %v158_v1 }
  0x92   :  { %8526 = vst [vmem:[#allocation79_spill] sm:$0xff] %v4196_v35  ;;  %8527 = vst [vmem:[#allocation80_spill] sm:$0xff] %v4200_v24  ;;  %v459_v39 = vld [vmem:[#allocation5 + $0x330] sm:$0xff]  ;;  %v460_v3 = vld [vmem:[#allocation5 + $0x338] sm:$0xff]  ;;  %v1041_v60 = vadd.f32 %v1040_v6, %v4182_v34 }
  0x93   :  { %v461_v63 = vld [vmem:[#allocation5 + $0x340] sm:$0xff]  ;;  %v1032_v51 = vadd.f32 %v1031_v9, %v4192_v20  ;;  %v176_v4 = vld [vmem:[#allocation2 + $0x358] sm:$0xff]  ;;  %v462_v7 = vld [vmem:[#allocation5 + $0x348] sm:$0xff]  ;;  %v4204_v27 = vadd.f32 %v459_v39, %v171_v26  ;;  %v4206_v41 = vadd.f32 %v460_v3, %v172_v50  ;;  %8530 = vst [vmem:[#allocation83_spill] sm:$0xff] %v4208_v44 }
  0x94   :  { %v463_v59 = vld [vmem:[#allocation5 + $0x350] sm:$0xff]  ;;  %v464_v37 = vld [vmem:[#allocation5 + $0x358] sm:$0xff]  ;;  %v4210_v0 = vadd.f32 %v461_v63, %v173_v55  ;;  %v165_v8 = vld [vmem:[#allocation2 + $0x300] sm:$0xff]  ;;  %v1042_v5 = vadd.f32 %v1041_v60, %v4190_v48  ;;  %v4214_v34 = vadd.f32 %v462_v7, %v174_v28 }
  0x95   :  { %8528 = vst [vmem:[#allocation81_spill] sm:$0xff] %v4204_v27  ;;  %8529 = vst [vmem:[#allocation82_spill] sm:$0xff] %v4206_v41  ;;  %v166_v42 = vld [vmem:[#allocation2 + $0x308] sm:$0xff]  ;;  %v1033_v6 = vadd.f32 %v1032_v51, %v4196_v35  ;;  %v1052_v9 = vadd.f32 %v4206_v41, %v4204_v27  ;;  %v167_v26 = vld [vmem:[#allocation2 + $0x310] sm:$0xff]  ;;  %v4218_v3 = vadd.f32 %v463_v59, %v175_v21 }
  0x96   :  { %8531 = vst [vmem:[#allocation84_spill] sm:$0xff] %v4210_v0  ;;  %8532 = vst [vmem:[#allocation85_spill] sm:$0xff] %v4214_v34  ;;  %v168_v39 = vld [vmem:[#allocation2 + $0x318] sm:$0xff]  ;;  %v169_v50 = vld [vmem:[#allocation2 + $0x320] sm:$0xff]  ;;  %1043 = vadd.xlane.f32.xlu1 %v1042_v5  ;;  %v4226_v41 = vadd.f32 %v464_v37, %v176_v4 }
  0x97   :  { %8533 = vst [vmem:[#allocation86_spill] sm:$0xff] %v4218_v3  ;;  %v453_v1 = vld [vmem:[#allocation5 + $0x300] sm:$0xff]  ;;  %v454_v57 = vld [vmem:[#allocation5 + $0x308] sm:$0xff]  ;;  %v455_v55 = vld [vmem:[#allocation5 + $0x310] sm:$0xff]  ;;  %v1034_v63 = vadd.f32 %v1033_v6, %v4200_v24  ;;  %v1053_v60 = vadd.f32 %v1052_v9, %v4210_v0 }
  0x98   :  { %v170_v48 = vld [vmem:[#allocation2 + $0x328] sm:$0xff]  ;;  %v456_v51 = vld [vmem:[#allocation5 + $0x318] sm:$0xff]  ;;  %v457_v28 = vld [vmem:[#allocation5 + $0x320] sm:$0xff]  ;;  %v4222_v7 = vadd.f32 %v453_v1, %v165_v8  ;;  %v4224_v35 = vadd.f32 %v454_v57, %v166_v42  ;;  %8536 = vst [vmem:[#allocation89_spill] sm:$0xff] %v4226_v41  ;;  %v4228_v21 = vadd.f32 %v455_v55, %v167_v26 }
  0x99   :  { %v458_v27 = vld [vmem:[#allocation5 + $0x328] sm:$0xff]  ;;  %v183_v59 = vld [vmem:[#allocation2 + $0x390] sm:$0xff]  ;;  %v184_v20 = vld [vmem:[#allocation2 + $0x398] sm:$0xff]  ;;  %v1035_v5 = vadd.f32 %v1034_v63, %v4208_v44  ;;  %v1054_v6 = vadd.f32 %v1053_v60, %v4214_v34  ;;  %v4232_v24 = vadd.f32 %v456_v51, %v168_v39  ;;  %v4236_v57 = vadd.f32 %v457_v28, %v169_v50 }
  0x9a   :  { %8534 = vst [vmem:[#allocation87_spill] sm:$0xff] %v4222_v7  ;;  %8535 = vst [vmem:[#allocation88_spill] sm:$0xff] %v4224_v35  ;;  %v1045_v9 = vadd.f32 %v4224_v35, %v4222_v7  ;;  %v185_v8 = vld [vmem:[#allocation2 + $0x3a0] sm:$0xff]  ;;  %v186_v1 = vld [vmem:[#allocation2 + $0x3a8] sm:$0xff]  ;;  %v4244_v35 = vadd.f32 %v458_v27, %v170_v48 }
  0x9b   :  { %8537 = vst [vmem:[#allocation90_spill] sm:$0xff] %v4228_v21  ;;  %8538 = vst [vmem:[#allocation91_spill] sm:$0xff] %v4232_v24  ;;  %v187_v42 = vld [vmem:[#allocation2 + $0x3b0] sm:$0xff]  ;;  %v472_v37 = vld [vmem:[#allocation5 + $0x398] sm:$0xff]  ;;  %1036 = vadd.xlane.f32.xlu0 %v1035_v5  ;;  %v1055_v55 = vadd.f32 %v1054_v6, %v4218_v3 }
  0x9c   :  { %8539 = vst [vmem:[#allocation92_spill] sm:$0xff] %v4236_v57  ;;  %v471_v4 = vld [vmem:[#allocation5 + $0x390] sm:$0xff]  ;;  %v473_v26 = vld [vmem:[#allocation5 + $0x3a0] sm:$0xff]  ;;  %v1046_v63 = vadd.f32 %v1045_v9, %v4228_v21  ;;  %v188_v0 = vld [vmem:[#allocation2 + $0x3b8] sm:$0xff]  ;;  %v4242_v34 = vadd.f32 %v472_v37, %v184_v20 }
  0x9d   :  { %v474_v60 = vld [vmem:[#allocation5 + $0x3a8] sm:$0xff]  ;;  %v475_v39 = vld [vmem:[#allocation5 + $0x3b0] sm:$0xff]  ;;  %v4240_v51 = vadd.f32 %v471_v4, %v183_v59  ;;  %8542 = vst [vmem:[#allocation95_spill] sm:$0xff] %v4244_v35  ;;  %v476_v7 = vld [vmem:[#allocation5 + $0x3b8] sm:$0xff]  ;;  %v4246_v50 = vadd.f32 %v473_v26, %v185_v8  ;;  %v1056_v5 = vadd.f32 %v1055_v55, %v4226_v41 }
  0x9e   :  { %8541 = vst [vmem:[#allocation94_spill] sm:$0xff] %v4242_v34  ;;  %v177_v28 = vld [vmem:[#allocation2 + $0x360] sm:$0xff]  ;;  %v178_v44 = vld [vmem:[#allocation2 + $0x368] sm:$0xff]  ;;  %v1047_v6 = vadd.f32 %v1046_v63, %v4232_v24  ;;  %v4250_v3 = vadd.f32 %v474_v60, %v186_v1  ;;  %v179_v59 = vld [vmem:[#allocation2 + $0x370] sm:$0xff]  ;;  %v4254_v37 = vadd.f32 %v475_v39, %v187_v42 }
  0x9f   :  { %8540 = vst [vmem:[#allocation93_spill] sm:$0xff] %v4240_v51  ;;  %8543 = vst [vmem:[#allocation96_spill] sm:$0xff] %v4246_v50  ;;  %v1066_v9 = vadd.f32 %v4242_v34, %v4240_v51  ;;  %v180_v4 = vld [vmem:[#allocation2 + $0x378] sm:$0xff]  ;;  %v181_v20 = vld [vmem:[#allocation2 + $0x380] sm:$0xff]  ;;  %1057 = vadd.xlane.f32.xlu1 %v1056_v5  ;;  %v4262_v34 = vadd.f32 %v476_v7, %v188_v0 }
  0xa0   :  { %8544 = vst [vmem:[#allocation97_spill] sm:$0xff] %v4250_v3  ;;  %8545 = vst [vmem:[#allocation98_spill] sm:$0xff] %v4254_v37  ;;  %v465_v48 = vld [vmem:[#allocation5 + $0x360] sm:$0xff]  ;;  %v466_v27 = vld [vmem:[#allocation5 + $0x368] sm:$0xff]  ;;  %v1048_v26 = vadd.f32 %v1047_v6, %v4236_v57 }
  0xa1   :  { %v467_v8 = vld [vmem:[#allocation5 + $0x370] sm:$0xff]  ;;  %v1067_v55 = vadd.f32 %v1066_v9, %v4246_v50  ;;  %v182_v41 = vld [vmem:[#allocation2 + $0x388] sm:$0xff]  ;;  %v468_v63 = vld [vmem:[#allocation5 + $0x378] sm:$0xff]  ;;  %v4258_v60 = vadd.f32 %v465_v48, %v177_v28  ;;  %v4260_v24 = vadd.f32 %v466_v27, %v178_v44  ;;  %8548 = vst [vmem:[#allocation101_spill] sm:$0xff] %v4262_v34 }
  0xa2   :  { %v469_v1 = vld [vmem:[#allocation5 + $0x380] sm:$0xff]  ;;  %v470_v51 = vld [vmem:[#allocation5 + $0x388] sm:$0xff]  ;;  %v4264_v42 = vadd.f32 %v467_v8, %v179_v59  ;;  %v195_v39 = vld [vmem:[#allocation2 + $0x3f0] sm:$0xff]  ;;  %v1049_v5 = vadd.f32 %v1048_v26, %v4244_v35  ;;  %v4268_v57 = vadd.f32 %v468_v63, %v180_v4 }
  0xa3   :  { %8546 = vst [vmem:[#allocation99_spill] sm:$0xff] %v4258_v60  ;;  %8547 = vst [vmem:[#allocation100_spill] sm:$0xff] %v4260_v24  ;;  %v196_v21 = vld [vmem:[#allocation2 + $0x3f8] sm:$0xff]  ;;  %v1068_v6 = vadd.f32 %v1067_v55, %v4250_v3  ;;  %v1059_v9 = vadd.f32 %v4260_v24, %v4258_v60  ;;  %v197_v28 = vld [vmem:[#allocation2 + $0x400] sm:$0xff]  ;;  %v4272_v27 = vadd.f32 %v469_v1, %v181_v20 }
  0xa4   :  { %8549 = vst [vmem:[#allocation102_spill] sm:$0xff] %v4264_v42  ;;  %8550 = vst [vmem:[#allocation103_spill] sm:$0xff] %v4268_v57  ;;  %v198_v48 = vld [vmem:[#allocation2 + $0x408] sm:$0xff]  ;;  %v199_v44 = vld [vmem:[#allocation2 + $0x410] sm:$0xff]  ;;  %1050 = vadd.xlane.f32.xlu0 %v1049_v5  ;;  %v4280_v24 = vadd.f32 %v470_v51, %v182_v41 }
  0xa5   :  { %8551 = vst [vmem:[#allocation104_spill] sm:$0xff] %v4272_v27  ;;  %v483_v0 = vld [vmem:[#allocation5 + $0x3f0] sm:$0xff]  ;;  %v484_v7 = vld [vmem:[#allocation5 + $0x3f8] sm:$0xff]  ;;  %v485_v59 = vld [vmem:[#allocation5 + $0x400] sm:$0xff]  ;;  %v1069_v8 = vadd.f32 %v1068_v6, %v4254_v37  ;;  %v1060_v26 = vadd.f32 %v1059_v9, %v4264_v42 }
  0xa6   :  { %v200_v50 = vld [vmem:[#allocation2 + $0x418] sm:$0xff]  ;;  %v486_v55 = vld [vmem:[#allocation5 + $0x408] sm:$0xff]  ;;  %v487_v4 = vld [vmem:[#allocation5 + $0x410] sm:$0xff]  ;;  %v4276_v63 = vadd.f32 %v483_v0, %v195_v39  ;;  %v4278_v3 = vadd.f32 %v484_v7, %v196_v21  ;;  %8554 = vst [vmem:[#allocation107_spill] sm:$0xff] %v4280_v24  ;;  %v4282_v20 = vadd.f32 %v485_v59, %v197_v28 }
  0xa7   :  { %v488_v60 = vld [vmem:[#allocation5 + $0x418] sm:$0xff]  ;;  %v189_v1 = vld [vmem:[#allocation2 + $0x3c0] sm:$0xff]  ;;  %v190_v35 = vld [vmem:[#allocation2 + $0x3c8] sm:$0xff]  ;;  %v1070_v5 = vadd.f32 %v1069_v8, %v4262_v34  ;;  %v1061_v6 = vadd.f32 %v1060_v26, %v4268_v57  ;;  %v4286_v37 = vadd.f32 %v486_v55, %v198_v48  ;;  %v4290_v7 = vadd.f32 %v487_v4, %v199_v44 }
  0xa8   :  { %8552 = vst [vmem:[#allocation105_spill] sm:$0xff] %v4276_v63  ;;  %8553 = vst [vmem:[#allocation106_spill] sm:$0xff] %v4278_v3  ;;  %v1080_v9 = vadd.f32 %v4278_v3, %v4276_v63  ;;  %v191_v39 = vld [vmem:[#allocation2 + $0x3d0] sm:$0xff]  ;;  %v192_v0 = vld [vmem:[#allocation2 + $0x3d8] sm:$0xff]  ;;  %v4298_v3 = vadd.f32 %v488_v60, %v200_v50 }
  0xa9   :  { %8555 = vst [vmem:[#allocation108_spill] sm:$0xff] %v4282_v20  ;;  %8556 = vst [vmem:[#allocation109_spill] sm:$0xff] %v4286_v37  ;;  %v193_v21 = vld [vmem:[#allocation2 + $0x3e0] sm:$0xff]  ;;  %v478_v51 = vld [vmem:[#allocation5 + $0x3c8] sm:$0xff]  ;;  %1071 = vadd.xlane.f32.xlu1 %v1070_v5  ;;  %v1062_v59 = vadd.f32 %v1061_v6, %v4272_v27 }
  0xaa   :  { %8557 = vst [vmem:[#allocation110_spill] sm:$0xff] %v4290_v7  ;;  %v477_v41 = vld [vmem:[#allocation5 + $0x3c0] sm:$0xff]  ;;  %v479_v28 = vld [vmem:[#allocation5 + $0x3d0] sm:$0xff]  ;;  %v1081_v8 = vadd.f32 %v1080_v9, %v4282_v20  ;;  %v194_v34 = vld [vmem:[#allocation2 + $0x3e8] sm:$0xff]  ;;  %v4296_v57 = vadd.f32 %v478_v51, %v190_v35 }
  0xab   :  { %v480_v26 = vld [vmem:[#allocation5 + $0x3d8] sm:$0xff]  ;;  %v481_v48 = vld [vmem:[#allocation5 + $0x3e0] sm:$0xff]  ;;  %v4294_v55 = vadd.f32 %v477_v41, %v189_v1  ;;  %8560 = vst [vmem:[#allocation113_spill] sm:$0xff] %v4298_v3  ;;  %v482_v63 = vld [vmem:[#allocation5 + $0x3e8] sm:$0xff]  ;;  %v4300_v44 = vadd.f32 %v479_v28, %v191_v39  ;;  %v1063_v5 = vadd.f32 %v1062_v59, %v4280_v24 }
  0xac   :  { %8559 = vst [vmem:[#allocation112_spill] sm:$0xff] %v4296_v57  ;;  %v207_v4 = vld [vmem:[#allocation2 + $0x450] sm:$0xff]  ;;  %v208_v42 = vld [vmem:[#allocation2 + $0x458] sm:$0xff]  ;;  %v1082_v6 = vadd.f32 %v1081_v8, %v4286_v37  ;;  %v4304_v27 = vadd.f32 %v480_v26, %v192_v0  ;;  %v209_v1 = vld [vmem:[#allocation2 + $0x460] sm:$0xff]  ;;  %v4308_v51 = vadd.f32 %v481_v48, %v193_v21 }
  0xad   :  { %8558 = vst [vmem:[#allocation111_spill] sm:$0xff] %v4294_v55  ;;  %8561 = vst [vmem:[#allocation114_spill] sm:$0xff] %v4300_v44  ;;  %v1073_v9 = vadd.f32 %v4296_v57, %v4294_v55  ;;  %v210_v41 = vld [vmem:[#allocation2 + $0x468] sm:$0xff]  ;;  %v211_v35 = vld [vmem:[#allocation2 + $0x470] sm:$0xff]  ;;  %1064 = vadd.xlane.f32.xlu0 %v1063_v5  ;;  %v4316_v57 = vadd.f32 %v482_v63, %v194_v34 }
  0xae   :  { %8562 = vst [vmem:[#allocation115_spill] sm:$0xff] %v4304_v27  ;;  %8563 = vst [vmem:[#allocation116_spill] sm:$0xff] %v4308_v51  ;;  %v495_v50 = vld [vmem:[#allocation5 + $0x450] sm:$0xff]  ;;  %v496_v60 = vld [vmem:[#allocation5 + $0x458] sm:$0xff]  ;;  %v1083_v28 = vadd.f32 %v1082_v6, %v4290_v7 }
  0xaf   :  { %v497_v39 = vld [vmem:[#allocation5 + $0x460] sm:$0xff]  ;;  %v1074_v59 = vadd.f32 %v1073_v9, %v4300_v44  ;;  %v212_v20 = vld [vmem:[#allocation2 + $0x478] sm:$0xff]  ;;  %v498_v8 = vld [vmem:[#allocation5 + $0x468] sm:$0xff]  ;;  %v4312_v26 = vadd.f32 %v495_v50, %v207_v4  ;;  %v4314_v37 = vadd.f32 %v496_v60, %v208_v42  ;;  %8566 = vst [vmem:[#allocation119_spill] sm:$0xff] %v4316_v57 }
  0xb0   :  { %v499_v0 = vld [vmem:[#allocation5 + $0x470] sm:$0xff]  ;;  %v500_v55 = vld [vmem:[#allocation5 + $0x478] sm:$0xff]  ;;  %v4318_v21 = vadd.f32 %v497_v39, %v209_v1  ;;  %v201_v48 = vld [vmem:[#allocation2 + $0x420] sm:$0xff]  ;;  %v1084_v5 = vadd.f32 %v1083_v28, %v4298_v3  ;;  %v4322_v7 = vadd.f32 %v498_v8, %v210_v41 }
  0xb1   :  { %8564 = vst [vmem:[#allocation117_spill] sm:$0xff] %v4312_v26  ;;  %8565 = vst [vmem:[#allocation118_spill] sm:$0xff] %v4314_v37  ;;  %v202_v24 = vld [vmem:[#allocation2 + $0x428] sm:$0xff]  ;;  %v1075_v6 = vadd.f32 %v1074_v59, %v4304_v27  ;;  %v1094_v9 = vadd.f32 %v4314_v37, %v4312_v26  ;;  %v203_v4 = vld [vmem:[#allocation2 + $0x430] sm:$0xff]  ;;  %v4326_v60 = vadd.f32 %v499_v0, %v211_v35 }
  0xb2   :  { %8567 = vst [vmem:[#allocation120_spill] sm:$0xff] %v4318_v21  ;;  %8568 = vst [vmem:[#allocation121_spill] sm:$0xff] %v4322_v7  ;;  %v204_v50 = vld [vmem:[#allocation2 + $0x438] sm:$0xff]  ;;  %v205_v42 = vld [vmem:[#allocation2 + $0x440] sm:$0xff]  ;;  %1085 = vadd.xlane.f32.xlu1 %v1084_v5  ;;  %v4334_v37 = vadd.f32 %v500_v55, %v212_v20 }
  0xb3   :  { %8569 = vst [vmem:[#allocation122_spill] sm:$0xff] %v4326_v60  ;;  %v489_v34 = vld [vmem:[#allocation5 + $0x420] sm:$0xff]  ;;  %v490_v63 = vld [vmem:[#allocation5 + $0x428] sm:$0xff]  ;;  %v491_v1 = vld [vmem:[#allocation5 + $0x430] sm:$0xff]  ;;  %v1076_v39 = vadd.f32 %v1075_v6, %v4308_v51  ;;  %v1095_v28 = vadd.f32 %v1094_v9, %v4318_v21 }
  0xb4   :  { %v206_v3 = vld [vmem:[#allocation2 + $0x448] sm:$0xff]  ;;  %v492_v59 = vld [vmem:[#allocation5 + $0x438] sm:$0xff]  ;;  %v493_v41 = vld [vmem:[#allocation5 + $0x440] sm:$0xff]  ;;  %v4330_v8 = vadd.f32 %v489_v34, %v201_v48  ;;  %v4332_v27 = vadd.f32 %v490_v63, %v202_v24  ;;  %8572 = vst [vmem:[#allocation125_spill] sm:$0xff] %v4334_v37  ;;  %v4336_v35 = vadd.f32 %v491_v1, %v203_v4 }
  0xb5   :  { %v494_v26 = vld [vmem:[#allocation5 + $0x448] sm:$0xff]  ;;  %v219_v0 = vld [vmem:[#allocation2 + $0x4b0] sm:$0xff]  ;;  %v220_v44 = vld [vmem:[#allocation2 + $0x4b8] sm:$0xff]  ;;  %v1077_v5 = vadd.f32 %v1076_v39, %v4316_v57  ;;  %v1096_v6 = vadd.f32 %v1095_v28, %v4322_v7  ;;  %v4340_v51 = vadd.f32 %v492_v59, %v204_v50  ;;  %v4344_v63 = vadd.f32 %v493_v41, %v205_v42 }
  0xb6   :  { %8570 = vst [vmem:[#allocation123_spill] sm:$0xff] %v4330_v8  ;;  %8571 = vst [vmem:[#allocation124_spill] sm:$0xff] %v4332_v27  ;;  %v1087_v9 = vadd.f32 %v4332_v27, %v4330_v8  ;;  %v221_v48 = vld [vmem:[#allocation2 + $0x4c0] sm:$0xff]  ;;  %v222_v34 = vld [vmem:[#allocation2 + $0x4c8] sm:$0xff]  ;;  %v4352_v27 = vadd.f32 %v494_v26, %v206_v3 }
  0xb7   :  { %8573 = vst [vmem:[#allocation126_spill] sm:$0xff] %v4336_v35  ;;  %8574 = vst [vmem:[#allocation127_spill] sm:$0xff] %v4340_v51  ;;  %v223_v24 = vld [vmem:[#allocation2 + $0x4d0] sm:$0xff]  ;;  %v508_v55 = vld [vmem:[#allocation5 + $0x4b8] sm:$0xff]  ;;  %1078 = vadd.xlane.f32.xlu0 %v1077_v5  ;;  %v1097_v1 = vadd.f32 %v1096_v6, %v4326_v60 }
  0xb8   :  { %8575 = vst [vmem:[#allocation128_spill] sm:$0xff] %v4344_v63  ;;  %v507_v20 = vld [vmem:[#allocation5 + $0x4b0] sm:$0xff]  ;;  %v509_v4 = vld [vmem:[#allocation5 + $0x4c0] sm:$0xff]  ;;  %v1088_v39 = vadd.f32 %v1087_v9, %v4336_v35  ;;  %v224_v21 = vld [vmem:[#allocation2 + $0x4d8] sm:$0xff]  ;;  %v4350_v7 = vadd.f32 %v508_v55, %v220_v44 }
  0xb9   :  { %v510_v28 = vld [vmem:[#allocation5 + $0x4c8] sm:$0xff]  ;;  %v511_v50 = vld [vmem:[#allocation5 + $0x4d0] sm:$0xff]  ;;  %v4348_v59 = vadd.f32 %v507_v20, %v219_v0  ;;  %8578 = vst [vmem:[#allocation131_spill] sm:$0xff] %v4352_v27  ;;  %v512_v8 = vld [vmem:[#allocation5 + $0x4d8] sm:$0xff]  ;;  %v4354_v42 = vadd.f32 %v509_v4, %v221_v48  ;;  %v1098_v5 = vadd.f32 %v1097_v1, %v4334_v37 }
  0xba   :  { %8577 = vst [vmem:[#allocation130_spill] sm:$0xff] %v4350_v7  ;;  %v213_v41 = vld [vmem:[#allocation2 + $0x480] sm:$0xff]  ;;  %v214_v57 = vld [vmem:[#allocation2 + $0x488] sm:$0xff]  ;;  %v1089_v6 = vadd.f32 %v1088_v39, %v4340_v51  ;;  %v4358_v60 = vadd.f32 %v510_v28, %v222_v34  ;;  %v215_v0 = vld [vmem:[#allocation2 + $0x490] sm:$0xff]  ;;  %v4362_v55 = vadd.f32 %v511_v50, %v223_v24 }
  0xbb   :  { %8576 = vst [vmem:[#allocation129_spill] sm:$0xff] %v4348_v59  ;;  %8579 = vst [vmem:[#allocation132_spill] sm:$0xff] %v4354_v42  ;;  %v1108_v9 = vadd.f32 %v4350_v7, %v4348_v59  ;;  %v216_v20 = vld [vmem:[#allocation2 + $0x498] sm:$0xff]  ;;  %v217_v44 = vld [vmem:[#allocation2 + $0x4a0] sm:$0xff]  ;;  %1099 = vadd.xlane.f32.xlu1 %v1098_v5  ;;  %v4370_v7 = vadd.f32 %v512_v8, %v224_v21 }
  0xbc   :  { %8580 = vst [vmem:[#allocation133_spill] sm:$0xff] %v4358_v60  ;;  %8581 = vst [vmem:[#allocation134_spill] sm:$0xff] %v4362_v55  ;;  %v501_v3 = vld [vmem:[#allocation5 + $0x480] sm:$0xff]  ;;  %v502_v26 = vld [vmem:[#allocation5 + $0x488] sm:$0xff]  ;;  %v1090_v4 = vadd.f32 %v1089_v6, %v4344_v63 }
  0xbd   :  { %v503_v48 = vld [vmem:[#allocation5 + $0x490] sm:$0xff]  ;;  %v1109_v1 = vadd.f32 %v1108_v9, %v4354_v42  ;;  %v218_v37 = vld [vmem:[#allocation2 + $0x4a8] sm:$0xff]  ;;  %v504_v39 = vld [vmem:[#allocation5 + $0x498] sm:$0xff]  ;;  %v4366_v28 = vadd.f32 %v501_v3, %v213_v41  ;;  %v4368_v51 = vadd.f32 %v502_v26, %v214_v57  ;;  %8584 = vst [vmem:[#allocation137_spill] sm:$0xff] %v4370_v7 }
  0xbe   :  { %v505_v34 = vld [vmem:[#allocation5 + $0x4a0] sm:$0xff]  ;;  %v506_v59 = vld [vmem:[#allocation5 + $0x4a8] sm:$0xff]  ;;  %v4372_v24 = vadd.f32 %v503_v48, %v215_v0  ;;  %v231_v50 = vld [vmem:[#allocation2 + $0x510] sm:$0xff]  ;;  %v1091_v5 = vadd.f32 %v1090_v4, %v4352_v27  ;;  %v4376_v63 = vadd.f32 %v504_v39, %v216_v20 }
  0xbf   :  { %8582 = vst [vmem:[#allocation135_spill] sm:$0xff] %v4366_v28  ;;  %8583 = vst [vmem:[#allocation136_spill] sm:$0xff] %v4368_v51  ;;  %v232_v35 = vld [vmem:[#allocation2 + $0x518] sm:$0xff]  ;;  %v1110_v6 = vadd.f32 %v1109_v1, %v4358_v60  ;;  %v1101_v9 = vadd.f32 %v4368_v51, %v4366_v28  ;;  %v233_v41 = vld [vmem:[#allocation2 + $0x520] sm:$0xff]  ;;  %v4380_v26 = vadd.f32 %v505_v34, %v217_v44 }
  0xc0   :  { %8585 = vst [vmem:[#allocation138_spill] sm:$0xff] %v4372_v24  ;;  %8586 = vst [vmem:[#allocation139_spill] sm:$0xff] %v4376_v63  ;;  %v234_v3 = vld [vmem:[#allocation2 + $0x528] sm:$0xff]  ;;  %v235_v57 = vld [vmem:[#allocation2 + $0x530] sm:$0xff]  ;;  %1092 = vadd.xlane.f32.xlu0 %v1091_v5  ;;  %v4388_v51 = vadd.f32 %v506_v59, %v218_v37 }
  0xc1   :  { %8587 = vst [vmem:[#allocation140_spill] sm:$0xff] %v4380_v26  ;;  %v519_v21 = vld [vmem:[#allocation5 + $0x510] sm:$0xff]  ;;  %v520_v8 = vld [vmem:[#allocation5 + $0x518] sm:$0xff]  ;;  %v521_v0 = vld [vmem:[#allocation5 + $0x520] sm:$0xff]  ;;  %v1111_v48 = vadd.f32 %v1110_v6, %v4362_v55  ;;  %v1102_v4 = vadd.f32 %v1101_v9, %v4372_v24 }
  0xc2   :  { %v236_v42 = vld [vmem:[#allocation2 + $0x538] sm:$0xff]  ;;  %v522_v1 = vld [vmem:[#allocation5 + $0x528] sm:$0xff]  ;;  %v523_v20 = vld [vmem:[#allocation5 + $0x530] sm:$0xff]  ;;  %v4384_v39 = vadd.f32 %v519_v21, %v231_v50  ;;  %v4386_v60 = vadd.f32 %v520_v8, %v232_v35  ;;  %8590 = vst [vmem:[#allocation143_spill] sm:$0xff] %v4388_v51  ;;  %v4390_v44 = vadd.f32 %v521_v0, %v233_v41 }
  0xc3   :  { %v524_v28 = vld [vmem:[#allocation5 + $0x538] sm:$0xff]  ;;  %v225_v34 = vld [vmem:[#allocation2 + $0x4e0] sm:$0xff]  ;;  %v226_v27 = vld [vmem:[#allocation2 + $0x4e8] sm:$0xff]  ;;  %v1112_v5 = vadd.f32 %v1111_v48, %v4370_v7  ;;  %v1103_v6 = vadd.f32 %v1102_v4, %v4376_v63  ;;  %v4394_v55 = vadd.f32 %v522_v1, %v234_v3  ;;  %v4398_v8 = vadd.f32 %v523_v20, %v235_v57 }
  0xc4   :  { %8588 = vst [vmem:[#allocation141_spill] sm:$0xff] %v4384_v39  ;;  %8589 = vst [vmem:[#allocation142_spill] sm:$0xff] %v4386_v60  ;;  %v1122_v9 = vadd.f32 %v4386_v60, %v4384_v39  ;;  %v227_v50 = vld [vmem:[#allocation2 + $0x4f0] sm:$0xff]  ;;  %v228_v21 = vld [vmem:[#allocation2 + $0x4f8] sm:$0xff]  ;;  %v4406_v60 = vadd.f32 %v524_v28, %v236_v42 }
  0xc5   :  { %8591 = vst [vmem:[#allocation144_spill] sm:$0xff] %v4390_v44  ;;  %8592 = vst [vmem:[#allocation145_spill] sm:$0xff] %v4394_v55  ;;  %v229_v35 = vld [vmem:[#allocation2 + $0x500] sm:$0xff]  ;;  %v514_v59 = vld [vmem:[#allocation5 + $0x4e8] sm:$0xff]  ;;  %1113 = vadd.xlane.f32.xlu1 %v1112_v5  ;;  %v1104_v0 = vadd.f32 %v1103_v6, %v4380_v26 }
  0xc6   :  { %8593 = vst [vmem:[#allocation146_spill] sm:$0xff] %v4398_v8  ;;  %v513_v37 = vld [vmem:[#allocation5 + $0x4e0] sm:$0xff]  ;;  %v515_v41 = vld [vmem:[#allocation5 + $0x4f0] sm:$0xff]  ;;  %v1123_v48 = vadd.f32 %v1122_v9, %v4390_v44  ;;  %v230_v7 = vld [vmem:[#allocation2 + $0x508] sm:$0xff]  ;;  %v4404_v63 = vadd.f32 %v514_v59, %v226_v27 }
  0xc7   :  { %v516_v4 = vld [vmem:[#allocation5 + $0x4f8] sm:$0xff]  ;;  %v517_v3 = vld [vmem:[#allocation5 + $0x500] sm:$0xff]  ;;  %v4402_v1 = vadd.f32 %v513_v37, %v225_v34  ;;  %8596 = vst [vmem:[#allocation149_spill] sm:$0xff] %v4406_v60  ;;  %v518_v39 = vld [vmem:[#allocation5 + $0x508] sm:$0xff]  ;;  %v4408_v57 = vadd.f32 %v515_v41, %v227_v50  ;;  %v1105_v5 = vadd.f32 %v1104_v0, %v4388_v51 }
  0xc8   :  { %8595 = vst [vmem:[#allocation148_spill] sm:$0xff] %v4404_v63  ;;  %v243_v20 = vld [vmem:[#allocation2 + $0x570] sm:$0xff]  ;;  %v244_v24 = vld [vmem:[#allocation2 + $0x578] sm:$0xff]  ;;  %v1124_v6 = vadd.f32 %v1123_v48, %v4394_v55  ;;  %v4412_v26 = vadd.f32 %v516_v4, %v228_v21  ;;  %v245_v34 = vld [vmem:[#allocation2 + $0x580] sm:$0xff]  ;;  %v4416_v59 = vadd.f32 %v517_v3, %v229_v35 }
  0xc9   :  { %8594 = vst [vmem:[#allocation147_spill] sm:$0xff] %v4402_v1  ;;  %8597 = vst [vmem:[#allocation150_spill] sm:$0xff] %v4408_v57  ;;  %v1115_v9 = vadd.f32 %v4404_v63, %v4402_v1  ;;  %v246_v37 = vld [vmem:[#allocation2 + $0x588] sm:$0xff]  ;;  %v247_v27 = vld [vmem:[#allocation2 + $0x590] sm:$0xff]  ;;  %1106 = vadd.xlane.f32.xlu0 %v1105_v5  ;;  %v4424_v63 = vadd.f32 %v518_v39, %v230_v7 }
  0xca   :  { %8598 = vst [vmem:[#allocation151_spill] sm:$0xff] %v4412_v26  ;;  %8599 = vst [vmem:[#allocation152_spill] sm:$0xff] %v4416_v59  ;;  %v531_v42 = vld [vmem:[#allocation5 + $0x570] sm:$0xff]  ;;  %v532_v28 = vld [vmem:[#allocation5 + $0x578] sm:$0xff]  ;;  %v1125_v41 = vadd.f32 %v1124_v6, %v4398_v8 }
  0xcb   :  { %v533_v50 = vld [vmem:[#allocation5 + $0x580] sm:$0xff]  ;;  %v1116_v0 = vadd.f32 %v1115_v9, %v4408_v57  ;;  %v248_v44 = vld [vmem:[#allocation2 + $0x598] sm:$0xff]  ;;  %v534_v48 = vld [vmem:[#allocation5 + $0x588] sm:$0xff]  ;;  %v4420_v4 = vadd.f32 %v531_v42, %v243_v20  ;;  %v4422_v55 = vadd.f32 %v532_v28, %v244_v24  ;;  %8602 = vst [vmem:[#allocation155_spill] sm:$0xff] %v4424_v63 }
  0xcc   :  { %v535_v21 = vld [vmem:[#allocation5 + $0x590] sm:$0xff]  ;;  %v536_v1 = vld [vmem:[#allocation5 + $0x598] sm:$0xff]  ;;  %v4426_v35 = vadd.f32 %v533_v50, %v245_v34  ;;  %v237_v3 = vld [vmem:[#allocation2 + $0x540] sm:$0xff]  ;;  %v1126_v5 = vadd.f32 %v1125_v41, %v4406_v60  ;;  %v4430_v8 = vadd.f32 %v534_v48, %v246_v37 }
  0xcd   :  { %8600 = vst [vmem:[#allocation153_spill] sm:$0xff] %v4420_v4  ;;  %8601 = vst [vmem:[#allocation154_spill] sm:$0xff] %v4422_v55  ;;  %v238_v51 = vld [vmem:[#allocation2 + $0x548] sm:$0xff]  ;;  %v1117_v6 = vadd.f32 %v1116_v0, %v4412_v26  ;;  %v1136_v9 = vadd.f32 %v4422_v55, %v4420_v4  ;;  %v239_v20 = vld [vmem:[#allocation2 + $0x550] sm:$0xff]  ;;  %v4434_v28 = vadd.f32 %v535_v21, %v247_v27 }
  0xce   :  { %8603 = vst [vmem:[#allocation156_spill] sm:$0xff] %v4426_v35  ;;  %8604 = vst [vmem:[#allocation157_spill] sm:$0xff] %v4430_v8  ;;  %v240_v42 = vld [vmem:[#allocation2 + $0x558] sm:$0xff]  ;;  %v241_v24 = vld [vmem:[#allocation2 + $0x560] sm:$0xff]  ;;  %1127 = vadd.xlane.f32.xlu1 %v1126_v5  ;;  %v4442_v55 = vadd.f32 %v536_v1, %v248_v44 }
  0xcf   :  { %8605 = vst [vmem:[#allocation158_spill] sm:$0xff] %v4434_v28  ;;  %v525_v7 = vld [vmem:[#allocation5 + $0x540] sm:$0xff]  ;;  %v526_v39 = vld [vmem:[#allocation5 + $0x548] sm:$0xff]  ;;  %v527_v34 = vld [vmem:[#allocation5 + $0x550] sm:$0xff]  ;;  %v1118_v50 = vadd.f32 %v1117_v6, %v4416_v59  ;;  %v1137_v41 = vadd.f32 %v1136_v9, %v4426_v35 }
  0xd0   :  { %v242_v60 = vld [vmem:[#allocation2 + $0x568] sm:$0xff]  ;;  %v528_v0 = vld [vmem:[#allocation5 + $0x558] sm:$0xff]  ;;  %v529_v37 = vld [vmem:[#allocation5 + $0x560] sm:$0xff]  ;;  %v4438_v48 = vadd.f32 %v525_v7, %v237_v3  ;;  %v4440_v26 = vadd.f32 %v526_v39, %v238_v51  ;;  %8608 = vst [vmem:[#allocation161_spill] sm:$0xff] %v4442_v55  ;;  %v4444_v27 = vadd.f32 %v527_v34, %v239_v20 }
  0xd1   :  { %v530_v4 = vld [vmem:[#allocation5 + $0x568] sm:$0xff]  ;;  %v255_v21 = vld [vmem:[#allocation2 + $0x5d0] sm:$0xff]  ;;  %v256_v57 = vld [vmem:[#allocation2 + $0x5d8] sm:$0xff]  ;;  %v1119_v5 = vadd.f32 %v1118_v50, %v4424_v63  ;;  %v1138_v6 = vadd.f32 %v1137_v41, %v4430_v8  ;;  %v4448_v59 = vadd.f32 %v528_v0, %v240_v42  ;;  %v4452_v39 = vadd.f32 %v529_v37, %v241_v24 }
  0xd2   :  { %8606 = vst [vmem:[#allocation159_spill] sm:$0xff] %v4438_v48  ;;  %8607 = vst [vmem:[#allocation160_spill] sm:$0xff] %v4440_v26  ;;  %v1129_v9 = vadd.f32 %v4440_v26, %v4438_v48  ;;  %v257_v3 = vld [vmem:[#allocation2 + $0x5e0] sm:$0xff]  ;;  %v258_v7 = vld [vmem:[#allocation2 + $0x5e8] sm:$0xff]  ;;  %v4460_v26 = vadd.f32 %v530_v4, %v242_v60 }
  0xd3   :  { %8609 = vst [vmem:[#allocation162_spill] sm:$0xff] %v4444_v27  ;;  %8610 = vst [vmem:[#allocation163_spill] sm:$0xff] %v4448_v59  ;;  %v259_v51 = vld [vmem:[#allocation2 + $0x5f0] sm:$0xff]  ;;  %v544_v1 = vld [vmem:[#allocation5 + $0x5d8] sm:$0xff]  ;;  %1120 = vadd.xlane.f32.xlu0 %v1119_v5  ;;  %v1139_v34 = vadd.f32 %v1138_v6, %v4434_v28 }
  0xd4   :  { %8611 = vst [vmem:[#allocation164_spill] sm:$0xff] %v4452_v39  ;;  %v543_v44 = vld [vmem:[#allocation5 + $0x5d0] sm:$0xff]  ;;  %v545_v20 = vld [vmem:[#allocation5 + $0x5e0] sm:$0xff]  ;;  %v1130_v50 = vadd.f32 %v1129_v9, %v4444_v27  ;;  %v260_v35 = vld [vmem:[#allocation2 + $0x5f8] sm:$0xff]  ;;  %v4458_v8 = vadd.f32 %v544_v1, %v256_v57 }
  0xd5   :  { %v546_v41 = vld [vmem:[#allocation5 + $0x5e8] sm:$0xff]  ;;  %v547_v42 = vld [vmem:[#allocation5 + $0x5f0] sm:$0xff]  ;;  %v4456_v0 = vadd.f32 %v543_v44, %v255_v21  ;;  %8614 = vst [vmem:[#allocation167_spill] sm:$0xff] %v4460_v26  ;;  %v548_v48 = vld [vmem:[#allocation5 + $0x5f8] sm:$0xff]  ;;  %v4462_v24 = vadd.f32 %v545_v20, %v257_v3  ;;  %v1140_v5 = vadd.f32 %v1139_v34, %v4442_v55 }
  0xd6   :  { %8613 = vst [vmem:[#allocation166_spill] sm:$0xff] %v4458_v8  ;;  %v249_v37 = vld [vmem:[#allocation2 + $0x5a0] sm:$0xff]  ;;  %v250_v63 = vld [vmem:[#allocation2 + $0x5a8] sm:$0xff]  ;;  %v1131_v6 = vadd.f32 %v1130_v50, %v4448_v59  ;;  %v4466_v28 = vadd.f32 %v546_v41, %v258_v7  ;;  %v251_v21 = vld [vmem:[#allocation2 + $0x5b0] sm:$0xff]  ;;  %v4470_v1 = vadd.f32 %v547_v42, %v259_v51 }
  0xd7   :  { %8612 = vst [vmem:[#allocation165_spill] sm:$0xff] %v4456_v0  ;;  %8615 = vst [vmem:[#allocation168_spill] sm:$0xff] %v4462_v24  ;;  %v1150_v9 = vadd.f32 %v4458_v8, %v4456_v0  ;;  %v252_v44 = vld [vmem:[#allocation2 + $0x5b8] sm:$0xff]  ;;  %v253_v57 = vld [vmem:[#allocation2 + $0x5c0] sm:$0xff]  ;;  %1141 = vadd.xlane.f32.xlu1 %v1140_v5  ;;  %v4478_v8 = vadd.f32 %v548_v48, %v260_v35 }
  0xd8   :  { %8616 = vst [vmem:[#allocation169_spill] sm:$0xff] %v4466_v28  ;;  %8617 = vst [vmem:[#allocation170_spill] sm:$0xff] %v4470_v1  ;;  %v537_v60 = vld [vmem:[#allocation5 + $0x5a0] sm:$0xff]  ;;  %v538_v4 = vld [vmem:[#allocation5 + $0x5a8] sm:$0xff]  ;;  %v1132_v20 = vadd.f32 %v1131_v6, %v4452_v39 }
  0xd9   :  { %v539_v3 = vld [vmem:[#allocation5 + $0x5b0] sm:$0xff]  ;;  %v1151_v34 = vadd.f32 %v1150_v9, %v4462_v24  ;;  %v254_v55 = vld [vmem:[#allocation2 + $0x5c8] sm:$0xff]  ;;  %v540_v50 = vld [vmem:[#allocation5 + $0x5b8] sm:$0xff]  ;;  %v4474_v41 = vadd.f32 %v537_v60, %v249_v37  ;;  %v4476_v59 = vadd.f32 %v538_v4, %v250_v63  ;;  %8620 = vst [vmem:[#allocation173_spill] sm:$0xff] %v4478_v8 }
  0xda   :  { %v541_v7 = vld [vmem:[#allocation5 + $0x5c0] sm:$0xff]  ;;  %v542_v0 = vld [vmem:[#allocation5 + $0x5c8] sm:$0xff]  ;;  %v4480_v51 = vadd.f32 %v539_v3, %v251_v21  ;;  %v267_v42 = vld [vmem:[#allocation2 + $0x630] sm:$0xff]  ;;  %v1133_v5 = vadd.f32 %v1132_v20, %v4460_v26  ;;  %v4484_v39 = vadd.f32 %v540_v50, %v252_v44 }
  0xdb   :  { %8618 = vst [vmem:[#allocation171_spill] sm:$0xff] %v4474_v41  ;;  %8619 = vst [vmem:[#allocation172_spill] sm:$0xff] %v4476_v59  ;;  %v268_v27 = vld [vmem:[#allocation2 + $0x638] sm:$0xff]  ;;  %v1152_v6 = vadd.f32 %v1151_v34, %v4466_v28  ;;  %v1143_v9 = vadd.f32 %v4476_v59, %v4474_v41  ;;  %v269_v37 = vld [vmem:[#allocation2 + $0x640] sm:$0xff]  ;;  %v4488_v4 = vadd.f32 %v541_v7, %v253_v57 }
  0xdc   :  { %8621 = vst [vmem:[#allocation174_spill] sm:$0xff] %v4480_v51  ;;  %8622 = vst [vmem:[#allocation175_spill] sm:$0xff] %v4484_v39  ;;  %v270_v60 = vld [vmem:[#allocation2 + $0x648] sm:$0xff]  ;;  %v271_v63 = vld [vmem:[#allocation2 + $0x650] sm:$0xff]  ;;  %1134 = vadd.xlane.f32.xlu0 %v1133_v5  ;;  %v4496_v59 = vadd.f32 %v542_v0, %v254_v55 }
  0xdd   :  { %8623 = vst [vmem:[#allocation176_spill] sm:$0xff] %v4488_v4  ;;  %v555_v35 = vld [vmem:[#allocation5 + $0x630] sm:$0xff]  ;;  %v556_v48 = vld [vmem:[#allocation5 + $0x638] sm:$0xff]  ;;  %v557_v21 = vld [vmem:[#allocation5 + $0x640] sm:$0xff]  ;;  %v1153_v3 = vadd.f32 %v1152_v6, %v4470_v1  ;;  %v1144_v20 = vadd.f32 %v1143_v9, %v4480_v51 }
  0xde   :  { %v272_v24 = vld [vmem:[#allocation2 + $0x658] sm:$0xff]  ;;  %v558_v34 = vld [vmem:[#allocation5 + $0x648] sm:$0xff]  ;;  %v559_v44 = vld [vmem:[#allocation5 + $0x650] sm:$0xff]  ;;  %v4492_v50 = vadd.f32 %v555_v35, %v267_v42  ;;  %v4494_v28 = vadd.f32 %v556_v48, %v268_v27  ;;  %8626 = vst [vmem:[#allocation179_spill] sm:$0xff] %v4496_v59  ;;  %v4498_v57 = vadd.f32 %v557_v21, %v269_v37 }
  0xdf   :  { %v560_v41 = vld [vmem:[#allocation5 + $0x658] sm:$0xff]  ;;  %v261_v7 = vld [vmem:[#allocation2 + $0x600] sm:$0xff]  ;;  %v262_v26 = vld [vmem:[#allocation2 + $0x608] sm:$0xff]  ;;  %v1154_v5 = vadd.f32 %v1153_v3, %v4478_v8  ;;  %v1145_v6 = vadd.f32 %v1144_v20, %v4484_v39  ;;  %v4502_v1 = vadd.f32 %v558_v34, %v270_v60  ;;  %v4506_v48 = vadd.f32 %v559_v44, %v271_v63 }
  0xe0   :  { %8624 = vst [vmem:[#allocation177_spill] sm:$0xff] %v4492_v50  ;;  %8625 = vst [vmem:[#allocation178_spill] sm:$0xff] %v4494_v28  ;;  %v1164_v9 = vadd.f32 %v4494_v28, %v4492_v50  ;;  %v263_v42 = vld [vmem:[#allocation2 + $0x610] sm:$0xff]  ;;  %v264_v35 = vld [vmem:[#allocation2 + $0x618] sm:$0xff]  ;;  %v4514_v28 = vadd.f32 %v560_v41, %v272_v24 }
  0xe1   :  { %8627 = vst [vmem:[#allocation180_spill] sm:$0xff] %v4498_v57  ;;  %8628 = vst [vmem:[#allocation181_spill] sm:$0xff] %v4502_v1  ;;  %v265_v27 = vld [vmem:[#allocation2 + $0x620] sm:$0xff]  ;;  %v550_v0 = vld [vmem:[#allocation5 + $0x608] sm:$0xff]  ;;  %1155 = vadd.xlane.f32.xlu1 %v1154_v5  ;;  %v1146_v21 = vadd.f32 %v1145_v6, %v4488_v4 }
  0xe2   :  { %8629 = vst [vmem:[#allocation182_spill] sm:$0xff] %v4506_v48  ;;  %v549_v55 = vld [vmem:[#allocation5 + $0x600] sm:$0xff]  ;;  %v551_v37 = vld [vmem:[#allocation5 + $0x610] sm:$0xff]  ;;  %v1165_v3 = vadd.f32 %v1164_v9, %v4498_v57  ;;  %v266_v8 = vld [vmem:[#allocation2 + $0x628] sm:$0xff]  ;;  %v4512_v39 = vadd.f32 %v550_v0, %v262_v26 }
  0xe3   :  { %v552_v20 = vld [vmem:[#allocation5 + $0x618] sm:$0xff]  ;;  %v553_v60 = vld [vmem:[#allocation5 + $0x620] sm:$0xff]  ;;  %v4510_v34 = vadd.f32 %v549_v55, %v261_v7  ;;  %8632 = vst [vmem:[#allocation185_spill] sm:$0xff] %v4514_v28  ;;  %v554_v50 = vld [vmem:[#allocation5 + $0x628] sm:$0xff]  ;;  %v4516_v63 = vadd.f32 %v551_v37, %v263_v42  ;;  %v1147_v5 = vadd.f32 %v1146_v21, %v4496_v59 }
  0xe4   :  { %8631 = vst [vmem:[#allocation184_spill] sm:$0xff] %v4512_v39  ;;  %v279_v44 = vld [vmem:[#allocation2 + $0x690] sm:$0xff]  ;;  %v280_v51 = vld [vmem:[#allocation2 + $0x698] sm:$0xff]  ;;  %v1166_v6 = vadd.f32 %v1165_v3, %v4502_v1  ;;  %v4520_v4 = vadd.f32 %v552_v20, %v264_v35  ;;  %v281_v7 = vld [vmem:[#allocation2 + $0x6a0] sm:$0xff]  ;;  %v4524_v0 = vadd.f32 %v553_v60, %v265_v27 }
  0xe5   :  { %8630 = vst [vmem:[#allocation183_spill] sm:$0xff] %v4510_v34  ;;  %8633 = vst [vmem:[#allocation186_spill] sm:$0xff] %v4516_v63  ;;  %v1157_v9 = vadd.f32 %v4512_v39, %v4510_v34  ;;  %v282_v55 = vld [vmem:[#allocation2 + $0x6a8] sm:$0xff]  ;;  %v283_v26 = vld [vmem:[#allocation2 + $0x6b0] sm:$0xff]  ;;  %1148 = vadd.xlane.f32.xlu0 %v1147_v5  ;;  %v4532_v39 = vadd.f32 %v554_v50, %v266_v8 }
  0xe6   :  { %8634 = vst [vmem:[#allocation187_spill] sm:$0xff] %v4520_v4  ;;  %8635 = vst [vmem:[#allocation188_spill] sm:$0xff] %v4524_v0  ;;  %v567_v24 = vld [vmem:[#allocation5 + $0x690] sm:$0xff]  ;;  %v568_v41 = vld [vmem:[#allocation5 + $0x698] sm:$0xff]  ;;  %v1167_v37 = vadd.f32 %v1166_v6, %v4506_v48 }
  0xe7   :  { %v569_v42 = vld [vmem:[#allocation5 + $0x6a0] sm:$0xff]  ;;  %v1158_v21 = vadd.f32 %v1157_v9, %v4516_v63  ;;  %v284_v57 = vld [vmem:[#allocation2 + $0x6b8] sm:$0xff]  ;;  %v570_v3 = vld [vmem:[#allocation5 + $0x6a8] sm:$0xff]  ;;  %v4528_v20 = vadd.f32 %v567_v24, %v279_v44  ;;  %v4530_v1 = vadd.f32 %v568_v41, %v280_v51  ;;  %8638 = vst [vmem:[#allocation191_spill] sm:$0xff] %v4532_v39 }
  0xe8   :  { %v571_v35 = vld [vmem:[#allocation5 + $0x6b0] sm:$0xff]  ;;  %v572_v34 = vld [vmem:[#allocation5 + $0x6b8] sm:$0xff]  ;;  %v4534_v27 = vadd.f32 %v569_v42, %v281_v7  ;;  %v273_v60 = vld [vmem:[#allocation2 + $0x660] sm:$0xff]  ;;  %v1168_v5 = vadd.f32 %v1167_v37, %v4514_v28  ;;  %v4538_v48 = vadd.f32 %v570_v3, %v282_v55 }
  0xe9   :  { %8636 = vst [vmem:[#allocation189_spill] sm:$0xff] %v4528_v20  ;;  %8637 = vst [vmem:[#allocation190_spill] sm:$0xff] %v4530_v1  ;;  %v274_v59 = vld [vmem:[#allocation2 + $0x668] sm:$0xff]  ;;  %v1159_v6 = vadd.f32 %v1158_v21, %v4520_v4  ;;  %v1178_v9 = vadd.f32 %v4530_v1, %v4528_v20  ;;  %v275_v44 = vld [vmem:[#allocation2 + $0x670] sm:$0xff]  ;;  %v4542_v41 = vadd.f32 %v571_v35, %v283_v26  ;;  %v939_v46 = vpop.xlane.xlu0 %938 }
  0xea   :  { %8639 = vst [vmem:[#allocation192_spill] sm:$0xff] %v4534_v27  ;;  %8640 = vst [vmem:[#allocation193_spill] sm:$0xff] %v4538_v48  ;;  %v276_v24 = vld [vmem:[#allocation2 + $0x678] sm:$0xff]  ;;  %v277_v51 = vld [vmem:[#allocation2 + $0x680] sm:$0xff]  ;;  %1169 = vadd.xlane.f32.xlu1 %v1168_v5  ;;  %v4550_v1 = vadd.f32 %v572_v34, %v284_v57 }
  0xeb   :  { %8641 = vst [vmem:[#allocation194_spill] sm:$0xff] %v4542_v41  ;;  %v561_v8 = vld [vmem:[#allocation5 + $0x660] sm:$0xff]  ;;  %v562_v50 = vld [vmem:[#allocation5 + $0x668] sm:$0xff]  ;;  %v563_v7 = vld [vmem:[#allocation5 + $0x670] sm:$0xff]  ;;  %v1160_v42 = vadd.f32 %v1159_v6, %v4524_v0  ;;  %v1179_v37 = vadd.f32 %v1178_v9, %v4534_v27 }
  0xec   :  { %v278_v28 = vld [vmem:[#allocation2 + $0x688] sm:$0xff]  ;;  %v564_v21 = vld [vmem:[#allocation5 + $0x678] sm:$0xff]  ;;  %v565_v55 = vld [vmem:[#allocation5 + $0x680] sm:$0xff]  ;;  %v4546_v3 = vadd.f32 %v561_v8, %v273_v60  ;;  %v4548_v4 = vadd.f32 %v562_v50, %v274_v59  ;;  %8644 = vst [vmem:[#allocation197_spill] sm:$0xff] %v4550_v1  ;;  %v4552_v26 = vadd.f32 %v563_v7, %v275_v44 }
  0xed   :  { %v566_v20 = vld [vmem:[#allocation5 + $0x688] sm:$0xff]  ;;  %v291_v35 = vld [vmem:[#allocation2 + $0x6f0] sm:$0xff]  ;;  %v292_v63 = vld [vmem:[#allocation2 + $0x6f8] sm:$0xff]  ;;  %v1161_v5 = vadd.f32 %v1160_v42, %v4532_v39  ;;  %v1180_v6 = vadd.f32 %v1179_v37, %v4538_v48  ;;  %v4556_v0 = vadd.f32 %v564_v21, %v276_v24  ;;  %v4560_v50 = vadd.f32 %v565_v55, %v277_v51 }
  0xee   :  { %8642 = vst [vmem:[#allocation195_spill] sm:$0xff] %v4546_v3  ;;  %8643 = vst [vmem:[#allocation196_spill] sm:$0xff] %v4548_v4  ;;  %v1171_v9 = vadd.f32 %v4548_v4, %v4546_v3  ;;  %v293_v60 = vld [vmem:[#allocation2 + $0x700] sm:$0xff]  ;;  %v294_v8 = vld [vmem:[#allocation2 + $0x708] sm:$0xff]  ;;  %v4568_v4 = vadd.f32 %v566_v20, %v278_v28 }
  0xef   :  { %8645 = vst [vmem:[#allocation198_spill] sm:$0xff] %v4552_v26  ;;  %8646 = vst [vmem:[#allocation199_spill] sm:$0xff] %v4556_v0  ;;  %v295_v59 = vld [vmem:[#allocation2 + $0x710] sm:$0xff]  ;;  %v580_v34 = vld [vmem:[#allocation5 + $0x6f8] sm:$0xff]  ;;  %1162 = vadd.xlane.f32.xlu0 %v1161_v5  ;;  %v1181_v7 = vadd.f32 %v1180_v6, %v4542_v41 }
  0xf0   :  { %8647 = vst [vmem:[#allocation200_spill] sm:$0xff] %v4560_v50  ;;  %v579_v57 = vld [vmem:[#allocation5 + $0x6f0] sm:$0xff]  ;;  %v581_v44 = vld [vmem:[#allocation5 + $0x700] sm:$0xff]  ;;  %v1172_v42 = vadd.f32 %v1171_v9, %v4552_v26  ;;  %v296_v27 = vld [vmem:[#allocation2 + $0x718] sm:$0xff]  ;;  %v4566_v48 = vadd.f32 %v580_v34, %v292_v63 }
  0xf1   :  { %v582_v37 = vld [vmem:[#allocation5 + $0x708] sm:$0xff]  ;;  %v583_v24 = vld [vmem:[#allocation5 + $0x710] sm:$0xff]  ;;  %v4564_v21 = vadd.f32 %v579_v57, %v291_v35  ;;  %8650 = vst [vmem:[#allocation203_spill] sm:$0xff] %v4568_v4  ;;  %v584_v3 = vld [vmem:[#allocation5 + $0x718] sm:$0xff]  ;;  %v4570_v51 = vadd.f32 %v581_v44, %v293_v60  ;;  %v1182_v5 = vadd.f32 %v1181_v7, %v4550_v1 }
  0xf2   :  { %8649 = vst [vmem:[#allocation202_spill] sm:$0xff] %v4566_v48  ;;  %v285_v55 = vld [vmem:[#allocation2 + $0x6c0] sm:$0xff]  ;;  %v286_v39 = vld [vmem:[#allocation2 + $0x6c8] sm:$0xff]  ;;  %v1173_v6 = vadd.f32 %v1172_v42, %v4556_v0  ;;  %v4574_v41 = vadd.f32 %v582_v37, %v294_v8  ;;  %v287_v35 = vld [vmem:[#allocation2 + $0x6d0] sm:$0xff]  ;;  %v4578_v34 = vadd.f32 %v583_v24, %v295_v59 }
  0xf3   :  { %8648 = vst [vmem:[#allocation201_spill] sm:$0xff] %v4564_v21  ;;  %8651 = vst [vmem:[#allocation204_spill] sm:$0xff] %v4570_v51  ;;  %v1192_v9 = vadd.f32 %v4566_v48, %v4564_v21  ;;  %v288_v57 = vld [vmem:[#allocation2 + $0x6d8] sm:$0xff]  ;;  %v289_v63 = vld [vmem:[#allocation2 + $0x6e0] sm:$0xff]  ;;  %1183 = vadd.xlane.f32.xlu1 %v1182_v5  ;;  %v4586_v48 = vadd.f32 %v584_v3, %v296_v27 }
  0xf4   :  { %8652 = vst [vmem:[#allocation205_spill] sm:$0xff] %v4574_v41  ;;  %8653 = vst [vmem:[#allocation206_spill] sm:$0xff] %v4578_v34  ;;  %v573_v28 = vld [vmem:[#allocation5 + $0x6c0] sm:$0xff]  ;;  %v574_v20 = vld [vmem:[#allocation5 + $0x6c8] sm:$0xff]  ;;  %v1174_v44 = vadd.f32 %v1173_v6, %v4560_v50 }
  0xf5   :  { %v575_v60 = vld [vmem:[#allocation5 + $0x6d0] sm:$0xff]  ;;  %v1193_v7 = vadd.f32 %v1192_v9, %v4570_v51  ;;  %v290_v1 = vld [vmem:[#allocation2 + $0x6e8] sm:$0xff]  ;;  %v576_v42 = vld [vmem:[#allocation5 + $0x6d8] sm:$0xff]  ;;  %v4582_v37 = vadd.f32 %v573_v28, %v285_v55  ;;  %v4584_v0 = vadd.f32 %v574_v20, %v286_v39  ;;  %8656 = vst [vmem:[#allocation209_spill] sm:$0xff] %v4586_v48 }
  0xf6   :  { %v577_v8 = vld [vmem:[#allocation5 + $0x6e0] sm:$0xff]  ;;  %v578_v21 = vld [vmem:[#allocation5 + $0x6e8] sm:$0xff]  ;;  %v4588_v59 = vadd.f32 %v575_v60, %v287_v35  ;;  %v303_v24 = vld [vmem:[#allocation2 + $0x750] sm:$0xff]  ;;  %v1175_v5 = vadd.f32 %v1174_v44, %v4568_v4  ;;  %v4592_v50 = vadd.f32 %v576_v42, %v288_v57 }
  0xf7   :  { %8654 = vst [vmem:[#allocation207_spill] sm:$0xff] %v4582_v37  ;;  %8655 = vst [vmem:[#allocation208_spill] sm:$0xff] %v4584_v0  ;;  %v304_v26 = vld [vmem:[#allocation2 + $0x758] sm:$0xff]  ;;  %v1194_v6 = vadd.f32 %v1193_v7, %v4574_v41  ;;  %v1185_v9 = vadd.f32 %v4584_v0, %v4582_v37  ;;  %v305_v55 = vld [vmem:[#allocation2 + $0x760] sm:$0xff]  ;;  %v4596_v20 = vadd.f32 %v577_v8, %v289_v63 }
  0xf8   :  { %8657 = vst [vmem:[#allocation210_spill] sm:$0xff] %v4588_v59  ;;  %8658 = vst [vmem:[#allocation211_spill] sm:$0xff] %v4592_v50  ;;  %v306_v28 = vld [vmem:[#allocation2 + $0x768] sm:$0xff]  ;;  %v307_v39 = vld [vmem:[#allocation2 + $0x770] sm:$0xff]  ;;  %1176 = vadd.xlane.f32.xlu0 %v1175_v5  ;;  %v4604_v37 = vadd.f32 %v578_v21, %v290_v1  ;;  %v953_v5 = vpop.xlane.xlu1 %952 }
  0xf9   :  { %8659 = vst [vmem:[#allocation212_spill] sm:$0xff] %v4596_v20  ;;  %v591_v27 = vld [vmem:[#allocation5 + $0x750] sm:$0xff]  ;;  %v592_v3 = vld [vmem:[#allocation5 + $0x758] sm:$0xff]  ;;  %v593_v35 = vld [vmem:[#allocation5 + $0x760] sm:$0xff]  ;;  %v1195_v60 = vadd.f32 %v1194_v6, %v4578_v34  ;;  %v1186_v44 = vadd.f32 %v1185_v9, %v4588_v59  ;;  %v4616_v59 = vmul.f32 0.0013020834, %v953_v5 }
  0xfa   :  { %v308_v51 = vld [vmem:[#allocation2 + $0x778] sm:$0xff]  ;;  %v594_v7 = vld [vmem:[#allocation5 + $0x768] sm:$0xff]  ;;  %v595_v57 = vld [vmem:[#allocation5 + $0x770] sm:$0xff]  ;;  %v4600_v41 = vadd.f32 %v591_v27, %v303_v24  ;;  %v4602_v0 = vadd.f32 %v592_v3, %v304_v26  ;;  %8662 = vst [vmem:[#allocation215_spill] sm:$0xff] %v4604_v37  ;;  %v4606_v63 = vadd.f32 %v593_v35, %v305_v55 }
  0xfb   :  { %v596_v42 = vld [vmem:[#allocation5 + $0x778] sm:$0xff]  ;;  %v297_v8 = vld [vmem:[#allocation2 + $0x720] sm:$0xff]  ;;  %v298_v4 = vld [vmem:[#allocation2 + $0x728] sm:$0xff]  ;;  %v1196_v6 = vadd.f32 %v1195_v60, %v4586_v48  ;;  %v1187_v9 = vadd.f32 %v1186_v44, %v4592_v50  ;;  %v4610_v34 = vadd.f32 %v594_v7, %v306_v28  ;;  %v4614_v1 = vadd.f32 %v595_v57, %v307_v39 }
  0xfc   :  { %8660 = vst [vmem:[#allocation213_spill] sm:$0xff] %v4600_v41  ;;  %8661 = vst [vmem:[#allocation214_spill] sm:$0xff] %v4602_v0  ;;  %v299_v58 = vld [vmem:[#allocation2 + $0x730] sm:$0xff]  ;;  %v1206_v24 = vadd.f32 %v4602_v0, %v4600_v41  ;;  %v300_v27 = vld [vmem:[#allocation2 + $0x738] sm:$0xff]  ;;  %v4624_v41 = vadd.f32 %v596_v42, %v308_v51 }
  0xfd   :  { %8663 = vst [vmem:[#allocation216_spill] sm:$0xff] %v4606_v63  ;;  %8664 = vst [vmem:[#allocation217_spill] sm:$0xff] %v4610_v34  ;;  %v301_v26 = vld [vmem:[#allocation2 + $0x740] sm:$0xff]  ;;  %v302_v3 = vld [vmem:[#allocation2 + $0x748] sm:$0xff]  ;;  %1197 = vadd.xlane.f32.xlu1 %v1196_v6  ;;  %v1188_v60 = vadd.f32 %v1187_v9, %v4596_v20  ;;  %v4638_v20 = vmul.f32 0.0013020834, %v939_v46 }
  0xfe   :  { %8665 = vst [vmem:[#allocation218_spill] sm:$0xff] %v4614_v1  ;;  %v585_v21 = vld [vmem:[#allocation5 + $0x720] sm:$0xff]  ;;  %v586_v55 = vld [vmem:[#allocation5 + $0x728] sm:$0xff]  ;;  %v587_v35 = vld [vmem:[#allocation5 + $0x730] sm:$0xff]  ;;  %v1207_v44 = vadd.f32 %v1206_v24, %v4606_v63 }
  0xff   :  { %v588_v28 = vld [vmem:[#allocation5 + $0x738] sm:$0xff]  ;;  %v589_v7 = vld [vmem:[#allocation5 + $0x740] sm:$0xff]  ;;  %v590_v48 = vld [vmem:[#allocation5 + $0x748] sm:$0xff]  ;;  %v4620_v50 = vadd.f32 %v585_v21, %v297_v8  ;;  %v4622_v0 = vadd.f32 %v586_v55, %v298_v4  ;;  %8668 = vst [vmem:[#allocation221_spill] sm:$0xff] %v4624_v41  ;;  %v4626_v39 = vadd.f32 %v587_v35, %v299_v58  ;;  %v1189_v6 = vadd.f32 %v1188_v60, %v4604_v37  ;;  %v960_v37 = vpop.xlane.xlu1 %959 }
 0x100   :  { %v315_v57 = vld [vmem:[#allocation2 + $0x7b0] sm:$0xff]  ;;  %v316_v49 = vld [vmem:[#allocation2 + $0x7b8] sm:$0xff]  ;;  %v317_v5 = vld [vmem:[#allocation2 + $0x7c0] sm:$0xff]  ;;  %v1208_v9 = vadd.f32 %v1207_v44, %v4610_v34  ;;  %v4630_v24 = vadd.f32 %v588_v28, %v300_v27  ;;  %v4634_v51 = vadd.f32 %v589_v7, %v301_v26  ;;  %v4636_v58 = vadd.f32 %v590_v48, %v302_v3 }
 0x101   :  { %8666 = vst [vmem:[#allocation219_spill] sm:$0xff] %v4620_v50  ;;  %8667 = vst [vmem:[#allocation220_spill] sm:$0xff] %v4622_v0  ;;  %v1199_v8 = vadd.f32 %v4622_v0, %v4620_v50  ;;  %v318_v21 = vld [vmem:[#allocation2 + $0x7c8] sm:$0xff]  ;;  %v319_v4 = vld [vmem:[#allocation2 + $0x7d0] sm:$0xff]  ;;  %v4642_v60 = vsub.f32 %v3922_v10, %v4616_v59  ;;  %1190 = vadd.xlane.f32.xlu0 %v1189_v6  ;;  %v4654_v10 = vsub.f32 %v3924_v11, %v4616_v59 }
 0x102   :  { %8669 = vst [vmem:[#allocation222_spill] sm:$0xff] %v4626_v39  ;;  %8670 = vst [vmem:[#allocation223_spill] sm:$0xff] %v4630_v24  ;;  %v320_v55 = vld [vmem:[#allocation2 + $0x7d8] sm:$0xff]  ;;  %v603_v42 = vld [vmem:[#allocation5 + $0x7b0] sm:$0xff]  ;;  %v1209_v27 = vadd.f32 %v1208_v9, %v4614_v1  ;;  %v4658_v6 = vsub.f32 %v3926_v12, %v4616_v59  ;;  %v4674_v45 = vmul.f32 0.0013020834, %v960_v37 }
 0x103   :  { %8671 = vst [vmem:[#allocation224_spill] sm:$0xff] %v4634_v51  ;;  %8672 = vst [vmem:[#allocation225_spill] sm:$0xff] %v4636_v58  ;;  %v604_v35 = vld [vmem:[#allocation5 + $0x7b8] sm:$0xff]  ;;  %v605_v63 = vld [vmem:[#allocation5 + $0x7c0] sm:$0xff]  ;;  %v1200_v44 = vadd.f32 %v1199_v8, %v4626_v39  ;;  %v4646_v7 = vadd.f32 %v603_v42, %v315_v57  ;;  %v4662_v57 = vsub.f32 %v3928_v18, %v4616_v59 }
 0x104   :  { %8673 = vst [vmem:[#allocation226_spill] sm:$0xff] %v4642_v60  ;;  %v606_v28 = vld [vmem:[#allocation5 + $0x7c8] sm:$0xff]  ;;  %v607_v34 = vld [vmem:[#allocation5 + $0x7d0] sm:$0xff]  ;;  %v608_v26 = vld [vmem:[#allocation5 + $0x7d8] sm:$0xff]  ;;  %v4648_v48 = vadd.f32 %v604_v35, %v316_v49  ;;  %v4650_v3 = vadd.f32 %v605_v63, %v317_v5  ;;  %v1210_v49 = vadd.f32 %v1209_v27, %v4624_v41  ;;  %v4678_v27 = vsub.f32 %v3935_v30, %v4638_v20 }
 0x105   :  { %8674 = vst [vmem:[#allocation227_spill] sm:$0xff] %v4646_v7  ;;  %v309_v46 = vld [vmem:[#allocation2 + $0x780] sm:$0xff]  ;;  %v310_v0 = vld [vmem:[#allocation2 + $0x788] sm:$0xff]  ;;  %v311_v50 = vld [vmem:[#allocation2 + $0x790] sm:$0xff]  ;;  %v1201_v63 = vadd.f32 %v1200_v44, %v4630_v24  ;;  %v4666_v5 = vadd.f32 %v606_v28, %v318_v21  ;;  %v4670_v35 = vadd.f32 %v607_v34, %v319_v4  ;;  %v4672_v12 = vadd.f32 %v608_v26, %v320_v55  ;;  %v946_v24 = vpop.xlane.xlu0 %945 }
 0x106   :  { %8675 = vst [vmem:[#allocation228_spill] sm:$0xff] %v4648_v48  ;;  %8676 = vst [vmem:[#allocation229_spill] sm:$0xff] %v4650_v3  ;;  %v1220_v9 = vadd.f32 %v4648_v48, %v4646_v7  ;;  %v312_v8 = vld [vmem:[#allocation2 + $0x798] sm:$0xff]  ;;  %v313_v11 = vld [vmem:[#allocation2 + $0x7a0] sm:$0xff]  ;;  %1211 = vadd.xlane.f32.xlu1 %v1210_v49  ;;  %v4690_v30 = vsub.f32 %v3937_v31, %v4638_v20  ;;  %v4694_v49 = vsub.f32 %v3939_v32, %v4638_v20 }
 0x107   :  { %8677 = vst [vmem:[#allocation230_spill] sm:$0xff] %v4654_v10  ;;  %8678 = vst [vmem:[#allocation231_spill] sm:$0xff] %v4658_v6  ;;  %v314_v42 = vld [vmem:[#allocation2 + $0x7a8] sm:$0xff]  ;;  %v597_v1 = vld [vmem:[#allocation5 + $0x780] sm:$0xff]  ;;  %v1202_v21 = vadd.f32 %v1201_v63, %v4634_v51  ;;  %v4710_v62 = vmul.f32 0.0013020834, %v946_v24 }
 0x108   :  { %8679 = vst [vmem:[#allocation232_spill] sm:$0xff] %v4662_v57  ;;  %8680 = vst [vmem:[#allocation233_spill] sm:$0xff] %v4666_v5  ;;  %v598_v39 = vld [vmem:[#allocation5 + $0x788] sm:$0xff]  ;;  %v599_v18 = vld [vmem:[#allocation5 + $0x790] sm:$0xff]  ;;  %v1221_v44 = vadd.f32 %v1220_v9, %v4650_v3  ;;  %v4682_v4 = vadd.f32 %v597_v1, %v309_v46  ;;  %v4698_v1 = vsub.f32 %v3944_v38, %v4638_v20 }
 0x109   :  { %8681 = vst [vmem:[#allocation234_spill] sm:$0xff] %v4670_v35  ;;  %8682 = vst [vmem:[#allocation235_spill] sm:$0xff] %v4672_v12  ;;  %v600_v28 = vld [vmem:[#allocation5 + $0x798] sm:$0xff]  ;;  %v601_v48 = vld [vmem:[#allocation5 + $0x7a0] sm:$0xff]  ;;  %v4684_v55 = vadd.f32 %v598_v39, %v310_v0  ;;  %v4686_v26 = vadd.f32 %v599_v18, %v311_v50  ;;  %v1203_v0 = vadd.f32 %v1202_v21, %v4636_v58  ;;  %v974_v58 = vpop.xlane.xlu1 %973 }
 0x10a   :  { %8683 = vst [vmem:[#allocation236_spill] sm:$0xff] %v4678_v27  ;;  %v602_v34 = vld [vmem:[#allocation5 + $0x7a8] sm:$0xff]  ;;  %8684 = vst [vmem:[#allocation237_spill] sm:$0xff] %v4682_v4  ;;  %v327_v37 = vld [vmem:[#allocation2 + $0x810] sm:$0xff]  ;;  %v1222_v50 = vadd.f32 %v1221_v44, %v4666_v5  ;;  %v4702_v39 = vadd.f32 %v600_v28, %v312_v8  ;;  %v4706_v18 = vadd.f32 %v601_v48, %v313_v11 }
 0x10b   :  { %8685 = vst [vmem:[#allocation238_spill] sm:$0xff] %v4684_v55  ;;  %8686 = vst [vmem:[#allocation239_spill] sm:$0xff] %v4686_v26  ;;  %v328_v7 = vld [vmem:[#allocation2 + $0x818] sm:$0xff]  ;;  %v329_v41 = vld [vmem:[#allocation2 + $0x820] sm:$0xff]  ;;  %v1213_v46 = vadd.f32 %v4684_v55, %v4682_v4  ;;  %v4708_v32 = vadd.f32 %v602_v34, %v314_v42  ;;  %v4714_v21 = vsub.f32 %v3948_v43, %v4638_v20  ;;  %1204 = vadd.xlane.f32.xlu0 %v1203_v0 }
 0x10c   :  { %8687 = vst [vmem:[#allocation240_spill] sm:$0xff] %v4690_v30  ;;  %8688 = vst [vmem:[#allocation241_spill] sm:$0xff] %v4694_v49  ;;  %v330_v63 = vld [vmem:[#allocation2 + $0x828] sm:$0xff]  ;;  %v331_v31 = vld [vmem:[#allocation2 + $0x830] sm:$0xff]  ;;  %v1223_v8 = vadd.f32 %v1222_v50, %v4670_v35  ;;  %v4726_v43 = vsub.f32 %v3956_v54, %v4638_v20  ;;  %v1605_v0 = vmul.f32 %v4678_v27, %v4678_v27 }
 0x10d   :  { %8689 = vst [vmem:[#allocation242_spill] sm:$0xff] %v4698_v1  ;;  %8690 = vst [vmem:[#allocation243_spill] sm:$0xff] %v4702_v39  ;;  %v332_v9 = vld [vmem:[#allocation2 + $0x838] sm:$0xff]  ;;  %v615_v3 = vld [vmem:[#allocation5 + $0x810] sm:$0xff]  ;;  %v1214_v44 = vadd.f32 %v1213_v46, %v4686_v26  ;;  %v1606_v50 = vmul.f32 %v4690_v30, %v4690_v30  ;;  %v4742_v30 = vmul.f32 0.0013020834, %v974_v58 }
 0x10e   :  { %8691 = vst [vmem:[#allocation244_spill] sm:$0xff] %v4706_v18  ;;  %8692 = vst [vmem:[#allocation245_spill] sm:$0xff] %v4708_v32  ;;  %v616_v51 = vld [vmem:[#allocation5 + $0x818] sm:$0xff]  ;;  %v617_v38 = vld [vmem:[#allocation5 + $0x820] sm:$0xff]  ;;  %v4718_v11 = vadd.f32 %v615_v3, %v327_v37  ;;  %v1224_v3 = vadd.f32 %v1223_v8, %v4672_v12  ;;  %v4746_v8 = vmul.f32 %v4694_v49, %v4694_v49 }
 0x10f   :  { %8693 = vst [vmem:[#allocation246_spill] sm:$0xff] %v4714_v21  ;;  %v618_v28 = vld [vmem:[#allocation5 + $0x828] sm:$0xff]  ;;  %v619_v5 = vld [vmem:[#allocation5 + $0x830] sm:$0xff]  ;;  %v620_v48 = vld [vmem:[#allocation5 + $0x838] sm:$0xff]  ;;  %v4720_v42 = vadd.f32 %v616_v51, %v328_v7  ;;  %v4722_v34 = vadd.f32 %v617_v38, %v329_v41  ;;  %v1215_v51 = vadd.f32 %v1214_v44, %v4702_v39  ;;  %v967_v39 = vpop.xlane.xlu0 %966 }
 0x110   :  { %8694 = vst [vmem:[#allocation247_spill] sm:$0xff] %v4718_v11  ;;  %v321_v24 = vld [vmem:[#allocation2 + $0x7e0] sm:$0xff]  ;;  %v322_v55 = vld [vmem:[#allocation2 + $0x7e8] sm:$0xff]  ;;  %v323_v4 = vld [vmem:[#allocation2 + $0x7f0] sm:$0xff]  ;;  %v4734_v41 = vadd.f32 %v618_v28, %v330_v63  ;;  %v4738_v54 = vadd.f32 %v619_v5, %v331_v31  ;;  %v4740_v20 = vadd.f32 %v620_v48, %v332_v9  ;;  %1225 = vadd.xlane.f32.xlu1 %v1224_v3 }
 0x111   :  { %8695 = vst [vmem:[#allocation248_spill] sm:$0xff] %v4720_v42  ;;  %8696 = vst [vmem:[#allocation249_spill] sm:$0xff] %v4722_v34  ;;  %v1234_v7 = vadd.f32 %v4720_v42, %v4718_v11  ;;  %v324_v37 = vld [vmem:[#allocation2 + $0x7f8] sm:$0xff]  ;;  %v325_v46 = vld [vmem:[#allocation2 + $0x800] sm:$0xff]  ;;  %v1216_v63 = vadd.f32 %v1215_v51, %v4706_v18  ;;  %v4758_v3 = vmul.f32 %v4698_v1, %v4698_v1 }
 0x112   :  { %8697 = vst [vmem:[#allocation250_spill] sm:$0xff] %v4726_v43  ;;  %8698 = vst [vmem:[#allocation251_spill] sm:$0xff] %v4734_v41  ;;  %v326_v38 = vld [vmem:[#allocation2 + $0x808] sm:$0xff]  ;;  %v609_v27 = vld [vmem:[#allocation5 + $0x7e0] sm:$0xff]  ;;  %v4762_v51 = vmul.f32 %v4714_v21, %v4714_v21 }
 0x113   :  { %8699 = vst [vmem:[#allocation252_spill] sm:$0xff] %v4738_v54  ;;  %8700 = vst [vmem:[#allocation253_spill] sm:$0xff] %v4740_v20  ;;  %v610_v35 = vld [vmem:[#allocation5 + $0x7e8] sm:$0xff]  ;;  %v611_v26 = vld [vmem:[#allocation5 + $0x7f0] sm:$0xff]  ;;  %v1235_v44 = vadd.f32 %v1234_v7, %v4722_v34  ;;  %v4750_v31 = vadd.f32 %v609_v27, %v321_v24  ;;  %v4766_v27 = vmul.f32 %v4726_v43, %v4726_v43 }
 0x114   :  { %8701 = vst [vmem:[#allocation254_spill] sm:$0xff] %v4742_v30  ;;  %v612_v28 = vld [vmem:[#allocation5 + $0x7f8] sm:$0xff]  ;;  %v613_v42 = vld [vmem:[#allocation5 + $0x800] sm:$0xff]  ;;  %v614_v5 = vld [vmem:[#allocation5 + $0x808] sm:$0xff]  ;;  %v4752_v9 = vadd.f32 %v610_v35, %v322_v55  ;;  %v4754_v48 = vadd.f32 %v611_v26, %v323_v4  ;;  %v1217_v35 = vadd.f32 %v1216_v63, %v4708_v32  ;;  %v4778_v30 = vmul.f32 0.0013020834, %v967_v39  ;;  %v988_v39 = vpop.xlane.xlu1 %987 }
 0x115   :  { %8702 = vst [vmem:[#allocation255_spill] sm:$0xff] %v4750_v31  ;;  %v339_v58 = vld [vmem:[#allocation2 + $0x870] sm:$0xff]  ;;  %v340_v11 = vld [vmem:[#allocation2 + $0x878] sm:$0xff]  ;;  %v341_v12 = vld [vmem:[#allocation2 + $0x880] sm:$0xff]  ;;  %v1236_v4 = vadd.f32 %v1235_v44, %v4734_v41  ;;  %v4770_v55 = vadd.f32 %v612_v28, %v324_v37  ;;  %v4774_v49 = vadd.f32 %v613_v42, %v325_v46  ;;  %v4776_v21 = vadd.f32 %v614_v5, %v326_v38 }
 0x116   :  { %8703 = vst [vmem:[#allocation256_spill] sm:$0xff] %v4752_v9  ;;  %v1227_v26 = vadd.f32 %v4752_v9, %v4750_v31  ;;  %v342_v24 = vld [vmem:[#allocation2 + $0x888] sm:$0xff]  ;;  %v343_v7 = vld [vmem:[#allocation2 + $0x890] sm:$0xff]  ;;  %v344_v1 = vld [vmem:[#allocation2 + $0x898] sm:$0xff]  ;;  %v1893_v63 = vadd.f32 %v1606_v50, %v1605_v0  ;;  %1218 = vadd.xlane.f32.xlu0 %v1217_v35  ;;  %v4790_v0 = vsub.f32 %v3932_v22, %v4616_v59 }
 0x117   :  { %8704 = vst [vmem:[#allocation257_spill] sm:$0xff] %v4770_v55  ;;  %8705 = vst [vmem:[#allocation258_spill] sm:$0xff] %v4774_v49  ;;  %v627_v34 = vld [vmem:[#allocation5 + $0x870] sm:$0xff]  ;;  %v628_v18 = vld [vmem:[#allocation5 + $0x878] sm:$0xff]  ;;  %v1237_v37 = vadd.f32 %v1236_v4, %v4738_v54  ;;  %v4794_v50 = vsub.f32 %v3941_v36, %v4616_v59 }
 0x118   :  { %8706 = vst [vmem:[#allocation259_spill] sm:$0xff] %v4776_v21  ;;  %v629_v43 = vld [vmem:[#allocation5 + $0x880] sm:$0xff]  ;;  %v1228_v44 = vadd.f32 %v1227_v26, %v4754_v48  ;;  %v630_v28 = vld [vmem:[#allocation5 + $0x888] sm:$0xff]  ;;  %v631_v41 = vld [vmem:[#allocation5 + $0x890] sm:$0xff]  ;;  %v4782_v31 = vadd.f32 %v627_v34, %v339_v58  ;;  %v4784_v42 = vadd.f32 %v628_v18, %v340_v11  ;;  %v1617_v34 = vmul.f32 %v4642_v60, %v4642_v60 }
 0x119   :  { %v632_v9 = vld [vmem:[#allocation5 + $0x898] sm:$0xff]  ;;  %v4786_v46 = vadd.f32 %v629_v43, %v341_v12  ;;  %v333_v38 = vld [vmem:[#allocation2 + $0x840] sm:$0xff]  ;;  %v334_v5 = vld [vmem:[#allocation2 + $0x848] sm:$0xff]  ;;  %8710 = vst [vmem:[#allocation263_spill] sm:$0xff] %v4790_v0  ;;  %v1238_v18 = vadd.f32 %v1237_v37, %v4740_v20  ;;  %v4800_v11 = vadd.f32 %v630_v28, %v342_v24  ;;  %v4804_v4 = vadd.f32 %v631_v41, %v343_v7 }
 0x11a   :  { %8707 = vst [vmem:[#allocation260_spill] sm:$0xff] %v4782_v31  ;;  %8708 = vst [vmem:[#allocation261_spill] sm:$0xff] %v4784_v42  ;;  %v335_v32 = vld [vmem:[#allocation2 + $0x850] sm:$0xff]  ;;  %v1229_v12 = vadd.f32 %v1228_v44, %v4770_v55  ;;  %v1248_v43 = vadd.f32 %v4784_v42, %v4782_v31  ;;  %v336_v58 = vld [vmem:[#allocation2 + $0x858] sm:$0xff]  ;;  %v4806_v26 = vadd.f32 %v632_v9, %v344_v1  ;;  %v4808_v60 = vmul.f32 0.0013020834, %v988_v39  ;;  %v981_v55 = vpop.xlane.xlu0 %980 }
 0x11b   :  { %8709 = vst [vmem:[#allocation262_spill] sm:$0xff] %v4786_v46  ;;  %8711 = vst [vmem:[#allocation264_spill] sm:$0xff] %v4794_v50  ;;  %v337_v35 = vld [vmem:[#allocation2 + $0x860] sm:$0xff]  ;;  %v338_v22 = vld [vmem:[#allocation2 + $0x868] sm:$0xff]  ;;  %v1618_v37 = vmul.f32 %v4654_v10, %v4654_v10  ;;  %1239 = vadd.xlane.f32.xlu1 %v1238_v18  ;;  %v1894_v10 = vadd.f32 %v1893_v63, %v4746_v8  ;;  %v1619_v18 = vmul.f32 %v4658_v6, %v4658_v6 }
 0x11c   :  { %8712 = vst [vmem:[#allocation265_spill] sm:$0xff] %v4800_v11  ;;  %8713 = vst [vmem:[#allocation266_spill] sm:$0xff] %v4806_v26  ;;  %v621_v36 = vld [vmem:[#allocation5 + $0x840] sm:$0xff]  ;;  %v622_v59 = vld [vmem:[#allocation5 + $0x848] sm:$0xff]  ;;  %v1230_v24 = vadd.f32 %v1229_v12, %v4774_v49  ;;  %v1249_v44 = vadd.f32 %v1248_v43, %v4786_v46  ;;  %v4825_v12 = vmul.f32 %v4662_v57, %v4662_v57  ;;  %v4837_v49 = vmul.f32 0.0013020834, %v981_v55 }
 0x11d   :  { %v623_v54 = vld [vmem:[#allocation5 + $0x850] sm:$0xff]  ;;  %v624_v28 = vld [vmem:[#allocation5 + $0x858] sm:$0xff]  ;;  %v625_v42 = vld [vmem:[#allocation5 + $0x860] sm:$0xff]  ;;  %v4814_v41 = vadd.f32 %v621_v36, %v333_v38  ;;  %v4816_v1 = vadd.f32 %v622_v59, %v334_v5  ;;  %v1895_v55 = vadd.f32 %v1894_v10, %v4758_v3 }
 0x11e   :  { %v626_v31 = vld [vmem:[#allocation5 + $0x868] sm:$0xff]  ;;  %v4818_v9 = vadd.f32 %v623_v54, %v335_v32  ;;  %v351_v7 = vld [vmem:[#allocation2 + $0x8d0] sm:$0xff]  ;;  %v352_v39 = vld [vmem:[#allocation2 + $0x8d8] sm:$0xff]  ;;  %v1231_v38 = vadd.f32 %v1230_v24, %v4776_v21  ;;  %v1250_v5 = vadd.f32 %v1249_v44, %v4800_v11  ;;  %v4829_v43 = vadd.f32 %v624_v28, %v336_v58  ;;  %v1002_v21 = vpop.xlane.xlu1 %1001 }
 0x11f   :  { %8714 = vst [vmem:[#allocation267_spill] sm:$0xff] %v4814_v41  ;;  %8715 = vst [vmem:[#allocation268_spill] sm:$0xff] %v4816_v1  ;;  %v353_v20 = vld [vmem:[#allocation2 + $0x8e0] sm:$0xff]  ;;  %v1241_v32 = vadd.f32 %v4816_v1, %v4814_v41  ;;  %v354_v54 = vld [vmem:[#allocation2 + $0x8e8] sm:$0xff]  ;;  %v4833_v8 = vadd.f32 %v625_v42, %v337_v35  ;;  %v4835_v63 = vadd.f32 %v626_v31, %v338_v22 }
 0x120   :  { %v355_v36 = vld [vmem:[#allocation2 + $0x8f0] sm:$0xff]  ;;  %v356_v59 = vld [vmem:[#allocation2 + $0x8f8] sm:$0xff]  ;;  %v641_v57 = vld [vmem:[#allocation5 + $0x8e0] sm:$0xff]  ;;  %v1907_v24 = vadd.f32 %v1618_v37, %v1617_v34  ;;  %1232 = vadd.xlane.f32.xlu0 %v1231_v38  ;;  %v1251_v58 = vadd.f32 %v1250_v5, %v4804_v4  ;;  %v1621_v34 = vmul.f32 %v4790_v0, %v4790_v0  ;;  %v1622_v37 = vmul.f32 %v4794_v50, %v4794_v50 }
 0x121   :  { %v639_v6 = vld [vmem:[#allocation5 + $0x8d0] sm:$0xff]  ;;  %v640_v46 = vld [vmem:[#allocation5 + $0x8d8] sm:$0xff]  ;;  %v1242_v44 = vadd.f32 %v1241_v32, %v4818_v9  ;;  %v642_v28 = vld [vmem:[#allocation5 + $0x8e8] sm:$0xff]  ;;  %v4845_v31 = vadd.f32 %v641_v57, %v353_v20  ;;  %v4862_v0 = vmul.f32 0.0013020834, %v1002_v21  ;;  %v1896_v21 = vadd.f32 %v1895_v55, %v4762_v51 }
 0x122   :  { %v643_v11 = vld [vmem:[#allocation5 + $0x8f0] sm:$0xff]  ;;  %v644_v1 = vld [vmem:[#allocation5 + $0x8f8] sm:$0xff]  ;;  %v4841_v41 = vadd.f32 %v639_v6, %v351_v7  ;;  %v4843_v42 = vadd.f32 %v640_v46, %v352_v39  ;;  %v345_v35 = vld [vmem:[#allocation2 + $0x8a0] sm:$0xff]  ;;  %v1252_v38 = vadd.f32 %v1251_v58, %v4806_v26  ;;  %v4854_v7 = vadd.f32 %v642_v28, %v354_v54  ;;  %v995_v26 = vpop.xlane.xlu0 %994 }
 0x123   :  { %v346_v22 = vld [vmem:[#allocation2 + $0x8a8] sm:$0xff]  ;;  %v1243_v6 = vadd.f32 %v1242_v44, %v4829_v43  ;;  %v347_v20 = vld [vmem:[#allocation2 + $0x8b0] sm:$0xff]  ;;  %v348_v46 = vld [vmem:[#allocation2 + $0x8b8] sm:$0xff]  ;;  %v4858_v39 = vadd.f32 %v643_v11, %v355_v36  ;;  %v4860_v10 = vadd.f32 %v644_v1, %v356_v59  ;;  %v1908_v50 = vadd.f32 %v1907_v24, %v1619_v18 }
 0x124   :  { %8716 = vst [vmem:[#allocation269_spill] sm:$0xff] %v4841_v41  ;;  %8717 = vst [vmem:[#allocation270_spill] sm:$0xff] %v4843_v42  ;;  %v1262_v57 = vadd.f32 %v4843_v42, %v4841_v41  ;;  %v633_v3 = vld [vmem:[#allocation5 + $0x8a0] sm:$0xff]  ;;  %v634_v5 = vld [vmem:[#allocation5 + $0x8a8] sm:$0xff]  ;;  %1253 = vadd.xlane.f32.xlu1 %v1252_v38  ;;  %v4875_v18 = vsub.f32 %v3970_v14, %v4710_v62  ;;  %v4879_v24 = vsub.f32 %v3972_v15, %v4710_v62 }
 0x125   :  { %v635_v32 = vld [vmem:[#allocation5 + $0x8b0] sm:$0xff]  ;;  %v1244_v58 = vadd.f32 %v1243_v6, %v4833_v8  ;;  %v349_v44 = vld [vmem:[#allocation2 + $0x8c0] sm:$0xff]  ;;  %v636_v28 = vld [vmem:[#allocation5 + $0x8b8] sm:$0xff]  ;;  %v4866_v41 = vadd.f32 %v633_v3, %v345_v35  ;;  %v4868_v11 = vadd.f32 %v634_v5, %v346_v22  ;;  %v1909_v51 = vadd.f32 %v1908_v50, %v4825_v12 }
 0x126   :  { %v1263_v54 = vadd.f32 %v1262_v57, %v4845_v31  ;;  %v637_v42 = vld [vmem:[#allocation5 + $0x8c0] sm:$0xff]  ;;  %v350_v1 = vld [vmem:[#allocation2 + $0x8c8] sm:$0xff]  ;;  %v4870_v59 = vadd.f32 %v635_v32, %v347_v20  ;;  %v4883_v38 = vadd.f32 %v636_v28, %v348_v46  ;;  %v4892_v14 = vsub.f32 %v3976_v19, %v4710_v62 }
 0x127   :  { %v638_v36 = vld [vmem:[#allocation5 + $0x8c8] sm:$0xff]  ;;  %v1245_v35 = vadd.f32 %v1244_v58, %v4835_v63  ;;  %v1255_v6 = vadd.f32 %v4868_v11, %v4866_v41  ;;  %v4887_v57 = vadd.f32 %v637_v42, %v349_v44  ;;  %v4896_v15 = vsub.f32 %v3980_v25, %v4710_v62  ;;  %v1016_v42 = vpop.xlane.xlu1 %1015 }
 0x128   :  { %v1264_v22 = vadd.f32 %v1263_v54, %v4854_v7  ;;  %v4899_v20 = vadd.f32 %v638_v36, %v350_v1  ;;  %v4902_v3 = vmul.f32 0.0013020834, %v995_v26  ;;  %v1910_v5 = vadd.f32 %v1909_v51, %v1621_v34 }
 0x129   :  { %1246 = vadd.xlane.f32.xlu0 %v1245_v35  ;;  %v1256_v46 = vadd.f32 %v1255_v6, %v4870_v59  ;;  %v4906_v50 = vsub.f32 %v3984_v33, %v4710_v62  ;;  %v1611_v19 = vmul.f32 %v4875_v18, %v4875_v18  ;;  %v1612_v25 = vmul.f32 %v4879_v24, %v4879_v24 }
 0x12a   :  { %v1265_v55 = vadd.f32 %v1264_v22, %v4858_v39  ;;  %v1897_v58 = vadd.f32 %v1896_v21, %v4766_v27  ;;  %v4917_v26 = vsub.f32 %v3992_v47, %v4710_v62  ;;  %v4919_v34 = vmul.f32 0.0013020834, %v1016_v42  ;;  %v1009_v22 = vpop.xlane.xlu0 %1008 }
 0x12b   :  { %v1257_v32 = vadd.f32 %v1256_v46, %v4883_v38  ;;  %v1613_v33 = vmul.f32 %v4892_v14, %v4892_v14  ;;  %v1614_v54 = vmul.f32 %v4896_v15, %v4896_v15  ;;  %v1900_v44 = vadd.f32 %v1612_v25, %v1611_v19 }
 0x12c   :  { %v1266_v12 = vadd.f32 %v1265_v55, %v4860_v10  ;;  %v4928_v1 = vsub.f32 %v3952_v52, %v4674_v45  ;;  %v4932_v47 = vsub.f32 %v3954_v53, %v4674_v45  ;;  %v4936_v62 = vsub.f32 %v3958_v56, %v4674_v45 }
 0x12d   :  { %v1258_v28 = vadd.f32 %v1257_v32, %v4887_v57  ;;  %v1911_v27 = vadd.f32 %v1910_v5, %v1622_v37  ;;  %v1615_v36 = vmul.f32 %v4906_v50, %v4906_v50  ;;  %v1901_v21 = vadd.f32 %v1900_v44, %v1613_v33 }
 0x12e   :  { %1267 = vadd.xlane.f32.xlu1 %v1266_v12  ;;  %v4942_v35 = vsub.f32 %v3962_v61, %v4674_v45  ;;  %v4947_v53 = vsub.f32 %v3966_v2, %v4674_v45  ;;  %v1623_v56 = vmul.f32 %v4928_v1, %v4928_v1  ;;  %v1624_v37 = vmul.f32 %v4932_v47, %v4932_v47 }
 0x12f   :  { %v1259_v52 = vadd.f32 %v1258_v28, %v4899_v20  ;;  %v1616_v6 = vmul.f32 %v4917_v26, %v4917_v26  ;;  %v1902_v51 = vadd.f32 %v1901_v21, %v1614_v54  ;;  %v4957_v61 = vsub.f32 %v3974_v16, %v4674_v45  ;;  %v1030_v54 = vpop.xlane.xlu1 %1029 }
 0x130   :  { %v1625_v55 = vmul.f32 %v4936_v62, %v4936_v62  ;;  %v1626_v2 = vmul.f32 %v4942_v35, %v4942_v35  ;;  %v1914_v46 = vadd.f32 %v1624_v37, %v1623_v56  ;;  %v4965_v42 = vsub.f32 %v4006_v13, %v4778_v30 }
 0x131   :  { %1260 = vadd.xlane.f32.xlu0 %v1259_v52  ;;  %v4969_v5 = vsub.f32 %v4008_v17, %v4778_v30  ;;  %v4971_v19 = vmul.f32 0.0013020834, %v1009_v22  ;;  %v1903_v16 = vadd.f32 %v1902_v51, %v1615_v36  ;;  %v4975_v45 = vsub.f32 %v4012_v23, %v4778_v30  ;;  %v8720_v36 = vld [vmem:[#allocation23_spill] sm:$0xff]  ;;  %v8722_v52 = vld [vmem:[#allocation254_spill] sm:$0xff] }
 0x132   :  { %v4979_v25 = vsub.f32 %v4016_v29, %v4778_v30  ;;  %v1627_v12 = vmul.f32 %v4947_v53, %v4947_v53  ;;  %v1915_v13 = vadd.f32 %v1914_v46, %v1625_v55  ;;  %v4985_v32 = vsub.f32 %v4020_v40, %v4778_v30  ;;  %v8723_v22 = vld [vmem:[#allocation15_spill] sm:$0xff] }
 0x133   :  { %v1629_v17 = vmul.f32 %v4965_v42, %v4965_v42  ;;  %v1904_v33 = vadd.f32 %v1903_v16, %v1616_v6  ;;  %v1628_v23 = vmul.f32 %v4957_v61, %v4957_v61  ;;  %v1630_v29 = vmul.f32 %v4969_v5, %v4969_v5  ;;  %v8725_v6 = vld [vmem:[#allocation16_spill] sm:$0xff] }
 0x134   :  { %8718 = vst [vmem:[#allocation271_spill] sm:$0xff] %v4979_v25  ;;  %8719 = vst [vmem:[#allocation272_spill] sm:$0xff] %v4985_v32  ;;  %v1631_v44 = vmul.f32 %v4975_v45, %v4975_v45  ;;  %v1916_v28 = vadd.f32 %v1915_v13, %v1626_v2  ;;  %v4997_v40 = vsub.f32 %v8720_v36, %v4778_v30  ;;  %v8729_v30 = vld [vmem:[#allocation18_spill] sm:$0xff]  ;;  %v5017_v46 = vmul.f32 0.0013020834, %v1030_v54 }
 0x135   :  { %1898 = vadd.xlane.f32.xlu0 %v1897_v58  ;;  %v1632_v21 = vmul.f32 %v4979_v25, %v4979_v25  ;;  %v5003_v56 = vsub.f32 %v8723_v22, %v8722_v52  ;;  %1905 = vadd.xlane.f32.xlu1 %v1904_v33  ;;  %v1921_v37 = vadd.f32 %v1630_v29, %v1629_v17  ;;  %v8727_v58 = vld [vmem:[#allocation17_spill] sm:$0xff]  ;;  %v8731_v17 = vld [vmem:[#allocation19_spill] sm:$0xff]  ;;  %v1023_v29 = vpop.xlane.xlu0 %1022 }
 0x136   :  { %8721 = vst [vmem:[#allocation23_spill] sm:$0xff] %v4997_v40  ;;  %v5007_v51 = vsub.f32 %v8725_v6, %v8722_v52  ;;  %v5011_v55 = vsub.f32 %v8727_v58, %v8722_v52  ;;  %v5015_v2 = vsub.f32 %v8729_v30, %v8722_v52  ;;  %v1917_v16 = vadd.f32 %v1916_v28, %v1627_v12  ;;  %v8733_v58 = vld [vmem:[#allocation20_spill] sm:$0xff] }
 0x137   :  { %8724 = vst [vmem:[#allocation254_spill] sm:$0xff] %v5003_v56  ;;  %v1633_v13 = vmul.f32 %v4985_v32, %v4985_v32  ;;  %v5023_v33 = vsub.f32 %v8731_v17, %v8722_v52  ;;  %v1922_v36 = vadd.f32 %v1921_v37, %v1631_v44  ;;  %v1635_v22 = vmul.f32 %v5003_v56, %v5003_v56  ;;  %v1044_v17 = vpop.xlane.xlu1 %1043 }
 0x138   :  { %8726 = vst [vmem:[#allocation15_spill] sm:$0xff] %v5007_v51  ;;  %8728 = vst [vmem:[#allocation16_spill] sm:$0xff] %v5011_v55  ;;  %v1636_v6 = vmul.f32 %v5007_v51, %v5007_v51  ;;  %v1637_v54 = vmul.f32 %v5011_v55, %v5011_v55  ;;  %v1918_v12 = vadd.f32 %v1917_v16, %v1628_v23  ;;  %v8735_v51 = vld [vmem:[#allocation27_spill] sm:$0xff]  ;;  %v5047_v16 = vmul.f32 0.0013020834, %v1023_v29 }
 0x139   :  { %8730 = vst [vmem:[#allocation17_spill] sm:$0xff] %v5015_v2  ;;  %8732 = vst [vmem:[#allocation18_spill] sm:$0xff] %v5023_v33  ;;  %1912 = vadd.xlane.f32.xlu0 %v1911_v27  ;;  %v1634_v28 = vmul.f32 %v4997_v40, %v4997_v40  ;;  %v5035_v30 = vsub.f32 %v8733_v58, %v8722_v52  ;;  %v1638_v44 = vmul.f32 %v5015_v2, %v5015_v2  ;;  %v8737_v27 = vld [vmem:[#allocation28_spill] sm:$0xff]  ;;  %v8739_v58 = vld [vmem:[#allocation30_spill] sm:$0xff] }
 0x13a   :  { %v1923_v37 = vadd.f32 %v1922_v36, %v1632_v21  ;;  %v1928_v56 = vadd.f32 %v1636_v6, %v1635_v22  ;;  %v5041_v32 = vsub.f32 %v8735_v51, %v4837_v49  ;;  %v5045_v23 = vsub.f32 %v8737_v27, %v4837_v49  ;;  %1919 = vadd.xlane.f32.xlu1 %v1918_v12  ;;  %v8741_v21 = vld [vmem:[#allocation31_spill] sm:$0xff]  ;;  %v8743_v6 = vld [vmem:[#allocation32_spill] sm:$0xff] }
 0x13b   :  { %8734 = vst [vmem:[#allocation19_spill] sm:$0xff] %v5035_v30  ;;  %v1639_v52 = vmul.f32 %v5023_v33, %v5023_v33  ;;  %v5053_v2 = vsub.f32 %v8739_v58, %v4837_v49  ;;  %v5057_v36 = vsub.f32 %v8741_v21, %v4837_v49  ;;  %v5061_v27 = vsub.f32 %v8743_v6, %v4837_v49  ;;  %v8747_v6 = vld [vmem:[#allocation21_spill] sm:$0xff] }
 0x13c   :  { %8736 = vst [vmem:[#allocation20_spill] sm:$0xff] %v5041_v32  ;;  %8738 = vst [vmem:[#allocation27_spill] sm:$0xff] %v5045_v23  ;;  %v1924_v51 = vadd.f32 %v1923_v37, %v1633_v13  ;;  %v1929_v22 = vadd.f32 %v1928_v56, %v1637_v54  ;;  %v1641_v29 = vmul.f32 %v5041_v32, %v5041_v32  ;;  %v5065_v12 = vmul.f32 0.0013020834, %v1044_v17  ;;  %v8745_v54 = vld [vmem:[#allocation35_spill] sm:$0xff]  ;;  %v1037_v17 = vpop.xlane.xlu0 %1036 }
 0x13d   :  { %8740 = vst [vmem:[#allocation28_spill] sm:$0xff] %v5053_v2  ;;  %8742 = vst [vmem:[#allocation30_spill] sm:$0xff] %v5057_v36  ;;  %v1640_v33 = vmul.f32 %v5035_v30, %v5035_v30  ;;  %v1642_v58 = vmul.f32 %v5045_v23, %v5045_v23  ;;  %v1643_v21 = vmul.f32 %v5053_v2, %v5053_v2  ;;  %v8749_v23 = vld [vmem:[#allocation22_spill] sm:$0xff] }
 0x13e   :  { %8744 = vst [vmem:[#allocation31_spill] sm:$0xff] %v5061_v27  ;;  %v1925_v13 = vadd.f32 %v1924_v51, %v1634_v28  ;;  %v1930_v56 = vadd.f32 %v1929_v22, %v1638_v44  ;;  %v5075_v37 = vsub.f32 %v8745_v54, %v4837_v49  ;;  %v5079_v32 = vsub.f32 %v8747_v6, %v4808_v60  ;;  %v8751_v28 = vld [vmem:[#allocation24_spill] sm:$0xff]  ;;  %v8753_v22 = vld [vmem:[#allocation25_spill] sm:$0xff]  ;;  %v8755_v6 = vld [vmem:[#allocation26_spill] sm:$0xff] }
 0x13f   :  { %v1644_v30 = vmul.f32 %v5057_v36, %v5057_v36  ;;  %v1935_v55 = vadd.f32 %v1642_v58, %v1641_v29  ;;  %v5085_v40 = vsub.f32 %v8749_v23, %v4808_v60  ;;  %v5089_v44 = vsub.f32 %v8751_v28, %v4808_v60 }
 0x140   :  { %8746 = vst [vmem:[#allocation32_spill] sm:$0xff] %v5075_v37  ;;  %8748 = vst [vmem:[#allocation35_spill] sm:$0xff] %v5079_v32  ;;  %1926 = vadd.xlane.f32.xlu0 %v1925_v13  ;;  %v1931_v49 = vadd.f32 %v1930_v56, %v1639_v52  ;;  %v1645_v51 = vmul.f32 %v5061_v27, %v5061_v27  ;;  %v5095_v54 = vsub.f32 %v8753_v22, %v4808_v60  ;;  %v8757_v27 = vld [vmem:[#allocation29_spill] sm:$0xff] }
 0x141   :  { %8750 = vst [vmem:[#allocation21_spill] sm:$0xff] %v5085_v40  ;;  %8752 = vst [vmem:[#allocation22_spill] sm:$0xff] %v5089_v44  ;;  %v5099_v29 = vsub.f32 %v8755_v6, %v4808_v60  ;;  %v1936_v58 = vadd.f32 %v1935_v55, %v1643_v21  ;;  %v1647_v23 = vmul.f32 %v5079_v32, %v5079_v32  ;;  %v5107_v13 = vmul.f32 0.0013020834, %v1037_v17  ;;  %v1058_v21 = vpop.xlane.xlu1 %1057  ;;  %v8761_v17 = vld [vmem:[#allocation40_spill] sm:$0xff] }
 0x142   :  { %8754 = vst [vmem:[#allocation24_spill] sm:$0xff] %v5095_v54  ;;  %v1648_v28 = vmul.f32 %v5085_v40, %v5085_v40  ;;  %v1649_v52 = vmul.f32 %v5089_v44, %v5089_v44  ;;  %v1932_v56 = vadd.f32 %v1931_v49, %v1640_v33  ;;  %v1646_v22 = vmul.f32 %v5075_v37, %v5075_v37  ;;  %v8759_v40 = vld [vmem:[#allocation39_spill] sm:$0xff] }
 0x143   :  { %8756 = vst [vmem:[#allocation25_spill] sm:$0xff] %v5099_v29  ;;  %v5113_v6 = vsub.f32 %v8757_v27, %v4808_v60  ;;  %v1937_v55 = vadd.f32 %v1936_v58, %v1644_v30  ;;  %v1650_v32 = vmul.f32 %v5095_v54, %v5095_v54  ;;  %v5119_v2 = vsub.f32 %v8759_v40, %v4902_v3  ;;  %v8763_v60 = vld [vmem:[#allocation42_spill] sm:$0xff]  ;;  %v8765_v27 = vld [vmem:[#allocation43_spill] sm:$0xff]  ;;  %v8767_v40 = vld [vmem:[#allocation44_spill] sm:$0xff] }
 0x144   :  { %v1942_v36 = vadd.f32 %v1648_v28, %v1647_v23  ;;  %1933 = vadd.xlane.f32.xlu1 %v1932_v56  ;;  %v1651_v33 = vmul.f32 %v5099_v29, %v5099_v29  ;;  %v5125_v49 = vsub.f32 %v8761_v17, %v4902_v3  ;;  %v5129_v30 = vsub.f32 %v8763_v60, %v4902_v3  ;;  %v1051_v17 = vpop.xlane.xlu0 %1050 }
 0x145   :  { %8758 = vst [vmem:[#allocation26_spill] sm:$0xff] %v5113_v6  ;;  %8760 = vst [vmem:[#allocation29_spill] sm:$0xff] %v5119_v2  ;;  %v5133_v58 = vsub.f32 %v8765_v27, %v4902_v3  ;;  %v1938_v23 = vadd.f32 %v1937_v55, %v1645_v51  ;;  %v5137_v56 = vsub.f32 %v8767_v40, %v4902_v3  ;;  %v5141_v54 = vmul.f32 0.0013020834, %v1058_v21  ;;  %v8769_v55 = vld [vmem:[#allocation47_spill] sm:$0xff] }
 0x146   :  { %8762 = vst [vmem:[#allocation39_spill] sm:$0xff] %v5125_v49  ;;  %8764 = vst [vmem:[#allocation40_spill] sm:$0xff] %v5129_v30  ;;  %v1943_v28 = vadd.f32 %v1942_v36, %v1649_v52  ;;  %v1653_v29 = vmul.f32 %v5119_v2, %v5119_v2  ;;  %v1652_v60 = vmul.f32 %v5113_v6, %v5113_v6  ;;  %v8771_v2 = vld [vmem:[#allocation33_spill] sm:$0xff]  ;;  %v8773_v6 = vld [vmem:[#allocation34_spill] sm:$0xff] }
 0x147   :  { %8766 = vst [vmem:[#allocation42_spill] sm:$0xff] %v5133_v58  ;;  %8768 = vst [vmem:[#allocation43_spill] sm:$0xff] %v5137_v56  ;;  %v1654_v44 = vmul.f32 %v5125_v49, %v5125_v49  ;;  %v1655_v51 = vmul.f32 %v5129_v30, %v5129_v30  ;;  %v1939_v36 = vadd.f32 %v1938_v23, %v1646_v22  ;;  %v8775_v30 = vld [vmem:[#allocation36_spill] sm:$0xff] }
 0x148   :  { %v1944_v52 = vadd.f32 %v1943_v28, %v1650_v32  ;;  %v5151_v27 = vsub.f32 %v8769_v55, %v4902_v3  ;;  %v1656_v21 = vmul.f32 %v5133_v58, %v5133_v58  ;;  %v5157_v37 = vsub.f32 %v8771_v2, %v4862_v0  ;;  %v1072_v28 = vpop.xlane.xlu1 %1071 }
 0x149   :  { %v1949_v40 = vadd.f32 %v1654_v44, %v1653_v29  ;;  %v5161_v49 = vsub.f32 %v8773_v6, %v4862_v0  ;;  %v5165_v22 = vsub.f32 %v8775_v30, %v4862_v0  ;;  %1940 = vadd.xlane.f32.xlu0 %v1939_v36  ;;  %v5167_v32 = vmul.f32 0.0013020834, %v1051_v17  ;;  %v8777_v44 = vld [vmem:[#allocation37_spill] sm:$0xff] }
 0x14a   :  { %8770 = vst [vmem:[#allocation44_spill] sm:$0xff] %v5151_v27  ;;  %8772 = vst [vmem:[#allocation47_spill] sm:$0xff] %v5157_v37  ;;  %v1945_v3 = vadd.f32 %v1944_v52, %v1651_v33  ;;  %v1657_v23 = vmul.f32 %v5137_v56, %v5137_v56  ;;  %v5173_v29 = vsub.f32 %v8777_v44, %v4862_v0  ;;  %v8779_v52 = vld [vmem:[#allocation38_spill] sm:$0xff]  ;;  %v8783_v56 = vld [vmem:[#allocation51_spill] sm:$0xff] }
 0x14b   :  { %8774 = vst [vmem:[#allocation33_spill] sm:$0xff] %v5161_v49  ;;  %8776 = vst [vmem:[#allocation34_spill] sm:$0xff] %v5165_v22  ;;  %v1950_v2 = vadd.f32 %v1949_v40, %v1655_v51  ;;  %v1659_v6 = vmul.f32 %v5157_v37, %v5157_v37  ;;  %v1660_v30 = vmul.f32 %v5161_v49, %v5161_v49  ;;  %v8781_v51 = vld [vmem:[#allocation41_spill] sm:$0xff] }
 0x14c   :  { %8778 = vst [vmem:[#allocation36_spill] sm:$0xff] %v5173_v29  ;;  %v1661_v17 = vmul.f32 %v5165_v22, %v5165_v22  ;;  %v1946_v36 = vadd.f32 %v1945_v3, %v1652_v60  ;;  %v1658_v33 = vmul.f32 %v5151_v27, %v5151_v27  ;;  %v5185_v55 = vsub.f32 %v8779_v52, %v4862_v0  ;;  %v8785_v3 = vld [vmem:[#allocation52_spill] sm:$0xff]  ;;  %v8787_v27 = vld [vmem:[#allocation54_spill] sm:$0xff] }
 0x14d   :  { %v5189_v40 = vsub.f32 %v8781_v51, %v4862_v0  ;;  %v1951_v44 = vadd.f32 %v1950_v2, %v1656_v21  ;;  %v1662_v37 = vmul.f32 %v5173_v29, %v5173_v29  ;;  %v1956_v49 = vadd.f32 %v1660_v30, %v1659_v6  ;;  %v8789_v21 = vld [vmem:[#allocation55_spill] sm:$0xff] }
 0x14e   :  { %8780 = vst [vmem:[#allocation37_spill] sm:$0xff] %v5185_v55  ;;  %v5195_v22 = vsub.f32 %v8783_v56, %v4971_v19  ;;  %1947 = vadd.xlane.f32.xlu1 %v1946_v36  ;;  %v5197_v60 = vmul.f32 0.0013020834, %v1072_v28  ;;  %v5201_v52 = vsub.f32 %v8785_v3, %v4971_v19  ;;  %v5205_v0 = vsub.f32 %v8787_v27, %v4971_v19  ;;  %v8791_v56 = vld [vmem:[#allocation56_spill] sm:$0xff]  ;;  %v1065_v36 = vpop.xlane.xlu0 %1064 }
 0x14f   :  { %8782 = vst [vmem:[#allocation38_spill] sm:$0xff] %v5189_v40  ;;  %v5209_v2 = vsub.f32 %v8789_v21, %v4971_v19  ;;  %v1952_v6 = vadd.f32 %v1951_v44, %v1657_v23  ;;  %v1957_v30 = vadd.f32 %v1956_v49, %v1661_v17  ;;  %v5213_v51 = vsub.f32 %v8791_v56, %v4971_v19  ;;  %v8793_v44 = vld [vmem:[#allocation59_spill] sm:$0xff] }
 0x150   :  { %8784 = vst [vmem:[#allocation41_spill] sm:$0xff] %v5195_v22  ;;  %8786 = vst [vmem:[#allocation51_spill] sm:$0xff] %v5201_v52  ;;  %v1665_v28 = vmul.f32 %v5195_v22, %v5195_v22  ;;  %v1663_v3 = vmul.f32 %v5185_v55, %v5185_v55  ;;  %v1664_v27 = vmul.f32 %v5189_v40, %v5189_v40  ;;  %v8795_v55 = vld [vmem:[#allocation45_spill] sm:$0xff]  ;;  %v8797_v40 = vld [vmem:[#allocation46_spill] sm:$0xff] }
 0x151   :  { %8788 = vst [vmem:[#allocation52_spill] sm:$0xff] %v5205_v0  ;;  %8790 = vst [vmem:[#allocation54_spill] sm:$0xff] %v5209_v2  ;;  %v1666_v21 = vmul.f32 %v5201_v52, %v5201_v52  ;;  %v1667_v49 = vmul.f32 %v5205_v0, %v5205_v0  ;;  %v1953_v23 = vadd.f32 %v1952_v6, %v1658_v33  ;;  %v8799_v0 = vld [vmem:[#allocation48_spill] sm:$0xff] }
 0x152   :  { %8792 = vst [vmem:[#allocation55_spill] sm:$0xff] %v5213_v51  ;;  %v1958_v17 = vadd.f32 %v1957_v30, %v1662_v37  ;;  %v5227_v56 = vsub.f32 %v8793_v44, %v4971_v19  ;;  %v1668_v22 = vmul.f32 %v5209_v2, %v5209_v2  ;;  %v5233_v58 = vsub.f32 %v8795_v55, %v4919_v34  ;;  %v8801_v30 = vld [vmem:[#allocation49_spill] sm:$0xff] }
 0x153   :  { %v1963_v29 = vadd.f32 %v1666_v21, %v1665_v28  ;;  %v5237_v52 = vsub.f32 %v8797_v40, %v4919_v34  ;;  %v5241_v33 = vsub.f32 %v8799_v0, %v4919_v34  ;;  %1954 = vadd.xlane.f32.xlu0 %v1953_v23  ;;  %v5243_v37 = vmul.f32 0.0013020834, %v1065_v36  ;;  %v1086_v21 = vpop.xlane.xlu1 %1085  ;;  %v8803_v40 = vld [vmem:[#allocation50_spill] sm:$0xff] }
 0x154   :  { %8794 = vst [vmem:[#allocation56_spill] sm:$0xff] %v5227_v56  ;;  %8796 = vst [vmem:[#allocation59_spill] sm:$0xff] %v5233_v58  ;;  %v1959_v19 = vadd.f32 %v1958_v17, %v1663_v3  ;;  %v1669_v6 = vmul.f32 %v5213_v51, %v5213_v51  ;;  %v5249_v28 = vsub.f32 %v8801_v30, %v4919_v34  ;;  %v8805_v17 = vld [vmem:[#allocation53_spill] sm:$0xff] }
 0x155   :  { %8798 = vst [vmem:[#allocation45_spill] sm:$0xff] %v5237_v52  ;;  %8800 = vst [vmem:[#allocation46_spill] sm:$0xff] %v5241_v33  ;;  %v1964_v55 = vadd.f32 %v1963_v29, %v1667_v49  ;;  %v5253_v44 = vsub.f32 %v8803_v40, %v4919_v34  ;;  %v1671_v0 = vmul.f32 %v5233_v58, %v5233_v58  ;;  %v8807_v58 = vld [vmem:[#allocation63_spill] sm:$0xff] }
 0x156   :  { %8802 = vst [vmem:[#allocation48_spill] sm:$0xff] %v5249_v28  ;;  %v1672_v36 = vmul.f32 %v5237_v52, %v5237_v52  ;;  %v1960_v3 = vadd.f32 %v1959_v19, %v1664_v27  ;;  %v1670_v23 = vmul.f32 %v5227_v56, %v5227_v56  ;;  %v5263_v30 = vsub.f32 %v8805_v17, %v4919_v34  ;;  %v8809_v19 = vld [vmem:[#allocation64_spill] sm:$0xff]  ;;  %v8811_v34 = vld [vmem:[#allocation66_spill] sm:$0xff] }
 0x157   :  { %8804 = vst [vmem:[#allocation49_spill] sm:$0xff] %v5253_v44  ;;  %v1673_v29 = vmul.f32 %v5241_v33, %v5241_v33  ;;  %v1965_v49 = vadd.f32 %v1964_v55, %v1668_v22  ;;  %v1674_v40 = vmul.f32 %v5249_v28, %v5249_v28  ;;  %v5271_v2 = vsub.f32 %v8807_v58, %v5047_v16  ;;  %v8813_v22 = vld [vmem:[#allocation67_spill] sm:$0xff]  ;;  %v1079_v28 = vpop.xlane.xlu0 %1078 }
 0x158   :  { %8806 = vst [vmem:[#allocation50_spill] sm:$0xff] %v5263_v30  ;;  %v1970_v51 = vadd.f32 %v1672_v36, %v1671_v0  ;;  %1961 = vadd.xlane.f32.xlu1 %v1960_v3  ;;  %v5273_v27 = vmul.f32 0.0013020834, %v1086_v21  ;;  %v5277_v52 = vsub.f32 %v8809_v19, %v5047_v16  ;;  %v5281_v17 = vsub.f32 %v8811_v34, %v5047_v16  ;;  %v8815_v21 = vld [vmem:[#allocation68_spill] sm:$0xff] }
 0x159   :  { %8808 = vst [vmem:[#allocation53_spill] sm:$0xff] %v5271_v2  ;;  %v5285_v55 = vsub.f32 %v8813_v22, %v5047_v16  ;;  %v1966_v0 = vadd.f32 %v1965_v49, %v1669_v6  ;;  %v1675_v58 = vmul.f32 %v5253_v44, %v5253_v44  ;;  %v5291_v3 = vsub.f32 %v8815_v21, %v5047_v16 }
 0x15a   :  { %8810 = vst [vmem:[#allocation63_spill] sm:$0xff] %v5277_v52  ;;  %8812 = vst [vmem:[#allocation64_spill] sm:$0xff] %v5281_v17  ;;  %v1971_v36 = vadd.f32 %v1970_v51, %v1673_v29  ;;  %v1676_v19 = vmul.f32 %v5263_v30, %v5263_v30  ;;  %v1677_v34 = vmul.f32 %v5271_v2, %v5271_v2  ;;  %v8817_v51 = vld [vmem:[#allocation71_spill] sm:$0xff]  ;;  %v8819_v30 = vld [vmem:[#allocation57_spill] sm:$0xff] }
 0x15b   :  { %8814 = vst [vmem:[#allocation66_spill] sm:$0xff] %v5285_v55  ;;  %8816 = vst [vmem:[#allocation67_spill] sm:$0xff] %v5291_v3  ;;  %v1678_v22 = vmul.f32 %v5277_v52, %v5277_v52  ;;  %v1679_v6 = vmul.f32 %v5281_v17, %v5281_v17  ;;  %v1967_v49 = vadd.f32 %v1966_v0, %v1670_v23  ;;  %v8821_v2 = vld [vmem:[#allocation58_spill] sm:$0xff]  ;;  %v8823_v17 = vld [vmem:[#allocation60_spill] sm:$0xff] }
 0x15c   :  { %v1972_v44 = vadd.f32 %v1971_v36, %v1674_v40  ;;  %v5303_v29 = vsub.f32 %v8817_v51, %v5047_v16  ;;  %v1680_v21 = vmul.f32 %v5285_v55, %v5285_v55  ;;  %v5309_v56 = vsub.f32 %v8819_v30, %v5017_v46  ;;  %v8825_v36 = vld [vmem:[#allocation61_spill] sm:$0xff] }
 0x15d   :  { %v1977_v33 = vadd.f32 %v1678_v22, %v1677_v34  ;;  %v5313_v52 = vsub.f32 %v8821_v2, %v5017_v46  ;;  %v5317_v23 = vsub.f32 %v8823_v17, %v5017_v46  ;;  %1968 = vadd.xlane.f32.xlu0 %v1967_v49  ;;  %v5319_v40 = vmul.f32 0.0013020834, %v1079_v28  ;;  %v1100_v22 = vpop.xlane.xlu1 %1099  ;;  %v8827_v2 = vld [vmem:[#allocation62_spill] sm:$0xff]  ;;  %v8829_v49 = vld [vmem:[#allocation65_spill] sm:$0xff] }
 0x15e   :  { %8818 = vst [vmem:[#allocation68_spill] sm:$0xff] %v5303_v29  ;;  %8820 = vst [vmem:[#allocation71_spill] sm:$0xff] %v5309_v56  ;;  %v1973_v16 = vadd.f32 %v1972_v44, %v1675_v58  ;;  %v1681_v0 = vmul.f32 %v5291_v3, %v5291_v3  ;;  %v5325_v34 = vsub.f32 %v8825_v36, %v5017_v46 }
 0x15f   :  { %8822 = vst [vmem:[#allocation57_spill] sm:$0xff] %v5313_v52  ;;  %8824 = vst [vmem:[#allocation58_spill] sm:$0xff] %v5317_v23  ;;  %v1978_v30 = vadd.f32 %v1977_v33, %v1679_v6  ;;  %v5329_v51 = vsub.f32 %v8827_v2, %v5017_v46  ;;  %v1683_v17 = vmul.f32 %v5309_v56, %v5309_v56  ;;  %v8831_v56 = vld [vmem:[#allocation75_spill] sm:$0xff] }
 0x160   :  { %8826 = vst [vmem:[#allocation60_spill] sm:$0xff] %v5325_v34  ;;  %v1684_v28 = vmul.f32 %v5313_v52, %v5313_v52  ;;  %v1974_v44 = vadd.f32 %v1973_v16, %v1676_v19  ;;  %v1682_v58 = vmul.f32 %v5303_v29, %v5303_v29  ;;  %v5339_v36 = vsub.f32 %v8829_v49, %v5017_v46  ;;  %v1093_v16 = vpop.xlane.xlu0 %1092  ;;  %v8833_v52 = vld [vmem:[#allocation76_spill] sm:$0xff]  ;;  %v8835_v49 = vld [vmem:[#allocation78_spill] sm:$0xff] }
 0x161   :  { %8828 = vst [vmem:[#allocation61_spill] sm:$0xff] %v5329_v51  ;;  %v1685_v33 = vmul.f32 %v5317_v23, %v5317_v23  ;;  %v1979_v6 = vadd.f32 %v1978_v30, %v1680_v21  ;;  %v1686_v2 = vmul.f32 %v5325_v34, %v5325_v34  ;;  %v5347_v55 = vsub.f32 %v8831_v56, %v5107_v13  ;;  %v8837_v21 = vld [vmem:[#allocation79_spill] sm:$0xff]  ;;  %v1114_v29 = vpop.xlane.xlu1 %1113 }
 0x162   :  { %8830 = vst [vmem:[#allocation62_spill] sm:$0xff] %v5339_v36  ;;  %v1984_v3 = vadd.f32 %v1684_v28, %v1683_v17  ;;  %1975 = vadd.xlane.f32.xlu1 %v1974_v44  ;;  %v5349_v19 = vmul.f32 0.0013020834, %v1100_v22  ;;  %v5353_v46 = vsub.f32 %v8833_v52, %v5107_v13  ;;  %v5357_v23 = vsub.f32 %v8835_v49, %v5107_v13  ;;  %v8839_v22 = vld [vmem:[#allocation80_spill] sm:$0xff] }
 0x163   :  { %8832 = vst [vmem:[#allocation65_spill] sm:$0xff] %v5347_v55  ;;  %v5361_v30 = vsub.f32 %v8837_v21, %v5107_v13  ;;  %v1980_v17 = vadd.f32 %v1979_v6, %v1681_v0  ;;  %v1687_v56 = vmul.f32 %v5329_v51, %v5329_v51  ;;  %v5367_v44 = vsub.f32 %v8839_v22, %v5107_v13 }
 0x164   :  { %8834 = vst [vmem:[#allocation75_spill] sm:$0xff] %v5353_v46  ;;  %8836 = vst [vmem:[#allocation76_spill] sm:$0xff] %v5357_v23  ;;  %v1985_v28 = vadd.f32 %v1984_v3, %v1685_v33  ;;  %v1688_v52 = vmul.f32 %v5339_v36, %v5339_v36  ;;  %v1689_v49 = vmul.f32 %v5347_v55, %v5347_v55  ;;  %v5377_v21 = vmul.f32 0.0013020834, %v1093_v16  ;;  %v8841_v33 = vld [vmem:[#allocation83_spill] sm:$0xff]  ;;  %v8843_v55 = vld [vmem:[#allocation69_spill] sm:$0xff] }
 0x165   :  { %8838 = vst [vmem:[#allocation78_spill] sm:$0xff] %v5361_v30  ;;  %8840 = vst [vmem:[#allocation79_spill] sm:$0xff] %v5367_v44  ;;  %v1690_v34 = vmul.f32 %v5353_v46, %v5353_v46  ;;  %v1691_v0 = vmul.f32 %v5357_v23, %v5357_v23  ;;  %v1981_v6 = vadd.f32 %v1980_v17, %v1682_v58  ;;  %v8845_v46 = vld [vmem:[#allocation70_spill] sm:$0xff] }
 0x166   :  { %v1986_v3 = vadd.f32 %v1985_v28, %v1686_v2  ;;  %v5381_v22 = vsub.f32 %v8841_v33, %v5107_v13  ;;  %v1692_v36 = vmul.f32 %v5361_v30, %v5361_v30  ;;  %v5387_v25 = vsub.f32 %v8843_v55, %v5065_v12  ;;  %v8847_v13 = vld [vmem:[#allocation72_spill] sm:$0xff]  ;;  %v8851_v55 = vld [vmem:[#allocation74_spill] sm:$0xff] }
 0x167   :  { %v1991_v51 = vadd.f32 %v1690_v34, %v1689_v49  ;;  %v5391_v23 = vsub.f32 %v8845_v46, %v5065_v12  ;;  %1982 = vadd.xlane.f32.xlu0 %v1981_v6  ;;  %v1693_v2 = vmul.f32 %v5367_v44, %v5367_v44  ;;  %v5397_v16 = vsub.f32 %v8847_v13, %v5065_v12  ;;  %v8849_v34 = vld [vmem:[#allocation73_spill] sm:$0xff] }
 0x168   :  { %8842 = vst [vmem:[#allocation80_spill] sm:$0xff] %v5381_v22  ;;  %8844 = vst [vmem:[#allocation83_spill] sm:$0xff] %v5387_v25  ;;  %v1987_v58 = vadd.f32 %v1986_v3, %v1687_v56  ;;  %v5401_v17 = vsub.f32 %v8849_v34, %v5065_v12  ;;  %v5405_v49 = vsub.f32 %v8851_v55, %v5065_v12  ;;  %v5413_v33 = vmul.f32 0.0013020834, %v1114_v29  ;;  %v8857_v29 = vld [vmem:[#allocation88_spill] sm:$0xff] }
 0x169   :  { %8846 = vst [vmem:[#allocation69_spill] sm:$0xff] %v5391_v23  ;;  %8848 = vst [vmem:[#allocation70_spill] sm:$0xff] %v5397_v16  ;;  %v1992_v28 = vadd.f32 %v1991_v51, %v1691_v0  ;;  %v1695_v46 = vmul.f32 %v5387_v25, %v5387_v25  ;;  %v1696_v56 = vmul.f32 %v5391_v23, %v5391_v23  ;;  %v8853_v0 = vld [vmem:[#allocation77_spill] sm:$0xff]  ;;  %v1107_v23 = vpop.xlane.xlu0 %1106 }
 0x16a   :  { %8850 = vst [vmem:[#allocation72_spill] sm:$0xff] %v5401_v17  ;;  %8852 = vst [vmem:[#allocation73_spill] sm:$0xff] %v5405_v49  ;;  %v1988_v6 = vadd.f32 %v1987_v58, %v1688_v52  ;;  %v1694_v3 = vmul.f32 %v5381_v22, %v5381_v22  ;;  %v1697_v13 = vmul.f32 %v5397_v16, %v5397_v16  ;;  %v8855_v52 = vld [vmem:[#allocation87_spill] sm:$0xff] }
 0x16b   :  { %v1993_v51 = vadd.f32 %v1992_v28, %v1692_v36  ;;  %v5419_v34 = vsub.f32 %v8853_v0, %v5065_v12  ;;  %v1698_v55 = vmul.f32 %v5401_v17, %v5401_v17  ;;  %v1998_v25 = vadd.f32 %v1696_v56, %v1695_v46  ;;  %v8859_v36 = vld [vmem:[#allocation90_spill] sm:$0xff]  ;;  %v8861_v12 = vld [vmem:[#allocation91_spill] sm:$0xff] }
 0x16c   :  { %1989 = vadd.xlane.f32.xlu1 %v1988_v6  ;;  %v5425_v58 = vsub.f32 %v8855_v52, %v5167_v32  ;;  %v5429_v22 = vsub.f32 %v8857_v29, %v5167_v32  ;;  %v5433_v28 = vsub.f32 %v8859_v36, %v5167_v32  ;;  %v5437_v0 = vsub.f32 %v8861_v12, %v5167_v32  ;;  %v8863_v6 = vld [vmem:[#allocation92_spill] sm:$0xff]  ;;  %v8865_v29 = vld [vmem:[#allocation95_spill] sm:$0xff] }
 0x16d   :  { %8854 = vst [vmem:[#allocation74_spill] sm:$0xff] %v5419_v34  ;;  %v1994_v17 = vadd.f32 %v1993_v51, %v1693_v2  ;;  %v1699_v46 = vmul.f32 %v5405_v49, %v5405_v49  ;;  %v1999_v56 = vadd.f32 %v1998_v25, %v1697_v13  ;;  %v5443_v52 = vsub.f32 %v8863_v6, %v5167_v32 }
 0x16e   :  { %8856 = vst [vmem:[#allocation77_spill] sm:$0xff] %v5425_v58  ;;  %8858 = vst [vmem:[#allocation87_spill] sm:$0xff] %v5429_v22  ;;  %v5447_v16 = vsub.f32 %v8865_v29, %v5167_v32  ;;  %v1701_v36 = vmul.f32 %v5425_v58, %v5425_v58  ;;  %v1702_v12 = vmul.f32 %v5429_v22, %v5429_v22  ;;  %v5455_v49 = vmul.f32 0.0013020834, %v1107_v23  ;;  %v1128_v29 = vpop.xlane.xlu1 %1127  ;;  %v8867_v58 = vld [vmem:[#allocation81_spill] sm:$0xff]  ;;  %v8869_v22 = vld [vmem:[#allocation82_spill] sm:$0xff] }
 0x16f   :  { %8860 = vst [vmem:[#allocation88_spill] sm:$0xff] %v5433_v28  ;;  %8862 = vst [vmem:[#allocation90_spill] sm:$0xff] %v5437_v0  ;;  %v1703_v2 = vmul.f32 %v5433_v28, %v5433_v28  ;;  %v1995_v51 = vadd.f32 %v1994_v17, %v1694_v3  ;;  %v1700_v25 = vmul.f32 %v5419_v34, %v5419_v34  ;;  %v8871_v3 = vld [vmem:[#allocation84_spill] sm:$0xff] }
 0x170   :  { %8864 = vst [vmem:[#allocation91_spill] sm:$0xff] %v5443_v52  ;;  %8866 = vst [vmem:[#allocation92_spill] sm:$0xff] %v5447_v16  ;;  %v2000_v13 = vadd.f32 %v1999_v56, %v1698_v55  ;;  %v1704_v32 = vmul.f32 %v5437_v0, %v5437_v0  ;;  %v2005_v6 = vadd.f32 %v1702_v12, %v1701_v36  ;;  %v8873_v56 = vld [vmem:[#allocation85_spill] sm:$0xff] }
 0x171   :  { %v5463_v44 = vsub.f32 %v8867_v58, %v5141_v54  ;;  %v5467_v30 = vsub.f32 %v8869_v22, %v5141_v54  ;;  %1996 = vadd.xlane.f32.xlu0 %v1995_v51  ;;  %v1705_v17 = vmul.f32 %v5443_v52, %v5443_v52  ;;  %v5473_v55 = vsub.f32 %v8871_v3, %v5141_v54  ;;  %v1121_v52 = vpop.xlane.xlu0 %1120  ;;  %v8875_v3 = vld [vmem:[#allocation86_spill] sm:$0xff] }
 0x172   :  { %v2001_v23 = vadd.f32 %v2000_v13, %v1699_v46  ;;  %v5477_v36 = vsub.f32 %v8873_v56, %v5141_v54  ;;  %v1706_v58 = vmul.f32 %v5447_v16, %v5447_v16  ;;  %v2006_v12 = vadd.f32 %v2005_v6, %v1703_v2  ;;  %v8877_v2 = vld [vmem:[#allocation89_spill] sm:$0xff] }
 0x173   :  { %8868 = vst [vmem:[#allocation95_spill] sm:$0xff] %v5463_v44  ;;  %8870 = vst [vmem:[#allocation81_spill] sm:$0xff] %v5467_v30  ;;  %v1707_v22 = vmul.f32 %v5463_v44, %v5463_v44  ;;  %v1708_v46 = vmul.f32 %v5467_v30, %v5467_v30  ;;  %v5485_v13 = vmul.f32 0.0013020834, %v1128_v29  ;;  %v5489_v0 = vsub.f32 %v8875_v3, %v5141_v54 }
 0x174   :  { %8872 = vst [vmem:[#allocation82_spill] sm:$0xff] %v5473_v55  ;;  %8874 = vst [vmem:[#allocation84_spill] sm:$0xff] %v5477_v36  ;;  %v2002_v51 = vadd.f32 %v2001_v23, %v1700_v25  ;;  %v1709_v56 = vmul.f32 %v5473_v55, %v5473_v55  ;;  %v2007_v28 = vadd.f32 %v2006_v12, %v1704_v32  ;;  %v8879_v25 = vld [vmem:[#allocation99_spill] sm:$0xff]  ;;  %v8881_v23 = vld [vmem:[#allocation100_spill] sm:$0xff] }
 0x175   :  { %8876 = vst [vmem:[#allocation85_spill] sm:$0xff] %v5489_v0  ;;  %v5495_v6 = vsub.f32 %v8877_v2, %v5141_v54  ;;  %v1710_v44 = vmul.f32 %v5477_v36, %v5477_v36  ;;  %v2012_v30 = vadd.f32 %v1708_v46, %v1707_v22  ;;  %v5501_v29 = vsub.f32 %v8879_v25, %v5243_v37  ;;  %v8883_v55 = vld [vmem:[#allocation102_spill] sm:$0xff]  ;;  %v8885_v54 = vld [vmem:[#allocation103_spill] sm:$0xff]  ;;  %v8887_v46 = vld [vmem:[#allocation104_spill] sm:$0xff] }
 0x176   :  { %2003 = vadd.xlane.f32.xlu1 %v2002_v51  ;;  %v5505_v3 = vsub.f32 %v8881_v23, %v5243_v37  ;;  %v5509_v32 = vsub.f32 %v8883_v55, %v5243_v37  ;;  %v5513_v12 = vsub.f32 %v8885_v54, %v5243_v37  ;;  %v2008_v2 = vadd.f32 %v2007_v28, %v1705_v17  ;;  %v8889_v25 = vld [vmem:[#allocation107_spill] sm:$0xff]  ;;  %v1142_v54 = vpop.xlane.xlu1 %1141 }
 0x177   :  { %8878 = vst [vmem:[#allocation86_spill] sm:$0xff] %v5495_v6  ;;  %8880 = vst [vmem:[#allocation89_spill] sm:$0xff] %v5501_v29  ;;  %v5515_v36 = vmul.f32 0.0013020834, %v1121_v52  ;;  %v2013_v22 = vadd.f32 %v2012_v30, %v1709_v56  ;;  %v5519_v51 = vsub.f32 %v8887_v46, %v5243_v37  ;;  %v5523_v23 = vsub.f32 %v8889_v25, %v5243_v37  ;;  %v8891_v25 = vld [vmem:[#allocation93_spill] sm:$0xff] }
 0x178   :  { %8882 = vst [vmem:[#allocation99_spill] sm:$0xff] %v5505_v3  ;;  %8884 = vst [vmem:[#allocation100_spill] sm:$0xff] %v5509_v32  ;;  %v1713_v55 = vmul.f32 %v5501_v29, %v5501_v29  ;;  %v1714_v16 = vmul.f32 %v5505_v3, %v5505_v3  ;;  %v1715_v28 = vmul.f32 %v5509_v32, %v5509_v32  ;;  %v8893_v3 = vld [vmem:[#allocation94_spill] sm:$0xff] }
 0x179   :  { %8886 = vst [vmem:[#allocation102_spill] sm:$0xff] %v5513_v12  ;;  %8888 = vst [vmem:[#allocation103_spill] sm:$0xff] %v5519_v51  ;;  %v2009_v52 = vadd.f32 %v2008_v2, %v1706_v58  ;;  %v1711_v30 = vmul.f32 %v5489_v0, %v5489_v0  ;;  %v1712_v17 = vmul.f32 %v5495_v6, %v5495_v6  ;;  %v5557_v6 = vmul.f32 0.0013020834, %v1142_v54  ;;  %v1135_v0 = vpop.xlane.xlu0 %1134 }
 0x17a   :  { %8890 = vst [vmem:[#allocation104_spill] sm:$0xff] %v5523_v23  ;;  %v2014_v56 = vadd.f32 %v2013_v22, %v1710_v44  ;;  %v1716_v37 = vmul.f32 %v5513_v12, %v5513_v12  ;;  %v2019_v46 = vadd.f32 %v1714_v16, %v1713_v55  ;;  %v5539_v29 = vsub.f32 %v8891_v25, %v5197_v60  ;;  %v8895_v44 = vld [vmem:[#allocation96_spill] sm:$0xff]  ;;  %v8897_v12 = vld [vmem:[#allocation97_spill] sm:$0xff] }
 0x17b   :  { %v5543_v32 = vsub.f32 %v8893_v3, %v5197_v60  ;;  %2010 = vadd.xlane.f32.xlu0 %v2009_v52  ;;  %v1717_v2 = vmul.f32 %v5519_v51, %v5519_v51  ;;  %v5549_v22 = vsub.f32 %v8895_v44, %v5197_v60  ;;  %v5553_v16 = vsub.f32 %v8897_v12, %v5197_v60 }
 0x17c   :  { %8892 = vst [vmem:[#allocation107_spill] sm:$0xff] %v5539_v29  ;;  %v2015_v58 = vadd.f32 %v2014_v56, %v1711_v30  ;;  %v1718_v55 = vmul.f32 %v5523_v23, %v5523_v23  ;;  %v2020_v25 = vadd.f32 %v2019_v46, %v1715_v28  ;;  %v1719_v3 = vmul.f32 %v5539_v29, %v5539_v29  ;;  %v8899_v30 = vld [vmem:[#allocation98_spill] sm:$0xff]  ;;  %v8901_v28 = vld [vmem:[#allocation101_spill] sm:$0xff] }
 0x17d   :  { %8894 = vst [vmem:[#allocation93_spill] sm:$0xff] %v5543_v32  ;;  %8896 = vst [vmem:[#allocation94_spill] sm:$0xff] %v5549_v22  ;;  %v5563_v56 = vsub.f32 %v8899_v30, %v5197_v60  ;;  %v1720_v44 = vmul.f32 %v5543_v32, %v5543_v32  ;;  %v1721_v12 = vmul.f32 %v5549_v22, %v5549_v22  ;;  %v8905_v32 = vld [vmem:[#allocation112_spill] sm:$0xff] }
 0x17e   :  { %8898 = vst [vmem:[#allocation96_spill] sm:$0xff] %v5553_v16  ;;  %v2016_v52 = vadd.f32 %v2015_v58, %v1712_v17  ;;  %v2021_v51 = vadd.f32 %v2020_v25, %v1716_v37  ;;  %v5571_v54 = vsub.f32 %v8901_v28, %v5197_v60  ;;  %v1722_v46 = vmul.f32 %v5553_v16, %v5553_v16  ;;  %v8903_v17 = vld [vmem:[#allocation111_spill] sm:$0xff]  ;;  %v8907_v37 = vld [vmem:[#allocation114_spill] sm:$0xff]  ;;  %v8911_v16 = vld [vmem:[#allocation116_spill] sm:$0xff] }
 0x17f   :  { %8900 = vst [vmem:[#allocation97_spill] sm:$0xff] %v5563_v56  ;;  %v5577_v58 = vsub.f32 %v8903_v17, %v5319_v40  ;;  %v2026_v30 = vadd.f32 %v1720_v44, %v1719_v3  ;;  %v5581_v29 = vsub.f32 %v8905_v32, %v5319_v40  ;;  %v5585_v25 = vsub.f32 %v8907_v37, %v5319_v40  ;;  %v8909_v60 = vld [vmem:[#allocation115_spill] sm:$0xff] }
 0x180   :  { %8902 = vst [vmem:[#allocation98_spill] sm:$0xff] %v5571_v54  ;;  %2017 = vadd.xlane.f32.xlu1 %v2016_v52  ;;  %v5589_v28 = vsub.f32 %v8909_v60, %v5319_v40  ;;  %v2022_v22 = vadd.f32 %v2021_v51, %v1717_v2  ;;  %v5593_v23 = vsub.f32 %v8911_v16, %v5319_v40  ;;  %v8913_v52 = vld [vmem:[#allocation119_spill] sm:$0xff]  ;;  %v5601_v44 = vmul.f32 0.0013020834, %v1135_v0 }
 0x181   :  { %8904 = vst [vmem:[#allocation101_spill] sm:$0xff] %v5577_v58  ;;  %8906 = vst [vmem:[#allocation111_spill] sm:$0xff] %v5581_v29  ;;  %v5597_v3 = vsub.f32 %v8913_v52, %v5319_v40  ;;  %v1725_v32 = vmul.f32 %v5577_v58, %v5577_v58  ;;  %v2027_v17 = vadd.f32 %v2026_v30, %v1721_v12  ;;  %v1156_v52 = vpop.xlane.xlu1 %1155  ;;  %v8915_v12 = vld [vmem:[#allocation105_spill] sm:$0xff] }
 0x182   :  { %8908 = vst [vmem:[#allocation112_spill] sm:$0xff] %v5585_v25  ;;  %8910 = vst [vmem:[#allocation114_spill] sm:$0xff] %v5589_v28  ;;  %v1726_v37 = vmul.f32 %v5581_v29, %v5581_v29  ;;  %v1727_v51 = vmul.f32 %v5585_v25, %v5585_v25  ;;  %v2023_v2 = vadd.f32 %v2022_v22, %v1718_v55  ;;  %v8917_v29 = vld [vmem:[#allocation106_spill] sm:$0xff] }
 0x183   :  { %8912 = vst [vmem:[#allocation115_spill] sm:$0xff] %v5593_v23  ;;  %8914 = vst [vmem:[#allocation116_spill] sm:$0xff] %v5597_v3  ;;  %v1723_v16 = vmul.f32 %v5563_v56, %v5563_v56  ;;  %v1724_v40 = vmul.f32 %v5571_v54, %v5571_v54  ;;  %v1728_v60 = vmul.f32 %v5589_v28, %v5589_v28  ;;  %v8919_v28 = vld [vmem:[#allocation108_spill] sm:$0xff] }
 0x184   :  { %v2028_v0 = vadd.f32 %v2027_v17, %v1722_v46  ;;  %v2033_v58 = vadd.f32 %v1726_v37, %v1725_v32  ;;  %v5615_v30 = vsub.f32 %v8915_v12, %v5273_v27  ;;  %v5619_v25 = vsub.f32 %v8917_v29, %v5273_v27  ;;  %2024 = vadd.xlane.f32.xlu0 %v2023_v2  ;;  %v8921_v46 = vld [vmem:[#allocation109_spill] sm:$0xff]  ;;  %v8923_v2 = vld [vmem:[#allocation110_spill] sm:$0xff] }
 0x185   :  { %v1729_v22 = vmul.f32 %v5593_v23, %v5593_v23  ;;  %v1730_v55 = vmul.f32 %v5597_v3, %v5597_v3  ;;  %v5627_v54 = vsub.f32 %v8919_v28, %v5273_v27  ;;  %v5631_v32 = vsub.f32 %v8921_v46, %v5273_v27  ;;  %v8925_v3 = vld [vmem:[#allocation113_spill] sm:$0xff]  ;;  %v8927_v46 = vld [vmem:[#allocation123_spill] sm:$0xff] }
 0x186   :  { %8916 = vst [vmem:[#allocation119_spill] sm:$0xff] %v5615_v30  ;;  %8918 = vst [vmem:[#allocation105_spill] sm:$0xff] %v5619_v25  ;;  %v2029_v17 = vadd.f32 %v2028_v0, %v1723_v16  ;;  %v2034_v37 = vadd.f32 %v2033_v58, %v1727_v51  ;;  %v5633_v12 = vmul.f32 0.0013020834, %v1156_v52  ;;  %v1731_v29 = vmul.f32 %v5615_v30, %v5615_v30  ;;  %v1149_v52 = vpop.xlane.xlu0 %1148 }
 0x187   :  { %8920 = vst [vmem:[#allocation106_spill] sm:$0xff] %v5627_v54  ;;  %8922 = vst [vmem:[#allocation108_spill] sm:$0xff] %v5631_v32  ;;  %v5639_v23 = vsub.f32 %v8923_v2, %v5273_v27  ;;  %v5643_v56 = vsub.f32 %v8925_v3, %v5273_v27  ;;  %v1732_v28 = vmul.f32 %v5619_v25, %v5619_v25  ;;  %v8929_v27 = vld [vmem:[#allocation124_spill] sm:$0xff]  ;;  %v8931_v25 = vld [vmem:[#allocation126_spill] sm:$0xff] }
 0x188   :  { %v1733_v16 = vmul.f32 %v5627_v54, %v5627_v54  ;;  %v2030_v58 = vadd.f32 %v2029_v17, %v1724_v40  ;;  %v2035_v51 = vadd.f32 %v2034_v37, %v1728_v60  ;;  %v1734_v0 = vmul.f32 %v5631_v32, %v5631_v32  ;;  %v8933_v40 = vld [vmem:[#allocation127_spill] sm:$0xff]  ;;  %v8935_v37 = vld [vmem:[#allocation128_spill] sm:$0xff] }
 0x189   :  { %8924 = vst [vmem:[#allocation109_spill] sm:$0xff] %v5639_v23  ;;  %8926 = vst [vmem:[#allocation110_spill] sm:$0xff] %v5643_v56  ;;  %v5653_v2 = vsub.f32 %v8927_v46, %v5377_v21  ;;  %v2040_v30 = vadd.f32 %v1732_v28, %v1731_v29  ;;  %v5657_v3 = vsub.f32 %v8929_v27, %v5377_v21  ;;  %v8937_v29 = vld [vmem:[#allocation131_spill] sm:$0xff]  ;;  %v5677_v27 = vmul.f32 0.0013020834, %v1149_v52 }
 0x18a   :  { %v5661_v34 = vsub.f32 %v8931_v25, %v5377_v21  ;;  %v5665_v60 = vsub.f32 %v8933_v40, %v5377_v21  ;;  %2031 = vadd.xlane.f32.xlu1 %v2030_v58  ;;  %v2036_v17 = vadd.f32 %v2035_v51, %v1729_v22  ;;  %v5669_v32 = vsub.f32 %v8935_v37, %v5377_v21 }
 0x18b   :  { %8928 = vst [vmem:[#allocation113_spill] sm:$0xff] %v5653_v2  ;;  %8930 = vst [vmem:[#allocation123_spill] sm:$0xff] %v5657_v3  ;;  %v5673_v28 = vsub.f32 %v8937_v29, %v5377_v21  ;;  %v1737_v46 = vmul.f32 %v5653_v2, %v5653_v2  ;;  %v2041_v25 = vadd.f32 %v2040_v30, %v1733_v16  ;;  %v1170_v29 = vpop.xlane.xlu1 %1169 }
 0x18c   :  { %8932 = vst [vmem:[#allocation124_spill] sm:$0xff] %v5661_v34  ;;  %8934 = vst [vmem:[#allocation126_spill] sm:$0xff] %v5665_v60  ;;  %v1738_v40 = vmul.f32 %v5657_v3, %v5657_v3  ;;  %v1739_v22 = vmul.f32 %v5661_v34, %v5661_v34  ;;  %v2037_v58 = vadd.f32 %v2036_v17, %v1730_v55  ;;  %v8939_v3 = vld [vmem:[#allocation117_spill] sm:$0xff]  ;;  %v8941_v17 = vld [vmem:[#allocation118_spill] sm:$0xff] }
 0x18d   :  { %8936 = vst [vmem:[#allocation127_spill] sm:$0xff] %v5669_v32  ;;  %8938 = vst [vmem:[#allocation128_spill] sm:$0xff] %v5673_v28  ;;  %v1735_v51 = vmul.f32 %v5639_v23, %v5639_v23  ;;  %v1736_v21 = vmul.f32 %v5643_v56, %v5643_v56  ;;  %v1740_v37 = vmul.f32 %v5665_v60, %v5665_v60  ;;  %v8943_v60 = vld [vmem:[#allocation120_spill] sm:$0xff] }
 0x18e   :  { %v2042_v52 = vadd.f32 %v2041_v25, %v1734_v0  ;;  %v1741_v30 = vmul.f32 %v5669_v32, %v5669_v32  ;;  %v2047_v16 = vadd.f32 %v1738_v40, %v1737_v46  ;;  %v5693_v2 = vsub.f32 %v8939_v3, %v5349_v19  ;;  %2038 = vadd.xlane.f32.xlu0 %v2037_v58  ;;  %v8945_v0 = vld [vmem:[#allocation121_spill] sm:$0xff] }
 0x18f   :  { %v1742_v55 = vmul.f32 %v5673_v28, %v5673_v28  ;;  %v5699_v34 = vsub.f32 %v8941_v17, %v5349_v19  ;;  %v5703_v56 = vsub.f32 %v8943_v60, %v5349_v19  ;;  %v5707_v25 = vsub.f32 %v8945_v0, %v5349_v19  ;;  %v8947_v28 = vld [vmem:[#allocation122_spill] sm:$0xff]  ;;  %v8949_v17 = vld [vmem:[#allocation125_spill] sm:$0xff]  ;;  %v8951_v0 = vld [vmem:[#allocation135_spill] sm:$0xff] }
 0x190   :  { %8940 = vst [vmem:[#allocation131_spill] sm:$0xff] %v5693_v2  ;;  %v2043_v46 = vadd.f32 %v2042_v52, %v1735_v51  ;;  %v2048_v40 = vadd.f32 %v2047_v16, %v1739_v22  ;;  %v5709_v3 = vmul.f32 0.0013020834, %v1170_v29  ;;  %v1743_v58 = vmul.f32 %v5693_v2, %v5693_v2  ;;  %v1163_v52 = vpop.xlane.xlu0 %1162 }
 0x191   :  { %8942 = vst [vmem:[#allocation117_spill] sm:$0xff] %v5699_v34  ;;  %8944 = vst [vmem:[#allocation118_spill] sm:$0xff] %v5703_v56  ;;  %v5715_v32 = vsub.f32 %v8947_v28, %v5349_v19  ;;  %v5719_v23 = vsub.f32 %v8949_v17, %v5349_v19  ;;  %v1744_v60 = vmul.f32 %v5699_v34, %v5699_v34  ;;  %v8953_v19 = vld [vmem:[#allocation136_spill] sm:$0xff]  ;;  %v8955_v34 = vld [vmem:[#allocation138_spill] sm:$0xff] }
 0x192   :  { %8946 = vst [vmem:[#allocation120_spill] sm:$0xff] %v5707_v25  ;;  %v1745_v51 = vmul.f32 %v5703_v56, %v5703_v56  ;;  %v2044_v22 = vadd.f32 %v2043_v46, %v1736_v21  ;;  %v2049_v29 = vadd.f32 %v2048_v40, %v1740_v37  ;;  %v1746_v16 = vmul.f32 %v5707_v25, %v5707_v25  ;;  %v8957_v21 = vld [vmem:[#allocation139_spill] sm:$0xff]  ;;  %v8959_v40 = vld [vmem:[#allocation140_spill] sm:$0xff] }
 0x193   :  { %8948 = vst [vmem:[#allocation121_spill] sm:$0xff] %v5715_v32  ;;  %8950 = vst [vmem:[#allocation122_spill] sm:$0xff] %v5719_v23  ;;  %v5729_v28 = vsub.f32 %v8951_v0, %v5455_v49  ;;  %v2054_v2 = vadd.f32 %v1744_v60, %v1743_v58  ;;  %v5733_v17 = vsub.f32 %v8953_v19, %v5455_v49  ;;  %v8961_v58 = vld [vmem:[#allocation143_spill] sm:$0xff]  ;;  %v5753_v19 = vmul.f32 0.0013020834, %v1163_v52 }
 0x194   :  { %v5737_v54 = vsub.f32 %v8955_v34, %v5455_v49  ;;  %v5741_v37 = vsub.f32 %v8957_v21, %v5455_v49  ;;  %2045 = vadd.xlane.f32.xlu1 %v2044_v22  ;;  %v2050_v46 = vadd.f32 %v2049_v29, %v1741_v30  ;;  %v5745_v25 = vsub.f32 %v8959_v40, %v5455_v49 }
 0x195   :  { %8952 = vst [vmem:[#allocation125_spill] sm:$0xff] %v5729_v28  ;;  %8954 = vst [vmem:[#allocation135_spill] sm:$0xff] %v5733_v17  ;;  %v5749_v60 = vsub.f32 %v8961_v58, %v5455_v49  ;;  %v1749_v0 = vmul.f32 %v5729_v28, %v5729_v28  ;;  %v2055_v34 = vadd.f32 %v2054_v2, %v1745_v51  ;;  %v1184_v58 = vpop.xlane.xlu1 %1183 }
 0x196   :  { %8956 = vst [vmem:[#allocation136_spill] sm:$0xff] %v5737_v54  ;;  %8958 = vst [vmem:[#allocation138_spill] sm:$0xff] %v5741_v37  ;;  %v1750_v21 = vmul.f32 %v5733_v17, %v5733_v17  ;;  %v1751_v30 = vmul.f32 %v5737_v54, %v5737_v54  ;;  %v2051_v22 = vadd.f32 %v2050_v46, %v1742_v55  ;;  %v8963_v17 = vld [vmem:[#allocation129_spill] sm:$0xff]  ;;  %v8965_v46 = vld [vmem:[#allocation130_spill] sm:$0xff] }
 0x197   :  { %8960 = vst [vmem:[#allocation139_spill] sm:$0xff] %v5745_v25  ;;  %8962 = vst [vmem:[#allocation140_spill] sm:$0xff] %v5749_v60  ;;  %v1747_v29 = vmul.f32 %v5715_v32, %v5715_v32  ;;  %v1748_v49 = vmul.f32 %v5719_v23, %v5719_v23  ;;  %v1752_v40 = vmul.f32 %v5741_v37, %v5741_v37  ;;  %v8967_v37 = vld [vmem:[#allocation132_spill] sm:$0xff] }
 0x198   :  { %v2056_v52 = vadd.f32 %v2055_v34, %v1746_v16  ;;  %v1753_v2 = vmul.f32 %v5745_v25, %v5745_v25  ;;  %v2061_v51 = vadd.f32 %v1750_v21, %v1749_v0  ;;  %v5769_v28 = vsub.f32 %v8963_v17, %v5413_v33  ;;  %2052 = vadd.xlane.f32.xlu0 %v2051_v22  ;;  %v8969_v16 = vld [vmem:[#allocation133_spill] sm:$0xff] }
 0x199   :  { %v1754_v55 = vmul.f32 %v5749_v60, %v5749_v60  ;;  %v5775_v54 = vsub.f32 %v8965_v46, %v5413_v33  ;;  %v5779_v23 = vsub.f32 %v8967_v37, %v5413_v33  ;;  %v5783_v34 = vsub.f32 %v8969_v16, %v5413_v33  ;;  %v8971_v60 = vld [vmem:[#allocation134_spill] sm:$0xff]  ;;  %v8973_v46 = vld [vmem:[#allocation137_spill] sm:$0xff]  ;;  %v8975_v16 = vld [vmem:[#allocation147_spill] sm:$0xff] }
 0x19a   :  { %8964 = vst [vmem:[#allocation143_spill] sm:$0xff] %v5769_v28  ;;  %v2057_v0 = vadd.f32 %v2056_v52, %v1747_v29  ;;  %v2062_v21 = vadd.f32 %v2061_v51, %v1751_v30  ;;  %v5785_v17 = vmul.f32 0.0013020834, %v1184_v58  ;;  %v1755_v22 = vmul.f32 %v5769_v28, %v5769_v28  ;;  %v1177_v52 = vpop.xlane.xlu0 %1176 }
 0x19b   :  { %8966 = vst [vmem:[#allocation129_spill] sm:$0xff] %v5775_v54  ;;  %8968 = vst [vmem:[#allocation130_spill] sm:$0xff] %v5779_v23  ;;  %v5791_v25 = vsub.f32 %v8971_v60, %v5413_v33  ;;  %v5795_v32 = vsub.f32 %v8973_v46, %v5413_v33  ;;  %v1756_v37 = vmul.f32 %v5775_v54, %v5775_v54  ;;  %v8977_v33 = vld [vmem:[#allocation148_spill] sm:$0xff]  ;;  %v8979_v54 = vld [vmem:[#allocation150_spill] sm:$0xff] }
 0x19c   :  { %8970 = vst [vmem:[#allocation132_spill] sm:$0xff] %v5783_v34  ;;  %v1757_v29 = vmul.f32 %v5779_v23, %v5779_v23  ;;  %v2058_v30 = vadd.f32 %v2057_v0, %v1748_v49  ;;  %v2063_v58 = vadd.f32 %v2062_v21, %v1752_v40  ;;  %v1758_v51 = vmul.f32 %v5783_v34, %v5783_v34  ;;  %v8981_v49 = vld [vmem:[#allocation151_spill] sm:$0xff]  ;;  %v8983_v21 = vld [vmem:[#allocation152_spill] sm:$0xff] }
 0x19d   :  { %8972 = vst [vmem:[#allocation133_spill] sm:$0xff] %v5791_v25  ;;  %8974 = vst [vmem:[#allocation134_spill] sm:$0xff] %v5795_v32  ;;  %v5805_v60 = vsub.f32 %v8975_v16, %v5515_v36  ;;  %v2068_v28 = vadd.f32 %v1756_v37, %v1755_v22  ;;  %v5809_v46 = vsub.f32 %v8977_v33, %v5515_v36  ;;  %v8985_v22 = vld [vmem:[#allocation155_spill] sm:$0xff]  ;;  %v5829_v33 = vmul.f32 0.0013020834, %v1177_v52 }
 0x19e   :  { %v5813_v56 = vsub.f32 %v8979_v54, %v5515_v36  ;;  %v5817_v40 = vsub.f32 %v8981_v49, %v5515_v36  ;;  %2059 = vadd.xlane.f32.xlu1 %v2058_v30  ;;  %v2064_v0 = vadd.f32 %v2063_v58, %v1753_v2  ;;  %v5821_v34 = vsub.f32 %v8983_v21, %v5515_v36 }
 0x19f   :  { %8976 = vst [vmem:[#allocation137_spill] sm:$0xff] %v5805_v60  ;;  %8978 = vst [vmem:[#allocation147_spill] sm:$0xff] %v5809_v46  ;;  %v5825_v37 = vsub.f32 %v8985_v22, %v5515_v36  ;;  %v1761_v16 = vmul.f32 %v5805_v60, %v5805_v60  ;;  %v2069_v54 = vadd.f32 %v2068_v28, %v1757_v29  ;;  %v1198_v22 = vpop.xlane.xlu1 %1197 }
 0x1a0   :  { %8980 = vst [vmem:[#allocation148_spill] sm:$0xff] %v5813_v56  ;;  %8982 = vst [vmem:[#allocation150_spill] sm:$0xff] %v5817_v40  ;;  %v1762_v49 = vmul.f32 %v5809_v46, %v5809_v46  ;;  %v1763_v2 = vmul.f32 %v5813_v56, %v5813_v56  ;;  %v2065_v30 = vadd.f32 %v2064_v0, %v1754_v55  ;;  %v8987_v46 = vld [vmem:[#allocation141_spill] sm:$0xff]  ;;  %v8989_v0 = vld [vmem:[#allocation142_spill] sm:$0xff] }
 0x1a1   :  { %8984 = vst [vmem:[#allocation151_spill] sm:$0xff] %v5821_v34  ;;  %8986 = vst [vmem:[#allocation152_spill] sm:$0xff] %v5825_v37  ;;  %v1759_v58 = vmul.f32 %v5791_v25, %v5791_v25  ;;  %v1760_v36 = vmul.f32 %v5795_v32, %v5795_v32  ;;  %v1764_v21 = vmul.f32 %v5817_v40, %v5817_v40  ;;  %v8991_v40 = vld [vmem:[#allocation144_spill] sm:$0xff] }
 0x1a2   :  { %v2070_v52 = vadd.f32 %v2069_v54, %v1758_v51  ;;  %v1765_v28 = vmul.f32 %v5821_v34, %v5821_v34  ;;  %v2075_v29 = vadd.f32 %v1762_v49, %v1761_v16  ;;  %v5845_v60 = vsub.f32 %v8987_v46, %v5485_v13  ;;  %2066 = vadd.xlane.f32.xlu0 %v2065_v30  ;;  %v8993_v51 = vld [vmem:[#allocation145_spill] sm:$0xff] }
 0x1a3   :  { %v1766_v55 = vmul.f32 %v5825_v37, %v5825_v37  ;;  %v5851_v56 = vsub.f32 %v8989_v0, %v5485_v13  ;;  %v5855_v32 = vsub.f32 %v8991_v40, %v5485_v13  ;;  %v5859_v54 = vsub.f32 %v8993_v51, %v5485_v13  ;;  %v8995_v37 = vld [vmem:[#allocation146_spill] sm:$0xff]  ;;  %v8997_v0 = vld [vmem:[#allocation149_spill] sm:$0xff]  ;;  %v8999_v51 = vld [vmem:[#allocation159_spill] sm:$0xff] }
 0x1a4   :  { %8988 = vst [vmem:[#allocation155_spill] sm:$0xff] %v5845_v60  ;;  %v2071_v16 = vadd.f32 %v2070_v52, %v1759_v58  ;;  %v2076_v49 = vadd.f32 %v2075_v29, %v1763_v2  ;;  %v5861_v46 = vmul.f32 0.0013020834, %v1198_v22  ;;  %v1767_v30 = vmul.f32 %v5845_v60, %v5845_v60  ;;  %v1191_v52 = vpop.xlane.xlu0 %1190 }
 0x1a5   :  { %8990 = vst [vmem:[#allocation141_spill] sm:$0xff] %v5851_v56  ;;  %8992 = vst [vmem:[#allocation142_spill] sm:$0xff] %v5855_v32  ;;  %v5867_v34 = vsub.f32 %v8995_v37, %v5485_v13  ;;  %v5871_v25 = vsub.f32 %v8997_v0, %v5485_v13  ;;  %v1768_v40 = vmul.f32 %v5851_v56, %v5851_v56  ;;  %v9001_v13 = vld [vmem:[#allocation160_spill] sm:$0xff]  ;;  %v9003_v56 = vld [vmem:[#allocation162_spill] sm:$0xff] }
 0x1a6   :  { %8994 = vst [vmem:[#allocation144_spill] sm:$0xff] %v5859_v54  ;;  %v1769_v58 = vmul.f32 %v5855_v32, %v5855_v32  ;;  %v2072_v2 = vadd.f32 %v2071_v16, %v1760_v36  ;;  %v2077_v22 = vadd.f32 %v2076_v49, %v1764_v21  ;;  %v1770_v29 = vmul.f32 %v5859_v54, %v5859_v54  ;;  %v9005_v36 = vld [vmem:[#allocation163_spill] sm:$0xff]  ;;  %v9007_v49 = vld [vmem:[#allocation164_spill] sm:$0xff] }
 0x1a7   :  { %8996 = vst [vmem:[#allocation145_spill] sm:$0xff] %v5867_v34  ;;  %8998 = vst [vmem:[#allocation146_spill] sm:$0xff] %v5871_v25  ;;  %v5881_v37 = vsub.f32 %v8999_v51, %v5601_v44  ;;  %v2082_v60 = vadd.f32 %v1768_v40, %v1767_v30  ;;  %v5885_v0 = vsub.f32 %v9001_v13, %v5601_v44  ;;  %v9009_v30 = vld [vmem:[#allocation167_spill] sm:$0xff]  ;;  %v5905_v13 = vmul.f32 0.0013020834, %v1191_v52 }
 0x1a8   :  { %v5889_v23 = vsub.f32 %v9003_v56, %v5601_v44  ;;  %v5893_v21 = vsub.f32 %v9005_v36, %v5601_v44  ;;  %2073 = vadd.xlane.f32.xlu1 %v2072_v2  ;;  %v2078_v16 = vadd.f32 %v2077_v22, %v1765_v28  ;;  %v5897_v54 = vsub.f32 %v9007_v49, %v5601_v44 }
 0x1a9   :  { %9000 = vst [vmem:[#allocation149_spill] sm:$0xff] %v5881_v37  ;;  %9002 = vst [vmem:[#allocation159_spill] sm:$0xff] %v5885_v0  ;;  %v5901_v40 = vsub.f32 %v9009_v30, %v5601_v44  ;;  %v1773_v51 = vmul.f32 %v5881_v37, %v5881_v37  ;;  %v2083_v56 = vadd.f32 %v2082_v60, %v1769_v58  ;;  %v1212_v30 = vpop.xlane.xlu1 %1211 }
 0x1aa   :  { %9004 = vst [vmem:[#allocation160_spill] sm:$0xff] %v5889_v23  ;;  %9006 = vst [vmem:[#allocation162_spill] sm:$0xff] %v5893_v21  ;;  %v1774_v36 = vmul.f32 %v5885_v0, %v5885_v0  ;;  %v1775_v28 = vmul.f32 %v5889_v23, %v5889_v23  ;;  %v2079_v2 = vadd.f32 %v2078_v16, %v1766_v55  ;;  %v9011_v0 = vld [vmem:[#allocation153_spill] sm:$0xff]  ;;  %v9013_v16 = vld [vmem:[#allocation154_spill] sm:$0xff] }
 0x1ab   :  { %9008 = vst [vmem:[#allocation163_spill] sm:$0xff] %v5897_v54  ;;  %9010 = vst [vmem:[#allocation164_spill] sm:$0xff] %v5901_v40  ;;  %v1771_v22 = vmul.f32 %v5867_v34, %v5867_v34  ;;  %v1772_v44 = vmul.f32 %v5871_v25, %v5871_v25  ;;  %v1776_v49 = vmul.f32 %v5893_v21, %v5893_v21  ;;  %v9015_v21 = vld [vmem:[#allocation156_spill] sm:$0xff] }
 0x1ac   :  { %v2084_v52 = vadd.f32 %v2083_v56, %v1770_v29  ;;  %v1777_v60 = vmul.f32 %v5897_v54, %v5897_v54  ;;  %v2089_v58 = vadd.f32 %v1774_v36, %v1773_v51  ;;  %v5921_v37 = vsub.f32 %v9011_v0, %v5557_v6  ;;  %2080 = vadd.xlane.f32.xlu0 %v2079_v2  ;;  %v9017_v29 = vld [vmem:[#allocation157_spill] sm:$0xff] }
 0x1ad   :  { %v1778_v55 = vmul.f32 %v5901_v40, %v5901_v40  ;;  %v5927_v23 = vsub.f32 %v9013_v16, %v5557_v6  ;;  %v5931_v25 = vsub.f32 %v9015_v21, %v5557_v6  ;;  %v5935_v56 = vsub.f32 %v9017_v29, %v5557_v6  ;;  %v9019_v40 = vld [vmem:[#allocation158_spill] sm:$0xff]  ;;  %v9021_v16 = vld [vmem:[#allocation161_spill] sm:$0xff]  ;;  %v9023_v29 = vld [vmem:[#allocation171_spill] sm:$0xff] }
 0x1ae   :  { %9012 = vst [vmem:[#allocation167_spill] sm:$0xff] %v5921_v37  ;;  %v2085_v51 = vadd.f32 %v2084_v52, %v1771_v22  ;;  %v2090_v36 = vadd.f32 %v2089_v58, %v1775_v28  ;;  %v5937_v0 = vmul.f32 0.0013020834, %v1212_v30  ;;  %v1779_v2 = vmul.f32 %v5921_v37, %v5921_v37  ;;  %v1205_v52 = vpop.xlane.xlu0 %1204 }
 0x1af   :  { %9014 = vst [vmem:[#allocation153_spill] sm:$0xff] %v5927_v23  ;;  %9016 = vst [vmem:[#allocation154_spill] sm:$0xff] %v5931_v25  ;;  %v5943_v54 = vsub.f32 %v9019_v40, %v5557_v6  ;;  %v5947_v34 = vsub.f32 %v9021_v16, %v5557_v6  ;;  %v1780_v21 = vmul.f32 %v5927_v23, %v5927_v23  ;;  %v9025_v6 = vld [vmem:[#allocation172_spill] sm:$0xff]  ;;  %v9027_v23 = vld [vmem:[#allocation174_spill] sm:$0xff] }
 0x1b0   :  { %9018 = vst [vmem:[#allocation156_spill] sm:$0xff] %v5935_v56  ;;  %v1781_v22 = vmul.f32 %v5931_v25, %v5931_v25  ;;  %v2086_v28 = vadd.f32 %v2085_v51, %v1772_v44  ;;  %v2091_v30 = vadd.f32 %v2090_v36, %v1776_v49  ;;  %v1782_v58 = vmul.f32 %v5935_v56, %v5935_v56  ;;  %v9029_v44 = vld [vmem:[#allocation175_spill] sm:$0xff]  ;;  %v9031_v36 = vld [vmem:[#allocation176_spill] sm:$0xff] }
 0x1b1   :  { %9020 = vst [vmem:[#allocation157_spill] sm:$0xff] %v5943_v54  ;;  %9022 = vst [vmem:[#allocation158_spill] sm:$0xff] %v5947_v34  ;;  %v5957_v40 = vsub.f32 %v9023_v29, %v5677_v27  ;;  %v2096_v37 = vadd.f32 %v1780_v21, %v1779_v2  ;;  %v5961_v16 = vsub.f32 %v9025_v6, %v5677_v27  ;;  %v9033_v2 = vld [vmem:[#allocation179_spill] sm:$0xff]  ;;  %v5981_v6 = vmul.f32 0.0013020834, %v1205_v52 }
 0x1b2   :  { %v5965_v32 = vsub.f32 %v9027_v23, %v5677_v27  ;;  %v5969_v49 = vsub.f32 %v9029_v44, %v5677_v27  ;;  %2087 = vadd.xlane.f32.xlu1 %v2086_v28  ;;  %v2092_v51 = vadd.f32 %v2091_v30, %v1777_v60  ;;  %v5973_v56 = vsub.f32 %v9031_v36, %v5677_v27 }
 0x1b3   :  { %9024 = vst [vmem:[#allocation161_spill] sm:$0xff] %v5957_v40  ;;  %9026 = vst [vmem:[#allocation171_spill] sm:$0xff] %v5961_v16  ;;  %v5977_v21 = vsub.f32 %v9033_v2, %v5677_v27  ;;  %v1785_v29 = vmul.f32 %v5957_v40, %v5957_v40  ;;  %v2097_v23 = vadd.f32 %v2096_v37, %v1781_v22  ;;  %v1226_v2 = vpop.xlane.xlu1 %1225 }
 0x1b4   :  { %9028 = vst [vmem:[#allocation172_spill] sm:$0xff] %v5965_v32  ;;  %9030 = vst [vmem:[#allocation174_spill] sm:$0xff] %v5969_v49  ;;  %v1786_v44 = vmul.f32 %v5961_v16, %v5961_v16  ;;  %v1787_v60 = vmul.f32 %v5965_v32, %v5965_v32  ;;  %v2093_v28 = vadd.f32 %v2092_v51, %v1778_v55  ;;  %v9035_v16 = vld [vmem:[#allocation165_spill] sm:$0xff]  ;;  %v9037_v51 = vld [vmem:[#allocation166_spill] sm:$0xff] }
 0x1b5   :  { %9032 = vst [vmem:[#allocation175_spill] sm:$0xff] %v5973_v56  ;;  %9034 = vst [vmem:[#allocation176_spill] sm:$0xff] %v5977_v21  ;;  %v1783_v30 = vmul.f32 %v5943_v54, %v5943_v54  ;;  %v1784_v27 = vmul.f32 %v5947_v34, %v5947_v34  ;;  %v1788_v36 = vmul.f32 %v5969_v49, %v5969_v49  ;;  %v9039_v49 = vld [vmem:[#allocation168_spill] sm:$0xff] }
 0x1b6   :  { %v2098_v52 = vadd.f32 %v2097_v23, %v1782_v58  ;;  %v1789_v37 = vmul.f32 %v5973_v56, %v5973_v56  ;;  %v2103_v22 = vadd.f32 %v1786_v44, %v1785_v29  ;;  %v5997_v40 = vsub.f32 %v9035_v16, %v5633_v12  ;;  %2094 = vadd.xlane.f32.xlu0 %v2093_v28  ;;  %v9041_v58 = vld [vmem:[#allocation169_spill] sm:$0xff] }
 0x1b7   :  { %v1790_v55 = vmul.f32 %v5977_v21, %v5977_v21  ;;  %v6003_v32 = vsub.f32 %v9037_v51, %v5633_v12  ;;  %v6007_v34 = vsub.f32 %v9039_v49, %v5633_v12  ;;  %v6011_v23 = vsub.f32 %v9041_v58, %v5633_v12  ;;  %v9043_v21 = vld [vmem:[#allocation170_spill] sm:$0xff]  ;;  %v9045_v51 = vld [vmem:[#allocation173_spill] sm:$0xff]  ;;  %v9047_v58 = vld [vmem:[#allocation183_spill] sm:$0xff] }
 0x1b8   :  { %9036 = vst [vmem:[#allocation179_spill] sm:$0xff] %v5997_v40  ;;  %v2099_v29 = vadd.f32 %v2098_v52, %v1783_v30  ;;  %v2104_v44 = vadd.f32 %v2103_v22, %v1787_v60  ;;  %v6013_v16 = vmul.f32 0.0013020834, %v1226_v2  ;;  %v1791_v28 = vmul.f32 %v5997_v40, %v5997_v40  ;;  %v1219_v52 = vpop.xlane.xlu0 %1218 }
 0x1b9   :  { %9038 = vst [vmem:[#allocation165_spill] sm:$0xff] %v6003_v32  ;;  %9040 = vst [vmem:[#allocation166_spill] sm:$0xff] %v6007_v34  ;;  %v6019_v56 = vsub.f32 %v9043_v21, %v5633_v12  ;;  %v6023_v54 = vsub.f32 %v9045_v51, %v5633_v12  ;;  %v1792_v49 = vmul.f32 %v6003_v32, %v6003_v32  ;;  %v9049_v12 = vld [vmem:[#allocation184_spill] sm:$0xff]  ;;  %v9051_v32 = vld [vmem:[#allocation186_spill] sm:$0xff] }
 0x1ba   :  { %9042 = vst [vmem:[#allocation168_spill] sm:$0xff] %v6011_v23  ;;  %v1793_v30 = vmul.f32 %v6007_v34, %v6007_v34  ;;  %v2100_v60 = vadd.f32 %v2099_v29, %v1784_v27  ;;  %v2105_v2 = vadd.f32 %v2104_v44, %v1788_v36  ;;  %v1794_v22 = vmul.f32 %v6011_v23, %v6011_v23  ;;  %v9053_v27 = vld [vmem:[#allocation187_spill] sm:$0xff]  ;;  %v9055_v44 = vld [vmem:[#allocation188_spill] sm:$0xff] }
 0x1bb   :  { %9044 = vst [vmem:[#allocation169_spill] sm:$0xff] %v6019_v56  ;;  %9046 = vst [vmem:[#allocation170_spill] sm:$0xff] %v6023_v54  ;;  %v6033_v21 = vsub.f32 %v9047_v58, %v5753_v19  ;;  %v2110_v40 = vadd.f32 %v1792_v49, %v1791_v28  ;;  %v6037_v51 = vsub.f32 %v9049_v12, %v5753_v19  ;;  %v9057_v28 = vld [vmem:[#allocation191_spill] sm:$0xff]  ;;  %v6057_v12 = vmul.f32 0.0013020834, %v1219_v52 }
 0x1bc   :  { %v6041_v25 = vsub.f32 %v9051_v32, %v5753_v19  ;;  %v6045_v36 = vsub.f32 %v9053_v27, %v5753_v19  ;;  %2101 = vadd.xlane.f32.xlu1 %v2100_v60  ;;  %v2106_v29 = vadd.f32 %v2105_v2, %v1789_v37  ;;  %v6049_v23 = vsub.f32 %v9055_v44, %v5753_v19 }
 0x1bd   :  { %9048 = vst [vmem:[#allocation173_spill] sm:$0xff] %v6033_v21  ;;  %9050 = vst [vmem:[#allocation183_spill] sm:$0xff] %v6037_v51  ;;  %v6053_v49 = vsub.f32 %v9057_v28, %v5753_v19  ;;  %v1797_v58 = vmul.f32 %v6033_v21, %v6033_v21  ;;  %v2111_v32 = vadd.f32 %v2110_v40, %v1793_v30  ;;  %v1240_v28 = vpop.xlane.xlu1 %1239 }
 0x1be   :  { %9052 = vst [vmem:[#allocation184_spill] sm:$0xff] %v6041_v25  ;;  %9054 = vst [vmem:[#allocation186_spill] sm:$0xff] %v6045_v36  ;;  %v1798_v27 = vmul.f32 %v6037_v51, %v6037_v51  ;;  %v1799_v37 = vmul.f32 %v6041_v25, %v6041_v25  ;;  %v2107_v60 = vadd.f32 %v2106_v29, %v1790_v55  ;;  %v9059_v51 = vld [vmem:[#allocation177_spill] sm:$0xff]  ;;  %v9061_v29 = vld [vmem:[#allocation178_spill] sm:$0xff] }
 0x1bf   :  { %9056 = vst [vmem:[#allocation187_spill] sm:$0xff] %v6049_v23  ;;  %9058 = vst [vmem:[#allocation188_spill] sm:$0xff] %v6053_v49  ;;  %v1795_v2 = vmul.f32 %v6019_v56, %v6019_v56  ;;  %v1796_v19 = vmul.f32 %v6023_v54, %v6023_v54  ;;  %v1800_v44 = vmul.f32 %v6045_v36, %v6045_v36  ;;  %v9063_v36 = vld [vmem:[#allocation180_spill] sm:$0xff] }
 0x1c0   :  { %v2112_v52 = vadd.f32 %v2111_v32, %v1794_v22  ;;  %v1801_v40 = vmul.f32 %v6049_v23, %v6049_v23  ;;  %v2117_v30 = vadd.f32 %v1798_v27, %v1797_v58  ;;  %v6073_v21 = vsub.f32 %v9059_v51, %v5709_v3  ;;  %2108 = vadd.xlane.f32.xlu0 %v2107_v60  ;;  %v9065_v22 = vld [vmem:[#allocation181_spill] sm:$0xff] }
 0x1c1   :  { %v1802_v55 = vmul.f32 %v6053_v49, %v6053_v49  ;;  %v6079_v25 = vsub.f32 %v9061_v29, %v5709_v3  ;;  %v6083_v54 = vsub.f32 %v9063_v36, %v5709_v3  ;;  %v6087_v32 = vsub.f32 %v9065_v22, %v5709_v3  ;;  %v9067_v49 = vld [vmem:[#allocation182_spill] sm:$0xff]  ;;  %v9069_v29 = vld [vmem:[#allocation185_spill] sm:$0xff]  ;;  %v9071_v22 = vld [vmem:[#allocation195_spill] sm:$0xff] }
 0x1c2   :  { %9060 = vst [vmem:[#allocation191_spill] sm:$0xff] %v6073_v21  ;;  %v2113_v58 = vadd.f32 %v2112_v52, %v1795_v2  ;;  %v2118_v27 = vadd.f32 %v2117_v30, %v1799_v37  ;;  %v6089_v51 = vmul.f32 0.0013020834, %v1240_v28  ;;  %v1803_v60 = vmul.f32 %v6073_v21, %v6073_v21  ;;  %v1233_v52 = vpop.xlane.xlu0 %1232 }
 0x1c3   :  { %9062 = vst [vmem:[#allocation177_spill] sm:$0xff] %v6079_v25  ;;  %9064 = vst [vmem:[#allocation178_spill] sm:$0xff] %v6083_v54  ;;  %v6095_v23 = vsub.f32 %v9067_v49, %v5709_v3  ;;  %v6099_v56 = vsub.f32 %v9069_v29, %v5709_v3  ;;  %v1804_v36 = vmul.f32 %v6079_v25, %v6079_v25  ;;  %v9073_v3 = vld [vmem:[#allocation196_spill] sm:$0xff]  ;;  %v9075_v25 = vld [vmem:[#allocation198_spill] sm:$0xff] }
 0x1c4   :  { %9066 = vst [vmem:[#allocation180_spill] sm:$0xff] %v6087_v32  ;;  %v1805_v2 = vmul.f32 %v6083_v54, %v6083_v54  ;;  %v2114_v37 = vadd.f32 %v2113_v58, %v1796_v19  ;;  %v2119_v28 = vadd.f32 %v2118_v27, %v1800_v44  ;;  %v1806_v30 = vmul.f32 %v6087_v32, %v6087_v32  ;;  %v9077_v19 = vld [vmem:[#allocation199_spill] sm:$0xff]  ;;  %v9079_v27 = vld [vmem:[#allocation200_spill] sm:$0xff] }
 0x1c5   :  { %9068 = vst [vmem:[#allocation181_spill] sm:$0xff] %v6095_v23  ;;  %9070 = vst [vmem:[#allocation182_spill] sm:$0xff] %v6099_v56  ;;  %v6109_v49 = vsub.f32 %v9071_v22, %v5829_v33  ;;  %v2124_v21 = vadd.f32 %v1804_v36, %v1803_v60  ;;  %v6113_v29 = vsub.f32 %v9073_v3, %v5829_v33  ;;  %v9081_v60 = vld [vmem:[#allocation203_spill] sm:$0xff]  ;;  %v6133_v3 = vmul.f32 0.0013020834, %v1233_v52 }
 0x1c6   :  { %v6117_v34 = vsub.f32 %v9075_v25, %v5829_v33  ;;  %v6121_v44 = vsub.f32 %v9077_v19, %v5829_v33  ;;  %2115 = vadd.xlane.f32.xlu1 %v2114_v37  ;;  %v2120_v58 = vadd.f32 %v2119_v28, %v1801_v40  ;;  %v6125_v32 = vsub.f32 %v9079_v27, %v5829_v33 }
 0x1c7   :  { %9072 = vst [vmem:[#allocation185_spill] sm:$0xff] %v6109_v49  ;;  %9074 = vst [vmem:[#allocation195_spill] sm:$0xff] %v6113_v29  ;;  %v6129_v36 = vsub.f32 %v9081_v60, %v5829_v33  ;;  %v1809_v22 = vmul.f32 %v6109_v49, %v6109_v49  ;;  %v2125_v25 = vadd.f32 %v2124_v21, %v1805_v2  ;;  %v1254_v60 = vpop.xlane.xlu1 %1253 }
 0x1c8   :  { %9076 = vst [vmem:[#allocation196_spill] sm:$0xff] %v6117_v34  ;;  %9078 = vst [vmem:[#allocation198_spill] sm:$0xff] %v6121_v44  ;;  %v1810_v19 = vmul.f32 %v6113_v29, %v6113_v29  ;;  %v1811_v40 = vmul.f32 %v6117_v34, %v6117_v34  ;;  %v2121_v37 = vadd.f32 %v2120_v58, %v1802_v55  ;;  %v9083_v29 = vld [vmem:[#allocation189_spill] sm:$0xff]  ;;  %v9085_v58 = vld [vmem:[#allocation190_spill] sm:$0xff] }
 0x1c9   :  { %9080 = vst [vmem:[#allocation199_spill] sm:$0xff] %v6125_v32  ;;  %9082 = vst [vmem:[#allocation200_spill] sm:$0xff] %v6129_v36  ;;  %v1807_v28 = vmul.f32 %v6095_v23, %v6095_v23  ;;  %v1808_v33 = vmul.f32 %v6099_v56, %v6099_v56  ;;  %v1812_v27 = vmul.f32 %v6121_v44, %v6121_v44  ;;  %v9087_v44 = vld [vmem:[#allocation192_spill] sm:$0xff] }
 0x1ca   :  { %v2126_v52 = vadd.f32 %v2125_v25, %v1806_v30  ;;  %v1813_v21 = vmul.f32 %v6125_v32, %v6125_v32  ;;  %v2131_v2 = vadd.f32 %v1810_v19, %v1809_v22  ;;  %v6149_v49 = vsub.f32 %v9083_v29, %v5785_v17  ;;  %2122 = vadd.xlane.f32.xlu0 %v2121_v37  ;;  %v9089_v30 = vld [vmem:[#allocation193_spill] sm:$0xff] }
 0x1cb   :  { %v1814_v55 = vmul.f32 %v6129_v36, %v6129_v36  ;;  %v6155_v34 = vsub.f32 %v9085_v58, %v5785_v17  ;;  %v6159_v56 = vsub.f32 %v9087_v44, %v5785_v17  ;;  %v6163_v25 = vsub.f32 %v9089_v30, %v5785_v17  ;;  %v9091_v36 = vld [vmem:[#allocation194_spill] sm:$0xff]  ;;  %v9093_v58 = vld [vmem:[#allocation197_spill] sm:$0xff]  ;;  %v9095_v30 = vld [vmem:[#allocation207_spill] sm:$0xff] }
 0x1cc   :  { %9084 = vst [vmem:[#allocation203_spill] sm:$0xff] %v6149_v49  ;;  %v2127_v22 = vadd.f32 %v2126_v52, %v1807_v28  ;;  %v2132_v19 = vadd.f32 %v2131_v2, %v1811_v40  ;;  %v6165_v29 = vmul.f32 0.0013020834, %v1254_v60  ;;  %v1815_v37 = vmul.f32 %v6149_v49, %v6149_v49  ;;  %v1247_v52 = vpop.xlane.xlu0 %1246 }
 0x1cd   :  { %9086 = vst [vmem:[#allocation189_spill] sm:$0xff] %v6155_v34  ;;  %9088 = vst [vmem:[#allocation190_spill] sm:$0xff] %v6159_v56  ;;  %v6171_v32 = vsub.f32 %v9091_v36, %v5785_v17  ;;  %v6175_v23 = vsub.f32 %v9093_v58, %v5785_v17  ;;  %v1816_v44 = vmul.f32 %v6155_v34, %v6155_v34  ;;  %v9097_v17 = vld [vmem:[#allocation208_spill] sm:$0xff]  ;;  %v9099_v34 = vld [vmem:[#allocation210_spill] sm:$0xff] }
 0x1ce   :  { %9090 = vst [vmem:[#allocation192_spill] sm:$0xff] %v6163_v25  ;;  %v1817_v28 = vmul.f32 %v6159_v56, %v6159_v56  ;;  %v2128_v40 = vadd.f32 %v2127_v22, %v1808_v33  ;;  %v2133_v60 = vadd.f32 %v2132_v19, %v1812_v27  ;;  %v1818_v2 = vmul.f32 %v6163_v25, %v6163_v25  ;;  %v9101_v33 = vld [vmem:[#allocation211_spill] sm:$0xff]  ;;  %v9103_v19 = vld [vmem:[#allocation212_spill] sm:$0xff] }
 0x1cf   :  { %9092 = vst [vmem:[#allocation193_spill] sm:$0xff] %v6171_v32  ;;  %9094 = vst [vmem:[#allocation194_spill] sm:$0xff] %v6175_v23  ;;  %v6185_v36 = vsub.f32 %v9095_v30, %v5905_v13  ;;  %v2138_v49 = vadd.f32 %v1816_v44, %v1815_v37  ;;  %v6189_v58 = vsub.f32 %v9097_v17, %v5905_v13  ;;  %v9105_v37 = vld [vmem:[#allocation215_spill] sm:$0xff]  ;;  %v6209_v17 = vmul.f32 0.0013020834, %v1247_v52  ;;  %v1268_v52 = vpop.xlane.xlu1 %1267  ;;  %v9120_v56 = vld [vmem:[#allocation220_spill] sm:$0xff] }
 0x1d0   :  { %v6193_v54 = vsub.f32 %v9099_v34, %v5905_v13  ;;  %v6197_v27 = vsub.f32 %v9101_v33, %v5905_v13  ;;  %2129 = vadd.xlane.f32.xlu1 %v2128_v40  ;;  %v2134_v22 = vadd.f32 %v2133_v60, %v1813_v21  ;;  %v6201_v25 = vsub.f32 %v9103_v19, %v5905_v13 }
 0x1d1   :  { %9096 = vst [vmem:[#allocation197_spill] sm:$0xff] %v6185_v36  ;;  %9098 = vst [vmem:[#allocation207_spill] sm:$0xff] %v6189_v58  ;;  %v6205_v44 = vsub.f32 %v9105_v37, %v5905_v13  ;;  %v1821_v30 = vmul.f32 %v6185_v36, %v6185_v36  ;;  %v2139_v34 = vadd.f32 %v2138_v49, %v1817_v28 }
 0x1d2   :  { %9100 = vst [vmem:[#allocation208_spill] sm:$0xff] %v6193_v54  ;;  %9102 = vst [vmem:[#allocation210_spill] sm:$0xff] %v6197_v27  ;;  %v1822_v33 = vmul.f32 %v6189_v58, %v6189_v58  ;;  %v1823_v21 = vmul.f32 %v6193_v54, %v6193_v54  ;;  %v2135_v40 = vadd.f32 %v2134_v22, %v1814_v55  ;;  %v9107_v58 = vld [vmem:[#allocation201_spill] sm:$0xff]  ;;  %v9109_v22 = vld [vmem:[#allocation202_spill] sm:$0xff] }
 0x1d3   :  { %9104 = vst [vmem:[#allocation211_spill] sm:$0xff] %v6201_v25  ;;  %9106 = vst [vmem:[#allocation212_spill] sm:$0xff] %v6205_v44  ;;  %v1819_v60 = vmul.f32 %v6171_v32, %v6171_v32  ;;  %v1820_v13 = vmul.f32 %v6175_v23, %v6175_v23  ;;  %v1824_v19 = vmul.f32 %v6197_v27, %v6197_v27  ;;  %v9111_v27 = vld [vmem:[#allocation204_spill] sm:$0xff]  ;;  %v6247_v23 = vmul.f32 0.0013020834, %v1268_v52  ;;  %v9116_v32 = vld [vmem:[#allocation209_spill] sm:$0xff] }
 0x1d4   :  { %v2140_v37 = vadd.f32 %v2139_v34, %v1818_v2  ;;  %v1825_v49 = vmul.f32 %v6201_v25, %v6201_v25  ;;  %v2145_v28 = vadd.f32 %v1822_v33, %v1821_v30  ;;  %v6225_v36 = vsub.f32 %v9107_v58, %v5861_v46  ;;  %2136 = vadd.xlane.f32.xlu0 %v2135_v40  ;;  %v9113_v34 = vld [vmem:[#allocation205_spill] sm:$0xff]  ;;  %v9114_v58 = vld [vmem:[#allocation206_spill] sm:$0xff] }
 0x1d5   :  { %v1826_v55 = vmul.f32 %v6205_v44, %v6205_v44  ;;  %v6231_v54 = vsub.f32 %v9109_v22, %v5861_v46  ;;  %v6235_v2 = vsub.f32 %v9111_v27, %v5861_v46  ;;  %v6239_v30 = vsub.f32 %v9113_v34, %v5861_v46  ;;  %v1261_v22 = vpop.xlane.xlu0 %1260 }
 0x1d6   :  { %9108 = vst [vmem:[#allocation215_spill] sm:$0xff] %v6225_v36  ;;  %v2141_v33 = vadd.f32 %v2140_v37, %v1819_v60  ;;  %v2146_v25 = vadd.f32 %v2145_v28, %v1823_v21  ;;  %v6243_v40 = vsub.f32 %v9114_v58, %v5861_v46  ;;  %v1827_v44 = vmul.f32 %v6225_v36, %v6225_v36  ;;  %v9118_v58 = vld [vmem:[#allocation219_spill] sm:$0xff] }
 0x1d7   :  { %9110 = vst [vmem:[#allocation201_spill] sm:$0xff] %v6231_v54  ;;  %9112 = vst [vmem:[#allocation202_spill] sm:$0xff] %v6235_v2  ;;  %v6251_v27 = vsub.f32 %v9116_v32, %v5861_v46  ;;  %v1828_v34 = vmul.f32 %v6231_v54, %v6231_v54  ;;  %v1829_v21 = vmul.f32 %v6235_v2, %v6235_v2  ;;  %v9122_v32 = vld [vmem:[#allocation222_spill] sm:$0xff]  ;;  %v9124_v2 = vld [vmem:[#allocation223_spill] sm:$0xff] }
 0x1d8   :  { %9115 = vst [vmem:[#allocation204_spill] sm:$0xff] %v6243_v40  ;;  %v2142_v60 = vadd.f32 %v2141_v33, %v1820_v13  ;;  %v2147_v37 = vadd.f32 %v2146_v25, %v1824_v19  ;;  %v1830_v28 = vmul.f32 %v6239_v30, %v6239_v30  ;;  %v6261_v52 = vsub.f32 %v9118_v58, %v5981_v6 }
 0x1d9   :  { %9117 = vst [vmem:[#allocation205_spill] sm:$0xff] %v6251_v27  ;;  %v2152_v36 = vadd.f32 %v1828_v34, %v1827_v44  ;;  %v6265_v46 = vsub.f32 %v9120_v56, %v5981_v6  ;;  %v6269_v54 = vsub.f32 %v9122_v32, %v5981_v6  ;;  %v6273_v13 = vsub.f32 %v9124_v2, %v5981_v6  ;;  %v9128_v32 = vld [vmem:[#allocation213_spill] sm:$0xff] }
 0x1da   :  { %9119 = vst [vmem:[#allocation206_spill] sm:$0xff] %v6261_v52  ;;  %2143 = vadd.xlane.f32.xlu1 %v2142_v60  ;;  %v2148_v25 = vadd.f32 %v2147_v37, %v1825_v49  ;;  %v6275_v19 = vmul.f32 0.0013020834, %v1261_v22  ;;  %v1831_v33 = vmul.f32 %v6243_v40, %v6243_v40  ;;  %v1833_v44 = vmul.f32 %v6261_v52, %v6261_v52  ;;  %v9126_v49 = vld [vmem:[#allocation224_spill] sm:$0xff] }
 0x1db   :  { %9121 = vst [vmem:[#allocation209_spill] sm:$0xff] %v6265_v46  ;;  %9123 = vst [vmem:[#allocation219_spill] sm:$0xff] %v6269_v54  ;;  %v1832_v56 = vmul.f32 %v6251_v27, %v6251_v27  ;;  %v2153_v34 = vadd.f32 %v2152_v36, %v1829_v21  ;;  %v1834_v58 = vmul.f32 %v6265_v46, %v6265_v46  ;;  %v9130_v21 = vld [vmem:[#allocation214_spill] sm:$0xff] }
 0x1dc   :  { %9125 = vst [vmem:[#allocation220_spill] sm:$0xff] %v6273_v13  ;;  %v1835_v2 = vmul.f32 %v6269_v54, %v6269_v54  ;;  %v2149_v60 = vadd.f32 %v2148_v25, %v1826_v55  ;;  %v6289_v22 = vsub.f32 %v9126_v49, %v5981_v6  ;;  %v1836_v37 = vmul.f32 %v6273_v13, %v6273_v13  ;;  %v9132_v54 = vld [vmem:[#allocation216_spill] sm:$0xff]  ;;  %v9134_v25 = vld [vmem:[#allocation225_spill] sm:$0xff] }
 0x1dd   :  { %v6295_v52 = vsub.f32 %v9128_v32, %v5937_v0  ;;  %v2154_v27 = vadd.f32 %v2153_v34, %v1830_v28  ;;  %v2159_v36 = vadd.f32 %v1834_v58, %v1833_v44  ;;  %v6299_v46 = vsub.f32 %v9130_v21, %v5937_v0  ;;  %v9136_v13 = vld [vmem:[#allocation217_spill] sm:$0xff]  ;;  %v9138_v28 = vld [vmem:[#allocation218_spill] sm:$0xff] }
 0x1de   :  { %9127 = vst [vmem:[#allocation222_spill] sm:$0xff] %v6289_v22  ;;  %v6303_v55 = vsub.f32 %v9132_v54, %v5937_v0  ;;  %2150 = vadd.xlane.f32.xlu0 %v2149_v60  ;;  %v6307_v49 = vsub.f32 %v9134_v25, %v5981_v6  ;;  %v6311_v40 = vsub.f32 %v9136_v13, %v5937_v0  ;;  %v9140_v13 = vld [vmem:[#allocation221_spill] sm:$0xff] }
 0x1df   :  { %9129 = vst [vmem:[#allocation223_spill] sm:$0xff] %v6295_v52  ;;  %9131 = vst [vmem:[#allocation224_spill] sm:$0xff] %v6299_v46  ;;  %v6315_v44 = vsub.f32 %v9138_v28, %v5937_v0  ;;  %v1839_v34 = vmul.f32 %v6295_v52, %v6295_v52  ;;  %v2155_v58 = vadd.f32 %v2154_v27, %v1831_v33  ;;  %v9142_v28 = vld [vmem:[#allocation237_spill] sm:$0xff]  ;;  %v6339_v52 = vpop.xlane.xlu0 %1898 }
 0x1e0   :  { %9133 = vst [vmem:[#allocation213_spill] sm:$0xff] %v6303_v55  ;;  %9135 = vst [vmem:[#allocation214_spill] sm:$0xff] %v6307_v49  ;;  %v2160_v32 = vadd.f32 %v2159_v36, %v1835_v2  ;;  %v1840_v54 = vmul.f32 %v6299_v46, %v6299_v46  ;;  %v1841_v6 = vmul.f32 %v6303_v55, %v6303_v55  ;;  %v9144_v46 = vld [vmem:[#allocation238_spill] sm:$0xff] }
 0x1e1   :  { %9137 = vst [vmem:[#allocation216_spill] sm:$0xff] %v6311_v40  ;;  %9139 = vst [vmem:[#allocation225_spill] sm:$0xff] %v6315_v44  ;;  %v1837_v60 = vmul.f32 %v6289_v22, %v6289_v22  ;;  %v6327_v21 = vsub.f32 %v9140_v13, %v5937_v0  ;;  %v1842_v25 = vmul.f32 %v6311_v40, %v6311_v40  ;;  %v9146_v40 = vld [vmem:[#allocation239_spill] sm:$0xff] }
 0x1e2   :  { %v6333_v27 = vsub.f32 %v9142_v28, %v6057_v12  ;;  %v2156_v33 = vadd.f32 %v2155_v58, %v1832_v56  ;;  %v2161_v2 = vadd.f32 %v2160_v32, %v1836_v37  ;;  %v2166_v36 = vadd.f32 %v1840_v54, %v1839_v34  ;;  %v9148_v56 = vld [vmem:[#allocation243_spill] sm:$0xff]  ;;  %v9150_v28 = vld [vmem:[#allocation244_spill] sm:$0xff] }
 0x1e3   :  { %9141 = vst [vmem:[#allocation217_spill] sm:$0xff] %v6327_v21  ;;  %v6337_v55 = vsub.f32 %v9144_v46, %v6057_v12  ;;  %v1838_v0 = vmul.f32 %v6307_v49, %v6307_v49  ;;  %v1843_v13 = vmul.f32 %v6315_v44, %v6315_v44  ;;  %v6347_v22 = vsub.f32 %v9146_v40, %v6057_v12 }
 0x1e4   :  { %9143 = vst [vmem:[#allocation218_spill] sm:$0xff] %v6333_v27  ;;  %v6351_v37 = vsub.f32 %v9148_v56, %v6057_v12  ;;  %2157 = vadd.xlane.f32.xlu1 %v2156_v33  ;;  %v2162_v34 = vadd.f32 %v2161_v2, %v1837_v60  ;;  %v2167_v46 = vadd.f32 %v2166_v36, %v1841_v6  ;;  %v9152_v36 = vld [vmem:[#allocation227_spill] sm:$0xff] }
 0x1e5   :  { %9145 = vst [vmem:[#allocation221_spill] sm:$0xff] %v6337_v55  ;;  %9147 = vst [vmem:[#allocation237_spill] sm:$0xff] %v6347_v22  ;;  %v1845_v58 = vmul.f32 %v6333_v27, %v6333_v27  ;;  %v1846_v32 = vmul.f32 %v6337_v55, %v6337_v55  ;;  %v1844_v54 = vmul.f32 %v6327_v21, %v6327_v21  ;;  %v6371_v55 = vpop.xlane.xlu1 %1905  ;;  %v9154_v21 = vld [vmem:[#allocation245_spill] sm:$0xff] }
 0x1e6   :  { %9149 = vst [vmem:[#allocation238_spill] sm:$0xff] %v6351_v37  ;;  %v6361_v40 = vsub.f32 %v9150_v28, %v6057_v12  ;;  %v1847_v56 = vmul.f32 %v6347_v22, %v6347_v22  ;;  %v1848_v60 = vmul.f32 %v6351_v37, %v6351_v37  ;;  %v2163_v6 = vadd.f32 %v2162_v34, %v1838_v0  ;;  %v9156_v28 = vld [vmem:[#allocation228_spill] sm:$0xff]  ;;  %v9158_v22 = vld [vmem:[#allocation229_spill] sm:$0xff] }
 0x1e7   :  { %v2168_v33 = vadd.f32 %v2167_v46, %v1842_v25  ;;  %v2173_v2 = vadd.f32 %v1846_v32, %v1845_v58  ;;  %v6369_v27 = vsub.f32 %v9152_v36, %v6013_v16  ;;  %v6375_v44 = vsub.f32 %v9154_v21, %v6057_v12  ;;  %v9160_v25 = vld [vmem:[#allocation233_spill] sm:$0xff]  ;;  %v9162_v58 = vld [vmem:[#allocation234_spill] sm:$0xff]  ;;  %v6395_v21 = vpop.xlane.xlu0 %1912  ;;  %v9164_v36 = vld [vmem:[#allocation235_spill] sm:$0xff] }
 0x1e8   :  { %9151 = vst [vmem:[#allocation239_spill] sm:$0xff] %v6361_v40  ;;  %v6379_v49 = vsub.f32 %v9156_v28, %v6013_v16  ;;  %v6383_v37 = vsub.f32 %v9158_v22, %v6013_v16  ;;  %v6387_v0 = vsub.f32 %v9160_v25, %v6013_v16  ;;  %2164 = vadd.xlane.f32.xlu0 %v2163_v6  ;;  %v9166_v25 = vld [vmem:[#allocation255_spill] sm:$0xff] }
 0x1e9   :  { %9153 = vst [vmem:[#allocation243_spill] sm:$0xff] %v6369_v27  ;;  %9155 = vst [vmem:[#allocation244_spill] sm:$0xff] %v6375_v44  ;;  %v2169_v34 = vadd.f32 %v2168_v33, %v1843_v13  ;;  %v2174_v46 = vadd.f32 %v2173_v2, %v1847_v56  ;;  %v6391_v32 = vsub.f32 %v9162_v58, %v6013_v16 }
 0x1ea   :  { %9157 = vst [vmem:[#allocation227_spill] sm:$0xff] %v6379_v49  ;;  %9159 = vst [vmem:[#allocation245_spill] sm:$0xff] %v6383_v37  ;;  %v1851_v12 = vmul.f32 %v6369_v27, %v6369_v27  ;;  %v1849_v22 = vmul.f32 %v6361_v40, %v6361_v40  ;;  %v6401_v28 = vsub.f32 %v9164_v36, %v6013_v16  ;;  %v9168_v40 = vld [vmem:[#allocation256_spill] sm:$0xff] }
 0x1eb   :  { %9161 = vst [vmem:[#allocation228_spill] sm:$0xff] %v6387_v0  ;;  %9163 = vst [vmem:[#allocation229_spill] sm:$0xff] %v6391_v32  ;;  %v1852_v13 = vmul.f32 %v6379_v49, %v6379_v49  ;;  %v1853_v56 = vmul.f32 %v6383_v37, %v6383_v37  ;;  %v2170_v6 = vadd.f32 %v2169_v34, %v1844_v54  ;;  %v9171_v37 = vld [vmem:[#allocation257_spill] sm:$0xff] }
 0x1ec   :  { %9165 = vst [vmem:[#allocation233_spill] sm:$0xff] %v6401_v28  ;;  %v2175_v33 = vadd.f32 %v2174_v46, %v1848_v60  ;;  %v1854_v2 = vmul.f32 %v6387_v0, %v6387_v0  ;;  %v6411_v58 = vsub.f32 %v9166_v25, %v6133_v3  ;;  %v6415_v16 = vsub.f32 %v9168_v40, %v6133_v3 }
 0x1ed   :  { %v2180_v27 = vadd.f32 %v1852_v13, %v1851_v12  ;;  %v6419_v36 = vsub.f32 %v4754_v48, %v6133_v3  ;;  %v6423_v54 = vsub.f32 %v9171_v37, %v6133_v3  ;;  %2171 = vadd.xlane.f32.xlu1 %v2170_v6  ;;  %v1850_v60 = vmul.f32 %v6375_v44, %v6375_v44  ;;  %v6431_v12 = vpop.xlane.xlu1 %1919 }
 0x1ee   :  { %9167 = vst [vmem:[#allocation234_spill] sm:$0xff] %v6411_v58  ;;  %9169 = vst [vmem:[#allocation235_spill] sm:$0xff] %v6415_v16  ;;  %v2176_v34 = vadd.f32 %v2175_v33, %v1849_v22  ;;  %v1855_v46 = vmul.f32 %v6391_v32, %v6391_v32  ;;  %v1857_v40 = vmul.f32 %v6411_v58, %v6411_v58  ;;  %v9173_v22 = vld [vmem:[#allocation258_spill] sm:$0xff]  ;;  %v9174_v32 = vld [vmem:[#allocation247_spill] sm:$0xff] }
 0x1ef   :  { %9170 = vst [vmem:[#allocation255_spill] sm:$0xff] %v6419_v36  ;;  %9172 = vst [vmem:[#allocation256_spill] sm:$0xff] %v6423_v54  ;;  %v1856_v48 = vmul.f32 %v6401_v28, %v6401_v28  ;;  %v2181_v13 = vadd.f32 %v2180_v27, %v1853_v56  ;;  %v1858_v37 = vmul.f32 %v6415_v16, %v6415_v16  ;;  %v6449_v28 = vpop.xlane.xlu0 %1926  ;;  %v9176_v16 = vld [vmem:[#allocation248_spill] sm:$0xff] }
 0x1f0   :  { %v1859_v6 = vmul.f32 %v6419_v36, %v6419_v36  ;;  %v2177_v25 = vadd.f32 %v2176_v34, %v1850_v60  ;;  %v6441_v33 = vsub.f32 %v9173_v22, %v6133_v3  ;;  %v1860_v58 = vmul.f32 %v6423_v54, %v6423_v54  ;;  %v9178_v60 = vld [vmem:[#allocation249_spill] sm:$0xff]  ;;  %v9180_v22 = vld [vmem:[#allocation259_spill] sm:$0xff] }
 0x1f1   :  { %v6447_v0 = vsub.f32 %v9174_v32, %v6089_v51  ;;  %v2182_v27 = vadd.f32 %v2181_v13, %v1854_v2  ;;  %v2187_v56 = vadd.f32 %v1858_v37, %v1857_v40  ;;  %v6453_v49 = vsub.f32 %v9176_v16, %v6089_v51  ;;  %v9181_v32 = vld [vmem:[#allocation251_spill] sm:$0xff]  ;;  %v9183_v2 = vld [vmem:[#allocation252_spill] sm:$0xff] }
 0x1f2   :  { %v6457_v34 = vsub.f32 %v9178_v60, %v6089_v51  ;;  %2178 = vadd.xlane.f32.xlu0 %v2177_v25  ;;  %v6461_v54 = vsub.f32 %v9180_v22, %v6133_v3  ;;  %v6465_v36 = vsub.f32 %v9181_v32, %v6089_v51  ;;  %v6469_v40 = vsub.f32 %v9183_v2, %v6089_v51  ;;  %v9184_v22 = vld [vmem:[#allocation253_spill] sm:$0xff] }
 0x1f3   :  { %9175 = vst [vmem:[#allocation257_spill] sm:$0xff] %v6447_v0  ;;  %9177 = vst [vmem:[#allocation258_spill] sm:$0xff] %v6453_v49  ;;  %v1863_v16 = vmul.f32 %v6447_v0, %v6447_v0  ;;  %v2183_v13 = vadd.f32 %v2182_v27, %v1855_v46  ;;  %v2188_v37 = vadd.f32 %v2187_v56, %v1859_v6  ;;  %v9186_v0 = vld [vmem:[#allocation267_spill] sm:$0xff]  ;;  %v6489_v6 = vpop.xlane.xlu1 %1933 }
 0x1f4   :  { %9179 = vst [vmem:[#allocation247_spill] sm:$0xff] %v6457_v34  ;;  %9182 = vst [vmem:[#allocation248_spill] sm:$0xff] %v6465_v36  ;;  %v1864_v25 = vmul.f32 %v6453_v49, %v6453_v49  ;;  %v1865_v3 = vmul.f32 %v6457_v34, %v6457_v34  ;;  %v1861_v60 = vmul.f32 %v6441_v33, %v6441_v33  ;;  %v9188_v34 = vld [vmem:[#allocation268_spill] sm:$0xff] }
 0x1f5   :  { %v6481_v32 = vsub.f32 %v9184_v22, %v6089_v51  ;;  %v1866_v2 = vmul.f32 %v6465_v36, %v6465_v36  ;;  %v6487_v46 = vsub.f32 %v9186_v0, %v6209_v17  ;;  %v2184_v27 = vadd.f32 %v2183_v13, %v1856_v48 }
 0x1f6   :  { %v2189_v56 = vadd.f32 %v2188_v37, %v1860_v58  ;;  %v2194_v49 = vadd.f32 %v1864_v25, %v1863_v16  ;;  %v6493_v44 = vsub.f32 %v9188_v34, %v6209_v17  ;;  %v1862_v51 = vmul.f32 %v6461_v54, %v6461_v54  ;;  %v6507_v58 = vpop.xlane.xlu0 %1940 }
 0x1f7   :  { %9185 = vst [vmem:[#allocation249_spill] sm:$0xff] %v6481_v32  ;;  %9187 = vst [vmem:[#allocation259_spill] sm:$0xff] %v6487_v46  ;;  %v1867_v22 = vmul.f32 %v6469_v40, %v6469_v40  ;;  %v6501_v36 = vsub.f32 %v4818_v9, %v6209_v17  ;;  %v6505_v0 = vsub.f32 %v4829_v43, %v6209_v17  ;;  %2185 = vadd.xlane.f32.xlu1 %v2184_v27  ;;  %v9191_v27 = vld [vmem:[#allocation260_spill] sm:$0xff] }
 0x1f8   :  { %9189 = vst [vmem:[#allocation251_spill] sm:$0xff] %v6493_v44  ;;  %v2190_v48 = vadd.f32 %v2189_v56, %v1861_v60  ;;  %v2195_v34 = vadd.f32 %v2194_v49, %v1865_v3  ;;  %v1869_v16 = vmul.f32 %v6487_v46, %v6487_v46  ;;  %v1870_v13 = vmul.f32 %v6493_v44, %v6493_v44 }
 0x1f9   :  { %9190 = vst [vmem:[#allocation252_spill] sm:$0xff] %v6501_v36  ;;  %v1868_v37 = vmul.f32 %v6481_v32, %v6481_v32  ;;  %v6517_v9 = vsub.f32 %v4833_v8, %v6209_v17  ;;  %v1871_v43 = vmul.f32 %v6501_v36, %v6501_v36  ;;  %v1872_v25 = vmul.f32 %v6505_v0, %v6505_v0  ;;  %v9192_v8 = vld [vmem:[#allocation261_spill] sm:$0xff]  ;;  %v9194_v36 = vld [vmem:[#allocation262_spill] sm:$0xff] }
 0x1fa   :  { %v2191_v49 = vadd.f32 %v2190_v48, %v1862_v51  ;;  %v2196_v3 = vadd.f32 %v2195_v34, %v1866_v2  ;;  %v2201_v60 = vadd.f32 %v1870_v13, %v1869_v16  ;;  %v6525_v56 = vsub.f32 %v9191_v27, %v6165_v29  ;;  %v9196_v51 = vld [vmem:[#allocation265_spill] sm:$0xff]  ;;  %v6543_v48 = vpop.xlane.xlu1 %1947  ;;  %v9199_v13 = vld [vmem:[#allocation266_spill] sm:$0xff] }
 0x1fb   :  { %v6529_v44 = vsub.f32 %v4835_v63, %v6209_v17  ;;  %v6533_v46 = vsub.f32 %v9192_v8, %v6165_v29  ;;  %v6537_v32 = vsub.f32 %v9194_v36, %v6165_v29  ;;  %v6541_v2 = vsub.f32 %v9196_v51, %v6165_v29 }
 0x1fc   :  { %2192 = vadd.xlane.f32.xlu0 %v2191_v49  ;;  %v2197_v34 = vadd.f32 %v2196_v3, %v1867_v22  ;;  %v2202_v16 = vadd.f32 %v2201_v60, %v1871_v43  ;;  %v6547_v63 = vsub.f32 %v4804_v4, %v6165_v29  ;;  %v1875_v17 = vmul.f32 %v6525_v56, %v6525_v56  ;;  %v6561_v43 = vpop.xlane.xlu0 %1954 }
 0x1fd   :  { %9193 = vst [vmem:[#allocation253_spill] sm:$0xff] %v6533_v46  ;;  %9195 = vst [vmem:[#allocation267_spill] sm:$0xff] %v6537_v32  ;;  %v1873_v36 = vmul.f32 %v6517_v9, %v6517_v9  ;;  %v6555_v27 = vsub.f32 %v9199_v13, %v6165_v29  ;;  %v1876_v8 = vmul.f32 %v6533_v46, %v6533_v46 }
 0x1fe   :  { %9197 = vst [vmem:[#allocation268_spill] sm:$0xff] %v6541_v2  ;;  %9198 = vst [vmem:[#allocation260_spill] sm:$0xff] %v6547_v63  ;;  %v1877_v22 = vmul.f32 %v6537_v32, %v6537_v32  ;;  %v2198_v4 = vadd.f32 %v2197_v34, %v1868_v37  ;;  %v2203_v49 = vadd.f32 %v2202_v16, %v1872_v25  ;;  %v2234_v32 = vmul.f32 0.0013020834, %v6489_v6 }
 0x1ff   :  { %9200 = vst [vmem:[#allocation261_spill] sm:$0xff] %v6555_v27  ;;  %v1878_v3 = vmul.f32 %v6541_v2, %v6541_v2  ;;  %v6567_v60 = vsub.f32 %v4866_v41, %v6275_v19  ;;  %v2208_v51 = vadd.f32 %v1876_v8, %v1875_v17  ;;  %v6571_v29 = vsub.f32 %v4868_v11, %v6275_v19  ;;  %v6593_v8 = vpop.xlane.xlu1 %1961 }
 0x200   :  { %v6575_v13 = vsub.f32 %v4870_v59, %v6275_v19  ;;  %v6579_v37 = vsub.f32 %v4883_v38, %v6275_v19  ;;  %2199 = vadd.xlane.f32.xlu1 %v2198_v4  ;;  %v1874_v25 = vmul.f32 %v6529_v44, %v6529_v44  ;;  %v2204_v34 = vadd.f32 %v2203_v49, %v1873_v36 }
 0x201   :  { %9201 = vst [vmem:[#allocation262_spill] sm:$0xff] %v6567_v60  ;;  %9202 = vst [vmem:[#allocation265_spill] sm:$0xff] %v6571_v29  ;;  %v1879_v41 = vmul.f32 %v6547_v63, %v6547_v63  ;;  %v1881_v11 = vmul.f32 %v6567_v60, %v6567_v60  ;;  %v1880_v16 = vmul.f32 %v6555_v27, %v6555_v27  ;;  %v9206_v60 = vld [vmem:[#allocation269_spill] sm:$0xff]  ;;  %v2233_v2 = vmul.f32 0.0013020834, %v6449_v28 }
 0x202   :  { %9203 = vst [vmem:[#allocation266_spill] sm:$0xff] %v6575_v13  ;;  %9204 = vst [vmem:[#allocation273_spill] sm:$0xff] %v6579_v37  ;;  %v2209_v59 = vadd.f32 %v2208_v51, %v1877_v22  ;;  %v1882_v17 = vmul.f32 %v6571_v29, %v6571_v29  ;;  %v1883_v38 = vmul.f32 %v6575_v13, %v6575_v13  ;;  %v9208_v29 = vld [vmem:[#allocation270_spill] sm:$0xff] }
 0x203   :  { %v2205_v4 = vadd.f32 %v2204_v34, %v1874_v25  ;;  %v6597_v36 = vsub.f32 %v4887_v57, %v6275_v19  ;;  %v1884_v49 = vmul.f32 %v6579_v37, %v6579_v37  ;;  %v6603_v27 = vsub.f32 %v9206_v60, %v6247_v23  ;;  %v6613_v34 = vpop.xlane.xlu0 %1968 }
 0x204   :  { %v2210_v22 = vadd.f32 %v2209_v59, %v1878_v3  ;;  %v2215_v51 = vadd.f32 %v1882_v17, %v1881_v11  ;;  %v6607_v63 = vsub.f32 %v9208_v29, %v6247_v23  ;;  %v6611_v25 = vsub.f32 %v4845_v31, %v6247_v23 }
 0x205   :  { %9205 = vst [vmem:[#allocation274_spill] sm:$0xff] %v6597_v36  ;;  %9207 = vst [vmem:[#allocation269_spill] sm:$0xff] %v6603_v27  ;;  %2206 = vadd.xlane.f32.xlu0 %v2205_v4  ;;  %v6617_v57 = vsub.f32 %v4899_v20, %v6275_v19  ;;  %v6621_v60 = vsub.f32 %v4854_v7, %v6247_v23  ;;  %v6625_v3 = vsub.f32 %v4858_v39, %v6247_v23  ;;  %v2664_v17 = vlaneseq }
 0x206   :  { %9209 = vst [vmem:[#allocation270_spill] sm:$0xff] %v6607_v63  ;;  %9210 = vst [vmem:[#allocation275_spill] sm:$0xff] %v6611_v25  ;;  %v1887_v29 = vmul.f32 %v6603_v27, %v6603_v27  ;;  %v2211_v31 = vadd.f32 %v2210_v22, %v1879_v41  ;;  %v2216_v11 = vadd.f32 %v2215_v51, %v1883_v38  ;;  %v2229_v27 = vmul.f32 0.0013020834, %v6339_v52  ;;  %v1976_v41 = vpop.xlane.xlu1 %1975 }
 0x207   :  { %9211 = vst [vmem:[#allocation276_spill] sm:$0xff] %v6617_v57  ;;  %9212 = vst [vmem:[#allocation277_spill] sm:$0xff] %v6621_v60  ;;  %v1888_v59 = vmul.f32 %v6607_v63, %v6607_v63  ;;  %v1889_v20 = vmul.f32 %v6611_v25, %v6611_v25  ;;  %v1885_v19 = vmul.f32 %v6597_v36, %v6597_v36  ;;  %v6646_v25 = vshrl.u32 %v2664_v17, 7  ;;  %v1983_v52 = vpop.xlane.xlu0 %1982  ;;  %v2374_v17 = vld [vmem:[#allocation8] sm:$0x3f] }
 0x208   :  { %9213 = vst [vmem:[#allocation278_spill] sm:$0xff] %v6625_v3  ;;  %v1890_v7 = vmul.f32 %v6621_v60, %v6621_v60  ;;  %v2212_v39 = vadd.f32 %v2211_v31, %v1880_v16  ;;  %v2217_v4 = vadd.f32 %v2216_v11, %v1884_v49  ;;  %v1886_v38 = vmul.f32 %v6617_v57, %v6617_v57  ;;  %v2373_v31 = vld [vmem:[#allocation7] sm:$0x3f] }
 0x209   :  { %v2222_v37 = vadd.f32 %v1888_v59, %v1887_v29  ;;  %v6642_v22 = vsub.f32 %v4860_v10, %v6247_v23  ;;  %v1891_v51 = vmul.f32 %v6625_v3, %v6625_v3  ;;  %v2277_v49 = vadd.f32 1e-12, %v2229_v27 }
 0x20a   :  { %2213 = vadd.xlane.f32.xlu1 %v2212_v39  ;;  %v2218_v60 = vadd.f32 %v2217_v4, %v1885_v19  ;;  %v2230_v29 = vmul.f32 0.0013020834, %v6371_v55  ;;  %v2666_v11 = vsub.s32 0, %v6646_v25  ;;  %v2670_v59 = vsub.s32 1, %v6646_v25 }
 0x20b   :  { %9214 = vst [vmem:[#allocation279_spill] sm:$0xff] %v6642_v22  ;;  %v2223_v16 = vadd.f32 %v2222_v37, %v1889_v20  ;;  %v2674_v10 = vsub.s32 2, %v6646_v25  ;;  %v2678_v23 = vsub.s32 3, %v6646_v25  ;;  %v2682_v39 = vsub.s32 4, %v6646_v25 }
 0x20c   :  { %v2219_v63 = vadd.f32 %v2218_v60, %v1886_v38  ;;  %v2686_v37 = vsub.s32 5, %v6646_v25  ;;  %v1892_v55 = vmul.f32 %v6642_v22, %v6642_v22  ;;  %v2231_v27 = vmul.f32 0.0013020834, %v6395_v21 }
 0x20d   :  { %v2224_v3 = vadd.f32 %v2223_v16, %v1890_v7  ;;  %v2232_v20 = vmul.f32 0.0013020834, %v6431_v12  ;;  %v6659_v4 = vrot.slane %v2373_v31, %v2666_v11  ;;  %v6661_v57 = vrot.slane %v2373_v31, %v2670_v59  ;;  %v1990_v7 = vpop.xlane.xlu1 %1989 }
 0x20e   :  { %2220 = vadd.xlane.f32.xlu0 %v2219_v63  ;;  %v6663_v60 = vrot.slane %v2373_v31, %v2674_v10  ;;  %v6665_v38 = vrot.slane %v2373_v31, %v2678_v23  ;;  %v6667_v16 = vrot.slane %v2373_v31, %v2682_v39  ;;  %v6669_v25 = vrot.slane %v2373_v31, %v2686_v37  ;;  %v1997_v63 = vpop.xlane.xlu0 %1996 }
 0x20f   :  { %v2225_v19 = vadd.f32 %v2224_v3, %v1891_v51  ;;  %v6671_v22 = vrot.slane %v2374_v17, %v2666_v11  ;;  %v6673_v36 = vrot.slane %v2374_v17, %v2670_v59  ;;  %3615 = vrsqrt.f32 %v2277_v49 }
 0x210   :  { %v2278_v12 = vadd.f32 1e-12, %v2230_v29  ;;  %v6675_v3 = vrot.slane %v2374_v17, %v2674_v10  ;;  %v2279_v51 = vadd.f32 1e-12, %v2231_v27  ;;  %v2280_v13 = vadd.f32 1e-12, %v2232_v20 }
 0x211   :  { %v2226_v21 = vadd.f32 %v2225_v19, %v1892_v55  ;;  %v2235_v31 = vmul.f32 0.0013020834, %v6507_v58  ;;  %v2236_v11 = vmul.f32 0.0013020834, %v6543_v48  ;;  %v2281_v59 = vadd.f32 1e-12, %v2233_v2  ;;  %v2004_v20 = vpop.xlane.xlu1 %2003 }
 0x212   :  { %3617 = vrsqrt.f32 %v2278_v12  ;;  %v2237_v49 = vmul.f32 0.0013020834, %v6561_v43  ;;  %v2238_v29 = vmul.f32 0.0013020834, %v6593_v8  ;;  %v2282_v10 = vadd.f32 1e-12, %v2234_v32  ;;  %v2011_v12 = vpop.xlane.xlu0 %2010 }
 0x213   :  { %2227 = vadd.xlane.f32.xlu1 %v2226_v21  ;;  %3619 = vrsqrt.f32 %v2279_v51  ;;  %v2283_v55 = vadd.f32 1e-12, %v2235_v31  ;;  %v2284_v27 = vadd.f32 1e-12, %v2236_v11  ;;  %v2239_v6 = vmul.f32 0.0013020834, %v6613_v34 }
 0x214   :  { %3621 = vrsqrt.f32 %v2280_v13  ;;  %v2285_v28 = vadd.f32 1e-12, %v2237_v49  ;;  %v2286_v19 = vadd.f32 1e-12, %v2238_v29  ;;  %v2240_v58 = vmul.f32 0.0013020834, %v1976_v41 }
 0x215   :  { %3623 = vrsqrt.f32 %v2281_v59  ;;  %v2241_v21 = vmul.f32 0.0013020834, %v1983_v52  ;;  %v2242_v48 = vmul.f32 0.0013020834, %v1990_v7  ;;  %v6684_v2 = vrot.slane %v2374_v17, %v2678_v23  ;;  %v9217_v59 = vld [vmem:[#allocation241_spill] sm:$0xff]  ;;  %v9218_v29 = vld [vmem:[#allocation242_spill] sm:$0xff] }
 0x216   :  { %3625 = vrsqrt.f32 %v2282_v10  ;;  %v2243_v43 = vmul.f32 0.0013020834, %v1997_v63  ;;  %v2244_v8 = vmul.f32 0.0013020834, %v2004_v20  ;;  %v6686_v13 = vrot.slane %v2374_v17, %v2682_v39  ;;  %v9215_v39 = vld [vmem:[#allocation236_spill] sm:$0xff] }
 0x217   :  { %3627 = vrsqrt.f32 %v2283_v55  ;;  %v6688_v32 = vrot.slane %v2374_v17, %v2686_v37  ;;  %v2287_v51 = vadd.f32 1e-12, %v2239_v6  ;;  %v6690_v31 = vadd.f32 1e-12, %v2240_v58  ;;  %v9216_v17 = vld [vmem:[#allocation240_spill] sm:$0xff] }
 0x218   :  { %3629 = vrsqrt.f32 %v2284_v27  ;;  %v6692_v34 = vadd.f32 1e-12, %v2241_v21  ;;  %v2245_v41 = vmul.f32 0.0013020834, %v2011_v12  ;;  %v6694_v7 = vadd.f32 1e-12, %v2242_v48 }
 0x219   :  { %3631 = vrsqrt.f32 %v2285_v28  ;;  %v3616_v52 = vpop.eup %3615  ;;  %v6696_v23 = vadd.f32 1e-12, %v2243_v43  ;;  %v6698_v63 = vadd.f32 1e-12, %v2244_v8  ;;  %v9219_v27 = vld [vmem:[#allocation246_spill] sm:$0xff] }
 0x21a   :  { %3633 = vrsqrt.f32 %v2286_v19  ;;  %v2375_v11 = vmul.f32 %v3616_v52, %v9215_v39  ;;  %v2376_v37 = vmul.f32 %v3616_v52, %v9216_v17  ;;  %v2377_v49 = vmul.f32 %v3616_v52, %v9217_v59  ;;  %v9220_v28 = vld [vmem:[#allocation250_spill] sm:$0xff] }
 0x21b   :  { %v2378_v10 = vmul.f32 %v3616_v52, %v9218_v29  ;;  %v2379_v20 = vmul.f32 %v3616_v52, %v9219_v27  ;;  %v2380_v6 = vmul.f32 %v3616_v52, %v9220_v28  ;;  %3635 = vrsqrt.f32 %v2287_v51 }
 0x21c   :  { %v3618_v55 = vpop.eup %3617  ;;  %v6706_v19 = vadd.f32 1e-12, %v2245_v41  ;;  %v2694_v21 = vmul.f32 %v6659_v4, %v2375_v11  ;;  %v2695_v48 = vmul.f32 %v6661_v57, %v2376_v37  ;;  %v2696_v12 = vmul.f32 %v6663_v60, %v2377_v49 }
 0x21d   :  { %v3620_v58 = vpop.eup %3619  ;;  %v2697_v43 = vmul.f32 %v6665_v38, %v2378_v10  ;;  %v2698_v39 = vmul.f32 %v6667_v16, %v2379_v20  ;;  %v2699_v17 = vmul.f32 %v6669_v25, %v2380_v6  ;;  %v2381_v52 = vmul.f32 %v3618_v55, %v4875_v18 }
 0x21e   :  { %v6712_v8 = vpop.eup %3621  ;;  %v2382_v51 = vmul.f32 %v3618_v55, %v4879_v24  ;;  %v3013_v11 = vadd.f32 %v6671_v22, %v2694_v21  ;;  %v3014_v37 = vadd.f32 %v6673_v36, %v2695_v48  ;;  %v3015_v59 = vadd.f32 %v6675_v3, %v2696_v12 }
 0x21f   :  { %v6718_v41 = vpop.eup %3623  ;;  %v3016_v49 = vadd.f32 %v6684_v2, %v2697_v43  ;;  %v3017_v10 = vadd.f32 %v6686_v13, %v2698_v39  ;;  %v3018_v27 = vadd.f32 %v6688_v32, %v2699_v17  ;;  %v2383_v18 = vmul.f32 %v3618_v55, %v4892_v14  ;;  %v9221_v43 = vld [vmem:[#allocation226_spill] sm:$0xff] }
 0x220   :  { %v6724_v29 = vpop.eup %3625  ;;  %v2384_v24 = vmul.f32 %v3618_v55, %v4896_v15  ;;  %3301 = vst [vmem:[#allocation10] sm:$0xff] %v3013_v11  ;;  %3302 = vst [vmem:[#allocation10 + $0x8] sm:$0xff] %v3014_v37  ;;  %v2385_v28 = vmul.f32 %v3618_v55, %v4906_v50  ;;  %v2386_v6 = vmul.f32 %v3618_v55, %v4917_v26  ;;  %v9222_v17 = vld [vmem:[#allocation230_spill] sm:$0xff]  ;;  %3637 = vrsqrt.f32 %v6690_v31 }
 0x221   :  { %v6730_v20 = vpop.eup %3627  ;;  %3303 = vst [vmem:[#allocation10 + $0x10] sm:$0xff] %v3015_v59  ;;  %3304 = vst [vmem:[#allocation10 + $0x18] sm:$0xff] %v3016_v49  ;;  %v2700_v21 = vmul.f32 %v6659_v4, %v2381_v52  ;;  %v2701_v48 = vmul.f32 %v6661_v57, %v2382_v51  ;;  %v2702_v14 = vmul.f32 %v6663_v60, %v2383_v18  ;;  %v9224_v18 = vld [vmem:[#allocation232_spill] sm:$0xff]  ;;  %3639 = vrsqrt.f32 %v6692_v34 }
 0x222   :  { %v6736_v12 = vpop.eup %3629  ;;  %3305 = vst [vmem:[#allocation10 + $0x20] sm:$0xff] %v3017_v10  ;;  %3306 = vst [vmem:[#allocation10 + $0x28] sm:$0xff] %v3018_v27  ;;  %v2703_v15 = vmul.f32 %v6665_v38, %v2384_v24  ;;  %v2387_v39 = vmul.f32 %v3620_v58, %v9221_v43  ;;  %v2388_v11 = vmul.f32 %v3620_v58, %v9222_v17  ;;  %v9223_v10 = vld [vmem:[#allocation231_spill] sm:$0xff]  ;;  %v9226_v17 = vld [vmem:[#allocation264_spill] sm:$0xff]  ;;  %3641 = vrsqrt.f32 %v6694_v7 }
 0x223   :  { %v6742_v37 = vpop.eup %3631  ;;  %v2704_v50 = vmul.f32 %v6667_v16, %v2385_v28  ;;  %v2705_v26 = vmul.f32 %v6669_v25, %v2386_v6  ;;  %v3019_v55 = vadd.f32 %v6671_v22, %v2700_v21  ;;  %v3020_v52 = vadd.f32 %v6673_v36, %v2701_v48  ;;  %v9225_v6 = vld [vmem:[#allocation263_spill] sm:$0xff] }
 0x224   :  { %v6748_v51 = vpop.eup %3633  ;;  %v3021_v59 = vadd.f32 %v6675_v3, %v2702_v14  ;;  %v3022_v49 = vadd.f32 %v6684_v2, %v2703_v15  ;;  %v2389_v27 = vmul.f32 %v3620_v58, %v9223_v10  ;;  %v2390_v24 = vmul.f32 %v3620_v58, %v9224_v18 }
 0x225   :  { %v3023_v43 = vadd.f32 %v6686_v13, %v2704_v50  ;;  %v3024_v28 = vadd.f32 %v6688_v32, %v2705_v26  ;;  %3307 = vst [vmem:[#allocation10 + $0x30] sm:$0xff] %v3019_v55  ;;  %3308 = vst [vmem:[#allocation10 + $0x38] sm:$0xff] %v3020_v52  ;;  %v2391_v21 = vmul.f32 %v3620_v58, %v9225_v6  ;;  %v6758_v46 = vpop.eup %3635  ;;  %3643 = vrsqrt.f32 %v6696_v23 }
 0x226   :  { %v2392_v48 = vmul.f32 %v3620_v58, %v9226_v17  ;;  %3309 = vst [vmem:[#allocation10 + $0x40] sm:$0xff] %v3021_v59  ;;  %3310 = vst [vmem:[#allocation10 + $0x48] sm:$0xff] %v3022_v49  ;;  %v2706_v14 = vmul.f32 %v6659_v4, %v2387_v39  ;;  %v2707_v15 = vmul.f32 %v6661_v57, %v2388_v11  ;;  %3645 = vrsqrt.f32 %v6698_v63 }
 0x227   :  { %v2708_v10 = vmul.f32 %v6663_v60, %v2389_v27  ;;  %v2709_v50 = vmul.f32 %v6665_v38, %v2390_v24  ;;  %3311 = vst [vmem:[#allocation10 + $0x50] sm:$0xff] %v3023_v43  ;;  %3312 = vst [vmem:[#allocation10 + $0x58] sm:$0xff] %v3024_v28  ;;  %v2710_v26 = vmul.f32 %v6667_v16, %v2391_v21  ;;  %3647 = vrsqrt.f32 %v6706_v19 }
 0x228   :  { %v2711_v55 = vmul.f32 %v6669_v25, %v2392_v48  ;;  %v2393_v58 = vmul.f32 %v6712_v8, %v4928_v1  ;;  %v2394_v52 = vmul.f32 %v6712_v8, %v4932_v47  ;;  %v3025_v39 = vadd.f32 %v6671_v22, %v2706_v14 }
 0x229   :  { %v3026_v11 = vadd.f32 %v6673_v36, %v2707_v15  ;;  %v3027_v59 = vadd.f32 %v6675_v3, %v2708_v10  ;;  %v3028_v49 = vadd.f32 %v6684_v2, %v2709_v50  ;;  %v3029_v27 = vadd.f32 %v6686_v13, %v2710_v26  ;;  %v9227_v50 = vld [vmem:[#allocation271_spill] sm:$0xff]  ;;  %v6802_v26 = vpop.xlane.xlu1 %2017 }
 0x22a   :  { %v3030_v18 = vadd.f32 %v6688_v32, %v2711_v55  ;;  %v2395_v24 = vmul.f32 %v6712_v8, %v4936_v62  ;;  %v2396_v1 = vmul.f32 %v6712_v8, %v4942_v35  ;;  %3313 = vst [vmem:[#allocation10 + $0x60] sm:$0xff] %v3025_v39  ;;  %v2397_v47 = vmul.f32 %v6712_v8, %v4947_v53  ;;  %v9229_v39 = vld [vmem:[#allocation23_spill] sm:$0xff] }
 0x22b   :  { %3314 = vst [vmem:[#allocation10 + $0x68] sm:$0xff] %v3026_v11  ;;  %3315 = vst [vmem:[#allocation10 + $0x70] sm:$0xff] %v3027_v59  ;;  %v2398_v43 = vmul.f32 %v6712_v8, %v4957_v61  ;;  %v2712_v28 = vmul.f32 %v6659_v4, %v2393_v58  ;;  %v2713_v6 = vmul.f32 %v6661_v57, %v2394_v52  ;;  %v9228_v58 = vld [vmem:[#allocation272_spill] sm:$0xff] }
 0x22c   :  { %3316 = vst [vmem:[#allocation10 + $0x78] sm:$0xff] %v3028_v49  ;;  %3317 = vst [vmem:[#allocation10 + $0x80] sm:$0xff] %v3029_v27  ;;  %v2714_v62 = vmul.f32 %v6663_v60, %v2395_v24  ;;  %v2715_v35 = vmul.f32 %v6665_v38, %v2396_v1  ;;  %v2399_v21 = vmul.f32 %v6718_v41, %v4965_v42  ;;  %v9230_v1 = vld [vmem:[#allocation254_spill] sm:$0xff] }
 0x22d   :  { %3318 = vst [vmem:[#allocation10 + $0x88] sm:$0xff] %v3030_v18  ;;  %v2400_v17 = vmul.f32 %v6718_v41, %v4969_v5  ;;  %v2716_v53 = vmul.f32 %v6667_v16, %v2397_v47  ;;  %v2717_v61 = vmul.f32 %v6669_v25, %v2398_v43  ;;  %v3031_v8 = vadd.f32 %v6671_v22, %v2712_v28 }
 0x22e   :  { %v3032_v48 = vadd.f32 %v6673_v36, %v2713_v6  ;;  %v3033_v14 = vadd.f32 %v6675_v3, %v2714_v62  ;;  %v3034_v15 = vadd.f32 %v6684_v2, %v2715_v35  ;;  %v2401_v10 = vmul.f32 %v6718_v41, %v4975_v45 }
 0x22f   :  { %v2402_v42 = vmul.f32 %v6718_v41, %v9227_v50  ;;  %v3035_v5 = vadd.f32 %v6686_v13, %v2716_v53  ;;  %v3036_v55 = vadd.f32 %v6688_v32, %v2717_v61  ;;  %3319 = vst [vmem:[#allocation10 + $0x90] sm:$0xff] %v3031_v8  ;;  %v2403_v52 = vmul.f32 %v6718_v41, %v9228_v58  ;;  %v9232_v53 = vld [vmem:[#allocation16_spill] sm:$0xff]  ;;  %v9233_v8 = vld [vmem:[#allocation17_spill] sm:$0xff]  ;;  %v6838_v58 = vpop.xlane.xlu1 %2031 }
 0x230   :  { %3320 = vst [vmem:[#allocation10 + $0x98] sm:$0xff] %v3032_v48  ;;  %v2404_v11 = vmul.f32 %v6718_v41, %v9229_v39  ;;  %3321 = vst [vmem:[#allocation10 + $0xa0] sm:$0xff] %v3033_v14  ;;  %v2718_v45 = vmul.f32 %v6659_v4, %v2399_v21  ;;  %v2719_v59 = vmul.f32 %v6661_v57, %v2400_v17  ;;  %v9231_v41 = vld [vmem:[#allocation15_spill] sm:$0xff]  ;;  %v9234_v14 = vld [vmem:[#allocation18_spill] sm:$0xff] }
 0x231   :  { %3322 = vst [vmem:[#allocation10 + $0xa8] sm:$0xff] %v3034_v15  ;;  %v2720_v49 = vmul.f32 %v6663_v60, %v2401_v10  ;;  %v2721_v27 = vmul.f32 %v6665_v38, %v2402_v42  ;;  %3323 = vst [vmem:[#allocation10 + $0xb0] sm:$0xff] %v3035_v5  ;;  %v2722_v18 = vmul.f32 %v6667_v16, %v2403_v52  ;;  %v9235_v10 = vld [vmem:[#allocation19_spill] sm:$0xff] }
 0x232   :  { %3324 = vst [vmem:[#allocation10 + $0xb8] sm:$0xff] %v3036_v55  ;;  %v2723_v24 = vmul.f32 %v6669_v25, %v2404_v11  ;;  %v2405_v47 = vmul.f32 %v6724_v29, %v9230_v1  ;;  %v2406_v43 = vmul.f32 %v6724_v29, %v9231_v41  ;;  %v3037_v28 = vadd.f32 %v6671_v22, %v2718_v45  ;;  %v6836_v55 = vpop.xlane.xlu0 %2024  ;;  %v9236_v11 = vld [vmem:[#allocation20_spill] sm:$0xff] }
 0x233   :  { %v3038_v6 = vadd.f32 %v6673_v36, %v2719_v59  ;;  %v3039_v62 = vadd.f32 %v6675_v3, %v2720_v49  ;;  %v3040_v35 = vadd.f32 %v6684_v2, %v2721_v27  ;;  %v3041_v21 = vadd.f32 %v6686_v13, %v2722_v18  ;;  %v9237_v59 = vld [vmem:[#allocation27_spill] sm:$0xff]  ;;  %v9238_v41 = vld [vmem:[#allocation28_spill] sm:$0xff] }
 0x234   :  { %v3042_v17 = vadd.f32 %v6688_v32, %v2723_v24  ;;  %v2407_v61 = vmul.f32 %v6724_v29, %v9232_v53  ;;  %v2408_v48 = vmul.f32 %v6724_v29, %v9233_v8  ;;  %3325 = vst [vmem:[#allocation10 + $0xc0] sm:$0xff] %v3037_v28  ;;  %v2409_v15 = vmul.f32 %v6724_v29, %v9234_v14  ;;  %v9239_v28 = vld [vmem:[#allocation30_spill] sm:$0xff]  ;;  %v9241_v53 = vld [vmem:[#allocation32_spill] sm:$0xff] }
 0x235   :  { %3326 = vst [vmem:[#allocation10 + $0xc8] sm:$0xff] %v3038_v6  ;;  %3327 = vst [vmem:[#allocation10 + $0xd0] sm:$0xff] %v3039_v62  ;;  %v2410_v50 = vmul.f32 %v6724_v29, %v9235_v10  ;;  %v2724_v42 = vmul.f32 %v6659_v4, %v2405_v47  ;;  %v2725_v5 = vmul.f32 %v6661_v57, %v2406_v43  ;;  %v2247_v31 = vmul.f32 0.0013020834, %v6836_v55 }
 0x236   :  { %3328 = vst [vmem:[#allocation10 + $0xd8] sm:$0xff] %v3040_v35  ;;  %3329 = vst [vmem:[#allocation10 + $0xe0] sm:$0xff] %v3041_v21  ;;  %v2726_v52 = vmul.f32 %v6663_v60, %v2407_v61  ;;  %v2727_v39 = vmul.f32 %v6665_v38, %v2408_v48  ;;  %v2411_v45 = vmul.f32 %v6730_v20, %v9236_v11  ;;  %v9240_v21 = vld [vmem:[#allocation31_spill] sm:$0xff]  ;;  %v6874_v11 = vpop.xlane.xlu1 %2045 }
 0x237   :  { %3330 = vst [vmem:[#allocation10 + $0xe8] sm:$0xff] %v3042_v17  ;;  %v2412_v29 = vmul.f32 %v6730_v20, %v9237_v59  ;;  %v2728_v49 = vmul.f32 %v6667_v16, %v2409_v15  ;;  %v2729_v27 = vmul.f32 %v6669_v25, %v2410_v50  ;;  %v3043_v18 = vadd.f32 %v6671_v22, %v2724_v42  ;;  %v9242_v42 = vld [vmem:[#allocation35_spill] sm:$0xff] }
 0x238   :  { %v3044_v24 = vadd.f32 %v6673_v36, %v2725_v5  ;;  %v3045_v1 = vadd.f32 %v6675_v3, %v2726_v52  ;;  %v3046_v47 = vadd.f32 %v6684_v2, %v2727_v39  ;;  %v2413_v43 = vmul.f32 %v6730_v20, %v9238_v41  ;;  %v6872_v39 = vpop.xlane.xlu0 %2038 }
 0x239   :  { %v2414_v6 = vmul.f32 %v6730_v20, %v9239_v28  ;;  %v3047_v62 = vadd.f32 %v6686_v13, %v2728_v49  ;;  %v3048_v35 = vadd.f32 %v6688_v32, %v2729_v27  ;;  %3331 = vst [vmem:[#allocation10 + $0xf0] sm:$0xff] %v3043_v18  ;;  %v2415_v17 = vmul.f32 %v6730_v20, %v9240_v21 }
 0x23a   :  { %3332 = vst [vmem:[#allocation10 + $0xf8] sm:$0xff] %v3044_v24  ;;  %v2416_v61 = vmul.f32 %v6730_v20, %v9241_v53  ;;  %3333 = vst [vmem:[#allocation10 + $0x100] sm:$0xff] %v3045_v1  ;;  %v2730_v8 = vmul.f32 %v6659_v4, %v2411_v45  ;;  %v2731_v48 = vmul.f32 %v6661_v57, %v2412_v29  ;;  %v9243_v20 = vld [vmem:[#allocation21_spill] sm:$0xff]  ;;  %v9244_v24 = vld [vmem:[#allocation22_spill] sm:$0xff] }
 0x23b   :  { %3334 = vst [vmem:[#allocation10 + $0x108] sm:$0xff] %v3046_v47  ;;  %v2732_v14 = vmul.f32 %v6663_v60, %v2413_v43  ;;  %v2733_v15 = vmul.f32 %v6665_v38, %v2414_v6  ;;  %3335 = vst [vmem:[#allocation10 + $0x110] sm:$0xff] %v3047_v62  ;;  %v2734_v10 = vmul.f32 %v6667_v16, %v2415_v17  ;;  %v9245_v47 = vld [vmem:[#allocation24_spill] sm:$0xff]  ;;  %v9246_v43 = vld [vmem:[#allocation25_spill] sm:$0xff] }
 0x23c   :  { %3336 = vst [vmem:[#allocation10 + $0x118] sm:$0xff] %v3048_v35  ;;  %v2735_v50 = vmul.f32 %v6669_v25, %v2416_v61  ;;  %v2417_v5 = vmul.f32 %v6736_v12, %v9242_v42  ;;  %v2418_v52 = vmul.f32 %v6736_v12, %v9243_v20  ;;  %v3049_v45 = vadd.f32 %v6671_v22, %v2730_v8  ;;  %v9247_v6 = vld [vmem:[#allocation26_spill] sm:$0xff]  ;;  %v9248_v61 = vld [vmem:[#allocation29_spill] sm:$0xff]  ;;  %v9250_v20 = vld [vmem:[#allocation40_spill] sm:$0xff] }
 0x23d   :  { %v3050_v59 = vadd.f32 %v6673_v36, %v2731_v48  ;;  %v3051_v29 = vadd.f32 %v6675_v3, %v2732_v14  ;;  %v3052_v49 = vadd.f32 %v6684_v2, %v2733_v15  ;;  %v3053_v27 = vadd.f32 %v6686_v13, %v2734_v10  ;;  %v9249_v48 = vld [vmem:[#allocation39_spill] sm:$0xff] }
 0x23e   :  { %v3054_v18 = vadd.f32 %v6688_v32, %v2735_v50  ;;  %v2419_v1 = vmul.f32 %v6736_v12, %v9244_v24  ;;  %v2420_v41 = vmul.f32 %v6736_v12, %v9245_v47  ;;  %3337 = vst [vmem:[#allocation10 + $0x120] sm:$0xff] %v3049_v45  ;;  %v2421_v28 = vmul.f32 %v6736_v12, %v9246_v43  ;;  %v9251_v45 = vld [vmem:[#allocation42_spill] sm:$0xff]  ;;  %v9252_v24 = vld [vmem:[#allocation43_spill] sm:$0xff]  ;;  %v9253_v47 = vld [vmem:[#allocation44_spill] sm:$0xff] }
 0x23f   :  { %3338 = vst [vmem:[#allocation10 + $0x128] sm:$0xff] %v3050_v59  ;;  %3339 = vst [vmem:[#allocation10 + $0x130] sm:$0xff] %v3051_v29  ;;  %v2422_v62 = vmul.f32 %v6736_v12, %v9247_v6  ;;  %v2736_v35 = vmul.f32 %v6659_v4, %v2417_v5  ;;  %v2737_v21 = vmul.f32 %v6661_v57, %v2418_v52  ;;  %v6908_v29 = vpop.xlane.xlu0 %2052 }
 0x240   :  { %3340 = vst [vmem:[#allocation10 + $0x138] sm:$0xff] %v3052_v49  ;;  %3341 = vst [vmem:[#allocation10 + $0x140] sm:$0xff] %v3053_v27  ;;  %v2738_v17 = vmul.f32 %v6663_v60, %v2419_v1  ;;  %v2739_v53 = vmul.f32 %v6665_v38, %v2420_v41  ;;  %v2423_v8 = vmul.f32 %v6742_v37, %v9248_v61  ;;  %v6910_v49 = vpop.xlane.xlu1 %2059  ;;  %v2251_v34 = vmul.f32 0.0013020834, %v6908_v29 }
 0x241   :  { %3342 = vst [vmem:[#allocation10 + $0x148] sm:$0xff] %v3054_v18  ;;  %v2424_v14 = vmul.f32 %v6742_v37, %v9249_v48  ;;  %v2740_v15 = vmul.f32 %v6667_v16, %v2421_v28  ;;  %v2741_v12 = vmul.f32 %v6669_v25, %v2422_v62  ;;  %v3055_v10 = vadd.f32 %v6671_v22, %v2736_v35 }
 0x242   :  { %v3056_v50 = vadd.f32 %v6673_v36, %v2737_v21  ;;  %v3057_v42 = vadd.f32 %v6675_v3, %v2738_v17  ;;  %v3058_v5 = vadd.f32 %v6684_v2, %v2739_v53  ;;  %v2425_v52 = vmul.f32 %v6742_v37, %v9250_v20  ;;  %v9254_v17 = vld [vmem:[#allocation47_spill] sm:$0xff] }
 0x243   :  { %v2426_v59 = vmul.f32 %v6742_v37, %v9251_v45  ;;  %v3059_v27 = vadd.f32 %v6686_v13, %v2740_v15  ;;  %v3060_v18 = vadd.f32 %v6688_v32, %v2741_v12  ;;  %3343 = vst [vmem:[#allocation10 + $0x150] sm:$0xff] %v3055_v10  ;;  %v2427_v1 = vmul.f32 %v6742_v37, %v9252_v24 }
 0x244   :  { %3344 = vst [vmem:[#allocation10 + $0x158] sm:$0xff] %v3056_v50  ;;  %v2428_v41 = vmul.f32 %v6742_v37, %v9253_v47  ;;  %3345 = vst [vmem:[#allocation10 + $0x160] sm:$0xff] %v3057_v42  ;;  %v2742_v43 = vmul.f32 %v6659_v4, %v2423_v8  ;;  %v2743_v28 = vmul.f32 %v6661_v57, %v2424_v14  ;;  %v9255_v37 = vld [vmem:[#allocation33_spill] sm:$0xff]  ;;  %v9256_v50 = vld [vmem:[#allocation34_spill] sm:$0xff]  ;;  %v6946_v47 = vpop.xlane.xlu1 %2073  ;;  %v2252_v7 = vmul.f32 0.0013020834, %v6910_v49 }
 0x245   :  { %3346 = vst [vmem:[#allocation10 + $0x168] sm:$0xff] %v3058_v5  ;;  %v2744_v6 = vmul.f32 %v6663_v60, %v2425_v52  ;;  %v2745_v62 = vmul.f32 %v6665_v38, %v2426_v59  ;;  %3347 = vst [vmem:[#allocation10 + $0x170] sm:$0xff] %v3059_v27  ;;  %v2746_v35 = vmul.f32 %v6667_v16, %v2427_v1  ;;  %v9257_v5 = vld [vmem:[#allocation36_spill] sm:$0xff]  ;;  %v9258_v52 = vld [vmem:[#allocation37_spill] sm:$0xff]  ;;  %v6944_v1 = vpop.xlane.xlu0 %2066  ;;  %v2254_v23 = vmul.f32 0.0013020834, %v6946_v47 }
 0x246   :  { %3348 = vst [vmem:[#allocation10 + $0x178] sm:$0xff] %v3060_v18  ;;  %v2747_v21 = vmul.f32 %v6669_v25, %v2428_v41  ;;  %v2429_v53 = vmul.f32 %v6748_v51, %v9254_v17  ;;  %v2430_v61 = vmul.f32 %v6748_v51, %v9255_v37  ;;  %v3061_v8 = vadd.f32 %v6671_v22, %v2742_v43  ;;  %v9259_v59 = vld [vmem:[#allocation38_spill] sm:$0xff] }
 0x247   :  { %v3062_v48 = vadd.f32 %v6673_v36, %v2743_v28  ;;  %v3063_v14 = vadd.f32 %v6675_v3, %v2744_v6  ;;  %v3064_v15 = vadd.f32 %v6684_v2, %v2745_v62  ;;  %v3065_v12 = vadd.f32 %v6686_v13, %v2746_v35  ;;  %v9260_v28 = vld [vmem:[#allocation41_spill] sm:$0xff]  ;;  %v9261_v62 = vld [vmem:[#allocation51_spill] sm:$0xff] }
 0x248   :  { %v3066_v10 = vadd.f32 %v6688_v32, %v2747_v21  ;;  %v2431_v42 = vmul.f32 %v6748_v51, %v9256_v50  ;;  %v2432_v20 = vmul.f32 %v6748_v51, %v9257_v5  ;;  %3349 = vst [vmem:[#allocation10 + $0x180] sm:$0xff] %v3061_v8  ;;  %v2433_v45 = vmul.f32 %v6748_v51, %v9258_v52  ;;  %v9262_v8 = vld [vmem:[#allocation52_spill] sm:$0xff]  ;;  %v9264_v50 = vld [vmem:[#allocation55_spill] sm:$0xff] }
 0x249   :  { %3350 = vst [vmem:[#allocation10 + $0x188] sm:$0xff] %v3062_v48  ;;  %3351 = vst [vmem:[#allocation10 + $0x190] sm:$0xff] %v3063_v14  ;;  %v2434_v27 = vmul.f32 %v6748_v51, %v9259_v59  ;;  %v2748_v18 = vmul.f32 %v6659_v4, %v2429_v53  ;;  %v2749_v24 = vmul.f32 %v6661_v57, %v2430_v61  ;;  %v9263_v14 = vld [vmem:[#allocation54_spill] sm:$0xff]  ;;  %v9265_v5 = vld [vmem:[#allocation56_spill] sm:$0xff]  ;;  %v6997_v29 = vadd.f32 1e-12, %v2251_v34 }
 0x24a   :  { %3352 = vst [vmem:[#allocation10 + $0x198] sm:$0xff] %v3064_v15  ;;  %3353 = vst [vmem:[#allocation10 + $0x1a0] sm:$0xff] %v3065_v12  ;;  %v2750_v41 = vmul.f32 %v6663_v60, %v2431_v42  ;;  %v2751_v43 = vmul.f32 %v6665_v38, %v2432_v20  ;;  %v2435_v6 = vmul.f32 %v6758_v46, %v9260_v28  ;;  %v9273_v34 = vld [vmem:[#allocation63_spill] sm:$0xff] }
 0x24b   :  { %3354 = vst [vmem:[#allocation10 + $0x1a8] sm:$0xff] %v3066_v10  ;;  %v2436_v51 = vmul.f32 %v6758_v46, %v9261_v62  ;;  %v2752_v35 = vmul.f32 %v6667_v16, %v2433_v45  ;;  %v2753_v21 = vmul.f32 %v6669_v25, %v2434_v27  ;;  %v3067_v17 = vadd.f32 %v6671_v22, %v2748_v18 }
 0x24c   :  { %v3068_v53 = vadd.f32 %v6673_v36, %v2749_v24  ;;  %v3069_v37 = vadd.f32 %v6675_v3, %v2750_v41  ;;  %v3070_v61 = vadd.f32 %v6684_v2, %v2751_v43  ;;  %v2437_v48 = vmul.f32 %v6758_v46, %v9262_v8  ;;  %v2081_v41 = vpop.xlane.xlu0 %2080  ;;  %v2088_v43 = vpop.xlane.xlu1 %2087 }
 0x24d   :  { %v2438_v15 = vmul.f32 %v6758_v46, %v9263_v14  ;;  %v3071_v12 = vadd.f32 %v6686_v13, %v2752_v35  ;;  %v3072_v10 = vadd.f32 %v6688_v32, %v2753_v21  ;;  %3355 = vst [vmem:[#allocation10 + $0x1b0] sm:$0xff] %v3067_v17  ;;  %v2439_v42 = vmul.f32 %v6758_v46, %v9264_v50  ;;  %v9266_v50 = vld [vmem:[#allocation59_spill] sm:$0xff] }
 0x24e   :  { %3356 = vst [vmem:[#allocation10 + $0x1b8] sm:$0xff] %v3068_v53  ;;  %v2440_v20 = vmul.f32 %v6758_v46, %v9265_v5  ;;  %3357 = vst [vmem:[#allocation10 + $0x1c0] sm:$0xff] %v3069_v37  ;;  %v2754_v52 = vmul.f32 %v6659_v4, %v2435_v6  ;;  %v2755_v45 = vmul.f32 %v6661_v57, %v2436_v51  ;;  %v2246_v46 = vmul.f32 0.0013020834, %v6802_v26  ;;  %v9267_v5 = vld [vmem:[#allocation45_spill] sm:$0xff] }
 0x24f   :  { %3358 = vst [vmem:[#allocation10 + $0x1c8] sm:$0xff] %v3070_v61  ;;  %v2756_v59 = vmul.f32 %v6663_v60, %v2437_v48  ;;  %v2757_v27 = vmul.f32 %v6665_v38, %v2438_v15  ;;  %3359 = vst [vmem:[#allocation10 + $0x1d0] sm:$0xff] %v3071_v12  ;;  %v2758_v18 = vmul.f32 %v6667_v16, %v2439_v42  ;;  %v2248_v26 = vmul.f32 0.0013020834, %v6838_v58  ;;  %v3638_v12 = vpop.eup %3637 }
 0x250   :  { %3360 = vst [vmem:[#allocation10 + $0x1d8] sm:$0xff] %v3072_v10  ;;  %v2759_v24 = vmul.f32 %v6669_v25, %v2440_v20  ;;  %v3073_v28 = vadd.f32 %v6671_v22, %v2754_v52  ;;  %v3074_v6 = vadd.f32 %v6673_v36, %v2755_v45  ;;  %v2294_v17 = vadd.f32 1e-12, %v2246_v46  ;;  %v2095_v58 = vpop.xlane.xlu0 %2094  ;;  %v2102_v48 = vpop.xlane.xlu1 %2101  ;;  %v9268_v52 = vld [vmem:[#allocation46_spill] sm:$0xff] }
 0x251   :  { %v3075_v62 = vadd.f32 %v6675_v3, %v2756_v59  ;;  %v3076_v51 = vadd.f32 %v6684_v2, %v2757_v27  ;;  %v3077_v35 = vadd.f32 %v6686_v13, %v2758_v18  ;;  %v2249_v53 = vmul.f32 0.0013020834, %v6872_v39  ;;  %v9269_v59 = vld [vmem:[#allocation48_spill] sm:$0xff]  ;;  %v3640_v18 = vpop.eup %3639 }
 0x252   :  { %v3078_v21 = vadd.f32 %v6688_v32, %v2759_v24  ;;  %3361 = vst [vmem:[#allocation10 + $0x1e0] sm:$0xff] %v3073_v28  ;;  %3362 = vst [vmem:[#allocation10 + $0x1e8] sm:$0xff] %v3074_v6  ;;  %v2250_v37 = vmul.f32 0.0013020834, %v6874_v11  ;;  %v2295_v61 = vadd.f32 1e-12, %v2247_v31  ;;  %3649 = vrsqrt.f32 %v2294_v17  ;;  %v3642_v6 = vpop.eup %3641 }
 0x253   :  { %3363 = vst [vmem:[#allocation10 + $0x1f0] sm:$0xff] %v3075_v62  ;;  %3364 = vst [vmem:[#allocation10 + $0x1f8] sm:$0xff] %v3076_v51  ;;  %v2296_v8 = vadd.f32 1e-12, %v2248_v26  ;;  %v2297_v55 = vadd.f32 1e-12, %v2249_v53  ;;  %v2441_v42 = vmul.f32 %v3638_v12, %v9266_v50  ;;  %v2442_v20 = vmul.f32 %v3638_v12, %v9267_v5  ;;  %v7023_v17 = vpop.eup %3643 }
 0x254   :  { %3365 = vst [vmem:[#allocation10 + $0x200] sm:$0xff] %v3077_v35  ;;  %3366 = vst [vmem:[#allocation10 + $0x208] sm:$0xff] %v3078_v21  ;;  %v2253_v39 = vmul.f32 0.0013020834, %v6944_v1  ;;  %v2255_v14 = vmul.f32 0.0013020834, %v2081_v41  ;;  %3651 = vrsqrt.f32 %v2295_v61  ;;  %v2443_v45 = vmul.f32 %v3638_v12, %v9268_v52 }
 0x255   :  { %v2298_v11 = vadd.f32 1e-12, %v2250_v37  ;;  %v2256_v63 = vmul.f32 0.0013020834, %v2088_v43  ;;  %3653 = vrsqrt.f32 %v2296_v8  ;;  %v6999_v15 = vadd.f32 1e-12, %v2252_v7  ;;  %v7029_v8 = vpop.eup %3645 }
 0x256   :  { %v7001_v49 = vmul.f32 0.0013020834, %v2095_v58  ;;  %v7003_v19 = vmul.f32 0.0013020834, %v2102_v48  ;;  %3655 = vrsqrt.f32 %v2297_v55  ;;  %v7005_v10 = vadd.f32 1e-12, %v2253_v39  ;;  %v7035_v39 = vpop.eup %3647 }
 0x257   :  { %v7007_v1 = vadd.f32 1e-12, %v2254_v23  ;;  %v7009_v47 = vadd.f32 1e-12, %v2255_v14  ;;  %v2444_v27 = vmul.f32 %v3638_v12, %v9269_v59  ;;  %v9270_v24 = vld [vmem:[#allocation49_spill] sm:$0xff]  ;;  %v9271_v41 = vld [vmem:[#allocation50_spill] sm:$0xff]  ;;  %3657 = vrsqrt.f32 %v2298_v11 }
 0x258   :  { %v2445_v46 = vmul.f32 %v3638_v12, %v9270_v24  ;;  %v2446_v43 = vmul.f32 %v3638_v12, %v9271_v41  ;;  %v7017_v28 = vadd.f32 1e-12, %v2256_v63  ;;  %v2760_v62 = vmul.f32 %v6659_v4, %v2441_v42  ;;  %v9272_v53 = vld [vmem:[#allocation53_spill] sm:$0xff]  ;;  %v9274_v11 = vld [vmem:[#allocation64_spill] sm:$0xff]  ;;  %v9275_v12 = vld [vmem:[#allocation66_spill] sm:$0xff] }
 0x259   :  { %v2761_v51 = vmul.f32 %v6661_v57, %v2442_v20  ;;  %v2762_v35 = vmul.f32 %v6663_v60, %v2443_v45  ;;  %v2763_v21 = vmul.f32 %v6665_v38, %v2444_v27  ;;  %v2447_v37 = vmul.f32 %v3640_v18, %v9272_v53  ;;  %v9276_v5 = vld [vmem:[#allocation67_spill] sm:$0xff]  ;;  %v9277_v52 = vld [vmem:[#allocation68_spill] sm:$0xff] }
 0x25a   :  { %v2764_v31 = vmul.f32 %v6667_v16, %v2445_v46  ;;  %v2765_v26 = vmul.f32 %v6669_v25, %v2446_v43  ;;  %v2448_v61 = vmul.f32 %v3640_v18, %v9273_v34  ;;  %v3079_v7 = vadd.f32 %v6671_v22, %v2760_v62  ;;  %v9278_v43 = vld [vmem:[#allocation71_spill] sm:$0xff] }
 0x25b   :  { %v3080_v55 = vadd.f32 %v6673_v36, %v2761_v51  ;;  %v3081_v58 = vadd.f32 %v6675_v3, %v2762_v35  ;;  %v3082_v48 = vadd.f32 %v6684_v2, %v2763_v21  ;;  %v2449_v63 = vmul.f32 %v3640_v18, %v9274_v11  ;;  %v9279_v51 = vld [vmem:[#allocation57_spill] sm:$0xff] }
 0x25c   :  { %v3083_v23 = vadd.f32 %v6686_v13, %v2764_v31  ;;  %v3084_v14 = vadd.f32 %v6688_v32, %v2765_v26  ;;  %v2450_v50 = vmul.f32 %v3640_v18, %v9275_v12  ;;  %v7041_v42 = vpop.eup %3649  ;;  %3367 = vst [vmem:[#allocation10 + $0x210] sm:$0xff] %v3079_v7  ;;  %v2451_v20 = vmul.f32 %v3640_v18, %v9276_v5  ;;  %v9280_v7 = vld [vmem:[#allocation58_spill] sm:$0xff]  ;;  %v9282_v11 = vld [vmem:[#allocation61_spill] sm:$0xff] }
 0x25d   :  { %3368 = vst [vmem:[#allocation10 + $0x218] sm:$0xff] %v3080_v55  ;;  %3369 = vst [vmem:[#allocation10 + $0x220] sm:$0xff] %v3081_v58  ;;  %v2452_v45 = vmul.f32 %v3640_v18, %v9277_v52  ;;  %v2766_v59 = vmul.f32 %v6659_v4, %v2447_v37  ;;  %v2767_v27 = vmul.f32 %v6661_v57, %v2448_v61  ;;  %v9281_v58 = vld [vmem:[#allocation60_spill] sm:$0xff]  ;;  %v9283_v12 = vld [vmem:[#allocation62_spill] sm:$0xff]  ;;  %3659 = vrsqrt.f32 %v6997_v29 }
 0x25e   :  { %3370 = vst [vmem:[#allocation10 + $0x228] sm:$0xff] %v3082_v48  ;;  %v7047_v24 = vpop.eup %3651  ;;  %3371 = vst [vmem:[#allocation10 + $0x230] sm:$0xff] %v3083_v23  ;;  %v2768_v46 = vmul.f32 %v6663_v60, %v2449_v63  ;;  %v2769_v41 = vmul.f32 %v6665_v38, %v2450_v50  ;;  %v2453_v62 = vmul.f32 %v3642_v6, %v9278_v43  ;;  %v9285_v43 = vld [vmem:[#allocation75_spill] sm:$0xff]  ;;  %3661 = vrsqrt.f32 %v6999_v15 }
 0x25f   :  { %3372 = vst [vmem:[#allocation10 + $0x238] sm:$0xff] %v3084_v14  ;;  %v2454_v35 = vmul.f32 %v3642_v6, %v9279_v51  ;;  %v7053_v21 = vpop.eup %3653  ;;  %v2770_v18 = vmul.f32 %v6667_v16, %v2451_v20  ;;  %v2771_v31 = vmul.f32 %v6669_v25, %v2452_v45  ;;  %v3085_v26 = vadd.f32 %v6671_v22, %v2766_v59 }
 0x260   :  { %v3086_v53 = vadd.f32 %v6673_v36, %v2767_v27  ;;  %v7059_v37 = vpop.eup %3655  ;;  %v3087_v34 = vadd.f32 %v6675_v3, %v2768_v46  ;;  %v3088_v61 = vadd.f32 %v6684_v2, %v2769_v41  ;;  %v2455_v55 = vmul.f32 %v3642_v6, %v9280_v7  ;;  %v9284_v41 = vld [vmem:[#allocation65_spill] sm:$0xff]  ;;  %v9287_v7 = vld [vmem:[#allocation78_spill] sm:$0xff] }
 0x261   :  { %v2456_v48 = vmul.f32 %v3642_v6, %v9281_v58  ;;  %v3089_v23 = vadd.f32 %v6686_v13, %v2770_v18  ;;  %v3090_v14 = vadd.f32 %v6688_v32, %v2771_v31  ;;  %3373 = vst [vmem:[#allocation10 + $0x240] sm:$0xff] %v3085_v26  ;;  %v2457_v63 = vmul.f32 %v3642_v6, %v9282_v11  ;;  %v7069_v5 = vpop.eup %3657  ;;  %v9288_v58 = vld [vmem:[#allocation79_spill] sm:$0xff] }
 0x262   :  { %3374 = vst [vmem:[#allocation10 + $0x248] sm:$0xff] %v3086_v53  ;;  %v2458_v50 = vmul.f32 %v3642_v6, %v9283_v12  ;;  %3375 = vst [vmem:[#allocation10 + $0x250] sm:$0xff] %v3087_v34  ;;  %v2772_v20 = vmul.f32 %v6659_v4, %v2453_v62  ;;  %v2773_v52 = vmul.f32 %v6661_v57, %v2454_v35  ;;  %v9286_v34 = vld [vmem:[#allocation76_spill] sm:$0xff]  ;;  %3663 = vrsqrt.f32 %v7005_v10 }
 0x263   :  { %3376 = vst [vmem:[#allocation10 + $0x258] sm:$0xff] %v3088_v61  ;;  %v2774_v45 = vmul.f32 %v6663_v60, %v2455_v55  ;;  %v2775_v59 = vmul.f32 %v6665_v38, %v2456_v48  ;;  %3377 = vst [vmem:[#allocation10 + $0x260] sm:$0xff] %v3089_v23  ;;  %v2776_v27 = vmul.f32 %v6667_v16, %v2457_v63  ;;  %v9289_v23 = vld [vmem:[#allocation80_spill] sm:$0xff]  ;;  %v2305_v29 = vadd.f32 1e-12, %v7001_v49 }
 0x264   :  { %3378 = vst [vmem:[#allocation10 + $0x268] sm:$0xff] %v3090_v14  ;;  %v2777_v46 = vmul.f32 %v6669_v25, %v2458_v50  ;;  %v2459_v6 = vmul.f32 %v7023_v17, %v9284_v41  ;;  %v2460_v51 = vmul.f32 %v7023_v17, %v9285_v43  ;;  %v3091_v62 = vadd.f32 %v6671_v22, %v2772_v20  ;;  %v9290_v20 = vld [vmem:[#allocation83_spill] sm:$0xff] }
 0x265   :  { %v3092_v35 = vadd.f32 %v6673_v36, %v2773_v52  ;;  %v3093_v18 = vadd.f32 %v6675_v3, %v2774_v45  ;;  %v3094_v31 = vadd.f32 %v6684_v2, %v2775_v59  ;;  %v3095_v26 = vadd.f32 %v6686_v13, %v2776_v27  ;;  %v9291_v45 = vld [vmem:[#allocation69_spill] sm:$0xff] }
 0x266   :  { %v3096_v53 = vadd.f32 %v6688_v32, %v2777_v46  ;;  %v2461_v61 = vmul.f32 %v7023_v17, %v9286_v34  ;;  %v2462_v55 = vmul.f32 %v7023_v17, %v9287_v7  ;;  %3379 = vst [vmem:[#allocation10 + $0x270] sm:$0xff] %v3091_v62  ;;  %v2463_v48 = vmul.f32 %v7023_v17, %v9288_v58 }
 0x267   :  { %3380 = vst [vmem:[#allocation10 + $0x278] sm:$0xff] %v3092_v35  ;;  %3381 = vst [vmem:[#allocation10 + $0x280] sm:$0xff] %v3093_v18  ;;  %v2464_v14 = vmul.f32 %v7023_v17, %v9289_v23  ;;  %v2778_v11 = vmul.f32 %v6659_v4, %v2459_v6  ;;  %v2779_v63 = vmul.f32 %v6661_v57, %v2460_v51  ;;  %v9292_v51 = vld [vmem:[#allocation70_spill] sm:$0xff]  ;;  %v9293_v35 = vld [vmem:[#allocation72_spill] sm:$0xff]  ;;  %3665 = vrsqrt.f32 %v7007_v1 }
 0x268   :  { %3382 = vst [vmem:[#allocation10 + $0x288] sm:$0xff] %v3094_v31  ;;  %3383 = vst [vmem:[#allocation10 + $0x290] sm:$0xff] %v3095_v26  ;;  %v2780_v12 = vmul.f32 %v6663_v60, %v2461_v61  ;;  %v2781_v50 = vmul.f32 %v6665_v38, %v2462_v55  ;;  %v2465_v52 = vmul.f32 %v7029_v8, %v9290_v20  ;;  %v9295_v61 = vld [vmem:[#allocation74_spill] sm:$0xff]  ;;  %3667 = vrsqrt.f32 %v7009_v47 }
 0x269   :  { %3384 = vst [vmem:[#allocation10 + $0x298] sm:$0xff] %v3096_v53  ;;  %v2466_v59 = vmul.f32 %v7029_v8, %v9291_v45  ;;  %v2782_v27 = vmul.f32 %v6667_v16, %v2463_v48  ;;  %v2783_v17 = vmul.f32 %v6669_v25, %v2464_v14  ;;  %v3097_v46 = vadd.f32 %v6671_v22, %v2778_v11  ;;  %v9294_v53 = vld [vmem:[#allocation73_spill] sm:$0xff] }
 0x26a   :  { %v3098_v41 = vadd.f32 %v6673_v36, %v2779_v63  ;;  %v3099_v6 = vadd.f32 %v6675_v3, %v2780_v12  ;;  %v3100_v43 = vadd.f32 %v6684_v2, %v2781_v50  ;;  %v2467_v62 = vmul.f32 %v7029_v8, %v9292_v51  ;;  %v9296_v63 = vld [vmem:[#allocation77_spill] sm:$0xff]  ;;  %v9300_v51 = vld [vmem:[#allocation91_spill] sm:$0xff] }
 0x26b   :  { %v2468_v18 = vmul.f32 %v7029_v8, %v9293_v35  ;;  %v3101_v31 = vadd.f32 %v6686_v13, %v2782_v27  ;;  %v3102_v26 = vadd.f32 %v6688_v32, %v2783_v17  ;;  %3385 = vst [vmem:[#allocation10 + $0x2a0] sm:$0xff] %v3097_v46  ;;  %v2469_v34 = vmul.f32 %v7029_v8, %v9294_v53  ;;  %v9298_v46 = vld [vmem:[#allocation88_spill] sm:$0xff] }
 0x26c   :  { %3386 = vst [vmem:[#allocation10 + $0x2a8] sm:$0xff] %v3098_v41  ;;  %v2470_v7 = vmul.f32 %v7029_v8, %v9295_v61  ;;  %3387 = vst [vmem:[#allocation10 + $0x2b0] sm:$0xff] %v3099_v6  ;;  %v2784_v55 = vmul.f32 %v6659_v4, %v2465_v52  ;;  %v2785_v58 = vmul.f32 %v6661_v57, %v2466_v59  ;;  %v9297_v8 = vld [vmem:[#allocation87_spill] sm:$0xff]  ;;  %v9299_v6 = vld [vmem:[#allocation90_spill] sm:$0xff]  ;;  %3669 = vrsqrt.f32 %v7017_v28 }
 0x26d   :  { %3388 = vst [vmem:[#allocation10 + $0x2b8] sm:$0xff] %v3100_v43  ;;  %v2786_v48 = vmul.f32 %v6663_v60, %v2467_v62  ;;  %v2787_v23 = vmul.f32 %v6665_v38, %v2468_v18  ;;  %3389 = vst [vmem:[#allocation10 + $0x2c0] sm:$0xff] %v3101_v31  ;;  %v2788_v14 = vmul.f32 %v6667_v16, %v2469_v34  ;;  %v9301_v35 = vld [vmem:[#allocation92_spill] sm:$0xff]  ;;  %v9302_v61 = vld [vmem:[#allocation95_spill] sm:$0xff]  ;;  %3671 = vrsqrt.f32 %v2305_v29 }
 0x26e   :  { %3390 = vst [vmem:[#allocation10 + $0x2c8] sm:$0xff] %v3102_v26  ;;  %v2789_v11 = vmul.f32 %v6669_v25, %v2470_v7  ;;  %v2471_v12 = vmul.f32 %v7035_v39, %v9296_v63  ;;  %v2472_v50 = vmul.f32 %v7035_v39, %v9297_v8  ;;  %v3103_v20 = vadd.f32 %v6671_v22, %v2784_v55  ;;  %v9303_v55 = vld [vmem:[#allocation81_spill] sm:$0xff]  ;;  %v9304_v8 = vld [vmem:[#allocation82_spill] sm:$0xff] }
 0x26f   :  { %v3104_v52 = vadd.f32 %v6673_v36, %v2785_v58  ;;  %v3105_v45 = vadd.f32 %v6675_v3, %v2786_v48  ;;  %v3106_v59 = vadd.f32 %v6684_v2, %v2787_v23  ;;  %v3107_v27 = vadd.f32 %v6686_v13, %v2788_v14  ;;  %v7151_v48 = vpop.xlane.xlu0 %2108 }
 0x270   :  { %v3108_v17 = vadd.f32 %v6688_v32, %v2789_v11  ;;  %v2473_v41 = vmul.f32 %v7035_v39, %v9298_v46  ;;  %v2474_v43 = vmul.f32 %v7035_v39, %v9299_v6  ;;  %3391 = vst [vmem:[#allocation10 + $0x2d0] sm:$0xff] %v3103_v20  ;;  %v2475_v62 = vmul.f32 %v7035_v39, %v9300_v51  ;;  %v9305_v20 = vld [vmem:[#allocation84_spill] sm:$0xff] }
 0x271   :  { %3392 = vst [vmem:[#allocation10 + $0x2d8] sm:$0xff] %v3104_v52  ;;  %3393 = vst [vmem:[#allocation10 + $0x2e0] sm:$0xff] %v3105_v45  ;;  %v2476_v18 = vmul.f32 %v7035_v39, %v9301_v35  ;;  %v2790_v31 = vmul.f32 %v6659_v4, %v2471_v12  ;;  %v2791_v26 = vmul.f32 %v6661_v57, %v2472_v50  ;;  %v7163_v45 = vpop.xlane.xlu1 %2115 }
 0x272   :  { %3394 = vst [vmem:[#allocation10 + $0x2e8] sm:$0xff] %v3106_v59  ;;  %3395 = vst [vmem:[#allocation10 + $0x2f0] sm:$0xff] %v3107_v27  ;;  %v2792_v53 = vmul.f32 %v6663_v60, %v2473_v41  ;;  %v2793_v34 = vmul.f32 %v6665_v38, %v2474_v43  ;;  %v2477_v7 = vmul.f32 %v7041_v42, %v9302_v61  ;;  %v9307_v41 = vld [vmem:[#allocation86_spill] sm:$0xff] }
 0x273   :  { %3396 = vst [vmem:[#allocation10 + $0x2f8] sm:$0xff] %v3108_v17  ;;  %v2478_v58 = vmul.f32 %v7041_v42, %v9303_v55  ;;  %v2794_v39 = vmul.f32 %v6667_v16, %v2475_v62  ;;  %v2795_v23 = vmul.f32 %v6669_v25, %v2476_v18  ;;  %v3109_v14 = vadd.f32 %v6671_v22, %v2790_v31  ;;  %v9306_v17 = vld [vmem:[#allocation85_spill] sm:$0xff] }
 0x274   :  { %v3110_v11 = vadd.f32 %v6673_v36, %v2791_v26  ;;  %v3111_v63 = vadd.f32 %v6675_v3, %v2792_v53  ;;  %v3112_v12 = vadd.f32 %v6684_v2, %v2793_v34  ;;  %v2479_v50 = vmul.f32 %v7041_v42, %v9304_v8  ;;  %v9308_v26 = vld [vmem:[#allocation89_spill] sm:$0xff] }
 0x275   :  { %v2480_v52 = vmul.f32 %v7041_v42, %v9305_v20  ;;  %v3113_v59 = vadd.f32 %v6686_v13, %v2794_v39  ;;  %v3114_v27 = vadd.f32 %v6688_v32, %v2795_v23  ;;  %3397 = vst [vmem:[#allocation10 + $0x300] sm:$0xff] %v3109_v14  ;;  %v2481_v46 = vmul.f32 %v7041_v42, %v9306_v17  ;;  %v7185_v39 = vpop.xlane.xlu0 %2122 }
 0x276   :  { %3398 = vst [vmem:[#allocation10 + $0x308] sm:$0xff] %v3110_v11  ;;  %v2482_v6 = vmul.f32 %v7041_v42, %v9307_v41  ;;  %3399 = vst [vmem:[#allocation10 + $0x310] sm:$0xff] %v3111_v63  ;;  %v2796_v43 = vmul.f32 %v6659_v4, %v2477_v7  ;;  %v2797_v51 = vmul.f32 %v6661_v57, %v2478_v58  ;;  %v9309_v42 = vld [vmem:[#allocation99_spill] sm:$0xff]  ;;  %v9310_v11 = vld [vmem:[#allocation100_spill] sm:$0xff] }
 0x277   :  { %3400 = vst [vmem:[#allocation10 + $0x318] sm:$0xff] %v3112_v12  ;;  %v2798_v62 = vmul.f32 %v6663_v60, %v2479_v50  ;;  %v2799_v35 = vmul.f32 %v6665_v38, %v2480_v52  ;;  %3401 = vst [vmem:[#allocation10 + $0x320] sm:$0xff] %v3113_v59  ;;  %v2800_v18 = vmul.f32 %v6667_v16, %v2481_v46  ;;  %v9311_v12 = vld [vmem:[#allocation102_spill] sm:$0xff]  ;;  %v9312_v50 = vld [vmem:[#allocation103_spill] sm:$0xff]  ;;  %v7199_v46 = vpop.xlane.xlu1 %2129 }
 0x278   :  { %3402 = vst [vmem:[#allocation10 + $0x328] sm:$0xff] %v3114_v27  ;;  %v2801_v31 = vmul.f32 %v6669_v25, %v2482_v6  ;;  %v2483_v53 = vmul.f32 %v7047_v24, %v9308_v26  ;;  %v2484_v34 = vmul.f32 %v7047_v24, %v9309_v42  ;;  %v3115_v61 = vadd.f32 %v6671_v22, %v2796_v43  ;;  %v9313_v52 = vld [vmem:[#allocation104_spill] sm:$0xff]  ;;  %v9314_v43 = vld [vmem:[#allocation107_spill] sm:$0xff] }
 0x279   :  { %v3116_v7 = vadd.f32 %v6673_v36, %v2797_v51  ;;  %v3117_v55 = vadd.f32 %v6675_v3, %v2798_v62  ;;  %v3118_v58 = vadd.f32 %v6684_v2, %v2799_v35  ;;  %v3119_v23 = vadd.f32 %v6686_v13, %v2800_v18  ;;  %v9315_v62 = vld [vmem:[#allocation93_spill] sm:$0xff] }
 0x27a   :  { %v3120_v14 = vadd.f32 %v6688_v32, %v2801_v31  ;;  %v2485_v63 = vmul.f32 %v7047_v24, %v9310_v11  ;;  %v2486_v8 = vmul.f32 %v7047_v24, %v9311_v12  ;;  %3403 = vst [vmem:[#allocation10 + $0x330] sm:$0xff] %v3115_v61  ;;  %v2487_v20 = vmul.f32 %v7047_v24, %v9312_v50 }
 0x27b   :  { %3404 = vst [vmem:[#allocation10 + $0x338] sm:$0xff] %v3116_v7  ;;  %3405 = vst [vmem:[#allocation10 + $0x340] sm:$0xff] %v3117_v55  ;;  %v2488_v59 = vmul.f32 %v7047_v24, %v9313_v52  ;;  %v2802_v27 = vmul.f32 %v6659_v4, %v2483_v53  ;;  %v2803_v17 = vmul.f32 %v6661_v57, %v2484_v34  ;;  %v9316_v34 = vld [vmem:[#allocation94_spill] sm:$0xff]  ;;  %v9317_v7 = vld [vmem:[#allocation96_spill] sm:$0xff]  ;;  %v2262_v15 = vmul.f32 0.0013020834, %v7199_v46 }
 0x27c   :  { %3406 = vst [vmem:[#allocation10 + $0x348] sm:$0xff] %v3118_v58  ;;  %3407 = vst [vmem:[#allocation10 + $0x350] sm:$0xff] %v3119_v23  ;;  %v2804_v41 = vmul.f32 %v6663_v60, %v2485_v63  ;;  %v2805_v6 = vmul.f32 %v6665_v38, %v2486_v8  ;;  %v2489_v51 = vmul.f32 %v7053_v21, %v9314_v43  ;;  %v9319_v63 = vld [vmem:[#allocation98_spill] sm:$0xff]  ;;  %v7223_v8 = vpop.xlane.xlu0 %2136 }
 0x27d   :  { %3408 = vst [vmem:[#allocation10 + $0x358] sm:$0xff] %v3120_v14  ;;  %v2490_v35 = vmul.f32 %v7053_v21, %v9315_v62  ;;  %v2806_v24 = vmul.f32 %v6667_v16, %v2487_v20  ;;  %v2807_v18 = vmul.f32 %v6669_v25, %v2488_v59  ;;  %v3121_v31 = vadd.f32 %v6671_v22, %v2802_v27  ;;  %v9318_v14 = vld [vmem:[#allocation97_spill] sm:$0xff]  ;;  %v7235_v62 = vpop.xlane.xlu1 %2143 }
 0x27e   :  { %v3122_v26 = vadd.f32 %v6673_v36, %v2803_v17  ;;  %v3123_v53 = vadd.f32 %v6675_v3, %v2804_v41  ;;  %v3124_v42 = vadd.f32 %v6684_v2, %v2805_v6  ;;  %v2491_v61 = vmul.f32 %v7053_v21, %v9316_v34  ;;  %v9320_v41 = vld [vmem:[#allocation101_spill] sm:$0xff]  ;;  %v9321_v6 = vld [vmem:[#allocation111_spill] sm:$0xff]  ;;  %v9323_v34 = vld [vmem:[#allocation114_spill] sm:$0xff] }
 0x27f   :  { %v2492_v55 = vmul.f32 %v7053_v21, %v9317_v7  ;;  %v3125_v58 = vadd.f32 %v6686_v13, %v2806_v24  ;;  %v3126_v23 = vadd.f32 %v6688_v32, %v2807_v18  ;;  %3409 = vst [vmem:[#allocation10 + $0x360] sm:$0xff] %v3121_v31  ;;  %v2493_v11 = vmul.f32 %v7053_v21, %v9318_v14  ;;  %v9324_v7 = vld [vmem:[#allocation115_spill] sm:$0xff] }
 0x280   :  { %3410 = vst [vmem:[#allocation10 + $0x368] sm:$0xff] %v3122_v26  ;;  %v2494_v12 = vmul.f32 %v7053_v21, %v9319_v63  ;;  %3411 = vst [vmem:[#allocation10 + $0x370] sm:$0xff] %v3123_v53  ;;  %v2808_v50 = vmul.f32 %v6659_v4, %v2489_v51  ;;  %v2809_v20 = vmul.f32 %v6661_v57, %v2490_v35  ;;  %v9322_v53 = vld [vmem:[#allocation112_spill] sm:$0xff]  ;;  %v2264_v10 = vmul.f32 0.0013020834, %v7235_v62 }
 0x281   :  { %3412 = vst [vmem:[#allocation10 + $0x378] sm:$0xff] %v3124_v42  ;;  %v2810_v52 = vmul.f32 %v6663_v60, %v2491_v61  ;;  %v2811_v59 = vmul.f32 %v6665_v38, %v2492_v55  ;;  %3413 = vst [vmem:[#allocation10 + $0x380] sm:$0xff] %v3125_v58  ;;  %v2812_v27 = vmul.f32 %v6667_v16, %v2493_v11  ;;  %v9325_v58 = vld [vmem:[#allocation116_spill] sm:$0xff] }
 0x282   :  { %3414 = vst [vmem:[#allocation10 + $0x388] sm:$0xff] %v3126_v23  ;;  %v2813_v17 = vmul.f32 %v6669_v25, %v2494_v12  ;;  %v2495_v21 = vmul.f32 %v7059_v37, %v9320_v41  ;;  %v2496_v43 = vmul.f32 %v7059_v37, %v9321_v6  ;;  %v3127_v51 = vadd.f32 %v6671_v22, %v2808_v50  ;;  %v9326_v50 = vld [vmem:[#allocation119_spill] sm:$0xff] }
 0x283   :  { %v3128_v35 = vadd.f32 %v6673_v36, %v2809_v20  ;;  %v3129_v24 = vadd.f32 %v6675_v3, %v2810_v52  ;;  %v3130_v18 = vadd.f32 %v6684_v2, %v2811_v59  ;;  %v3131_v31 = vadd.f32 %v6686_v13, %v2812_v27  ;;  %v9327_v52 = vld [vmem:[#allocation105_spill] sm:$0xff]  ;;  %v2151_v27 = vpop.xlane.xlu0 %2150 }
 0x284   :  { %v3132_v26 = vadd.f32 %v6688_v32, %v2813_v17  ;;  %v2497_v42 = vmul.f32 %v7059_v37, %v9322_v53  ;;  %v2498_v61 = vmul.f32 %v7059_v37, %v9323_v34  ;;  %3415 = vst [vmem:[#allocation10 + $0x390] sm:$0xff] %v3127_v51  ;;  %v2499_v55 = vmul.f32 %v7059_v37, %v9324_v7  ;;  %v9328_v51 = vld [vmem:[#allocation106_spill] sm:$0xff] }
 0x285   :  { %3416 = vst [vmem:[#allocation10 + $0x398] sm:$0xff] %v3128_v35  ;;  %3417 = vst [vmem:[#allocation10 + $0x3a0] sm:$0xff] %v3129_v24  ;;  %v2500_v23 = vmul.f32 %v7059_v37, %v9325_v58  ;;  %v2814_v14 = vmul.f32 %v6659_v4, %v2495_v21  ;;  %v2815_v11 = vmul.f32 %v6661_v57, %v2496_v43  ;;  %v9329_v24 = vld [vmem:[#allocation108_spill] sm:$0xff]  ;;  %v7305_v46 = vadd.f32 1e-12, %v2264_v10 }
 0x286   :  { %3418 = vst [vmem:[#allocation10 + $0x3a8] sm:$0xff] %v3130_v18  ;;  %3419 = vst [vmem:[#allocation10 + $0x3b0] sm:$0xff] %v3131_v31  ;;  %v2816_v63 = vmul.f32 %v6663_v60, %v2497_v42  ;;  %v2817_v12 = vmul.f32 %v6665_v38, %v2498_v61  ;;  %v2501_v20 = vmul.f32 %v7069_v5, %v9326_v50  ;;  %v2158_v31 = vpop.xlane.xlu1 %2157  ;;  %v9330_v42 = vld [vmem:[#allocation109_spill] sm:$0xff]  ;;  %v9331_v61 = vld [vmem:[#allocation110_spill] sm:$0xff] }
 0x287   :  { %3420 = vst [vmem:[#allocation10 + $0x3b8] sm:$0xff] %v3132_v26  ;;  %v2502_v59 = vmul.f32 %v7069_v5, %v9327_v52  ;;  %v2818_v17 = vmul.f32 %v6667_v16, %v2499_v55  ;;  %v2819_v37 = vmul.f32 %v6669_v25, %v2500_v23  ;;  %v3133_v41 = vadd.f32 %v6671_v22, %v2814_v14 }
 0x288   :  { %v3134_v21 = vadd.f32 %v6673_v36, %v2815_v11  ;;  %v3135_v6 = vadd.f32 %v6675_v3, %v2816_v63  ;;  %v3136_v43 = vadd.f32 %v6684_v2, %v2817_v12  ;;  %v2503_v35 = vmul.f32 %v7069_v5, %v9328_v51 }
 0x289   :  { %v2504_v18 = vmul.f32 %v7069_v5, %v9329_v24  ;;  %v3137_v26 = vadd.f32 %v6686_v13, %v2818_v17  ;;  %v3138_v53 = vadd.f32 %v6688_v32, %v2819_v37  ;;  %3421 = vst [vmem:[#allocation10 + $0x3c0] sm:$0xff] %v3133_v41  ;;  %v2505_v34 = vmul.f32 %v7069_v5, %v9330_v42  ;;  %v9333_v42 = vld [vmem:[#allocation123_spill] sm:$0xff] }
 0x28a   :  { %3422 = vst [vmem:[#allocation10 + $0x3c8] sm:$0xff] %v3134_v21  ;;  %v2506_v7 = vmul.f32 %v7069_v5, %v9331_v61  ;;  %3423 = vst [vmem:[#allocation10 + $0x3d0] sm:$0xff] %v3135_v6  ;;  %v2820_v55 = vmul.f32 %v6659_v4, %v2501_v20  ;;  %v2821_v58 = vmul.f32 %v6661_v57, %v2502_v59  ;;  %v2259_v5 = vmul.f32 0.0013020834, %v7151_v48  ;;  %v2165_v59 = vpop.xlane.xlu0 %2164  ;;  %v2172_v21 = vpop.xlane.xlu1 %2171  ;;  %v9334_v61 = vld [vmem:[#allocation124_spill] sm:$0xff] }
 0x28b   :  { %3424 = vst [vmem:[#allocation10 + $0x3d8] sm:$0xff] %v3136_v43  ;;  %v2822_v23 = vmul.f32 %v6663_v60, %v2503_v35  ;;  %v2823_v14 = vmul.f32 %v6665_v38, %v2504_v18  ;;  %3425 = vst [vmem:[#allocation10 + $0x3e0] sm:$0xff] %v3137_v26  ;;  %v2824_v11 = vmul.f32 %v6667_v16, %v2505_v34  ;;  %v2260_v41 = vmul.f32 0.0013020834, %v7163_v45  ;;  %v9332_v26 = vld [vmem:[#allocation113_spill] sm:$0xff] }
 0x28c   :  { %3426 = vst [vmem:[#allocation10 + $0x3e8] sm:$0xff] %v3138_v53  ;;  %v2825_v63 = vmul.f32 %v6669_v25, %v2506_v7  ;;  %v3139_v12 = vadd.f32 %v6671_v22, %v2820_v55  ;;  %v3140_v50 = vadd.f32 %v6673_v36, %v2821_v58  ;;  %v2306_v48 = vadd.f32 1e-12, %v7003_v19  ;;  %v9335_v55 = vld [vmem:[#allocation126_spill] sm:$0xff] }
 0x28d   :  { %v3141_v20 = vadd.f32 %v6675_v3, %v2822_v23  ;;  %v3142_v52 = vadd.f32 %v6684_v2, %v2823_v14  ;;  %v3143_v17 = vadd.f32 %v6686_v13, %v2824_v11  ;;  %v2261_v6 = vmul.f32 0.0013020834, %v7185_v39  ;;  %v9336_v14 = vld [vmem:[#allocation127_spill] sm:$0xff] }
 0x28e   :  { %v3144_v37 = vadd.f32 %v6688_v32, %v2825_v63  ;;  %3427 = vst [vmem:[#allocation10 + $0x3f0] sm:$0xff] %v3139_v12  ;;  %3428 = vst [vmem:[#allocation10 + $0x3f8] sm:$0xff] %v3140_v50  ;;  %v2263_v45 = vmul.f32 0.0013020834, %v7223_v8  ;;  %v2307_v43 = vadd.f32 1e-12, %v2259_v5  ;;  %v2179_v35 = vpop.xlane.xlu0 %2178  ;;  %3673 = vrsqrt.f32 %v2306_v48  ;;  %v2186_v62 = vpop.xlane.xlu1 %2185 }
 0x28f   :  { %3429 = vst [vmem:[#allocation10 + $0x400] sm:$0xff] %v3141_v20  ;;  %3430 = vst [vmem:[#allocation10 + $0x408] sm:$0xff] %v3142_v52  ;;  %v2265_v51 = vmul.f32 0.0013020834, %v2151_v27  ;;  %v2308_v49 = vadd.f32 1e-12, %v2260_v41  ;;  %v3660_v27 = vpop.eup %3659 }
 0x290   :  { %3431 = vst [vmem:[#allocation10 + $0x410] sm:$0xff] %v3143_v17  ;;  %3432 = vst [vmem:[#allocation10 + $0x418] sm:$0xff] %v3144_v37  ;;  %v2266_v19 = vmul.f32 0.0013020834, %v2158_v31  ;;  %v2309_v1 = vadd.f32 1e-12, %v2261_v6  ;;  %3675 = vrsqrt.f32 %v2307_v43  ;;  %v2507_v53 = vmul.f32 %v3660_v27, %v9332_v26  ;;  %v3662_v23 = vpop.eup %3661 }
 0x291   :  { %v7301_v24 = vadd.f32 1e-12, %v2262_v15  ;;  %v7303_v39 = vadd.f32 1e-12, %v2263_v45  ;;  %v7307_v47 = vadd.f32 1e-12, %v2265_v51  ;;  %3677 = vrsqrt.f32 %v2308_v49  ;;  %v3664_v50 = vpop.eup %3663 }
 0x292   :  { %v7309_v8 = vmul.f32 0.0013020834, %v2165_v59  ;;  %v7311_v28 = vadd.f32 1e-12, %v2266_v19  ;;  %v7313_v18 = vmul.f32 0.0013020834, %v2172_v21  ;;  %v2508_v34 = vmul.f32 %v3660_v27, %v9333_v42  ;;  %v7329_v37 = vpop.eup %3665 }
 0x293   :  { %v7315_v31 = vmul.f32 0.0013020834, %v2179_v35  ;;  %v2509_v7 = vmul.f32 %v3660_v27, %v9334_v61  ;;  %v2510_v58 = vmul.f32 %v3660_v27, %v9335_v55  ;;  %v2511_v11 = vmul.f32 %v3660_v27, %v9336_v14  ;;  %v9337_v63 = vld [vmem:[#allocation128_spill] sm:$0xff]  ;;  %v9338_v48 = vld [vmem:[#allocation131_spill] sm:$0xff]  ;;  %v9339_v6 = vld [vmem:[#allocation117_spill] sm:$0xff]  ;;  %v7335_v45 = vpop.eup %3667 }
 0x294   :  { %v2512_v5 = vmul.f32 %v3660_v27, %v9337_v63  ;;  %3679 = vrsqrt.f32 %v2309_v1  ;;  %v7323_v12 = vmul.f32 0.0013020834, %v2186_v62  ;;  %v2826_v20 = vmul.f32 %v6659_v4, %v2507_v53  ;;  %v7341_v19 = vpop.eup %3669  ;;  %v9340_v62 = vld [vmem:[#allocation118_spill] sm:$0xff]  ;;  %v9341_v26 = vld [vmem:[#allocation120_spill] sm:$0xff] }
 0x295   :  { %v2827_v52 = vmul.f32 %v6661_v57, %v2508_v34  ;;  %v2828_v59 = vmul.f32 %v6663_v60, %v2509_v7  ;;  %v2829_v17 = vmul.f32 %v6665_v38, %v2510_v58  ;;  %v2830_v41 = vmul.f32 %v6667_v16, %v2511_v11  ;;  %v7347_v42 = vpop.eup %3671  ;;  %v9342_v34 = vld [vmem:[#allocation121_spill] sm:$0xff]  ;;  %v9343_v7 = vld [vmem:[#allocation122_spill] sm:$0xff] }
 0x296   :  { %v2831_v29 = vmul.f32 %v6669_v25, %v2512_v5  ;;  %v2513_v21 = vmul.f32 %v3662_v23, %v9338_v48  ;;  %v2514_v15 = vmul.f32 %v3662_v23, %v9339_v6  ;;  %v3145_v43 = vadd.f32 %v6671_v22, %v2826_v20  ;;  %v9344_v20 = vld [vmem:[#allocation125_spill] sm:$0xff] }
 0x297   :  { %v3146_v10 = vadd.f32 %v6673_v36, %v2827_v52  ;;  %v3147_v51 = vadd.f32 %v6675_v3, %v2828_v59  ;;  %v3148_v49 = vadd.f32 %v6684_v2, %v2829_v17  ;;  %v3149_v35 = vadd.f32 %v6686_v13, %v2830_v41  ;;  %v9345_v59 = vld [vmem:[#allocation135_spill] sm:$0xff] }
 0x298   :  { %v3150_v1 = vadd.f32 %v6688_v32, %v2831_v29  ;;  %v2515_v27 = vmul.f32 %v3662_v23, %v9340_v62  ;;  %v2516_v53 = vmul.f32 %v3662_v23, %v9341_v26  ;;  %3433 = vst [vmem:[#allocation10 + $0x420] sm:$0xff] %v3145_v43  ;;  %v2517_v61 = vmul.f32 %v3662_v23, %v9342_v34  ;;  %v7353_v11 = vpop.eup %3673 }
 0x299   :  { %3434 = vst [vmem:[#allocation10 + $0x428] sm:$0xff] %v3146_v10  ;;  %3435 = vst [vmem:[#allocation10 + $0x430] sm:$0xff] %v3147_v51  ;;  %v2518_v55 = vmul.f32 %v3662_v23, %v9343_v7  ;;  %v2832_v58 = vmul.f32 %v6659_v4, %v2513_v21  ;;  %v2833_v14 = vmul.f32 %v6661_v57, %v2514_v15  ;;  %v9346_v10 = vld [vmem:[#allocation136_spill] sm:$0xff]  ;;  %3681 = vrsqrt.f32 %v7301_v24 }
 0x29a   :  { %3436 = vst [vmem:[#allocation10 + $0x438] sm:$0xff] %v3148_v49  ;;  %3437 = vst [vmem:[#allocation10 + $0x440] sm:$0xff] %v3149_v35  ;;  %v2834_v63 = vmul.f32 %v6663_v60, %v2515_v27  ;;  %v2835_v5 = vmul.f32 %v6665_v38, %v2516_v53  ;;  %v2519_v52 = vmul.f32 %v3664_v50, %v9344_v20  ;;  %v7359_v41 = vpop.eup %3675  ;;  %v9347_v49 = vld [vmem:[#allocation138_spill] sm:$0xff]  ;;  %v9348_v27 = vld [vmem:[#allocation139_spill] sm:$0xff]  ;;  %3683 = vrsqrt.f32 %v7303_v39 }
 0x29b   :  { %3438 = vst [vmem:[#allocation10 + $0x448] sm:$0xff] %v3150_v1  ;;  %v2520_v17 = vmul.f32 %v3664_v50, %v9345_v59  ;;  %v2836_v23 = vmul.f32 %v6667_v16, %v2517_v61  ;;  %v2837_v29 = vmul.f32 %v6669_v25, %v2518_v55  ;;  %v3151_v48 = vadd.f32 %v6671_v22, %v2832_v58  ;;  %v7365_v6 = vpop.eup %3677  ;;  %v9349_v53 = vld [vmem:[#allocation140_spill] sm:$0xff]  ;;  %v9350_v20 = vld [vmem:[#allocation143_spill] sm:$0xff]  ;;  %v9351_v59 = vld [vmem:[#allocation129_spill] sm:$0xff] }
 0x29c   :  { %v3152_v21 = vadd.f32 %v6673_v36, %v2833_v14  ;;  %v3153_v15 = vadd.f32 %v6675_v3, %v2834_v63  ;;  %v3154_v43 = vadd.f32 %v6684_v2, %v2835_v5  ;;  %v2521_v51 = vmul.f32 %v3664_v50, %v9346_v10 }
 0x29d   :  { %v2522_v35 = vmul.f32 %v3664_v50, %v9347_v49  ;;  %v3155_v1 = vadd.f32 %v6686_v13, %v2836_v23  ;;  %v3156_v62 = vadd.f32 %v6688_v32, %v2837_v29  ;;  %3439 = vst [vmem:[#allocation10 + $0x450] sm:$0xff] %v3151_v48  ;;  %v2523_v26 = vmul.f32 %v3664_v50, %v9348_v27 }
 0x29e   :  { %3440 = vst [vmem:[#allocation10 + $0x458] sm:$0xff] %v3152_v21  ;;  %v2524_v34 = vmul.f32 %v3664_v50, %v9349_v53  ;;  %v7375_v61 = vpop.eup %3679  ;;  %3441 = vst [vmem:[#allocation10 + $0x460] sm:$0xff] %v3153_v15  ;;  %v2838_v7 = vmul.f32 %v6659_v4, %v2519_v52  ;;  %v2839_v55 = vmul.f32 %v6661_v57, %v2520_v17  ;;  %3685 = vrsqrt.f32 %v7305_v46 }
 0x29f   :  { %3442 = vst [vmem:[#allocation10 + $0x468] sm:$0xff] %v3154_v43  ;;  %v2840_v58 = vmul.f32 %v6663_v60, %v2521_v51  ;;  %v2841_v14 = vmul.f32 %v6665_v38, %v2522_v35  ;;  %3443 = vst [vmem:[#allocation10 + $0x470] sm:$0xff] %v3155_v1  ;;  %v2842_v63 = vmul.f32 %v6667_v16, %v2523_v26  ;;  %v9352_v43 = vld [vmem:[#allocation130_spill] sm:$0xff]  ;;  %v9353_v51 = vld [vmem:[#allocation132_spill] sm:$0xff]  ;;  %v2316_v24 = vadd.f32 1e-12, %v7313_v18 }
 0x2a0   :  { %3444 = vst [vmem:[#allocation10 + $0x478] sm:$0xff] %v3156_v62  ;;  %v2843_v5 = vmul.f32 %v6669_v25, %v2524_v34  ;;  %v2525_v50 = vmul.f32 %v7329_v37, %v9350_v20  ;;  %v2526_v23 = vmul.f32 %v7329_v37, %v9351_v59  ;;  %v3157_v52 = vadd.f32 %v6671_v22, %v2838_v7  ;;  %v9354_v35 = vld [vmem:[#allocation133_spill] sm:$0xff]  ;;  %v9355_v62 = vld [vmem:[#allocation134_spill] sm:$0xff] }
 0x2a1   :  { %v3158_v17 = vadd.f32 %v6673_v36, %v2839_v55  ;;  %v3159_v29 = vadd.f32 %v6675_v3, %v2840_v58  ;;  %v3160_v48 = vadd.f32 %v6684_v2, %v2841_v14  ;;  %v3161_v21 = vadd.f32 %v6686_v13, %v2842_v63  ;;  %v9356_v55 = vld [vmem:[#allocation137_spill] sm:$0xff]  ;;  %v9357_v14 = vld [vmem:[#allocation147_spill] sm:$0xff] }
 0x2a2   :  { %v3162_v15 = vadd.f32 %v6688_v32, %v2843_v5  ;;  %v2527_v10 = vmul.f32 %v7329_v37, %v9352_v43  ;;  %v2528_v49 = vmul.f32 %v7329_v37, %v9353_v51  ;;  %3445 = vst [vmem:[#allocation10 + $0x480] sm:$0xff] %v3157_v52  ;;  %v2529_v1 = vmul.f32 %v7329_v37, %v9354_v35  ;;  %v9358_v52 = vld [vmem:[#allocation148_spill] sm:$0xff]  ;;  %v9360_v43 = vld [vmem:[#allocation151_spill] sm:$0xff] }
 0x2a3   :  { %3446 = vst [vmem:[#allocation10 + $0x488] sm:$0xff] %v3158_v17  ;;  %3447 = vst [vmem:[#allocation10 + $0x490] sm:$0xff] %v3159_v29  ;;  %v2530_v27 = vmul.f32 %v7329_v37, %v9355_v62  ;;  %v2844_v26 = vmul.f32 %v6659_v4, %v2525_v50  ;;  %v2845_v53 = vmul.f32 %v6661_v57, %v2526_v23  ;;  %v9359_v29 = vld [vmem:[#allocation150_spill] sm:$0xff]  ;;  %v9361_v51 = vld [vmem:[#allocation152_spill] sm:$0xff]  ;;  %3687 = vrsqrt.f32 %v7307_v47 }
 0x2a4   :  { %3448 = vst [vmem:[#allocation10 + $0x498] sm:$0xff] %v3160_v48  ;;  %3449 = vst [vmem:[#allocation10 + $0x4a0] sm:$0xff] %v3161_v21  ;;  %v2846_v34 = vmul.f32 %v6663_v60, %v2527_v10  ;;  %v2847_v7 = vmul.f32 %v6665_v38, %v2528_v49  ;;  %v2531_v58 = vmul.f32 %v7335_v45, %v9356_v55  ;;  %3689 = vrsqrt.f32 %v7311_v28 }
 0x2a5   :  { %3450 = vst [vmem:[#allocation10 + $0x4a8] sm:$0xff] %v3162_v15  ;;  %v2532_v63 = vmul.f32 %v7335_v45, %v9357_v14  ;;  %v2848_v5 = vmul.f32 %v6667_v16, %v2529_v1  ;;  %v2849_v37 = vmul.f32 %v6669_v25, %v2530_v27  ;;  %v3163_v20 = vadd.f32 %v6671_v22, %v2844_v26 }
 0x2a6   :  { %v3164_v50 = vadd.f32 %v6673_v36, %v2845_v53  ;;  %v3165_v59 = vadd.f32 %v6675_v3, %v2846_v34  ;;  %v3166_v23 = vadd.f32 %v6684_v2, %v2847_v7  ;;  %v2533_v17 = vmul.f32 %v7335_v45, %v9358_v52  ;;  %v9362_v34 = vld [vmem:[#allocation155_spill] sm:$0xff] }
 0x2a7   :  { %v2534_v48 = vmul.f32 %v7335_v45, %v9359_v29  ;;  %v3167_v21 = vadd.f32 %v6686_v13, %v2848_v5  ;;  %v3168_v15 = vadd.f32 %v6688_v32, %v2849_v37  ;;  %3451 = vst [vmem:[#allocation10 + $0x4b0] sm:$0xff] %v3163_v20  ;;  %v2535_v10 = vmul.f32 %v7335_v45, %v9360_v43 }
 0x2a8   :  { %3452 = vst [vmem:[#allocation10 + $0x4b8] sm:$0xff] %v3164_v50  ;;  %v2536_v49 = vmul.f32 %v7335_v45, %v9361_v51  ;;  %3453 = vst [vmem:[#allocation10 + $0x4c0] sm:$0xff] %v3165_v59  ;;  %v2850_v35 = vmul.f32 %v6659_v4, %v2531_v58  ;;  %v2851_v1 = vmul.f32 %v6661_v57, %v2532_v63  ;;  %v9363_v45 = vld [vmem:[#allocation141_spill] sm:$0xff]  ;;  %v9364_v50 = vld [vmem:[#allocation142_spill] sm:$0xff]  ;;  %v2318_v39 = vadd.f32 1e-12, %v7323_v12 }
 0x2a9   :  { %3454 = vst [vmem:[#allocation10 + $0x4c8] sm:$0xff] %v3166_v23  ;;  %v2852_v62 = vmul.f32 %v6663_v60, %v2533_v17  ;;  %v2853_v27 = vmul.f32 %v6665_v38, %v2534_v48  ;;  %3455 = vst [vmem:[#allocation10 + $0x4d0] sm:$0xff] %v3167_v21  ;;  %v2854_v26 = vmul.f32 %v6667_v16, %v2535_v10  ;;  %v9365_v23 = vld [vmem:[#allocation144_spill] sm:$0xff]  ;;  %v9366_v17 = vld [vmem:[#allocation145_spill] sm:$0xff] }
 0x2aa   :  { %3456 = vst [vmem:[#allocation10 + $0x4d8] sm:$0xff] %v3168_v15  ;;  %v2855_v53 = vmul.f32 %v6669_v25, %v2536_v49  ;;  %v2537_v7 = vmul.f32 %v7341_v19, %v9362_v34  ;;  %v2538_v55 = vmul.f32 %v7341_v19, %v9363_v45  ;;  %v3169_v58 = vadd.f32 %v6671_v22, %v2850_v35  ;;  %v9367_v48 = vld [vmem:[#allocation146_spill] sm:$0xff]  ;;  %v9368_v49 = vld [vmem:[#allocation149_spill] sm:$0xff]  ;;  %v9370_v45 = vld [vmem:[#allocation160_spill] sm:$0xff] }
 0x2ab   :  { %v3170_v14 = vadd.f32 %v6673_v36, %v2851_v1  ;;  %v3171_v63 = vadd.f32 %v6675_v3, %v2852_v62  ;;  %v3172_v5 = vadd.f32 %v6684_v2, %v2853_v27  ;;  %v3173_v37 = vadd.f32 %v6686_v13, %v2854_v26  ;;  %v9369_v1 = vld [vmem:[#allocation159_spill] sm:$0xff] }
 0x2ac   :  { %v3174_v20 = vadd.f32 %v6688_v32, %v2855_v53  ;;  %v2539_v59 = vmul.f32 %v7341_v19, %v9364_v50  ;;  %v2540_v52 = vmul.f32 %v7341_v19, %v9365_v23  ;;  %3457 = vst [vmem:[#allocation10 + $0x4e0] sm:$0xff] %v3169_v58  ;;  %v2541_v29 = vmul.f32 %v7341_v19, %v9366_v17  ;;  %v9371_v58 = vld [vmem:[#allocation162_spill] sm:$0xff]  ;;  %v9373_v50 = vld [vmem:[#allocation164_spill] sm:$0xff] }
 0x2ad   :  { %3458 = vst [vmem:[#allocation10 + $0x4e8] sm:$0xff] %v3170_v14  ;;  %3459 = vst [vmem:[#allocation10 + $0x4f0] sm:$0xff] %v3171_v63  ;;  %v2542_v21 = vmul.f32 %v7341_v19, %v9367_v48  ;;  %v2856_v15 = vmul.f32 %v6659_v4, %v2537_v7  ;;  %v2857_v43 = vmul.f32 %v6661_v57, %v2538_v55 }
 0x2ae   :  { %3460 = vst [vmem:[#allocation10 + $0x4f8] sm:$0xff] %v3172_v5  ;;  %3461 = vst [vmem:[#allocation10 + $0x500] sm:$0xff] %v3173_v37  ;;  %v2858_v10 = vmul.f32 %v6663_v60, %v2539_v59  ;;  %v2859_v51 = vmul.f32 %v6665_v38, %v2540_v52  ;;  %v2543_v35 = vmul.f32 %v7347_v42, %v9368_v49  ;;  %v9372_v37 = vld [vmem:[#allocation163_spill] sm:$0xff] }
 0x2af   :  { %3462 = vst [vmem:[#allocation10 + $0x508] sm:$0xff] %v3174_v20  ;;  %v2544_v62 = vmul.f32 %v7347_v42, %v9369_v1  ;;  %v2860_v27 = vmul.f32 %v6667_v16, %v2541_v29  ;;  %v2861_v19 = vmul.f32 %v6669_v25, %v2542_v21  ;;  %v3175_v26 = vadd.f32 %v6671_v22, %v2856_v15  ;;  %v9374_v15 = vld [vmem:[#allocation167_spill] sm:$0xff] }
 0x2b0   :  { %v3176_v53 = vadd.f32 %v6673_v36, %v2857_v43  ;;  %v3177_v34 = vadd.f32 %v6675_v3, %v2858_v10  ;;  %v3178_v7 = vadd.f32 %v6684_v2, %v2859_v51  ;;  %v2545_v55 = vmul.f32 %v7347_v42, %v9370_v45 }
 0x2b1   :  { %v2546_v14 = vmul.f32 %v7347_v42, %v9371_v58  ;;  %v3179_v63 = vadd.f32 %v6686_v13, %v2860_v27  ;;  %v3180_v5 = vadd.f32 %v6688_v32, %v2861_v19  ;;  %3463 = vst [vmem:[#allocation10 + $0x510] sm:$0xff] %v3175_v26  ;;  %v2547_v20 = vmul.f32 %v7347_v42, %v9372_v37  ;;  %v9376_v19 = vld [vmem:[#allocation154_spill] sm:$0xff] }
 0x2b2   :  { %3464 = vst [vmem:[#allocation10 + $0x518] sm:$0xff] %v3176_v53  ;;  %v2548_v59 = vmul.f32 %v7347_v42, %v9373_v50  ;;  %3465 = vst [vmem:[#allocation10 + $0x520] sm:$0xff] %v3177_v34  ;;  %v2862_v23 = vmul.f32 %v6659_v4, %v2543_v35  ;;  %v2863_v52 = vmul.f32 %v6661_v57, %v2544_v62  ;;  %v9375_v42 = vld [vmem:[#allocation153_spill] sm:$0xff]  ;;  %v9377_v53 = vld [vmem:[#allocation156_spill] sm:$0xff] }
 0x2b3   :  { %3466 = vst [vmem:[#allocation10 + $0x528] sm:$0xff] %v3178_v7  ;;  %v2864_v17 = vmul.f32 %v6663_v60, %v2545_v55  ;;  %v2865_v29 = vmul.f32 %v6665_v38, %v2546_v14  ;;  %3467 = vst [vmem:[#allocation10 + $0x530] sm:$0xff] %v3179_v63  ;;  %v2866_v48 = vmul.f32 %v6667_v16, %v2547_v20  ;;  %v9378_v7 = vld [vmem:[#allocation157_spill] sm:$0xff]  ;;  %v9379_v55 = vld [vmem:[#allocation158_spill] sm:$0xff] }
 0x2b4   :  { %3468 = vst [vmem:[#allocation10 + $0x538] sm:$0xff] %v3180_v5  ;;  %v2867_v21 = vmul.f32 %v6669_v25, %v2548_v59  ;;  %v2549_v43 = vmul.f32 %v7353_v11, %v9374_v15  ;;  %v2550_v10 = vmul.f32 %v7353_v11, %v9375_v42  ;;  %v3181_v51 = vadd.f32 %v6671_v22, %v2862_v23  ;;  %v9380_v20 = vld [vmem:[#allocation161_spill] sm:$0xff]  ;;  %v9381_v59 = vld [vmem:[#allocation171_spill] sm:$0xff]  ;;  %v9382_v15 = vld [vmem:[#allocation172_spill] sm:$0xff] }
 0x2b5   :  { %v3182_v49 = vadd.f32 %v6673_v36, %v2863_v52  ;;  %v3183_v35 = vadd.f32 %v6675_v3, %v2864_v17  ;;  %v3184_v1 = vadd.f32 %v6684_v2, %v2865_v29  ;;  %v3185_v62 = vadd.f32 %v6686_v13, %v2866_v48  ;;  %v9383_v42 = vld [vmem:[#allocation174_spill] sm:$0xff] }
 0x2b6   :  { %v3186_v27 = vadd.f32 %v6688_v32, %v2867_v21  ;;  %v2551_v26 = vmul.f32 %v7353_v11, %v9376_v19  ;;  %v2552_v34 = vmul.f32 %v7353_v11, %v9377_v53  ;;  %3469 = vst [vmem:[#allocation10 + $0x540] sm:$0xff] %v3181_v51  ;;  %v2553_v45 = vmul.f32 %v7353_v11, %v9378_v7 }
 0x2b7   :  { %3470 = vst [vmem:[#allocation10 + $0x548] sm:$0xff] %v3182_v49  ;;  %3471 = vst [vmem:[#allocation10 + $0x550] sm:$0xff] %v3183_v35  ;;  %v2554_v58 = vmul.f32 %v7353_v11, %v9379_v55  ;;  %v2868_v14 = vmul.f32 %v6659_v4, %v2549_v43  ;;  %v2869_v63 = vmul.f32 %v6661_v57, %v2550_v10  ;;  %v9384_v35 = vld [vmem:[#allocation175_spill] sm:$0xff] }
 0x2b8   :  { %3472 = vst [vmem:[#allocation10 + $0x558] sm:$0xff] %v3184_v1  ;;  %3473 = vst [vmem:[#allocation10 + $0x560] sm:$0xff] %v3185_v62  ;;  %v2870_v5 = vmul.f32 %v6663_v60, %v2551_v26  ;;  %v2871_v37 = vmul.f32 %v6665_v38, %v2552_v34  ;;  %v2555_v50 = vmul.f32 %v7359_v41, %v9380_v20  ;;  %v9385_v62 = vld [vmem:[#allocation176_spill] sm:$0xff]  ;;  %v9386_v55 = vld [vmem:[#allocation179_spill] sm:$0xff] }
 0x2b9   :  { %3474 = vst [vmem:[#allocation10 + $0x568] sm:$0xff] %v3186_v27  ;;  %v2556_v23 = vmul.f32 %v7359_v41, %v9381_v59  ;;  %v2872_v52 = vmul.f32 %v6667_v16, %v2553_v45  ;;  %v2873_v11 = vmul.f32 %v6669_v25, %v2554_v58  ;;  %v3187_v17 = vadd.f32 %v6671_v22, %v2868_v14 }
 0x2ba   :  { %v3188_v29 = vadd.f32 %v6673_v36, %v2869_v63  ;;  %v3189_v48 = vadd.f32 %v6675_v3, %v2870_v5  ;;  %v3190_v21 = vadd.f32 %v6684_v2, %v2871_v37  ;;  %v2557_v43 = vmul.f32 %v7359_v41, %v9382_v15 }
 0x2bb   :  { %v2558_v10 = vmul.f32 %v7359_v41, %v9383_v42  ;;  %v3191_v51 = vadd.f32 %v6686_v13, %v2872_v52  ;;  %v3192_v49 = vadd.f32 %v6688_v32, %v2873_v11  ;;  %3475 = vst [vmem:[#allocation10 + $0x570] sm:$0xff] %v3187_v17  ;;  %v2559_v1 = vmul.f32 %v7359_v41, %v9384_v35  ;;  %v9389_v11 = vld [vmem:[#allocation168_spill] sm:$0xff] }
 0x2bc   :  { %3476 = vst [vmem:[#allocation10 + $0x578] sm:$0xff] %v3188_v29  ;;  %v2560_v27 = vmul.f32 %v7359_v41, %v9385_v62  ;;  %3477 = vst [vmem:[#allocation10 + $0x580] sm:$0xff] %v3189_v48  ;;  %v2874_v19 = vmul.f32 %v6659_v4, %v2555_v50  ;;  %v2875_v26 = vmul.f32 %v6661_v57, %v2556_v23  ;;  %v9387_v41 = vld [vmem:[#allocation165_spill] sm:$0xff]  ;;  %v9388_v23 = vld [vmem:[#allocation166_spill] sm:$0xff] }
 0x2bd   :  { %3478 = vst [vmem:[#allocation10 + $0x588] sm:$0xff] %v3190_v21  ;;  %v2876_v53 = vmul.f32 %v6663_v60, %v2557_v43  ;;  %v2877_v34 = vmul.f32 %v6665_v38, %v2558_v10  ;;  %3479 = vst [vmem:[#allocation10 + $0x590] sm:$0xff] %v3191_v51  ;;  %v2878_v7 = vmul.f32 %v6667_v16, %v2559_v1  ;;  %v9390_v29 = vld [vmem:[#allocation169_spill] sm:$0xff]  ;;  %v9391_v21 = vld [vmem:[#allocation170_spill] sm:$0xff] }
 0x2be   :  { %3480 = vst [vmem:[#allocation10 + $0x598] sm:$0xff] %v3192_v49  ;;  %v2879_v45 = vmul.f32 %v6669_v25, %v2560_v27  ;;  %v2561_v58 = vmul.f32 %v7365_v6, %v9386_v55  ;;  %v2562_v14 = vmul.f32 %v7365_v6, %v9387_v41  ;;  %v3193_v63 = vadd.f32 %v6671_v22, %v2874_v19  ;;  %v9392_v49 = vld [vmem:[#allocation173_spill] sm:$0xff]  ;;  %v9393_v1 = vld [vmem:[#allocation183_spill] sm:$0xff]  ;;  %v2193_v27 = vpop.xlane.xlu0 %2192 }
 0x2bf   :  { %v3194_v5 = vadd.f32 %v6673_v36, %v2875_v26  ;;  %v3195_v37 = vadd.f32 %v6675_v3, %v2876_v53  ;;  %v3196_v20 = vadd.f32 %v6684_v2, %v2877_v34  ;;  %v3197_v50 = vadd.f32 %v6686_v13, %v2878_v7 }
 0x2c0   :  { %v3198_v59 = vadd.f32 %v6688_v32, %v2879_v45  ;;  %v2563_v52 = vmul.f32 %v7365_v6, %v9388_v23  ;;  %v2564_v17 = vmul.f32 %v7365_v6, %v9389_v11  ;;  %3481 = vst [vmem:[#allocation10 + $0x5a0] sm:$0xff] %v3193_v63  ;;  %v2565_v48 = vmul.f32 %v7365_v6, %v9390_v29  ;;  %v9394_v45 = vld [vmem:[#allocation184_spill] sm:$0xff] }
 0x2c1   :  { %3482 = vst [vmem:[#allocation10 + $0x5a8] sm:$0xff] %v3194_v5  ;;  %3483 = vst [vmem:[#allocation10 + $0x5b0] sm:$0xff] %v3195_v37  ;;  %v2566_v15 = vmul.f32 %v7365_v6, %v9391_v21  ;;  %v2880_v43 = vmul.f32 %v6659_v4, %v2561_v58  ;;  %v2881_v42 = vmul.f32 %v6661_v57, %v2562_v14  ;;  %v9395_v58 = vld [vmem:[#allocation186_spill] sm:$0xff]  ;;  %v9396_v5 = vld [vmem:[#allocation187_spill] sm:$0xff] }
 0x2c2   :  { %3484 = vst [vmem:[#allocation10 + $0x5b8] sm:$0xff] %v3196_v20  ;;  %3485 = vst [vmem:[#allocation10 + $0x5c0] sm:$0xff] %v3197_v50  ;;  %v2882_v10 = vmul.f32 %v6663_v60, %v2563_v52  ;;  %v2883_v51 = vmul.f32 %v6665_v38, %v2564_v17  ;;  %v2567_v35 = vmul.f32 %v7375_v61, %v9392_v49  ;;  %v9397_v20 = vld [vmem:[#allocation188_spill] sm:$0xff]  ;;  %v2200_v17 = vpop.xlane.xlu1 %2199 }
 0x2c3   :  { %3486 = vst [vmem:[#allocation10 + $0x5c8] sm:$0xff] %v3198_v59  ;;  %v2568_v62 = vmul.f32 %v7375_v61, %v9393_v1  ;;  %v2884_v19 = vmul.f32 %v6667_v16, %v2565_v48  ;;  %v2885_v6 = vmul.f32 %v6669_v25, %v2566_v15  ;;  %v3199_v26 = vadd.f32 %v6671_v22, %v2880_v43 }
 0x2c4   :  { %v3200_v53 = vadd.f32 %v6673_v36, %v2881_v42  ;;  %v3201_v34 = vadd.f32 %v6675_v3, %v2882_v10  ;;  %v3202_v7 = vadd.f32 %v6684_v2, %v2883_v51  ;;  %v2569_v55 = vmul.f32 %v7375_v61, %v9394_v45  ;;  %v2207_v10 = vpop.xlane.xlu0 %2206 }
 0x2c5   :  { %v2570_v41 = vmul.f32 %v7375_v61, %v9395_v58  ;;  %v3203_v14 = vadd.f32 %v6686_v13, %v2884_v19  ;;  %v3204_v63 = vadd.f32 %v6688_v32, %v2885_v6  ;;  %3487 = vst [vmem:[#allocation10 + $0x5d0] sm:$0xff] %v3199_v26  ;;  %v2571_v37 = vmul.f32 %v7375_v61, %v9396_v5  ;;  %v3682_v26 = vpop.eup %3681  ;;  %v9403_v5 = vld [vmem:[#allocation182_spill] sm:$0xff] }
 0x2c6   :  { %3488 = vst [vmem:[#allocation10 + $0x5d8] sm:$0xff] %v3200_v53  ;;  %v2572_v50 = vmul.f32 %v7375_v61, %v9397_v20  ;;  %3489 = vst [vmem:[#allocation10 + $0x5e0] sm:$0xff] %v3201_v34  ;;  %v2886_v59 = vmul.f32 %v6659_v4, %v2567_v35  ;;  %v2887_v23 = vmul.f32 %v6661_v57, %v2568_v62  ;;  %v2271_v61 = vmul.f32 0.0013020834, %v2193_v27  ;;  %v9398_v53 = vld [vmem:[#allocation191_spill] sm:$0xff]  ;;  %v9399_v34 = vld [vmem:[#allocation177_spill] sm:$0xff] }
 0x2c7   :  { %3490 = vst [vmem:[#allocation10 + $0x5e8] sm:$0xff] %v3202_v7  ;;  %v2888_v52 = vmul.f32 %v6663_v60, %v2569_v55  ;;  %v2889_v11 = vmul.f32 %v6665_v38, %v2570_v41  ;;  %3491 = vst [vmem:[#allocation10 + $0x5f0] sm:$0xff] %v3203_v14  ;;  %v2890_v29 = vmul.f32 %v6667_v16, %v2571_v37  ;;  %v2315_v35 = vadd.f32 1e-12, %v7309_v8  ;;  %v2214_v8 = vpop.xlane.xlu1 %2213  ;;  %v9400_v7 = vld [vmem:[#allocation178_spill] sm:$0xff]  ;;  %v9401_v55 = vld [vmem:[#allocation180_spill] sm:$0xff]  ;;  %v3684_v41 = vpop.eup %3683 }
 0x2c8   :  { %3492 = vst [vmem:[#allocation10 + $0x5f8] sm:$0xff] %v3204_v63  ;;  %v2891_v48 = vmul.f32 %v6669_v25, %v2572_v50  ;;  %v3205_v21 = vadd.f32 %v6671_v22, %v2886_v59  ;;  %v3206_v15 = vadd.f32 %v6673_v36, %v2887_v23  ;;  %v2317_v1 = vadd.f32 1e-12, %v7315_v31  ;;  %v2221_v6 = vpop.xlane.xlu0 %2220  ;;  %v9402_v14 = vld [vmem:[#allocation181_spill] sm:$0xff]  ;;  %v3686_v50 = vpop.eup %3685 }
 0x2c9   :  { %v3207_v43 = vadd.f32 %v6675_v3, %v2888_v52  ;;  %v3208_v42 = vadd.f32 %v6684_v2, %v2889_v11  ;;  %v3209_v51 = vadd.f32 %v6686_v13, %v2890_v29  ;;  %v2272_v62 = vmul.f32 0.0013020834, %v2200_v17  ;;  %v7606_v17 = vpop.eup %3687 }
 0x2ca   :  { %v3210_v49 = vadd.f32 %v6688_v32, %v2891_v48  ;;  %3493 = vst [vmem:[#allocation10 + $0x600] sm:$0xff] %v3205_v21  ;;  %3494 = vst [vmem:[#allocation10 + $0x608] sm:$0xff] %v3206_v15  ;;  %3691 = vrsqrt.f32 %v2315_v35  ;;  %v2319_v27 = vadd.f32 1e-12, %v2271_v61  ;;  %v2273_v19 = vmul.f32 0.0013020834, %v2207_v10 }
 0x2cb   :  { %3495 = vst [vmem:[#allocation10 + $0x610] sm:$0xff] %v3207_v43  ;;  %3496 = vst [vmem:[#allocation10 + $0x618] sm:$0xff] %v3208_v42  ;;  %3693 = vrsqrt.f32 %v2316_v24  ;;  %v2320_v46 = vadd.f32 1e-12, %v2272_v62  ;;  %v2274_v18 = vmul.f32 0.0013020834, %v2214_v8  ;;  %v2573_v28 = vmul.f32 %v3682_v26, %v9398_v53  ;;  %v7612_v42 = vpop.eup %3689 }
 0x2cc   :  { %3497 = vst [vmem:[#allocation10 + $0x620] sm:$0xff] %v3209_v51  ;;  %3498 = vst [vmem:[#allocation10 + $0x628] sm:$0xff] %v3210_v49  ;;  %3695 = vrsqrt.f32 %v2317_v1  ;;  %v7590_v47 = vadd.f32 1e-12, %v2273_v19  ;;  %v7592_v31 = vmul.f32 0.0013020834, %v2221_v6  ;;  %v2574_v12 = vmul.f32 %v3682_v26, %v9399_v34 }
 0x2cd   :  { %3697 = vrsqrt.f32 %v2318_v39  ;;  %v2575_v45 = vmul.f32 %v3682_v26, %v9400_v7  ;;  %v2576_v58 = vmul.f32 %v3682_v26, %v9401_v55  ;;  %v2577_v63 = vmul.f32 %v3682_v26, %v9402_v14  ;;  %v9404_v61 = vld [vmem:[#allocation185_spill] sm:$0xff]  ;;  %v9405_v15 = vld [vmem:[#allocation195_spill] sm:$0xff]  ;;  %v9406_v39 = vld [vmem:[#allocation196_spill] sm:$0xff] }
 0x2ce   :  { %3699 = vrsqrt.f32 %v2319_v27  ;;  %v2578_v37 = vmul.f32 %v3682_v26, %v9403_v5  ;;  %v7600_v20 = vadd.f32 1e-12, %v2274_v18  ;;  %v2892_v59 = vmul.f32 %v6659_v4, %v2573_v28  ;;  %v9407_v27 = vld [vmem:[#allocation198_spill] sm:$0xff]  ;;  %v9409_v26 = vld [vmem:[#allocation200_spill] sm:$0xff]  ;;  %v9410_v55 = vld [vmem:[#allocation203_spill] sm:$0xff] }
 0x2cf   :  { %3701 = vrsqrt.f32 %v2320_v46  ;;  %v2893_v23 = vmul.f32 %v6661_v57, %v2574_v12  ;;  %v2894_v52 = vmul.f32 %v6663_v60, %v2575_v45  ;;  %v2895_v11 = vmul.f32 %v6665_v38, %v2576_v58  ;;  %v9408_v46 = vld [vmem:[#allocation199_spill] sm:$0xff]  ;;  %v9411_v14 = vld [vmem:[#allocation189_spill] sm:$0xff] }
 0x2d0   :  { %v2896_v29 = vmul.f32 %v6667_v16, %v2577_v63  ;;  %v2897_v48 = vmul.f32 %v6669_v25, %v2578_v37  ;;  %v2579_v21 = vmul.f32 %v3684_v41, %v9404_v61  ;;  %v2580_v43 = vmul.f32 %v3684_v41, %v9405_v15 }
 0x2d1   :  { %v3211_v10 = vadd.f32 %v6671_v22, %v2892_v59  ;;  %v3212_v51 = vadd.f32 %v6673_v36, %v2893_v23  ;;  %v3213_v49 = vadd.f32 %v6675_v3, %v2894_v52  ;;  %v3214_v35 = vadd.f32 %v6684_v2, %v2895_v11 }
 0x2d2   :  { %v3215_v1 = vadd.f32 %v6686_v13, %v2896_v29  ;;  %v3216_v62 = vadd.f32 %v6688_v32, %v2897_v48  ;;  %v2581_v8 = vmul.f32 %v3684_v41, %v9406_v39  ;;  %v2582_v19 = vmul.f32 %v3684_v41, %v9407_v27  ;;  %v9412_v48 = vld [vmem:[#allocation190_spill] sm:$0xff] }
 0x2d3   :  { %3499 = vst [vmem:[#allocation10 + $0x630] sm:$0xff] %v3211_v10  ;;  %3500 = vst [vmem:[#allocation10 + $0x638] sm:$0xff] %v3212_v51  ;;  %v2583_v18 = vmul.f32 %v3684_v41, %v9408_v46  ;;  %v2584_v53 = vmul.f32 %v3684_v41, %v9409_v26  ;;  %v2898_v28 = vmul.f32 %v6659_v4, %v2579_v21  ;;  %v9413_v21 = vld [vmem:[#allocation192_spill] sm:$0xff]  ;;  %v9414_v51 = vld [vmem:[#allocation193_spill] sm:$0xff]  ;;  %3703 = vrsqrt.f32 %v7590_v47 }
 0x2d4   :  { %v7618_v24 = vpop.eup %3691  ;;  %3501 = vst [vmem:[#allocation10 + $0x640] sm:$0xff] %v3213_v49  ;;  %3502 = vst [vmem:[#allocation10 + $0x648] sm:$0xff] %v3214_v35  ;;  %v2899_v34 = vmul.f32 %v6661_v57, %v2580_v43  ;;  %v2900_v7 = vmul.f32 %v6663_v60, %v2581_v8  ;;  %v2901_v45 = vmul.f32 %v6665_v38, %v2582_v19  ;;  %v9415_v35 = vld [vmem:[#allocation194_spill] sm:$0xff]  ;;  %v9416_v26 = vld [vmem:[#allocation197_spill] sm:$0xff]  ;;  %3705 = vrsqrt.f32 %v7600_v20 }
 0x2d5   :  { %v7624_v6 = vpop.eup %3693  ;;  %3503 = vst [vmem:[#allocation10 + $0x650] sm:$0xff] %v3215_v1  ;;  %3504 = vst [vmem:[#allocation10 + $0x658] sm:$0xff] %v3216_v62  ;;  %v2585_v58 = vmul.f32 %v3686_v50, %v9410_v55  ;;  %v2586_v63 = vmul.f32 %v3686_v50, %v9411_v14  ;;  %v2902_v41 = vmul.f32 %v6667_v16, %v2583_v18 }
 0x2d6   :  { %v7630_v12 = vpop.eup %3695  ;;  %v2903_v37 = vmul.f32 %v6669_v25, %v2584_v53  ;;  %v3217_v59 = vadd.f32 %v6671_v22, %v2898_v28  ;;  %v3218_v23 = vadd.f32 %v6673_v36, %v2899_v34  ;;  %v3219_v11 = vadd.f32 %v6675_v3, %v2900_v7  ;;  %v9417_v53 = vld [vmem:[#allocation207_spill] sm:$0xff] }
 0x2d7   :  { %v7636_v5 = vpop.eup %3697  ;;  %v3220_v29 = vadd.f32 %v6684_v2, %v2901_v45  ;;  %v2587_v61 = vmul.f32 %v3686_v50, %v9412_v48  ;;  %v2588_v15 = vmul.f32 %v3686_v50, %v9413_v21  ;;  %v3221_v43 = vadd.f32 %v6686_v13, %v2902_v41 }
 0x2d8   :  { %v7642_v52 = vpop.eup %3699  ;;  %v3222_v10 = vadd.f32 %v6688_v32, %v2903_v37  ;;  %3505 = vst [vmem:[#allocation10 + $0x660] sm:$0xff] %v3217_v59  ;;  %3506 = vst [vmem:[#allocation10 + $0x668] sm:$0xff] %v3218_v23  ;;  %v2589_v49 = vmul.f32 %v3686_v50, %v9414_v51  ;;  %v2590_v1 = vmul.f32 %v3686_v50, %v9415_v35  ;;  %v9419_v37 = vld [vmem:[#allocation210_spill] sm:$0xff]  ;;  %v9420_v23 = vld [vmem:[#allocation211_spill] sm:$0xff] }
 0x2d9   :  { %v7652_v62 = vpop.eup %3701  ;;  %3507 = vst [vmem:[#allocation10 + $0x670] sm:$0xff] %v3219_v11  ;;  %3508 = vst [vmem:[#allocation10 + $0x678] sm:$0xff] %v3220_v29  ;;  %v2904_v39 = vmul.f32 %v6659_v4, %v2585_v58  ;;  %v2905_v8 = vmul.f32 %v6661_v57, %v2586_v63  ;;  %v2906_v27 = vmul.f32 %v6663_v60, %v2587_v61  ;;  %v9418_v63 = vld [vmem:[#allocation208_spill] sm:$0xff] }
 0x2da   :  { %v2907_v19 = vmul.f32 %v6665_v38, %v2588_v15  ;;  %3509 = vst [vmem:[#allocation10 + $0x680] sm:$0xff] %v3221_v43  ;;  %3510 = vst [vmem:[#allocation10 + $0x688] sm:$0xff] %v3222_v10  ;;  %v2908_v46 = vmul.f32 %v6667_v16, %v2589_v49  ;;  %v2909_v18 = vmul.f32 %v6669_v25, %v2590_v1  ;;  %v9421_v29 = vld [vmem:[#allocation212_spill] sm:$0xff]  ;;  %v9422_v10 = vld [vmem:[#allocation215_spill] sm:$0xff] }
 0x2db   :  { %v2591_v50 = vmul.f32 %v7606_v17, %v9416_v26  ;;  %v2592_v28 = vmul.f32 %v7606_v17, %v9417_v53  ;;  %v3223_v34 = vadd.f32 %v6671_v22, %v2904_v39  ;;  %v3224_v7 = vadd.f32 %v6673_v36, %v2905_v8  ;;  %v9423_v49 = vld [vmem:[#allocation201_spill] sm:$0xff] }
 0x2dc   :  { %v3225_v45 = vadd.f32 %v6675_v3, %v2906_v27  ;;  %v3226_v55 = vadd.f32 %v6684_v2, %v2907_v19  ;;  %v3227_v58 = vadd.f32 %v6686_v13, %v2908_v46  ;;  %v3228_v14 = vadd.f32 %v6688_v32, %v2909_v18  ;;  %v9424_v46 = vld [vmem:[#allocation202_spill] sm:$0xff] }
 0x2dd   :  { %v2593_v41 = vmul.f32 %v7606_v17, %v9418_v63  ;;  %v2594_v59 = vmul.f32 %v7606_v17, %v9419_v37  ;;  %3511 = vst [vmem:[#allocation10 + $0x690] sm:$0xff] %v3223_v34  ;;  %3512 = vst [vmem:[#allocation10 + $0x698] sm:$0xff] %v3224_v7  ;;  %v2595_v11 = vmul.f32 %v7606_v17, %v9420_v23  ;;  %v9426_v7 = vld [vmem:[#allocation205_spill] sm:$0xff]  ;;  %v9427_v37 = vld [vmem:[#allocation206_spill] sm:$0xff] }
 0x2de   :  { %3513 = vst [vmem:[#allocation10 + $0x6a0] sm:$0xff] %v3225_v45  ;;  %3514 = vst [vmem:[#allocation10 + $0x6a8] sm:$0xff] %v3226_v55  ;;  %v2596_v48 = vmul.f32 %v7606_v17, %v9421_v29  ;;  %v2910_v61 = vmul.f32 %v6659_v4, %v2591_v50  ;;  %v2911_v21 = vmul.f32 %v6661_v57, %v2592_v28  ;;  %v9425_v28 = vld [vmem:[#allocation204_spill] sm:$0xff] }
 0x2df   :  { %3515 = vst [vmem:[#allocation10 + $0x6b0] sm:$0xff] %v3227_v58  ;;  %3516 = vst [vmem:[#allocation10 + $0x6b8] sm:$0xff] %v3228_v14  ;;  %v2912_v15 = vmul.f32 %v6663_v60, %v2593_v41  ;;  %v2913_v43 = vmul.f32 %v6665_v38, %v2594_v59  ;;  %v2597_v51 = vmul.f32 %v7612_v42, %v9422_v10 }
 0x2e0   :  { %v2598_v35 = vmul.f32 %v7612_v42, %v9423_v49  ;;  %v2914_v1 = vmul.f32 %v6667_v16, %v2595_v11  ;;  %v2915_v17 = vmul.f32 %v6669_v25, %v2596_v48  ;;  %v3229_v39 = vadd.f32 %v6671_v22, %v2910_v61 }
 0x2e1   :  { %v3230_v8 = vadd.f32 %v6673_v36, %v2911_v21  ;;  %v3231_v27 = vadd.f32 %v6675_v3, %v2912_v15  ;;  %v3232_v19 = vadd.f32 %v6684_v2, %v2913_v43  ;;  %v2599_v18 = vmul.f32 %v7612_v42, %v9424_v46  ;;  %v9429_v43 = vld [vmem:[#allocation219_spill] sm:$0xff] }
 0x2e2   :  { %v2600_v26 = vmul.f32 %v7612_v42, %v6239_v30  ;;  %v3233_v50 = vadd.f32 %v6686_v13, %v2914_v1  ;;  %v3234_v53 = vadd.f32 %v6688_v32, %v2915_v17  ;;  %3517 = vst [vmem:[#allocation10 + $0x6c0] sm:$0xff] %v3229_v39  ;;  %v2601_v34 = vmul.f32 %v7612_v42, %v9425_v28  ;;  %v9432_v17 = vld [vmem:[#allocation214_spill] sm:$0xff] }
 0x2e3   :  { %3518 = vst [vmem:[#allocation10 + $0x6c8] sm:$0xff] %v3230_v8  ;;  %v2602_v45 = vmul.f32 %v7612_v42, %v9426_v7  ;;  %3519 = vst [vmem:[#allocation10 + $0x6d0] sm:$0xff] %v3231_v27  ;;  %v2916_v55 = vmul.f32 %v6659_v4, %v2597_v51  ;;  %v2917_v58 = vmul.f32 %v6661_v57, %v2598_v35  ;;  %v9428_v42 = vld [vmem:[#allocation209_spill] sm:$0xff]  ;;  %v9430_v51 = vld [vmem:[#allocation220_spill] sm:$0xff] }
 0x2e4   :  { %3520 = vst [vmem:[#allocation10 + $0x6d8] sm:$0xff] %v3232_v19  ;;  %v2918_v30 = vmul.f32 %v6663_v60, %v2599_v18  ;;  %v2919_v14 = vmul.f32 %v6665_v38, %v2600_v26  ;;  %3521 = vst [vmem:[#allocation10 + $0x6e0] sm:$0xff] %v3233_v50  ;;  %v2920_v63 = vmul.f32 %v6667_v16, %v2601_v34  ;;  %v9431_v35 = vld [vmem:[#allocation222_spill] sm:$0xff]  ;;  %v9433_v18 = vld [vmem:[#allocation223_spill] sm:$0xff] }
 0x2e5   :  { %3522 = vst [vmem:[#allocation10 + $0x6e8] sm:$0xff] %v3234_v53  ;;  %v2921_v41 = vmul.f32 %v6669_v25, %v2602_v45  ;;  %v2603_v59 = vmul.f32 %v7618_v24, %v9427_v37  ;;  %v2604_v23 = vmul.f32 %v7618_v24, %v9428_v42  ;;  %v3235_v11 = vadd.f32 %v6671_v22, %v2916_v55  ;;  %v9434_v50 = vld [vmem:[#allocation224_spill] sm:$0xff] }
 0x2e6   :  { %v3236_v29 = vadd.f32 %v6673_v36, %v2917_v58  ;;  %v3237_v48 = vadd.f32 %v6675_v3, %v2918_v30  ;;  %v3238_v61 = vadd.f32 %v6684_v2, %v2919_v14  ;;  %v3239_v21 = vadd.f32 %v6686_v13, %v2920_v63  ;;  %v9435_v58 = vld [vmem:[#allocation213_spill] sm:$0xff]  ;;  %v9436_v14 = vld [vmem:[#allocation216_spill] sm:$0xff] }
 0x2e7   :  { %v3240_v15 = vadd.f32 %v6688_v32, %v2921_v41  ;;  %v2605_v10 = vmul.f32 %v7618_v24, %v9429_v43  ;;  %v2606_v49 = vmul.f32 %v7618_v24, %v9430_v51  ;;  %3523 = vst [vmem:[#allocation10 + $0x6f0] sm:$0xff] %v3235_v11  ;;  %v2607_v1 = vmul.f32 %v7618_v24, %v9431_v35 }
 0x2e8   :  { %3524 = vst [vmem:[#allocation10 + $0x6f8] sm:$0xff] %v3236_v29  ;;  %3525 = vst [vmem:[#allocation10 + $0x700] sm:$0xff] %v3237_v48  ;;  %v2608_v39 = vmul.f32 %v7618_v24, %v9432_v17  ;;  %v2922_v8 = vmul.f32 %v6659_v4, %v2603_v59  ;;  %v2923_v27 = vmul.f32 %v6661_v57, %v2604_v23  ;;  %v9437_v59 = vld [vmem:[#allocation225_spill] sm:$0xff] }
 0x2e9   :  { %3526 = vst [vmem:[#allocation10 + $0x708] sm:$0xff] %v3238_v61  ;;  %3527 = vst [vmem:[#allocation10 + $0x710] sm:$0xff] %v3239_v21  ;;  %v2924_v19 = vmul.f32 %v6663_v60, %v2605_v10  ;;  %v2925_v46 = vmul.f32 %v6665_v38, %v2606_v49  ;;  %v2609_v26 = vmul.f32 %v7624_v6, %v9433_v18  ;;  %v9438_v23 = vld [vmem:[#allocation217_spill] sm:$0xff]  ;;  %v9439_v10 = vld [vmem:[#allocation218_spill] sm:$0xff] }
 0x2ea   :  { %3528 = vst [vmem:[#allocation10 + $0x718] sm:$0xff] %v3240_v15  ;;  %v2610_v53 = vmul.f32 %v7624_v6, %v9434_v50  ;;  %v2926_v28 = vmul.f32 %v6667_v16, %v2607_v1  ;;  %v2927_v24 = vmul.f32 %v6669_v25, %v2608_v39  ;;  %v3241_v34 = vadd.f32 %v6671_v22, %v2922_v8  ;;  %v9442_v18 = vld [vmem:[#allocation238_spill] sm:$0xff]  ;;  %v9443_v50 = vld [vmem:[#allocation239_spill] sm:$0xff] }
 0x2eb   :  { %v3242_v7 = vadd.f32 %v6673_v36, %v2923_v27  ;;  %v3243_v45 = vadd.f32 %v6675_v3, %v2924_v19  ;;  %v3244_v55 = vadd.f32 %v6684_v2, %v2925_v46  ;;  %v2611_v30 = vmul.f32 %v7624_v6, %v9435_v58  ;;  %v9441_v19 = vld [vmem:[#allocation237_spill] sm:$0xff]  ;;  %v9445_v58 = vld [vmem:[#allocation243_spill] sm:$0xff] }
 0x2ec   :  { %v2612_v63 = vmul.f32 %v7624_v6, %v9436_v14  ;;  %v3245_v41 = vadd.f32 %v6686_v13, %v2926_v28  ;;  %v3246_v37 = vadd.f32 %v6688_v32, %v2927_v24  ;;  %3529 = vst [vmem:[#allocation10 + $0x720] sm:$0xff] %v3241_v34  ;;  %v2613_v42 = vmul.f32 %v7624_v6, %v9437_v59  ;;  %v9444_v28 = vld [vmem:[#allocation244_spill] sm:$0xff]  ;;  %v9446_v14 = vld [vmem:[#allocation227_spill] sm:$0xff] }
 0x2ed   :  { %3530 = vst [vmem:[#allocation10 + $0x728] sm:$0xff] %v3242_v7  ;;  %v2614_v11 = vmul.f32 %v7624_v6, %v9438_v23  ;;  %3531 = vst [vmem:[#allocation10 + $0x730] sm:$0xff] %v3243_v45  ;;  %v2928_v29 = vmul.f32 %v6659_v4, %v2609_v26  ;;  %v2929_v48 = vmul.f32 %v6661_v57, %v2610_v53  ;;  %v9440_v6 = vld [vmem:[#allocation221_spill] sm:$0xff] }
 0x2ee   :  { %3532 = vst [vmem:[#allocation10 + $0x738] sm:$0xff] %v3244_v55  ;;  %v2930_v61 = vmul.f32 %v6663_v60, %v2611_v30  ;;  %v2931_v21 = vmul.f32 %v6665_v38, %v2612_v63  ;;  %3533 = vst [vmem:[#allocation10 + $0x740] sm:$0xff] %v3245_v41  ;;  %v2932_v15 = vmul.f32 %v6667_v16, %v2613_v42 }
 0x2ef   :  { %3534 = vst [vmem:[#allocation10 + $0x748] sm:$0xff] %v3246_v37  ;;  %v2933_v43 = vmul.f32 %v6669_v25, %v2614_v11  ;;  %v2615_v51 = vmul.f32 %v7630_v12, %v9439_v10  ;;  %v2616_v49 = vmul.f32 %v7630_v12, %v9440_v6  ;;  %v3247_v35 = vadd.f32 %v6671_v22, %v2928_v29  ;;  %v9447_v11 = vld [vmem:[#allocation245_spill] sm:$0xff] }
 0x2f0   :  { %v3248_v1 = vadd.f32 %v6673_v36, %v2929_v48  ;;  %v3249_v17 = vadd.f32 %v6675_v3, %v2930_v61  ;;  %v3250_v39 = vadd.f32 %v6684_v2, %v2931_v21  ;;  %v3251_v8 = vadd.f32 %v6686_v13, %v2932_v15  ;;  %v9448_v48 = vld [vmem:[#allocation228_spill] sm:$0xff] }
 0x2f1   :  { %v3252_v27 = vadd.f32 %v6688_v32, %v2933_v43  ;;  %v2617_v46 = vmul.f32 %v7630_v12, %v9441_v19  ;;  %v2618_v26 = vmul.f32 %v7630_v12, %v9442_v18  ;;  %3535 = vst [vmem:[#allocation10 + $0x750] sm:$0xff] %v3247_v35  ;;  %v2619_v53 = vmul.f32 %v7630_v12, %v9443_v50  ;;  %v9449_v43 = vld [vmem:[#allocation229_spill] sm:$0xff] }
 0x2f2   :  { %3536 = vst [vmem:[#allocation10 + $0x758] sm:$0xff] %v3248_v1  ;;  %3537 = vst [vmem:[#allocation10 + $0x760] sm:$0xff] %v3249_v17  ;;  %v2620_v24 = vmul.f32 %v7630_v12, %v9444_v28  ;;  %v2934_v34 = vmul.f32 %v6659_v4, %v2615_v51  ;;  %v2935_v7 = vmul.f32 %v6661_v57, %v2616_v49  ;;  %v9450_v51 = vld [vmem:[#allocation233_spill] sm:$0xff] }
 0x2f3   :  { %3538 = vst [vmem:[#allocation10 + $0x768] sm:$0xff] %v3250_v39  ;;  %3539 = vst [vmem:[#allocation10 + $0x770] sm:$0xff] %v3251_v8  ;;  %v2936_v45 = vmul.f32 %v6663_v60, %v2617_v46  ;;  %v2937_v55 = vmul.f32 %v6665_v38, %v2618_v26  ;;  %v2621_v30 = vmul.f32 %v7636_v5, %v9445_v58 }
 0x2f4   :  { %3540 = vst [vmem:[#allocation10 + $0x778] sm:$0xff] %v3252_v27  ;;  %v2622_v63 = vmul.f32 %v7636_v5, %v9446_v14  ;;  %v2938_v41 = vmul.f32 %v6667_v16, %v2619_v53  ;;  %v2939_v12 = vmul.f32 %v6669_v25, %v2620_v24  ;;  %v3253_v37 = vadd.f32 %v6671_v22, %v2934_v34  ;;  %v9451_v27 = vld [vmem:[#allocation234_spill] sm:$0xff]  ;;  %v9453_v34 = vld [vmem:[#allocation255_spill] sm:$0xff] }
 0x2f5   :  { %v3254_v59 = vadd.f32 %v6673_v36, %v2935_v7  ;;  %v3255_v42 = vadd.f32 %v6675_v3, %v2936_v45  ;;  %v3256_v23 = vadd.f32 %v6684_v2, %v2937_v55  ;;  %v2623_v29 = vmul.f32 %v7636_v5, %v9447_v11  ;;  %v9454_v45 = vld [vmem:[#allocation256_spill] sm:$0xff] }
 0x2f6   :  { %v2624_v61 = vmul.f32 %v7636_v5, %v9448_v48  ;;  %v3257_v21 = vadd.f32 %v6686_v13, %v2938_v41  ;;  %v3258_v15 = vadd.f32 %v6688_v32, %v2939_v12  ;;  %3541 = vst [vmem:[#allocation10 + $0x780] sm:$0xff] %v3253_v37  ;;  %v2625_v10 = vmul.f32 %v7636_v5, %v9449_v43  ;;  %v9455_v37 = vld [vmem:[#allocation257_spill] sm:$0xff] }
 0x2f7   :  { %3542 = vst [vmem:[#allocation10 + $0x788] sm:$0xff] %v3254_v59  ;;  %v2626_v6 = vmul.f32 %v7636_v5, %v9450_v51  ;;  %3543 = vst [vmem:[#allocation10 + $0x790] sm:$0xff] %v3255_v42  ;;  %v2940_v49 = vmul.f32 %v6659_v4, %v2621_v30  ;;  %v2941_v35 = vmul.f32 %v6661_v57, %v2622_v63  ;;  %v9452_v5 = vld [vmem:[#allocation235_spill] sm:$0xff]  ;;  %v9456_v42 = vld [vmem:[#allocation258_spill] sm:$0xff] }
 0x2f8   :  { %3544 = vst [vmem:[#allocation10 + $0x798] sm:$0xff] %v3256_v23  ;;  %v2942_v1 = vmul.f32 %v6663_v60, %v2623_v29  ;;  %v2943_v17 = vmul.f32 %v6665_v38, %v2624_v61  ;;  %3545 = vst [vmem:[#allocation10 + $0x7a0] sm:$0xff] %v3257_v21  ;;  %v2944_v39 = vmul.f32 %v6667_v16, %v2625_v10  ;;  %v9457_v61 = vld [vmem:[#allocation247_spill] sm:$0xff] }
 0x2f9   :  { %3546 = vst [vmem:[#allocation10 + $0x7a8] sm:$0xff] %v3258_v15  ;;  %v2945_v8 = vmul.f32 %v6669_v25, %v2626_v6  ;;  %v2627_v19 = vmul.f32 %v7642_v52, %v9451_v27  ;;  %v2628_v46 = vmul.f32 %v7642_v52, %v9452_v5  ;;  %v3259_v18 = vadd.f32 %v6671_v22, %v2940_v49  ;;  %v9458_v15 = vld [vmem:[#allocation248_spill] sm:$0xff]  ;;  %v9459_v49 = vld [vmem:[#allocation249_spill] sm:$0xff]  ;;  %v2228_v27 = vpop.xlane.xlu1 %2227 }
 0x2fa   :  { %v3260_v26 = vadd.f32 %v6673_v36, %v2941_v35  ;;  %v3261_v50 = vadd.f32 %v6675_v3, %v2942_v1  ;;  %v3262_v53 = vadd.f32 %v6684_v2, %v2943_v17  ;;  %v3263_v28 = vadd.f32 %v6686_v13, %v2944_v39 }
 0x2fb   :  { %v3264_v24 = vadd.f32 %v6688_v32, %v2945_v8  ;;  %v2629_v7 = vmul.f32 %v7642_v52, %v9453_v34  ;;  %v2630_v55 = vmul.f32 %v7642_v52, %v9454_v45  ;;  %3547 = vst [vmem:[#allocation10 + $0x7b0] sm:$0xff] %v3259_v18  ;;  %v2631_v58 = vmul.f32 %v7642_v52, %v6441_v33 }
 0x2fc   :  { %3548 = vst [vmem:[#allocation10 + $0x7b8] sm:$0xff] %v3260_v26  ;;  %3549 = vst [vmem:[#allocation10 + $0x7c0] sm:$0xff] %v3261_v50  ;;  %v2632_v30 = vmul.f32 %v7642_v52, %v6461_v54  ;;  %v2946_v14 = vmul.f32 %v6659_v4, %v2627_v19  ;;  %v2947_v63 = vmul.f32 %v6661_v57, %v2628_v46 }
 0x2fd   :  { %3550 = vst [vmem:[#allocation10 + $0x7c8] sm:$0xff] %v3262_v53  ;;  %3551 = vst [vmem:[#allocation10 + $0x7d0] sm:$0xff] %v3263_v28  ;;  %v2948_v41 = vmul.f32 %v6663_v60, %v2629_v7  ;;  %v2949_v12 = vmul.f32 %v6665_v38, %v2630_v55  ;;  %v2633_v59 = vmul.f32 %v7652_v62, %v9455_v37  ;;  %v2276_v28 = vmul.f32 0.0013020834, %v2228_v27  ;;  %v9461_v7 = vld [vmem:[#allocation251_spill] sm:$0xff]  ;;  %v9462_v55 = vld [vmem:[#allocation252_spill] sm:$0xff] }
 0x2fe   :  { %3552 = vst [vmem:[#allocation10 + $0x7d8] sm:$0xff] %v3264_v24  ;;  %v2634_v23 = vmul.f32 %v7652_v62, %v9456_v42  ;;  %v2950_v33 = vmul.f32 %v6667_v16, %v2631_v58  ;;  %v2951_v54 = vmul.f32 %v6669_v25, %v2632_v30  ;;  %v3265_v52 = vadd.f32 %v6671_v22, %v2946_v14  ;;  %v9460_v24 = vld [vmem:[#allocation259_spill] sm:$0xff] }
 0x2ff   :  { %v3266_v11 = vadd.f32 %v6673_v36, %v2947_v63  ;;  %v3267_v29 = vadd.f32 %v6675_v3, %v2948_v41  ;;  %v3268_v48 = vadd.f32 %v6684_v2, %v2949_v12  ;;  %v2635_v21 = vmul.f32 %v7652_v62, %v9457_v61 }
 0x300   :  { %v2636_v43 = vmul.f32 %v7652_v62, %v9458_v15  ;;  %v3269_v10 = vadd.f32 %v6686_v13, %v2950_v33  ;;  %v3270_v51 = vadd.f32 %v6688_v32, %v2951_v54  ;;  %3553 = vst [vmem:[#allocation10 + $0x7e0] sm:$0xff] %v3265_v52  ;;  %v2637_v6 = vmul.f32 %v7652_v62, %v6469_v40 }
 0x301   :  { %3554 = vst [vmem:[#allocation10 + $0x7e8] sm:$0xff] %v3266_v11  ;;  %v2638_v35 = vmul.f32 %v7652_v62, %v9459_v49  ;;  %3555 = vst [vmem:[#allocation10 + $0x7f0] sm:$0xff] %v3267_v29  ;;  %v2952_v1 = vmul.f32 %v6659_v4, %v2633_v59  ;;  %v2953_v17 = vmul.f32 %v6661_v57, %v2634_v23  ;;  %v2323_v62 = vadd.f32 1e-12, %v7592_v31  ;;  %v3704_v31 = vpop.eup %3703 }
 0x302   :  { %3556 = vst [vmem:[#allocation10 + $0x7f8] sm:$0xff] %v3268_v48  ;;  %v2954_v39 = vmul.f32 %v6663_v60, %v2635_v21  ;;  %v2955_v8 = vmul.f32 %v6665_v38, %v2636_v43  ;;  %3557 = vst [vmem:[#allocation10 + $0x800] sm:$0xff] %v3269_v10  ;;  %v2956_v19 = vmul.f32 %v6667_v16, %v2637_v6  ;;  %v2324_v47 = vadd.f32 1e-12, %v2276_v28  ;;  %v3706_v20 = vpop.eup %3705  ;;  %v9464_v21 = vld [vmem:[#allocation267_spill] sm:$0xff]  ;;  %v9465_v43 = vld [vmem:[#allocation268_spill] sm:$0xff] }
 0x303   :  { %3558 = vst [vmem:[#allocation10 + $0x808] sm:$0xff] %v3270_v51  ;;  %v2957_v40 = vmul.f32 %v6669_v25, %v2638_v35  ;;  %v3271_v5 = vadd.f32 %v6671_v22, %v2952_v1  ;;  %v3272_v46 = vadd.f32 %v6673_v36, %v2953_v17  ;;  %3707 = vrsqrt.f32 %v2323_v62  ;;  %v9467_v6 = vld [vmem:[#allocation261_spill] sm:$0xff]  ;;  %v9470_v28 = vld [vmem:[#allocation266_spill] sm:$0xff] }
 0x304   :  { %v3273_v18 = vadd.f32 %v6675_v3, %v2954_v39  ;;  %v3274_v26 = vadd.f32 %v6684_v2, %v2955_v8  ;;  %v3275_v50 = vadd.f32 %v6686_v13, %v2956_v19  ;;  %3709 = vrsqrt.f32 %v2324_v47  ;;  %v9468_v8 = vld [vmem:[#allocation262_spill] sm:$0xff]  ;;  %v9469_v19 = vld [vmem:[#allocation265_spill] sm:$0xff] }
 0x305   :  { %v3276_v53 = vadd.f32 %v6688_v32, %v2957_v40  ;;  %3559 = vst [vmem:[#allocation10 + $0x810] sm:$0xff] %v3271_v5  ;;  %3560 = vst [vmem:[#allocation10 + $0x818] sm:$0xff] %v3272_v46  ;;  %v2639_v34 = vmul.f32 %v3704_v31, %v9460_v24  ;;  %v2640_v45 = vmul.f32 %v3704_v31, %v9461_v7 }
 0x306   :  { %3561 = vst [vmem:[#allocation10 + $0x820] sm:$0xff] %v3273_v18  ;;  %3562 = vst [vmem:[#allocation10 + $0x828] sm:$0xff] %v3274_v26  ;;  %v2641_v58 = vmul.f32 %v3704_v31, %v9462_v55  ;;  %v2642_v30 = vmul.f32 %v3704_v31, %v6505_v0  ;;  %v2643_v14 = vmul.f32 %v3704_v31, %v6517_v9  ;;  %v9463_v0 = vld [vmem:[#allocation253_spill] sm:$0xff] }
 0x307   :  { %3563 = vst [vmem:[#allocation10 + $0x830] sm:$0xff] %v3275_v50  ;;  %3564 = vst [vmem:[#allocation10 + $0x838] sm:$0xff] %v3276_v53  ;;  %v2644_v63 = vmul.f32 %v3704_v31, %v6529_v44  ;;  %v2958_v41 = vmul.f32 %v6659_v4, %v2639_v34  ;;  %v2959_v12 = vmul.f32 %v6661_v57, %v2640_v45  ;;  %v9471_v31 = vld [vmem:[#allocation273_spill] sm:$0xff]  ;;  %v9472_v45 = vld [vmem:[#allocation274_spill] sm:$0xff] }
 0x308   :  { %v2960_v37 = vmul.f32 %v6663_v60, %v2641_v58  ;;  %v2961_v59 = vmul.f32 %v6665_v38, %v2642_v30  ;;  %v2962_v42 = vmul.f32 %v6667_v16, %v2643_v14  ;;  %v2645_v33 = vmul.f32 %v3706_v20, %v6525_v56  ;;  %v9466_v56 = vld [vmem:[#allocation260_spill] sm:$0xff] }
 0x309   :  { %v2963_v23 = vmul.f32 %v6669_v25, %v2644_v63  ;;  %v2646_v54 = vmul.f32 %v3706_v20, %v9463_v0  ;;  %v3277_v9 = vadd.f32 %v6671_v22, %v2958_v41  ;;  %v3278_v44 = vadd.f32 %v6673_v36, %v2959_v12  ;;  %v9473_v58 = vld [vmem:[#allocation276_spill] sm:$0xff] }
 0x30a   :  { %v3279_v11 = vadd.f32 %v6675_v3, %v2960_v37  ;;  %v3280_v29 = vadd.f32 %v6684_v2, %v2961_v59  ;;  %v3281_v48 = vadd.f32 %v6686_v13, %v2962_v42  ;;  %v2647_v15 = vmul.f32 %v3706_v20, %v9464_v21  ;;  %v9474_v59 = vld [vmem:[#allocation269_spill] sm:$0xff] }
 0x30b   :  { %v3282_v61 = vadd.f32 %v6688_v32, %v2963_v23  ;;  %v2648_v10 = vmul.f32 %v3706_v20, %v9465_v43  ;;  %3565 = vst [vmem:[#allocation10 + $0x840] sm:$0xff] %v3277_v9  ;;  %3566 = vst [vmem:[#allocation10 + $0x848] sm:$0xff] %v3278_v44  ;;  %v2649_v51 = vmul.f32 %v3706_v20, %v9466_v56  ;;  %v9475_v23 = vld [vmem:[#allocation270_spill] sm:$0xff] }
 0x30c   :  { %3567 = vst [vmem:[#allocation10 + $0x850] sm:$0xff] %v3279_v11  ;;  %3568 = vst [vmem:[#allocation10 + $0x858] sm:$0xff] %v3280_v29  ;;  %v2650_v49 = vmul.f32 %v3706_v20, %v9467_v6  ;;  %v2964_v35 = vmul.f32 %v6659_v4, %v2645_v33  ;;  %v2965_v1 = vmul.f32 %v6661_v57, %v2646_v54  ;;  %v9476_v29 = vld [vmem:[#allocation275_spill] sm:$0xff] }
 0x30d   :  { %v3708_v52 = vpop.eup %3707  ;;  %3569 = vst [vmem:[#allocation10 + $0x860] sm:$0xff] %v3281_v48  ;;  %3570 = vst [vmem:[#allocation10 + $0x868] sm:$0xff] %v3282_v61  ;;  %v2966_v17 = vmul.f32 %v6663_v60, %v2647_v15  ;;  %v2967_v39 = vmul.f32 %v6665_v38, %v2648_v10  ;;  %v2968_v62 = vmul.f32 %v6667_v16, %v2649_v51  ;;  %v9477_v61 = vld [vmem:[#allocation277_spill] sm:$0xff]  ;;  %v9478_v15 = vld [vmem:[#allocation278_spill] sm:$0xff] }
 0x30e   :  { %v2651_v27 = vmul.f32 %v3708_v52, %v9468_v8  ;;  %v2652_v40 = vmul.f32 %v3708_v52, %v9469_v19  ;;  %v2969_v5 = vmul.f32 %v6669_v25, %v2650_v49  ;;  %v3283_v46 = vadd.f32 %v6671_v22, %v2964_v35  ;;  %v3710_v26 = vpop.eup %3709  ;;  %v9479_v10 = vld [vmem:[#allocation279_spill] sm:$0xff] }
 0x30f   :  { %v3284_v18 = vadd.f32 %v6673_v36, %v2965_v1  ;;  %v3285_v50 = vadd.f32 %v6675_v3, %v2966_v17  ;;  %v3286_v53 = vadd.f32 %v6684_v2, %v2967_v39  ;;  %v2653_v47 = vmul.f32 %v3708_v52, %v9470_v28 }
 0x310   :  { %v2654_v24 = vmul.f32 %v3708_v52, %v9471_v31  ;;  %v3287_v34 = vadd.f32 %v6686_v13, %v2968_v62  ;;  %v3288_v7 = vadd.f32 %v6688_v32, %v2969_v5  ;;  %3571 = vst [vmem:[#allocation10 + $0x870] sm:$0xff] %v3283_v46  ;;  %v2655_v55 = vmul.f32 %v3708_v52, %v9472_v45 }
 0x311   :  { %3572 = vst [vmem:[#allocation10 + $0x878] sm:$0xff] %v3284_v18  ;;  %v2656_v30 = vmul.f32 %v3708_v52, %v9473_v58  ;;  %3573 = vst [vmem:[#allocation10 + $0x880] sm:$0xff] %v3285_v50  ;;  %v2970_v20 = vmul.f32 %v6659_v4, %v2651_v27  ;;  %v2971_v14 = vmul.f32 %v6661_v57, %v2652_v40 }
 0x312   :  { %3574 = vst [vmem:[#allocation10 + $0x888] sm:$0xff] %v3286_v53  ;;  %v2972_v63 = vmul.f32 %v6663_v60, %v2653_v47  ;;  %v2973_v41 = vmul.f32 %v6665_v38, %v2654_v24  ;;  %3575 = vst [vmem:[#allocation10 + $0x890] sm:$0xff] %v3287_v34  ;;  %v2974_v12 = vmul.f32 %v6667_v16, %v2655_v55 }
 0x313   :  { %3576 = vst [vmem:[#allocation10 + $0x898] sm:$0xff] %v3288_v7  ;;  %v2975_v37 = vmul.f32 %v6669_v25, %v2656_v30  ;;  %v2657_v42 = vmul.f32 %v3710_v26, %v9474_v59  ;;  %v2658_v33 = vmul.f32 %v3710_v26, %v9475_v23  ;;  %v3289_v0 = vadd.f32 %v6671_v22, %v2970_v20 }
 0x314   :  { %v3290_v54 = vadd.f32 %v6673_v36, %v2971_v14  ;;  %v3291_v52 = vadd.f32 %v6675_v3, %v2972_v63  ;;  %v3292_v9 = vadd.f32 %v6684_v2, %v2973_v41  ;;  %v3293_v44 = vadd.f32 %v6686_v13, %v2974_v12 }
 0x315   :  { %v3294_v11 = vadd.f32 %v6688_v32, %v2975_v37  ;;  %v2659_v48 = vmul.f32 %v3710_v26, %v9476_v29  ;;  %v2660_v21 = vmul.f32 %v3710_v26, %v9477_v61  ;;  %3577 = vst [vmem:[#allocation10 + $0x8a0] sm:$0xff] %v3289_v0  ;;  %v2661_v43 = vmul.f32 %v3710_v26, %v9478_v15 }
 0x316   :  { %3578 = vst [vmem:[#allocation10 + $0x8a8] sm:$0xff] %v3290_v54  ;;  %3579 = vst [vmem:[#allocation10 + $0x8b0] sm:$0xff] %v3291_v52  ;;  %v2662_v56 = vmul.f32 %v3710_v26, %v9479_v10  ;;  %v2976_v51 = vmul.f32 %v6659_v4, %v2657_v42  ;;  %v2977_v6 = vmul.f32 %v6661_v57, %v2658_v33 }
 0x317   :  { %3580 = vst [vmem:[#allocation10 + $0x8b8] sm:$0xff] %v3292_v9  ;;  %3581 = vst [vmem:[#allocation10 + $0x8c0] sm:$0xff] %v3293_v44  ;;  %v2978_v49 = vmul.f32 %v6663_v60, %v2659_v48  ;;  %v2979_v35 = vmul.f32 %v6665_v38, %v2660_v21  ;;  %v2980_v1 = vmul.f32 %v6667_v16, %v2661_v43 }
 0x318   :  { %3582 = vst [vmem:[#allocation10 + $0x8c8] sm:$0xff] %v3294_v11  ;;  %v2981_v17 = vmul.f32 %v6669_v25, %v2662_v56  ;;  %v3295_v39 = vadd.f32 %v6671_v22, %v2976_v51  ;;  %v3296_v8 = vadd.f32 %v6673_v36, %v2977_v6 }
 0x319   :  { %v3297_v4 = vadd.f32 %v6675_v3, %v2978_v49  ;;  %v3298_v57 = vadd.f32 %v6684_v2, %v2979_v35  ;;  %v3299_v27 = vadd.f32 %v6686_v13, %v2980_v1 }
 0x31a   :  { %v3300_v60 = vadd.f32 %v6688_v32, %v2981_v17  ;;  %3583 = vst [vmem:[#allocation10 + $0x8d0] sm:$0xff] %v3295_v39  ;;  %3584 = vst [vmem:[#allocation10 + $0x8d8] sm:$0xff] %v3296_v8 }
 0x31b   :  { %3585 = vst [vmem:[#allocation10 + $0x8e0] sm:$0xff] %v3297_v4  ;;  %3586 = vst [vmem:[#allocation10 + $0x8e8] sm:$0xff] %v3298_v57 }
 0x31c   :  { %3587 = vst [vmem:[#allocation10 + $0x8f0] sm:$0xff] %v3299_v27  ;;  %3588 = vst [vmem:[#allocation10 + $0x8f8] sm:$0xff] %v3300_v60 }
 0x31d   :  { %3810 = shalt.err (!%p3807_p8)
}
 0x31e   :  { %s3811_s15 = scalar_lea.hbm %s7952_s4, 36864 }
 0x31f   :  { %p3812_p9 = scmp.ne.s32.totalorder %s7952_s4, %s3811_s15  ;;  %p3815_p10 = scmp.lt.u32.totalorder %s3811_s15, %s7952_s4 }
 0x321   :  { %p3817_p11 = pnand %p3815_p10, %p3812_p9 }
 0x323   :  { %3820 = shalt.err (!%p3817_p11)
}
 0x324   :  { %3600 = dma.vmem_to_hbm [thread:$0]  %s3595_s12, 36864, %s7952_s4, [#allocation4], %s3831_s27, %s3831_s27, %s3832_s28  }
 0x325   :  { %3827 = dma.done.wait [#allocation4], 36864  }
 0x326   :  { %3828 = vsyncadd [#allocation4], 4294930432 }
 0x327   :  { %3604 = vsyncpa [#allocation3], 1 }
 0x328   :  { %3605 = vsyncpa [#allocation6], 1 }
 0x329   :  { %3606 = vsyncpa [#allocation9], 1 }
 0x32a   :  { %3607 = vsyncpa [#allocation4], 1 }

</bundles_post_ra>
